<compile_context>
chip_gen: v7x
topology: tpu7x:2x2x1
jax: 0.10.0
libtpu: 0.0.40
codegen_flags: <defaults>
</compile_context>

<pallas_src>
import functools

import jax
import jax.numpy as jnp
from jax import lax
from jax.experimental import pallas as pl
from jax.experimental.pallas import tpu as pltpu


# ----------------------------------------------------------------------------
# Fused MBR kernel (B lane-packed batch elements per grid step)
# ----------------------------------------------------------------------------
def _mbr_kernel(mask_ref, x_ref,
                ws1_ref, bs1_ref, ws2_ref, bs2_ref, ws3_ref, bs3_ref,
                o_ref,
                bufA, bufB, pt,
                *, C, Wp, L, guard):
    # Precomputed interior mask (1.0 at real padded-grid interior output lanes).
    # jnp.where (not multiply) so garbage read from never-written guard bands can
    # never produce NaN*0 poisoning of the zero-padding ring.
    msk = mask_ref[...] != 0.0                                   # (2C, L)

    def fill(row0, getter, K, cin):
        """Write the K*K im2col tap blocks into the persistent patch scratch."""
        p = (K - 1) // 2
        t = 0
        for ky in range(K):
            for kx in range(K):
                off = (ky - p) * Wp + (kx - p)                   # flat lane shift, |off| < guard
                pt[row0 + t * cin: row0 + (t + 1) * cin, :] = getter(off)
                t += 1

    x_get = lambda off: x_ref[0, :, guard + off: guard + off + L]
    a1_get = lambda off: bufA[0:C, guard + off: guard + off + L]
    a2_get = lambda off: bufA[C:2 * C, guard + off: guard + off + L]
    bb_get = lambda off: bufB[:, guard + off: guard + off + L]

    # --- stage 1: conv1(3x3 embedded in 5x5)+bn1+relu  and  conv3(5x5)+bn3+relu
    #     share ONE 5x5 patch matrix of x; one (2C, 25C) matmul.
    fill(0, x_get, 5, C)
    s1 = jnp.dot(ws1_ref[...], pt[0:25 * C, :], preferred_element_type=jnp.float32)
    bufA[:, guard:guard + L] = jnp.where(msk, jnp.maximum(s1 + bs1_ref[...], 0.0), 0.0)

    # --- stage 2: conv2(3x3)+bn2 on branch 1 and conv4(5x5)+bn4 on branch 2 as
    #     ONE block-diagonal (2C, 34C) matmul over stacked patches.
    fill(0, a1_get, 3, C)
    fill(9 * C, a2_get, 5, C)
    s2 = jnp.dot(ws2_ref[...], pt[0:34 * C, :], preferred_element_type=jnp.float32)
    bufB[:, guard:guard + L] = jnp.where(msk, s2 + bs2_ref[...], 0.0)

    # --- stage 3: conv_cat(3x3)+bn on concat(out1, out2) == one (C, 18C) matmul
    #     over the 2C-channel stage-2 buffer, fused with residual add + relu.
    fill(0, bb_get, 3, 2 * C)
    s3 = jnp.dot(ws3_ref[...], pt[0:18 * C, :], preferred_element_type=jnp.float32)
    out = s3 + bs3_ref[...] + x_ref[0, :, guard:guard + L]
    o_ref[0] = jnp.maximum(out, 0.0).astype(o_ref.dtype)


# ----------------------------------------------------------------------------
# Wrapper: layout plumbing + BN folding + merged weights + single pallas_call
# ----------------------------------------------------------------------------
def mbr_forward(x, params):
    """x: (N, H, W, C) NHWC float32 -> (N, H, W, C)."""
    N, H, W, C = x.shape
    pad = 2                                            # common padded geometry (3x3 / 5x5)
    Hp, Wp = H + 2 * pad, W + 2 * pad
    HWp = Hp * Wp
    GUARD = ((2 * Wp + 2 + 127) // 128) * 128          # >= max tap shift, lane aligned
    HWp_pad = ((HWp + 127) // 128) * 128               # lane-dense per-element slab
    TOT = 2 * GUARD + HWp_pad                          # per-element packed width

    # Lane-batch pack factor B: largest divisor of N that keeps grid >= 2 (so v7x
    # megacore shards it) and the patch scratch within a modest VMEM budget.
    B = 1
    for b in range(1, N + 1):
        if N % b:
            continue
        if N >= 2 and N // b < 2:
            continue
        if 34 * C * (b * TOT - 2 * GUARD) * 4 > (8 << 20):
            continue
        B = b
    G = N // B
    Btot = B * TOT
    L = Btot - 2 * GUARD                               # output lane width (multiple of 128)

    (w1, s1, b1), (w2, s2, b2), (w3, s3, b3), (w4, s4, b4), (wc, sc, bc) = params

    # --- wrapper-side layout plumbing (small, fused XLA op chain) -------------
    xc = jnp.transpose(x, (0, 3, 1, 2)).astype(jnp.float32)              # (N, C, H, W)
    xp = jnp.pad(xc, ((0, 0), (0, 0), (pad, pad), (pad, pad)))            # (N, C, Hp, Wp)
    xf = jnp.pad(xp.reshape(N, C, HWp),
                 ((0, 0), (0, 0), (GUARD, GUARD + HWp_pad - HWp)))        # (N, C, TOT)
    xg = xf.reshape(G, B, C, TOT).transpose(0, 2, 1, 3).reshape(G, C, Btot)

    # Precomputed interior mask over the output lane slab (replaces in-kernel
    # iota + integer div/mod).
    lane = jnp.arange(L, dtype=jnp.int32) + GUARD
    q = lane % TOT
    f = q - GUARD
    gy, gx = f // Wp, f % Wp
    valid = ((q >= GUARD) & (q < GUARD + HWp) &
             (gy >= pad) & (gy < pad + H) & (gx >= pad) & (gx < pad + W))
    mask = jnp.broadcast_to(valid.astype(jnp.float32)[None, :], (2 * C, L))

    # --- fold BN scale into weights; build the three merged matmul operands ---
    def fold(w, s):
        K, _, cin, cout = w.shape
        ws = (w * s.reshape(1, 1, 1, cout)).astype(jnp.float32)
        return jnp.transpose(ws, (3, 0, 1, 2)).reshape(cout, K * K * cin)

    w1e = jnp.pad(w1, ((1, 1), (1, 1), (0, 0), (0, 0)))                   # 3x3 -> 5x5 taps
    ws1 = jnp.concatenate([fold(w1e, s1), fold(w3, s3)], axis=0)          # (2C, 25C)
    bs1 = jnp.concatenate([b1, b3]).reshape(2 * C, 1).astype(jnp.float32)

    w2f, w4f = fold(w2, s2), fold(w4, s4)
    ws2 = jnp.concatenate([                                               # (2C, 34C) block-diag
        jnp.concatenate([w2f, jnp.zeros((C, 25 * C), jnp.float32)], axis=1),
        jnp.concatenate([jnp.zeros((C, 9 * C), jnp.float32), w4f], axis=1)], axis=0)
    bs2 = jnp.concatenate([b2, b4]).reshape(2 * C, 1).astype(jnp.float32)

    ws3 = fold(wc, sc)                                                    # (C, 18C): cat folded
    bs3 = bc.reshape(C, 1).astype(jnp.float32)

    consts = [ws1, bs1, ws2, bs2, ws3, bs3]

    def full_spec(a):
        return pl.BlockSpec(a.shape, lambda g: (0,) * a.ndim)

    kernel = functools.partial(_mbr_kernel, C=C, Wp=Wp, L=L, guard=GUARD)

    out_flat = pl.pallas_call(
        kernel,
        out_shape=jax.ShapeDtypeStruct((G, C, L), jnp.float32),
        grid=(G,),
        in_specs=[full_spec(mask),
                  pl.BlockSpec((1, C, Btot), lambda g: (g, 0, 0))]
                 + [full_spec(a) for a in consts],
        out_specs=pl.BlockSpec((1, C, L), lambda g: (g, 0, 0)),
        scratch_shapes=[pltpu.VMEM((2 * C, Btot), jnp.float32),   # bufA: stage-1 acts (both branches)
                        pltpu.VMEM((2 * C, Btot), jnp.float32),   # bufB: stage-2 acts (out1|out2)
                        pltpu.VMEM((34 * C, L), jnp.float32)],    # shared im2col patch scratch
        compiler_params=pltpu.CompilerParams(
            dimension_semantics=("parallel",),
            vmem_limit_bytes=32 * 1024 * 1024),
    )(mask, xg, *consts)

    # --- unpack: (G, C, L) -> NHWC crop ---------------------------------------
    out_full = jnp.pad(out_flat, ((0, 0), (0, 0), (GUARD, GUARD)))         # (G, C, Btot)
    out_e = out_full.reshape(G, C, B, TOT).transpose(0, 2, 1, 3)           # (G, B, C, TOT)
    out_e = out_e.reshape(N, C, TOT)[:, :, GUARD:GUARD + HWp]              # (N, C, HWp)
    out = out_e.reshape(N, C, Hp, Wp)[:, :, pad:pad + H, pad:pad + W]
    return jnp.transpose(out, (0, 2, 3, 1)).astype(x.dtype)                # back to NHWC


# ----------------------------------------------------------------------------
# Deterministic parameter construction + pure-JAX reference
# ----------------------------------------------------------------------------
def make_conv_bn_params(key, K, cin, cout):
    k1, k2, k3, k4, k5 = jax.random.split(key, 5)
    w = jax.random.normal(k1, (K, K, cin, cout), jnp.float32) / jnp.sqrt(K * K * cin)
    gamma = jax.random.uniform(k2, (cout,), minval=0.5, maxval=1.5)
    beta = jax.random.normal(k3, (cout,)) * 0.1
    mean = jax.random.normal(k4, (cout,)) * 0.1
    var = jax.random.uniform(k5, (cout,), minval=0.5, maxval=1.5)
    scale = gamma * lax.rsqrt(var + 1e-5)
    bias = beta - mean * scale
    return w, scale, bias


def _ref_conv_bn(x, w, s, b, pad, relu=False):
    y = lax.conv_general_dilated(
        x, w, window_strides=(1, 1), padding=[(pad, pad), (pad, pad)],
        dimension_numbers=("NHWC", "HWIO", "NHWC"))
    y = y * s + b
    if relu:
        y = jnp.maximum(y, 0.0)
    return y


def mbr_reference(x, params):
    (w1, s1, b1), (w2, s2, b2), (w3, s3, b3), (w4, s4, b4), (wc, sc, bc) = params
    out1 = _ref_conv_bn(x, w1, s1, b1, 1, relu=True)
    out1 = _ref_conv_bn(out1, w2, s2, b2, 1, relu=False)
    out2 = _ref_conv_bn(x, w3, s3, b3, 2, relu=True)
    out2 = _ref_conv_bn(out2, w4, s4, b4, 2, relu=False)
    cat = jnp.concatenate([out1, out2], axis=-1)
    out = _ref_conv_bn(cat, wc, sc, bc, 1, relu=False)
    return jnp.maximum(out + x, 0.0)


# ----------------------------------------------------------------------------
if __name__ == "__main__":
    # N=4 so the lane-batch packing (B=2 per grid step) and grid=(2,) megacore
    # sharding are both exercised.  inplanes == planes == C (required by residual).
    N, C, H, W = 4, 8, 16, 16
    key = jax.random.PRNGKey(0)
    kx, k1, k2, k3, k4, kc = jax.random.split(key, 6)

    x = jax.random.normal(kx, (N, H, W, C), jnp.float32)

    params = (
        make_conv_bn_params(k1, 3, C, C),          # conv1 / bn1
        make_conv_bn_params(k2, 3, C, C),          # conv2 / bn2
        make_conv_bn_params(k3, 5, C, C),          # conv3 / bn3
        make_conv_bn_params(k4, 5, C, C),          # conv4 / bn4
        make_conv_bn_params(kc, 3, 2 * C, C),      # conv_cat / its bn
    )

    out = jax.block_until_ready(mbr_forward(x, params))
    ref = jax.block_until_ready(mbr_reference(x, params))

    assert out.shape == (N, H, W, C), out.shape
    assert jnp.allclose(out, ref, atol=2e-4, rtol=2e-4), \
        float(jnp.max(jnp.abs(out - ref)))

    print("KERNEL_OK")
</pallas_src>

<mosaic_0001>
module attributes {stable_mosaic.version = 11 : i64} {
  func.func @_mbr_kernel(%arg0: i32, %arg1: memref<16x1280xf32, #tpu.memory_space<vmem>>, %arg2: memref<1x8x1536xf32, #tpu.memory_space<vmem>>, %arg3: memref<16x200xf32, #tpu.memory_space<vmem>>, %arg4: memref<16x1xf32, #tpu.memory_space<vmem>>, %arg5: memref<16x272xf32, #tpu.memory_space<vmem>>, %arg6: memref<16x1xf32, #tpu.memory_space<vmem>>, %arg7: memref<8x144xf32, #tpu.memory_space<vmem>>, %arg8: memref<8x1xf32, #tpu.memory_space<vmem>>, %arg9: memref<1x8x1280xf32, #tpu.memory_space<vmem>>, %arg10: memref<16x1536xf32, #tpu.memory_space<vmem>>, %arg11: memref<16x1536xf32, #tpu.memory_space<vmem>>, %arg12: memref<272x1280xf32, #tpu.memory_space<vmem>>) attributes {dimension_semantics = [#tpu.dimension_semantics<parallel>], iteration_bounds = array<i64: 2>, scalar_prefetch = 0 : i64, scratch_operands = 3 : i64, tpu.core_type = #tpu.core_type<tc>, window_params = [{pipeline_mode = #tpu.pipeline_mode<synchronous>, transform_indices = @transform_0, window_bounds = array<i64: 16, 1280>}, {transform_indices = @transform_1, window_bounds = array<i64: 1, 8, 1536>}, {pipeline_mode = #tpu.pipeline_mode<synchronous>, transform_indices = @transform_2, window_bounds = array<i64: 16, 200>}, {pipeline_mode = #tpu.pipeline_mode<synchronous>, transform_indices = @transform_3, window_bounds = array<i64: 16, 1>}, {pipeline_mode = #tpu.pipeline_mode<synchronous>, transform_indices = @transform_4, window_bounds = array<i64: 16, 272>}, {pipeline_mode = #tpu.pipeline_mode<synchronous>, transform_indices = @transform_5, window_bounds = array<i64: 16, 1>}, {pipeline_mode = #tpu.pipeline_mode<synchronous>, transform_indices = @transform_6, window_bounds = array<i64: 8, 144>}, {pipeline_mode = #tpu.pipeline_mode<synchronous>, transform_indices = @transform_7, window_bounds = array<i64: 8, 1>}, {transform_indices = @transform_8, window_bounds = array<i64: 1, 8, 1280>}]} {
    %c0 = arith.constant 0 : index
    %c0_0 = arith.constant 0 : index
    %0 = vector.load %arg1[%c0, %c0_0] : memref<16x1280xf32, #tpu.memory_space<vmem>>, vector<16x1280xf32>
    %cst = arith.constant 0.000000e+00 : f32
    %1 = vector.broadcast %cst : f32 to vector<16x1280xf32>
    %2 = arith.cmpf one, %0, %1 : vector<16x1280xf32>
    %c0_1 = arith.constant 0 : index
    %c0_2 = arith.constant 0 : index
    %c86 = arith.constant 86 : index
    %3 = vector.load %arg2[%c0_1, %c0_2, %c86] : memref<1x8x1536xf32, #tpu.memory_space<vmem>>, vector<1x8x1280xf32>
    %4 = vector.shape_cast %3 : vector<1x8x1280xf32> to vector<8x1280xf32>
    %c0_3 = arith.constant 0 : index
    %c0_4 = arith.constant 0 : index
    %5 = vector.load %arg12[%c0_3, %c0_4] : memref<272x1280xf32, #tpu.memory_space<vmem>>, vector<8x1280xf32>
    tpu.vector_store %arg12[%c0_3, %c0_4], %4 {strides = array<i32>} : memref<272x1280xf32, #tpu.memory_space<vmem>>, vector<8x1280xf32>,
    %c0_5 = arith.constant 0 : index
    %c0_6 = arith.constant 0 : index
    %c87 = arith.constant 87 : index
    %6 = vector.load %arg2[%c0_5, %c0_6, %c87] : memref<1x8x1536xf32, #tpu.memory_space<vmem>>, vector<1x8x1280xf32>
    %7 = vector.shape_cast %6 : vector<1x8x1280xf32> to vector<8x1280xf32>
    %c8 = arith.constant 8 : index
    %c0_7 = arith.constant 0 : index
    %8 = vector.load %arg12[%c8, %c0_7] : memref<272x1280xf32, #tpu.memory_space<vmem>>, vector<8x1280xf32>
    tpu.vector_store %arg12[%c8, %c0_7], %7 {strides = array<i32>} : memref<272x1280xf32, #tpu.memory_space<vmem>>, vector<8x1280xf32>,
    %c0_8 = arith.constant 0 : index
    %c0_9 = arith.constant 0 : index
    %c88 = arith.constant 88 : index
    %9 = vector.load %arg2[%c0_8, %c0_9, %c88] : memref<1x8x1536xf32, #tpu.memory_space<vmem>>, vector<1x8x1280xf32>
    %10 = vector.shape_cast %9 : vector<1x8x1280xf32> to vector<8x1280xf32>
    %c16 = arith.constant 16 : index
    %c0_10 = arith.constant 0 : index
    %11 = vector.load %arg12[%c16, %c0_10] : memref<272x1280xf32, #tpu.memory_space<vmem>>, vector<8x1280xf32>
    tpu.vector_store %arg12[%c16, %c0_10], %10 {strides = array<i32>} : memref<272x1280xf32, #tpu.memory_space<vmem>>, vector<8x1280xf32>,
    %c0_11 = arith.constant 0 : index
    %c0_12 = arith.constant 0 : index
    %c89 = arith.constant 89 : index
    %12 = vector.load %arg2[%c0_11, %c0_12, %c89] : memref<1x8x1536xf32, #tpu.memory_space<vmem>>, vector<1x8x1280xf32>
    %13 = vector.shape_cast %12 : vector<1x8x1280xf32> to vector<8x1280xf32>
    %c24 = arith.constant 24 : index
    %c0_13 = arith.constant 0 : index
    %14 = vector.load %arg12[%c24, %c0_13] : memref<272x1280xf32, #tpu.memory_space<vmem>>, vector<8x1280xf32>
    tpu.vector_store %arg12[%c24, %c0_13], %13 {strides = array<i32>} : memref<272x1280xf32, #tpu.memory_space<vmem>>, vector<8x1280xf32>,
    %c0_14 = arith.constant 0 : index
    %c0_15 = arith.constant 0 : index
    %c90 = arith.constant 90 : index
    %15 = vector.load %arg2[%c0_14, %c0_15, %c90] : memref<1x8x1536xf32, #tpu.memory_space<vmem>>, vector<1x8x1280xf32>
    %16 = vector.shape_cast %15 : vector<1x8x1280xf32> to vector<8x1280xf32>
    %c32 = arith.constant 32 : index
    %c0_16 = arith.constant 0 : index
    %17 = vector.load %arg12[%c32, %c0_16] : memref<272x1280xf32, #tpu.memory_space<vmem>>, vector<8x1280xf32>
    tpu.vector_store %arg12[%c32, %c0_16], %16 {strides = array<i32>} : memref<272x1280xf32, #tpu.memory_space<vmem>>, vector<8x1280xf32>,
    %c0_17 = arith.constant 0 : index
    %c0_18 = arith.constant 0 : index
    %c106 = arith.constant 106 : index
    %18 = vector.load %arg2[%c0_17, %c0_18, %c106] : memref<1x8x1536xf32, #tpu.memory_space<vmem>>, vector<1x8x1280xf32>
    %19 = vector.shape_cast %18 : vector<1x8x1280xf32> to vector<8x1280xf32>
    %c40 = arith.constant 40 : index
    %c0_19 = arith.constant 0 : index
    %20 = vector.load %arg12[%c40, %c0_19] : memref<272x1280xf32, #tpu.memory_space<vmem>>, vector<8x1280xf32>
    tpu.vector_store %arg12[%c40, %c0_19], %19 {strides = array<i32>} : memref<272x1280xf32, #tpu.memory_space<vmem>>, vector<8x1280xf32>,
    %c0_20 = arith.constant 0 : index
    %c0_21 = arith.constant 0 : index
    %c107 = arith.constant 107 : index
    %21 = vector.load %arg2[%c0_20, %c0_21, %c107] : memref<1x8x1536xf32, #tpu.memory_space<vmem>>, vector<1x8x1280xf32>
    %22 = vector.shape_cast %21 : vector<1x8x1280xf32> to vector<8x1280xf32>
    %c48 = arith.constant 48 : index
    %c0_22 = arith.constant 0 : index
    %23 = vector.load %arg12[%c48, %c0_22] : memref<272x1280xf32, #tpu.memory_space<vmem>>, vector<8x1280xf32>
    tpu.vector_store %arg12[%c48, %c0_22], %22 {strides = array<i32>} : memref<272x1280xf32, #tpu.memory_space<vmem>>, vector<8x1280xf32>,
    %c0_23 = arith.constant 0 : index
    %c0_24 = arith.constant 0 : index
    %c108 = arith.constant 108 : index
    %24 = vector.load %arg2[%c0_23, %c0_24, %c108] : memref<1x8x1536xf32, #tpu.memory_space<vmem>>, vector<1x8x1280xf32>
    %25 = vector.shape_cast %24 : vector<1x8x1280xf32> to vector<8x1280xf32>
    %c56 = arith.constant 56 : index
    %c0_25 = arith.constant 0 : index
    %26 = vector.load %arg12[%c56, %c0_25] : memref<272x1280xf32, #tpu.memory_space<vmem>>, vector<8x1280xf32>
    tpu.vector_store %arg12[%c56, %c0_25], %25 {strides = array<i32>} : memref<272x1280xf32, #tpu.memory_space<vmem>>, vector<8x1280xf32>,
    %c0_26 = arith.constant 0 : index
    %c0_27 = arith.constant 0 : index
    %c109 = arith.constant 109 : index
    %27 = vector.load %arg2[%c0_26, %c0_27, %c109] : memref<1x8x1536xf32, #tpu.memory_space<vmem>>, vector<1x8x1280xf32>
    %28 = vector.shape_cast %27 : vector<1x8x1280xf32> to vector<8x1280xf32>
    %c64 = arith.constant 64 : index
    %c0_28 = arith.constant 0 : index
    %29 = vector.load %arg12[%c64, %c0_28] : memref<272x1280xf32, #tpu.memory_space<vmem>>, vector<8x1280xf32>
    tpu.vector_store %arg12[%c64, %c0_28], %28 {strides = array<i32>} : memref<272x1280xf32, #tpu.memory_space<vmem>>, vector<8x1280xf32>,
    %c0_29 = arith.constant 0 : index
    %c0_30 = arith.constant 0 : index
    %c110 = arith.constant 110 : index
    %30 = vector.load %arg2[%c0_29, %c0_30, %c110] : memref<1x8x1536xf32, #tpu.memory_space<vmem>>, vector<1x8x1280xf32>
    %31 = vector.shape_cast %30 : vector<1x8x1280xf32> to vector<8x1280xf32>
    %c72 = arith.constant 72 : index
    %c0_31 = arith.constant 0 : index
    %32 = vector.load %arg12[%c72, %c0_31] : memref<272x1280xf32, #tpu.memory_space<vmem>>, vector<8x1280xf32>
    tpu.vector_store %arg12[%c72, %c0_31], %31 {strides = array<i32>} : memref<272x1280xf32, #tpu.memory_space<vmem>>, vector<8x1280xf32>,
    %c0_32 = arith.constant 0 : index
    %c0_33 = arith.constant 0 : index
    %c126 = arith.constant 126 : index
    %33 = vector.load %arg2[%c0_32, %c0_33, %c126] : memref<1x8x1536xf32, #tpu.memory_space<vmem>>, vector<1x8x1280xf32>
    %34 = vector.shape_cast %33 : vector<1x8x1280xf32> to vector<8x1280xf32>
    %c80 = arith.constant 80 : index
    %c0_34 = arith.constant 0 : index
    %35 = vector.load %arg12[%c80, %c0_34] : memref<272x1280xf32, #tpu.memory_space<vmem>>, vector<8x1280xf32>
    tpu.vector_store %arg12[%c80, %c0_34], %34 {strides = array<i32>} : memref<272x1280xf32, #tpu.memory_space<vmem>>, vector<8x1280xf32>,
    %c0_35 = arith.constant 0 : index
    %c0_36 = arith.constant 0 : index
    %c127 = arith.constant 127 : index
    %36 = vector.load %arg2[%c0_35, %c0_36, %c127] : memref<1x8x1536xf32, #tpu.memory_space<vmem>>, vector<1x8x1280xf32>
    %37 = vector.shape_cast %36 : vector<1x8x1280xf32> to vector<8x1280xf32>
    %c88_37 = arith.constant 88 : index
    %c0_38 = arith.constant 0 : index
    %38 = vector.load %arg12[%c88_37, %c0_38] : memref<272x1280xf32, #tpu.memory_space<vmem>>, vector<8x1280xf32>
    tpu.vector_store %arg12[%c88_37, %c0_38], %37 {strides = array<i32>} : memref<272x1280xf32, #tpu.memory_space<vmem>>, vector<8x1280xf32>,
    %c0_39 = arith.constant 0 : index
    %c0_40 = arith.constant 0 : index
    %c128 = arith.constant 128 : index
    %39 = vector.load %arg2[%c0_39, %c0_40, %c128] : memref<1x8x1536xf32, #tpu.memory_space<vmem>>, vector<1x8x1280xf32>
    %40 = vector.shape_cast %39 : vector<1x8x1280xf32> to vector<8x1280xf32>
    %c96 = arith.constant 96 : index
    %c0_41 = arith.constant 0 : index
    %41 = vector.load %arg12[%c96, %c0_41] : memref<272x1280xf32, #tpu.memory_space<vmem>>, vector<8x1280xf32>
    tpu.vector_store %arg12[%c96, %c0_41], %40 {strides = array<i32>} : memref<272x1280xf32, #tpu.memory_space<vmem>>, vector<8x1280xf32>,
    %c0_42 = arith.constant 0 : index
    %c0_43 = arith.constant 0 : index
    %c129 = arith.constant 129 : index
    %42 = vector.load %arg2[%c0_42, %c0_43, %c129] : memref<1x8x1536xf32, #tpu.memory_space<vmem>>, vector<1x8x1280xf32>
    %43 = vector.shape_cast %42 : vector<1x8x1280xf32> to vector<8x1280xf32>
    %c104 = arith.constant 104 : index
    %c0_44 = arith.constant 0 : index
    %44 = vector.load %arg12[%c104, %c0_44] : memref<272x1280xf32, #tpu.memory_space<vmem>>, vector<8x1280xf32>
    tpu.vector_store %arg12[%c104, %c0_44], %43 {strides = array<i32>} : memref<272x1280xf32, #tpu.memory_space<vmem>>, vector<8x1280xf32>,
    %c0_45 = arith.constant 0 : index
    %c0_46 = arith.constant 0 : index
    %c130 = arith.constant 130 : index
    %45 = vector.load %arg2[%c0_45, %c0_46, %c130] : memref<1x8x1536xf32, #tpu.memory_space<vmem>>, vector<1x8x1280xf32>
    %46 = vector.shape_cast %45 : vector<1x8x1280xf32> to vector<8x1280xf32>
    %c112 = arith.constant 112 : index
    %c0_47 = arith.constant 0 : index
    %47 = vector.load %arg12[%c112, %c0_47] : memref<272x1280xf32, #tpu.memory_space<vmem>>, vector<8x1280xf32>
    tpu.vector_store %arg12[%c112, %c0_47], %46 {strides = array<i32>} : memref<272x1280xf32, #tpu.memory_space<vmem>>, vector<8x1280xf32>,
    %c0_48 = arith.constant 0 : index
    %c0_49 = arith.constant 0 : index
    %c146 = arith.constant 146 : index
    %48 = vector.load %arg2[%c0_48, %c0_49, %c146] : memref<1x8x1536xf32, #tpu.memory_space<vmem>>, vector<1x8x1280xf32>
    %49 = vector.shape_cast %48 : vector<1x8x1280xf32> to vector<8x1280xf32>
    %c120 = arith.constant 120 : index
    %c0_50 = arith.constant 0 : index
    %50 = vector.load %arg12[%c120, %c0_50] : memref<272x1280xf32, #tpu.memory_space<vmem>>, vector<8x1280xf32>
    tpu.vector_store %arg12[%c120, %c0_50], %49 {strides = array<i32>} : memref<272x1280xf32, #tpu.memory_space<vmem>>, vector<8x1280xf32>,
    %c0_51 = arith.constant 0 : index
    %c0_52 = arith.constant 0 : index
    %c147 = arith.constant 147 : index
    %51 = vector.load %arg2[%c0_51, %c0_52, %c147] : memref<1x8x1536xf32, #tpu.memory_space<vmem>>, vector<1x8x1280xf32>
    %52 = vector.shape_cast %51 : vector<1x8x1280xf32> to vector<8x1280xf32>
    %c128_53 = arith.constant 128 : index
    %c0_54 = arith.constant 0 : index
    %53 = vector.load %arg12[%c128_53, %c0_54] : memref<272x1280xf32, #tpu.memory_space<vmem>>, vector<8x1280xf32>
    tpu.vector_store %arg12[%c128_53, %c0_54], %52 {strides = array<i32>} : memref<272x1280xf32, #tpu.memory_space<vmem>>, vector<8x1280xf32>,
    %c0_55 = arith.constant 0 : index
    %c0_56 = arith.constant 0 : index
    %c148 = arith.constant 148 : index
    %54 = vector.load %arg2[%c0_55, %c0_56, %c148] : memref<1x8x1536xf32, #tpu.memory_space<vmem>>, vector<1x8x1280xf32>
    %55 = vector.shape_cast %54 : vector<1x8x1280xf32> to vector<8x1280xf32>
    %c136 = arith.constant 136 : index
    %c0_57 = arith.constant 0 : index
    %56 = vector.load %arg12[%c136, %c0_57] : memref<272x1280xf32, #tpu.memory_space<vmem>>, vector<8x1280xf32>
    tpu.vector_store %arg12[%c136, %c0_57], %55 {strides = array<i32>} : memref<272x1280xf32, #tpu.memory_space<vmem>>, vector<8x1280xf32>,
    %c0_58 = arith.constant 0 : index
    %c0_59 = arith.constant 0 : index
    %c149 = arith.constant 149 : index
    %57 = vector.load %arg2[%c0_58, %c0_59, %c149] : memref<1x8x1536xf32, #tpu.memory_space<vmem>>, vector<1x8x1280xf32>
    %58 = vector.shape_cast %57 : vector<1x8x1280xf32> to vector<8x1280xf32>
    %c144 = arith.constant 144 : index
    %c0_60 = arith.constant 0 : index
    %59 = vector.load %arg12[%c144, %c0_60] : memref<272x1280xf32, #tpu.memory_space<vmem>>, vector<8x1280xf32>
    tpu.vector_store %arg12[%c144, %c0_60], %58 {strides = array<i32>} : memref<272x1280xf32, #tpu.memory_space<vmem>>, vector<8x1280xf32>,
    %c0_61 = arith.constant 0 : index
    %c0_62 = arith.constant 0 : index
    %c150 = arith.constant 150 : index
    %60 = vector.load %arg2[%c0_61, %c0_62, %c150] : memref<1x8x1536xf32, #tpu.memory_space<vmem>>, vector<1x8x1280xf32>
    %61 = vector.shape_cast %60 : vector<1x8x1280xf32> to vector<8x1280xf32>
    %c152 = arith.constant 152 : index
    %c0_63 = arith.constant 0 : index
    %62 = vector.load %arg12[%c152, %c0_63] : memref<272x1280xf32, #tpu.memory_space<vmem>>, vector<8x1280xf32>
    tpu.vector_store %arg12[%c152, %c0_63], %61 {strides = array<i32>} : memref<272x1280xf32, #tpu.memory_space<vmem>>, vector<8x1280xf32>,
    %c0_64 = arith.constant 0 : index
    %c0_65 = arith.constant 0 : index
    %c166 = arith.constant 166 : index
    %63 = vector.load %arg2[%c0_64, %c0_65, %c166] : memref<1x8x1536xf32, #tpu.memory_space<vmem>>, vector<1x8x1280xf32>
    %64 = vector.shape_cast %63 : vector<1x8x1280xf32> to vector<8x1280xf32>
    %c160 = arith.constant 160 : index
    %c0_66 = arith.constant 0 : index
    %65 = vector.load %arg12[%c160, %c0_66] : memref<272x1280xf32, #tpu.memory_space<vmem>>, vector<8x1280xf32>
    tpu.vector_store %arg12[%c160, %c0_66], %64 {strides = array<i32>} : memref<272x1280xf32, #tpu.memory_space<vmem>>, vector<8x1280xf32>,
    %c0_67 = arith.constant 0 : index
    %c0_68 = arith.constant 0 : index
    %c167 = arith.constant 167 : index
    %66 = vector.load %arg2[%c0_67, %c0_68, %c167] : memref<1x8x1536xf32, #tpu.memory_space<vmem>>, vector<1x8x1280xf32>
    %67 = vector.shape_cast %66 : vector<1x8x1280xf32> to vector<8x1280xf32>
    %c168 = arith.constant 168 : index
    %c0_69 = arith.constant 0 : index
    %68 = vector.load %arg12[%c168, %c0_69] : memref<272x1280xf32, #tpu.memory_space<vmem>>, vector<8x1280xf32>
    tpu.vector_store %arg12[%c168, %c0_69], %67 {strides = array<i32>} : memref<272x1280xf32, #tpu.memory_space<vmem>>, vector<8x1280xf32>,
    %c0_70 = arith.constant 0 : index
    %c0_71 = arith.constant 0 : index
    %c168_72 = arith.constant 168 : index
    %69 = vector.load %arg2[%c0_70, %c0_71, %c168_72] : memref<1x8x1536xf32, #tpu.memory_space<vmem>>, vector<1x8x1280xf32>
    %70 = vector.shape_cast %69 : vector<1x8x1280xf32> to vector<8x1280xf32>
    %c176 = arith.constant 176 : index
    %c0_73 = arith.constant 0 : index
    %71 = vector.load %arg12[%c176, %c0_73] : memref<272x1280xf32, #tpu.memory_space<vmem>>, vector<8x1280xf32>
    tpu.vector_store %arg12[%c176, %c0_73], %70 {strides = array<i32>} : memref<272x1280xf32, #tpu.memory_space<vmem>>, vector<8x1280xf32>,
    %c0_74 = arith.constant 0 : index
    %c0_75 = arith.constant 0 : index
    %c169 = arith.constant 169 : index
    %72 = vector.load %arg2[%c0_74, %c0_75, %c169] : memref<1x8x1536xf32, #tpu.memory_space<vmem>>, vector<1x8x1280xf32>
    %73 = vector.shape_cast %72 : vector<1x8x1280xf32> to vector<8x1280xf32>
    %c184 = arith.constant 184 : index
    %c0_76 = arith.constant 0 : index
    %74 = vector.load %arg12[%c184, %c0_76] : memref<272x1280xf32, #tpu.memory_space<vmem>>, vector<8x1280xf32>
    tpu.vector_store %arg12[%c184, %c0_76], %73 {strides = array<i32>} : memref<272x1280xf32, #tpu.memory_space<vmem>>, vector<8x1280xf32>,
    %c0_77 = arith.constant 0 : index
    %c0_78 = arith.constant 0 : index
    %c170 = arith.constant 170 : index
    %75 = vector.load %arg2[%c0_77, %c0_78, %c170] : memref<1x8x1536xf32, #tpu.memory_space<vmem>>, vector<1x8x1280xf32>
    %76 = vector.shape_cast %75 : vector<1x8x1280xf32> to vector<8x1280xf32>
    %c192 = arith.constant 192 : index
    %c0_79 = arith.constant 0 : index
    %77 = vector.load %arg12[%c192, %c0_79] : memref<272x1280xf32, #tpu.memory_space<vmem>>, vector<8x1280xf32>
    tpu.vector_store %arg12[%c192, %c0_79], %76 {strides = array<i32>} : memref<272x1280xf32, #tpu.memory_space<vmem>>, vector<8x1280xf32>,
    %c0_80 = arith.constant 0 : index
    %c0_81 = arith.constant 0 : index
    %78 = vector.load %arg3[%c0_80, %c0_81] : memref<16x200xf32, #tpu.memory_space<vmem>>, vector<16x200xf32>
    %c0_82 = arith.constant 0 : index
    %c0_83 = arith.constant 0 : index
    %79 = vector.load %arg12[%c0_82, %c0_83] : memref<272x1280xf32, #tpu.memory_space<vmem>>, vector<200x1280xf32>
    %cst_84 = arith.constant dense<0.000000e+00> : vector<16x1280xf32>
    %80 = tpu.matmul %78, %79, %cst_84 {dimension_numbers = #tpu.dot_dimension_numbers<[1], [0], [0], [1], [0, 0, 1, 1], [], []>} : vector<16x200xf32>, vector<200x1280xf32>, vector<16x1280xf32> -> vector<16x1280xf32>
    %c0_85 = arith.constant 0 : index
    %c0_86 = arith.constant 0 : index
    %81 = vector.load %arg4[%c0_85, %c0_86] : memref<16x1xf32, #tpu.memory_space<vmem>>, vector<16x1xf32>
    %82 = vector.broadcast %81 : vector<16x1xf32> to vector<16x1280xf32>
    %83 = arith.addf %80, %82 : vector<16x1280xf32>
    %cst_87 = arith.constant 0.000000e+00 : f32
    %84 = vector.broadcast %cst_87 : f32 to vector<16x1280xf32>
    %85 = arith.maximumf %83, %84 : vector<16x1280xf32>
    %cst_88 = arith.constant 0.000000e+00 : f32
    %86 = vector.broadcast %cst_88 : f32 to vector<16x1280xf32>
    %87 = arith.select %2, %85, %86 : vector<16x1280xi1>, vector<16x1280xf32>
    %c0_89 = arith.constant 0 : index
    %c128_90 = arith.constant 128 : index
    %88 = vector.load %arg10[%c0_89, %c128_90] : memref<16x1536xf32, #tpu.memory_space<vmem>>, vector<16x1280xf32>
    tpu.vector_store %arg10[%c0_89, %c128_90], %87 {strides = array<i32>} : memref<16x1536xf32, #tpu.memory_space<vmem>>, vector<16x1280xf32>,
    %c0_91 = arith.constant 0 : index
    %c107_92 = arith.constant 107 : index
    %89 = vector.load %arg10[%c0_91, %c107_92] : memref<16x1536xf32, #tpu.memory_space<vmem>>, vector<8x1280xf32>
    %c0_93 = arith.constant 0 : index
    %c0_94 = arith.constant 0 : index
    %90 = vector.load %arg12[%c0_93, %c0_94] : memref<272x1280xf32, #tpu.memory_space<vmem>>, vector<8x1280xf32>
    tpu.vector_store %arg12[%c0_93, %c0_94], %89 {strides = array<i32>} : memref<272x1280xf32, #tpu.memory_space<vmem>>, vector<8x1280xf32>,
    %c0_95 = arith.constant 0 : index
    %c108_96 = arith.constant 108 : index
    %91 = vector.load %arg10[%c0_95, %c108_96] : memref<16x1536xf32, #tpu.memory_space<vmem>>, vector<8x1280xf32>
    %c8_97 = arith.constant 8 : index
    %c0_98 = arith.constant 0 : index
    %92 = vector.load %arg12[%c8_97, %c0_98] : memref<272x1280xf32, #tpu.memory_space<vmem>>, vector<8x1280xf32>
    tpu.vector_store %arg12[%c8_97, %c0_98], %91 {strides = array<i32>} : memref<272x1280xf32, #tpu.memory_space<vmem>>, vector<8x1280xf32>,
    %c0_99 = arith.constant 0 : index
    %c109_100 = arith.constant 109 : index
    %93 = vector.load %arg10[%c0_99, %c109_100] : memref<16x1536xf32, #tpu.memory_space<vmem>>, vector<8x1280xf32>
    %c16_101 = arith.constant 16 : index
    %c0_102 = arith.constant 0 : index
    %94 = vector.load %arg12[%c16_101, %c0_102] : memref<272x1280xf32, #tpu.memory_space<vmem>>, vector<8x1280xf32>
    tpu.vector_store %arg12[%c16_101, %c0_102], %93 {strides = array<i32>} : memref<272x1280xf32, #tpu.memory_space<vmem>>, vector<8x1280xf32>,
    %c0_103 = arith.constant 0 : index
    %c127_104 = arith.constant 127 : index
    %95 = vector.load %arg10[%c0_103, %c127_104] : memref<16x1536xf32, #tpu.memory_space<vmem>>, vector<8x1280xf32>
    %c24_105 = arith.constant 24 : index
    %c0_106 = arith.constant 0 : index
    %96 = vector.load %arg12[%c24_105, %c0_106] : memref<272x1280xf32, #tpu.memory_space<vmem>>, vector<8x1280xf32>
    tpu.vector_store %arg12[%c24_105, %c0_106], %95 {strides = array<i32>} : memref<272x1280xf32, #tpu.memory_space<vmem>>, vector<8x1280xf32>,
    %c0_107 = arith.constant 0 : index
    %c128_108 = arith.constant 128 : index
    %97 = vector.load %arg10[%c0_107, %c128_108] : memref<16x1536xf32, #tpu.memory_space<vmem>>, vector<8x1280xf32>
    %c32_109 = arith.constant 32 : index
    %c0_110 = arith.constant 0 : index
    %98 = vector.load %arg12[%c32_109, %c0_110] : memref<272x1280xf32, #tpu.memory_space<vmem>>, vector<8x1280xf32>
    tpu.vector_store %arg12[%c32_109, %c0_110], %97 {strides = array<i32>} : memref<272x1280xf32, #tpu.memory_space<vmem>>, vector<8x1280xf32>,
    %c0_111 = arith.constant 0 : index
    %c129_112 = arith.constant 129 : index
    %99 = vector.load %arg10[%c0_111, %c129_112] : memref<16x1536xf32, #tpu.memory_space<vmem>>, vector<8x1280xf32>
    %c40_113 = arith.constant 40 : index
    %c0_114 = arith.constant 0 : index
    %100 = vector.load %arg12[%c40_113, %c0_114] : memref<272x1280xf32, #tpu.memory_space<vmem>>, vector<8x1280xf32>
    tpu.vector_store %arg12[%c40_113, %c0_114], %99 {strides = array<i32>} : memref<272x1280xf32, #tpu.memory_space<vmem>>, vector<8x1280xf32>,
    %c0_115 = arith.constant 0 : index
    %c147_116 = arith.constant 147 : index
    %101 = vector.load %arg10[%c0_115, %c147_116] : memref<16x1536xf32, #tpu.memory_space<vmem>>, vector<8x1280xf32>
    %c48_117 = arith.constant 48 : index
    %c0_118 = arith.constant 0 : index
    %102 = vector.load %arg12[%c48_117, %c0_118] : memref<272x1280xf32, #tpu.memory_space<vmem>>, vector<8x1280xf32>
    tpu.vector_store %arg12[%c48_117, %c0_118], %101 {strides = array<i32>} : memref<272x1280xf32, #tpu.memory_space<vmem>>, vector<8x1280xf32>,
    %c0_119 = arith.constant 0 : index
    %c148_120 = arith.constant 148 : index
    %103 = vector.load %arg10[%c0_119, %c148_120] : memref<16x1536xf32, #tpu.memory_space<vmem>>, vector<8x1280xf32>
    %c56_121 = arith.constant 56 : index
    %c0_122 = arith.constant 0 : index
    %104 = vector.load %arg12[%c56_121, %c0_122] : memref<272x1280xf32, #tpu.memory_space<vmem>>, vector<8x1280xf32>
    tpu.vector_store %arg12[%c56_121, %c0_122], %103 {strides = array<i32>} : memref<272x1280xf32, #tpu.memory_space<vmem>>, vector<8x1280xf32>,
    %c0_123 = arith.constant 0 : index
    %c149_124 = arith.constant 149 : index
    %105 = vector.load %arg10[%c0_123, %c149_124] : memref<16x1536xf32, #tpu.memory_space<vmem>>, vector<8x1280xf32>
    %c64_125 = arith.constant 64 : index
    %c0_126 = arith.constant 0 : index
    %106 = vector.load %arg12[%c64_125, %c0_126] : memref<272x1280xf32, #tpu.memory_space<vmem>>, vector<8x1280xf32>
    tpu.vector_store %arg12[%c64_125, %c0_126], %105 {strides = array<i32>} : memref<272x1280xf32, #tpu.memory_space<vmem>>, vector<8x1280xf32>,
    %c8_127 = arith.constant 8 : index
    %c86_128 = arith.constant 86 : index
    %107 = vector.load %arg10[%c8_127, %c86_128] : memref<16x1536xf32, #tpu.memory_space<vmem>>, vector<8x1280xf32>
    %c72_129 = arith.constant 72 : index
    %c0_130 = arith.constant 0 : index
    %108 = vector.load %arg12[%c72_129, %c0_130] : memref<272x1280xf32, #tpu.memory_space<vmem>>, vector<8x1280xf32>
    tpu.vector_store %arg12[%c72_129, %c0_130], %107 {strides = array<i32>} : memref<272x1280xf32, #tpu.memory_space<vmem>>, vector<8x1280xf32>,
    %c8_131 = arith.constant 8 : index
    %c87_132 = arith.constant 87 : index
    %109 = vector.load %arg10[%c8_131, %c87_132] : memref<16x1536xf32, #tpu.memory_space<vmem>>, vector<8x1280xf32>
    %c80_133 = arith.constant 80 : index
    %c0_134 = arith.constant 0 : index
    %110 = vector.load %arg12[%c80_133, %c0_134] : memref<272x1280xf32, #tpu.memory_space<vmem>>, vector<8x1280xf32>
    tpu.vector_store %arg12[%c80_133, %c0_134], %109 {strides = array<i32>} : memref<272x1280xf32, #tpu.memory_space<vmem>>, vector<8x1280xf32>,
    %c8_135 = arith.constant 8 : index
    %c88_136 = arith.constant 88 : index
    %111 = vector.load %arg10[%c8_135, %c88_136] : memref<16x1536xf32, #tpu.memory_space<vmem>>, vector<8x1280xf32>
    %c88_137 = arith.constant 88 : index
    %c0_138 = arith.constant 0 : index
    %112 = vector.load %arg12[%c88_137, %c0_138] : memref<272x1280xf32, #tpu.memory_space<vmem>>, vector<8x1280xf32>
    tpu.vector_store %arg12[%c88_137, %c0_138], %111 {strides = array<i32>} : memref<272x1280xf32, #tpu.memory_space<vmem>>, vector<8x1280xf32>,
    %c8_139 = arith.constant 8 : index
    %c89_140 = arith.constant 89 : index
    %113 = vector.load %arg10[%c8_139, %c89_140] : memref<16x1536xf32, #tpu.memory_space<vmem>>, vector<8x1280xf32>
    %c96_141 = arith.constant 96 : index
    %c0_142 = arith.constant 0 : index
    %114 = vector.load %arg12[%c96_141, %c0_142] : memref<272x1280xf32, #tpu.memory_space<vmem>>, vector<8x1280xf32>
    tpu.vector_store %arg12[%c96_141, %c0_142], %113 {strides = array<i32>} : memref<272x1280xf32, #tpu.memory_space<vmem>>, vector<8x1280xf32>,
    %c8_143 = arith.constant 8 : index
    %c90_144 = arith.constant 90 : index
    %115 = vector.load %arg10[%c8_143, %c90_144] : memref<16x1536xf32, #tpu.memory_space<vmem>>, vector<8x1280xf32>
    %c104_145 = arith.constant 104 : index
    %c0_146 = arith.constant 0 : index
    %116 = vector.load %arg12[%c104_145, %c0_146] : memref<272x1280xf32, #tpu.memory_space<vmem>>, vector<8x1280xf32>
    tpu.vector_store %arg12[%c104_145, %c0_146], %115 {strides = array<i32>} : memref<272x1280xf32, #tpu.memory_space<vmem>>, vector<8x1280xf32>,
    %c8_147 = arith.constant 8 : index
    %c106_148 = arith.constant 106 : index
    %117 = vector.load %arg10[%c8_147, %c106_148] : memref<16x1536xf32, #tpu.memory_space<vmem>>, vector<8x1280xf32>
    %c112_149 = arith.constant 112 : index
    %c0_150 = arith.constant 0 : index
    %118 = vector.load %arg12[%c112_149, %c0_150] : memref<272x1280xf32, #tpu.memory_space<vmem>>, vector<8x1280xf32>
    tpu.vector_store %arg12[%c112_149, %c0_150], %117 {strides = array<i32>} : memref<272x1280xf32, #tpu.memory_space<vmem>>, vector<8x1280xf32>,
    %c8_151 = arith.constant 8 : index
    %c107_152 = arith.constant 107 : index
    %119 = vector.load %arg10[%c8_151, %c107_152] : memref<16x1536xf32, #tpu.memory_space<vmem>>, vector<8x1280xf32>
    %c120_153 = arith.constant 120 : index
    %c0_154 = arith.constant 0 : index
    %120 = vector.load %arg12[%c120_153, %c0_154] : memref<272x1280xf32, #tpu.memory_space<vmem>>, vector<8x1280xf32>
    tpu.vector_store %arg12[%c120_153, %c0_154], %119 {strides = array<i32>} : memref<272x1280xf32, #tpu.memory_space<vmem>>, vector<8x1280xf32>,
    %c8_155 = arith.constant 8 : index
    %c108_156 = arith.constant 108 : index
    %121 = vector.load %arg10[%c8_155, %c108_156] : memref<16x1536xf32, #tpu.memory_space<vmem>>, vector<8x1280xf32>
    %c128_157 = arith.constant 128 : index
    %c0_158 = arith.constant 0 : index
    %122 = vector.load %arg12[%c128_157, %c0_158] : memref<272x1280xf32, #tpu.memory_space<vmem>>, vector<8x1280xf32>
    tpu.vector_store %arg12[%c128_157, %c0_158], %121 {strides = array<i32>} : memref<272x1280xf32, #tpu.memory_space<vmem>>, vector<8x1280xf32>,
    %c8_159 = arith.constant 8 : index
    %c109_160 = arith.constant 109 : index
    %123 = vector.load %arg10[%c8_159, %c109_160] : memref<16x1536xf32, #tpu.memory_space<vmem>>, vector<8x1280xf32>
    %c136_161 = arith.constant 136 : index
    %c0_162 = arith.constant 0 : index
    %124 = vector.load %arg12[%c136_161, %c0_162] : memref<272x1280xf32, #tpu.memory_space<vmem>>, vector<8x1280xf32>
    tpu.vector_store %arg12[%c136_161, %c0_162], %123 {strides = array<i32>} : memref<272x1280xf32, #tpu.memory_space<vmem>>, vector<8x1280xf32>,
    %c8_163 = arith.constant 8 : index
    %c110_164 = arith.constant 110 : index
    %125 = vector.load %arg10[%c8_163, %c110_164] : memref<16x1536xf32, #tpu.memory_space<vmem>>, vector<8x1280xf32>
    %c144_165 = arith.constant 144 : index
    %c0_166 = arith.constant 0 : index
    %126 = vector.load %arg12[%c144_165, %c0_166] : memref<272x1280xf32, #tpu.memory_space<vmem>>, vector<8x1280xf32>
    tpu.vector_store %arg12[%c144_165, %c0_166], %125 {strides = array<i32>} : memref<272x1280xf32, #tpu.memory_space<vmem>>, vector<8x1280xf32>,
    %c8_167 = arith.constant 8 : index
    %c126_168 = arith.constant 126 : index
    %127 = vector.load %arg10[%c8_167, %c126_168] : memref<16x1536xf32, #tpu.memory_space<vmem>>, vector<8x1280xf32>
    %c152_169 = arith.constant 152 : index
    %c0_170 = arith.constant 0 : index
    %128 = vector.load %arg12[%c152_169, %c0_170] : memref<272x1280xf32, #tpu.memory_space<vmem>>, vector<8x1280xf32>
    tpu.vector_store %arg12[%c152_169, %c0_170], %127 {strides = array<i32>} : memref<272x1280xf32, #tpu.memory_space<vmem>>, vector<8x1280xf32>,
    %c8_171 = arith.constant 8 : index
    %c127_172 = arith.constant 127 : index
    %129 = vector.load %arg10[%c8_171, %c127_172] : memref<16x1536xf32, #tpu.memory_space<vmem>>, vector<8x1280xf32>
    %c160_173 = arith.constant 160 : index
    %c0_174 = arith.constant 0 : index
    %130 = vector.load %arg12[%c160_173, %c0_174] : memref<272x1280xf32, #tpu.memory_space<vmem>>, vector<8x1280xf32>
    tpu.vector_store %arg12[%c160_173, %c0_174], %129 {strides = array<i32>} : memref<272x1280xf32, #tpu.memory_space<vmem>>, vector<8x1280xf32>,
    %c8_175 = arith.constant 8 : index
    %c128_176 = arith.constant 128 : index
    %131 = vector.load %arg10[%c8_175, %c128_176] : memref<16x1536xf32, #tpu.memory_space<vmem>>, vector<8x1280xf32>
    %c168_177 = arith.constant 168 : index
    %c0_178 = arith.constant 0 : index
    %132 = vector.load %arg12[%c168_177, %c0_178] : memref<272x1280xf32, #tpu.memory_space<vmem>>, vector<8x1280xf32>
    tpu.vector_store %arg12[%c168_177, %c0_178], %131 {strides = array<i32>} : memref<272x1280xf32, #tpu.memory_space<vmem>>, vector<8x1280xf32>,
    %c8_179 = arith.constant 8 : index
    %c129_180 = arith.constant 129 : index
    %133 = vector.load %arg10[%c8_179, %c129_180] : memref<16x1536xf32, #tpu.memory_space<vmem>>, vector<8x1280xf32>
    %c176_181 = arith.constant 176 : index
    %c0_182 = arith.constant 0 : index
    %134 = vector.load %arg12[%c176_181, %c0_182] : memref<272x1280xf32, #tpu.memory_space<vmem>>, vector<8x1280xf32>
    tpu.vector_store %arg12[%c176_181, %c0_182], %133 {strides = array<i32>} : memref<272x1280xf32, #tpu.memory_space<vmem>>, vector<8x1280xf32>,
    %c8_183 = arith.constant 8 : index
    %c130_184 = arith.constant 130 : index
    %135 = vector.load %arg10[%c8_183, %c130_184] : memref<16x1536xf32, #tpu.memory_space<vmem>>, vector<8x1280xf32>
    %c184_185 = arith.constant 184 : index
    %c0_186 = arith.constant 0 : index
    %136 = vector.load %arg12[%c184_185, %c0_186] : memref<272x1280xf32, #tpu.memory_space<vmem>>, vector<8x1280xf32>
    tpu.vector_store %arg12[%c184_185, %c0_186], %135 {strides = array<i32>} : memref<272x1280xf32, #tpu.memory_space<vmem>>, vector<8x1280xf32>,
    %c8_187 = arith.constant 8 : index
    %c146_188 = arith.constant 146 : index
    %137 = vector.load %arg10[%c8_187, %c146_188] : memref<16x1536xf32, #tpu.memory_space<vmem>>, vector<8x1280xf32>
    %c192_189 = arith.constant 192 : index
    %c0_190 = arith.constant 0 : index
    %138 = vector.load %arg12[%c192_189, %c0_190] : memref<272x1280xf32, #tpu.memory_space<vmem>>, vector<8x1280xf32>
    tpu.vector_store %arg12[%c192_189, %c0_190], %137 {strides = array<i32>} : memref<272x1280xf32, #tpu.memory_space<vmem>>, vector<8x1280xf32>,
    %c8_191 = arith.constant 8 : index
    %c147_192 = arith.constant 147 : index
    %139 = vector.load %arg10[%c8_191, %c147_192] : memref<16x1536xf32, #tpu.memory_space<vmem>>, vector<8x1280xf32>
    %c200 = arith.constant 200 : index
    %c0_193 = arith.constant 0 : index
    %140 = vector.load %arg12[%c200, %c0_193] : memref<272x1280xf32, #tpu.memory_space<vmem>>, vector<8x1280xf32>
    tpu.vector_store %arg12[%c200, %c0_193], %139 {strides = array<i32>} : memref<272x1280xf32, #tpu.memory_space<vmem>>, vector<8x1280xf32>,
    %c8_194 = arith.constant 8 : index
    %c148_195 = arith.constant 148 : index
    %141 = vector.load %arg10[%c8_194, %c148_195] : memref<16x1536xf32, #tpu.memory_space<vmem>>, vector<8x1280xf32>
    %c208 = arith.constant 208 : index
    %c0_196 = arith.constant 0 : index
    %142 = vector.load %arg12[%c208, %c0_196] : memref<272x1280xf32, #tpu.memory_space<vmem>>, vector<8x1280xf32>
    tpu.vector_store %arg12[%c208, %c0_196], %141 {strides = array<i32>} : memref<272x1280xf32, #tpu.memory_space<vmem>>, vector<8x1280xf32>,
    %c8_197 = arith.constant 8 : index
    %c149_198 = arith.constant 149 : index
    %143 = vector.load %arg10[%c8_197, %c149_198] : memref<16x1536xf32, #tpu.memory_space<vmem>>, vector<8x1280xf32>
    %c216 = arith.constant 216 : index
    %c0_199 = arith.constant 0 : index
    %144 = vector.load %arg12[%c216, %c0_199] : memref<272x1280xf32, #tpu.memory_space<vmem>>, vector<8x1280xf32>
    tpu.vector_store %arg12[%c216, %c0_199], %143 {strides = array<i32>} : memref<272x1280xf32, #tpu.memory_space<vmem>>, vector<8x1280xf32>,
    %c8_200 = arith.constant 8 : index
    %c150_201 = arith.constant 150 : index
    %145 = vector.load %arg10[%c8_200, %c150_201] : memref<16x1536xf32, #tpu.memory_space<vmem>>, vector<8x1280xf32>
    %c224 = arith.constant 224 : index
    %c0_202 = arith.constant 0 : index
    %146 = vector.load %arg12[%c224, %c0_202] : memref<272x1280xf32, #tpu.memory_space<vmem>>, vector<8x1280xf32>
    tpu.vector_store %arg12[%c224, %c0_202], %145 {strides = array<i32>} : memref<272x1280xf32, #tpu.memory_space<vmem>>, vector<8x1280xf32>,
    %c8_203 = arith.constant 8 : index
    %c166_204 = arith.constant 166 : index
    %147 = vector.load %arg10[%c8_203, %c166_204] : memref<16x1536xf32, #tpu.memory_space<vmem>>, vector<8x1280xf32>
    %c232 = arith.constant 232 : index
    %c0_205 = arith.constant 0 : index
    %148 = vector.load %arg12[%c232, %c0_205] : memref<272x1280xf32, #tpu.memory_space<vmem>>, vector<8x1280xf32>
    tpu.vector_store %arg12[%c232, %c0_205], %147 {strides = array<i32>} : memref<272x1280xf32, #tpu.memory_space<vmem>>, vector<8x1280xf32>,
    %c8_206 = arith.constant 8 : index
    %c167_207 = arith.constant 167 : index
    %149 = vector.load %arg10[%c8_206, %c167_207] : memref<16x1536xf32, #tpu.memory_space<vmem>>, vector<8x1280xf32>
    %c240 = arith.constant 240 : index
    %c0_208 = arith.constant 0 : index
    %150 = vector.load %arg12[%c240, %c0_208] : memref<272x1280xf32, #tpu.memory_space<vmem>>, vector<8x1280xf32>
    tpu.vector_store %arg12[%c240, %c0_208], %149 {strides = array<i32>} : memref<272x1280xf32, #tpu.memory_space<vmem>>, vector<8x1280xf32>,
    %c8_209 = arith.constant 8 : index
    %c168_210 = arith.constant 168 : index
    %151 = vector.load %arg10[%c8_209, %c168_210] : memref<16x1536xf32, #tpu.memory_space<vmem>>, vector<8x1280xf32>
    %c248 = arith.constant 248 : index
    %c0_211 = arith.constant 0 : index
    %152 = vector.load %arg12[%c248, %c0_211] : memref<272x1280xf32, #tpu.memory_space<vmem>>, vector<8x1280xf32>
    tpu.vector_store %arg12[%c248, %c0_211], %151 {strides = array<i32>} : memref<272x1280xf32, #tpu.memory_space<vmem>>, vector<8x1280xf32>,
    %c8_212 = arith.constant 8 : index
    %c169_213 = arith.constant 169 : index
    %153 = vector.load %arg10[%c8_212, %c169_213] : memref<16x1536xf32, #tpu.memory_space<vmem>>, vector<8x1280xf32>
    %c256 = arith.constant 256 : index
    %c0_214 = arith.constant 0 : index
    %154 = vector.load %arg12[%c256, %c0_214] : memref<272x1280xf32, #tpu.memory_space<vmem>>, vector<8x1280xf32>
    tpu.vector_store %arg12[%c256, %c0_214], %153 {strides = array<i32>} : memref<272x1280xf32, #tpu.memory_space<vmem>>, vector<8x1280xf32>,
    %c8_215 = arith.constant 8 : index
    %c170_216 = arith.constant 170 : index
    %155 = vector.load %arg10[%c8_215, %c170_216] : memref<16x1536xf32, #tpu.memory_space<vmem>>, vector<8x1280xf32>
    %c264 = arith.constant 264 : index
    %c0_217 = arith.constant 0 : index
    %156 = vector.load %arg12[%c264, %c0_217] : memref<272x1280xf32, #tpu.memory_space<vmem>>, vector<8x1280xf32>
    tpu.vector_store %arg12[%c264, %c0_217], %155 {strides = array<i32>} : memref<272x1280xf32, #tpu.memory_space<vmem>>, vector<8x1280xf32>,
    %c0_218 = arith.constant 0 : index
    %c0_219 = arith.constant 0 : index
    %157 = vector.load %arg5[%c0_218, %c0_219] : memref<16x272xf32, #tpu.memory_space<vmem>>, vector<16x272xf32>
    %c0_220 = arith.constant 0 : index
    %c0_221 = arith.constant 0 : index
    %158 = vector.load %arg12[%c0_220, %c0_221] : memref<272x1280xf32, #tpu.memory_space<vmem>>, vector<272x1280xf32>
    %cst_222 = arith.constant dense<0.000000e+00> : vector<16x1280xf32>
    %159 = tpu.matmul %157, %158, %cst_222 {dimension_numbers = #tpu.dot_dimension_numbers<[1], [0], [0], [1], [0, 0, 1, 1], [], []>} : vector<16x272xf32>, vector<272x1280xf32>, vector<16x1280xf32> -> vector<16x1280xf32>
    %c0_223 = arith.constant 0 : index
    %c0_224 = arith.constant 0 : index
    %160 = vector.load %arg6[%c0_223, %c0_224] : memref<16x1xf32, #tpu.memory_space<vmem>>, vector<16x1xf32>
    %161 = vector.broadcast %160 : vector<16x1xf32> to vector<16x1280xf32>
    %162 = arith.addf %159, %161 : vector<16x1280xf32>
    %cst_225 = arith.constant 0.000000e+00 : f32
    %163 = vector.broadcast %cst_225 : f32 to vector<16x1280xf32>
    %164 = arith.select %2, %162, %163 : vector<16x1280xi1>, vector<16x1280xf32>
    %c0_226 = arith.constant 0 : index
    %c128_227 = arith.constant 128 : index
    %165 = vector.load %arg11[%c0_226, %c128_227] : memref<16x1536xf32, #tpu.memory_space<vmem>>, vector<16x1280xf32>
    tpu.vector_store %arg11[%c0_226, %c128_227], %164 {strides = array<i32>} : memref<16x1536xf32, #tpu.memory_space<vmem>>, vector<16x1280xf32>,
    %c0_228 = arith.constant 0 : index
    %c107_229 = arith.constant 107 : index
    %166 = vector.load %arg11[%c0_228, %c107_229] : memref<16x1536xf32, #tpu.memory_space<vmem>>, vector<16x1280xf32>
    %c0_230 = arith.constant 0 : index
    %c0_231 = arith.constant 0 : index
    %167 = vector.load %arg12[%c0_230, %c0_231] : memref<272x1280xf32, #tpu.memory_space<vmem>>, vector<16x1280xf32>
    tpu.vector_store %arg12[%c0_230, %c0_231], %166 {strides = array<i32>} : memref<272x1280xf32, #tpu.memory_space<vmem>>, vector<16x1280xf32>,
    %c0_232 = arith.constant 0 : index
    %c108_233 = arith.constant 108 : index
    %168 = vector.load %arg11[%c0_232, %c108_233] : memref<16x1536xf32, #tpu.memory_space<vmem>>, vector<16x1280xf32>
    %c16_234 = arith.constant 16 : index
    %c0_235 = arith.constant 0 : index
    %169 = vector.load %arg12[%c16_234, %c0_235] : memref<272x1280xf32, #tpu.memory_space<vmem>>, vector<16x1280xf32>
    tpu.vector_store %arg12[%c16_234, %c0_235], %168 {strides = array<i32>} : memref<272x1280xf32, #tpu.memory_space<vmem>>, vector<16x1280xf32>,
    %c0_236 = arith.constant 0 : index
    %c109_237 = arith.constant 109 : index
    %170 = vector.load %arg11[%c0_236, %c109_237] : memref<16x1536xf32, #tpu.memory_space<vmem>>, vector<16x1280xf32>
    %c32_238 = arith.constant 32 : index
    %c0_239 = arith.constant 0 : index
    %171 = vector.load %arg12[%c32_238, %c0_239] : memref<272x1280xf32, #tpu.memory_space<vmem>>, vector<16x1280xf32>
    tpu.vector_store %arg12[%c32_238, %c0_239], %170 {strides = array<i32>} : memref<272x1280xf32, #tpu.memory_space<vmem>>, vector<16x1280xf32>,
    %c0_240 = arith.constant 0 : index
    %c127_241 = arith.constant 127 : index
    %172 = vector.load %arg11[%c0_240, %c127_241] : memref<16x1536xf32, #tpu.memory_space<vmem>>, vector<16x1280xf32>
    %c48_242 = arith.constant 48 : index
    %c0_243 = arith.constant 0 : index
    %173 = vector.load %arg12[%c48_242, %c0_243] : memref<272x1280xf32, #tpu.memory_space<vmem>>, vector<16x1280xf32>
    tpu.vector_store %arg12[%c48_242, %c0_243], %172 {strides = array<i32>} : memref<272x1280xf32, #tpu.memory_space<vmem>>, vector<16x1280xf32>,
    %c0_244 = arith.constant 0 : index
    %c128_245 = arith.constant 128 : index
    %174 = vector.load %arg11[%c0_244, %c128_245] : memref<16x1536xf32, #tpu.memory_space<vmem>>, vector<16x1280xf32>
    %c64_246 = arith.constant 64 : index
    %c0_247 = arith.constant 0 : index
    %175 = vector.load %arg12[%c64_246, %c0_247] : memref<272x1280xf32, #tpu.memory_space<vmem>>, vector<16x1280xf32>
    tpu.vector_store %arg12[%c64_246, %c0_247], %174 {strides = array<i32>} : memref<272x1280xf32, #tpu.memory_space<vmem>>, vector<16x1280xf32>,
    %c0_248 = arith.constant 0 : index
    %c129_249 = arith.constant 129 : index
    %176 = vector.load %arg11[%c0_248, %c129_249] : memref<16x1536xf32, #tpu.memory_space<vmem>>, vector<16x1280xf32>
    %c80_250 = arith.constant 80 : index
    %c0_251 = arith.constant 0 : index
    %177 = vector.load %arg12[%c80_250, %c0_251] : memref<272x1280xf32, #tpu.memory_space<vmem>>, vector<16x1280xf32>
    tpu.vector_store %arg12[%c80_250, %c0_251], %176 {strides = array<i32>} : memref<272x1280xf32, #tpu.memory_space<vmem>>, vector<16x1280xf32>,
    %c0_252 = arith.constant 0 : index
    %c147_253 = arith.constant 147 : index
    %178 = vector.load %arg11[%c0_252, %c147_253] : memref<16x1536xf32, #tpu.memory_space<vmem>>, vector<16x1280xf32>
    %c96_254 = arith.constant 96 : index
    %c0_255 = arith.constant 0 : index
    %179 = vector.load %arg12[%c96_254, %c0_255] : memref<272x1280xf32, #tpu.memory_space<vmem>>, vector<16x1280xf32>
    tpu.vector_store %arg12[%c96_254, %c0_255], %178 {strides = array<i32>} : memref<272x1280xf32, #tpu.memory_space<vmem>>, vector<16x1280xf32>,
    %c0_256 = arith.constant 0 : index
    %c148_257 = arith.constant 148 : index
    %180 = vector.load %arg11[%c0_256, %c148_257] : memref<16x1536xf32, #tpu.memory_space<vmem>>, vector<16x1280xf32>
    %c112_258 = arith.constant 112 : index
    %c0_259 = arith.constant 0 : index
    %181 = vector.load %arg12[%c112_258, %c0_259] : memref<272x1280xf32, #tpu.memory_space<vmem>>, vector<16x1280xf32>
    tpu.vector_store %arg12[%c112_258, %c0_259], %180 {strides = array<i32>} : memref<272x1280xf32, #tpu.memory_space<vmem>>, vector<16x1280xf32>,
    %c0_260 = arith.constant 0 : index
    %c149_261 = arith.constant 149 : index
    %182 = vector.load %arg11[%c0_260, %c149_261] : memref<16x1536xf32, #tpu.memory_space<vmem>>, vector<16x1280xf32>
    %c128_262 = arith.constant 128 : index
    %c0_263 = arith.constant 0 : index
    %183 = vector.load %arg12[%c128_262, %c0_263] : memref<272x1280xf32, #tpu.memory_space<vmem>>, vector<16x1280xf32>
    tpu.vector_store %arg12[%c128_262, %c0_263], %182 {strides = array<i32>} : memref<272x1280xf32, #tpu.memory_space<vmem>>, vector<16x1280xf32>,
    %c0_264 = arith.constant 0 : index
    %c0_265 = arith.constant 0 : index
    %184 = vector.load %arg7[%c0_264, %c0_265] : memref<8x144xf32, #tpu.memory_space<vmem>>, vector<8x144xf32>
    %c0_266 = arith.constant 0 : index
    %c0_267 = arith.constant 0 : index
    %185 = vector.load %arg12[%c0_266, %c0_267] : memref<272x1280xf32, #tpu.memory_space<vmem>>, vector<144x1280xf32>
    %cst_268 = arith.constant dense<0.000000e+00> : vector<8x1280xf32>
    %186 = tpu.matmul %184, %185, %cst_268 {dimension_numbers = #tpu.dot_dimension_numbers<[1], [0], [0], [1], [0, 0, 1, 1], [], []>} : vector<8x144xf32>, vector<144x1280xf32>, vector<8x1280xf32> -> vector<8x1280xf32>
    %c0_269 = arith.constant 0 : index
    %c0_270 = arith.constant 0 : index
    %187 = vector.load %arg8[%c0_269, %c0_270] : memref<8x1xf32, #tpu.memory_space<vmem>>, vector<8x1xf32>
    %188 = vector.broadcast %187 : vector<8x1xf32> to vector<8x1280xf32>
    %189 = arith.addf %186, %188 : vector<8x1280xf32>
    %c0_271 = arith.constant 0 : index
    %c0_272 = arith.constant 0 : index
    %c128_273 = arith.constant 128 : index
    %190 = vector.load %arg2[%c0_271, %c0_272, %c128_273] : memref<1x8x1536xf32, #tpu.memory_space<vmem>>, vector<1x8x1280xf32>
    %191 = vector.shape_cast %190 : vector<1x8x1280xf32> to vector<8x1280xf32>
    %192 = arith.addf %189, %191 : vector<8x1280xf32>
    %cst_274 = arith.constant 0.000000e+00 : f32
    %193 = vector.broadcast %cst_274 : f32 to vector<8x1280xf32>
    %194 = arith.maximumf %192, %193 : vector<8x1280xf32>
    %c0_275 = arith.constant 0 : index
    %c0_276 = arith.constant 0 : index
    %c0_277 = arith.constant 0 : index
    %195 = vector.load %arg9[%c0_275, %c0_276, %c0_277] : memref<1x8x1280xf32, #tpu.memory_space<vmem>>, vector<1x8x1280xf32>
    %196 = vector.shape_cast %195 : vector<1x8x1280xf32> to vector<8x1280xf32>
    %197 = vector.shape_cast %194 : vector<8x1280xf32> to vector<1x8x1280xf32>
    tpu.vector_store %arg9[%c0_275, %c0_276, %c0_277], %197 {strides = array<i32>} : memref<1x8x1280xf32, #tpu.memory_space<vmem>>, vector<1x8x1280xf32>,
    return
  }
  func.func @transform_0(%arg0: i32) -> (i32, i32) {
    %c0_i32 = arith.constant 0 : i32
    %c0_i32_0 = arith.constant 0 : i32
    %c0_i32_1 = arith.constant 0 : i32
    return %c0_i32, %c0_i32_0 : i32, i32
  }
  func.func @transform_1(%arg0: i32) -> (i32, i32, i32) {
    %c0_i32 = arith.constant 0 : i32
    %c0_i32_0 = arith.constant 0 : i32
    %c0_i32_1 = arith.constant 0 : i32
    return %arg0, %c0_i32, %c0_i32_0 : i32, i32, i32
  }
  func.func @transform_2(%arg0: i32) -> (i32, i32) {
    %c0_i32 = arith.constant 0 : i32
    %c0_i32_0 = arith.constant 0 : i32
    %c0_i32_1 = arith.constant 0 : i32
    return %c0_i32, %c0_i32_0 : i32, i32
  }
  func.func @transform_3(%arg0: i32) -> (i32, i32) {
    %c0_i32 = arith.constant 0 : i32
    %c0_i32_0 = arith.constant 0 : i32
    %c0_i32_1 = arith.constant 0 : i32
    return %c0_i32, %c0_i32_0 : i32, i32
  }
  func.func @transform_4(%arg0: i32) -> (i32, i32) {
    %c0_i32 = arith.constant 0 : i32
    %c0_i32_0 = arith.constant 0 : i32
    %c0_i32_1 = arith.constant 0 : i32
    return %c0_i32, %c0_i32_0 : i32, i32
  }
  func.func @transform_5(%arg0: i32) -> (i32, i32) {
    %c0_i32 = arith.constant 0 : i32
    %c0_i32_0 = arith.constant 0 : i32
    %c0_i32_1 = arith.constant 0 : i32
    return %c0_i32, %c0_i32_0 : i32, i32
  }
  func.func @transform_6(%arg0: i32) -> (i32, i32) {
    %c0_i32 = arith.constant 0 : i32
    %c0_i32_0 = arith.constant 0 : i32
    %c0_i32_1 = arith.constant 0 : i32
    return %c0_i32, %c0_i32_0 : i32, i32
  }
  func.func @transform_7(%arg0: i32) -> (i32, i32) {
    %c0_i32 = arith.constant 0 : i32
    %c0_i32_0 = arith.constant 0 : i32
    %c0_i32_1 = arith.constant 0 : i32
    return %c0_i32, %c0_i32_0 : i32, i32
  }
  func.func @transform_8(%arg0: i32) -> (i32, i32, i32) {
    %c0_i32 = arith.constant 0 : i32
    %c0_i32_0 = arith.constant 0 : i32
    %c0_i32_1 = arith.constant 0 : i32
    return %arg0, %c0_i32, %c0_i32_0 : i32, i32, i32
  }
}

</mosaic_0001>

<bundles_post_ra>
// kernel: tpu_custom_call.1
= control target key start
LH: loop header
LB: loop body
LE: loop exit
PB: predicated region body
PF: predicated region fallthrough
CT: control target
= control target key end

     0   :  { %s16363_s0 = inlined_call_operand.hbm [shape: f32[16,1280], index: 0, kind: input, shape index: {}]   ;;  %s16364_s1 = inlined_call_operand.hbm [shape: f32[2,8,1536], index: 1, kind: input, shape index: {}]   ;;  %s16365_s2 = inlined_call_operand.hbm [shape: f32[16,200], index: 2, kind: input, shape index: {}]   ;;  %s16366_s3 = inlined_call_operand.vmem [shape: f32[16,1], index: 3, kind: input, shape index: {}]   ;;  %s16367_s4 = inlined_call_operand.vmem [shape: f32[16,272], index: 4, kind: input, shape index: {}]   ;;  %s16368_s5 = inlined_call_operand.vmem [shape: f32[16,1], index: 5, kind: input, shape index: {}]   ;;  %s16369_s6 = inlined_call_operand.vmem [shape: f32[8,144], index: 6, kind: input, shape index: {}]   ;;  %s16370_s7 = inlined_call_operand.vmem [shape: f32[8,1], index: 7, kind: input, shape index: {}]   ;;  %s16371_s8 = inlined_call_operand.hbm [shape: f32[2,8,1280], index: 8, kind: output, shape index: {}]  }
   0x1   :  { %16749 = sst [smem:[#allocation96_spill]] %s16363_s0 }
   0x2   :  { %16750 = sst [smem:[#allocation97_spill]] %s16364_s1 }
   0x3   :  { %16751 = sst [smem:[#allocation98_spill]] %s16365_s2 }
   0x4   :  { %16752 = sst [smem:[#allocation99_spill]] %s16366_s3 }
   0x5   :  { %16753 = sst [smem:[#allocation100_spill]] %s16371_s8 }
   0x6   :  { %13 = vsyncpa [#allocation6], 0 }
   0x7   :  { %14 = vsyncpa [#allocation9], 0 }
   0x8   :  { %16 = vsyncpa [#allocation9 + $0x1], 0 }
   0x9   :  { %17 = vsyncpa [#allocation7], 0 }
   0xa   :  { %19 = vsyncpa [#allocation7 + $0x1], 0  ;;  %s11508_s27 = smov 0   ;;  %s11510_s28 = smov 0  }
   0xb   :  { %s11512_s29 = smov 0   ;;  %s11514_s30 = smov 0  }
   0xc LB: > { %16754 = sst [smem:[#allocation16_spill]] %s11414_s27  ;;  %s11529_s9 = sadd.s32 4294967295, %s11426_s30   ;;  %s11426_s30 = sphi %s11514_s30, %s17759_s30   ;;  %s11422_s29 = sphi %s11512_s29, %s17762_s29   ;;  %s11418_s28 = sphi %s11510_s28, %s17761_s28   ;;  %s11414_s27 = sphi %s11508_s27, %s17760_s27  }
   0xd   : > { %16755 = sst [smem:[#allocation17_spill]] %s11418_s28  ;;  %s8428_s10 = sadd.s32 4294967294, %s11426_s30  }
   0xe   : > { %16756 = sst [smem:[#allocation18_spill]] %s11422_s29  ;;  %p66_p0 = scmp.ne.s32.totalorder %s11418_s28, %s11414_s27 }
   0xf   : > { %16757 = sst [smem:[#allocation19_spill]] %s11426_s30  ;;  %p16372_p1 = scmp.eq.s32.totalorder %s11529_s9, 0 }
  0x10   : > { %p222_p3 = scmp.eq.s32.totalorder %s8428_s10, 1  ;;  %p8429_p5 = scmp.ge.s32.totalorder %s11426_s30, 1 }
  0x11   : > { %p11538_p4 = por %p16372_p1, %p66_p0  ;;  %p229_p7 = scmp.lt.s32.totalorder %s11426_s30, 3 }
  0x12   : > { %p11543_p6 = por %p222_p3, %p66_p0  ;;  %s11428_s14 = smov [#allocation10]  }
  0x13   : > { %s16758_s11 = scalar_select %p11538_p4, 1, 0 }
  0x14   : > { %s16759_s12 = scalar_select %p11543_p6, 1, 0 }
  0x15   : > { %p11548_p8 = pnand %p8429_p5, %p229_p7  ;;  %s254_s15 = sshll.u32 %s11428_s14, 4  ;;  %s11552_s15 = int_to_ptr.vmem [resolvable:$true] %s254_s15 }
  0x16   : > { %16760 = sst [smem:[#allocation20_spill]] %s16759_s12  ;;  %s11429_s17 = smov [#allocation5]  }
  0x17   : > { %p9282_p9 = pneg %p11548_p8  ;;  %s241_s18 = sshll.u32 %s11429_s17, 4  ;;  %s11563_s18 = int_to_ptr.vmem [resolvable:$true] %s241_s18 }
  0x18   : > { %s16763_s2 = sld [smem:[#allocation98_spill]] }
  0x19   : > { %p11559_p11 = pnand %p9282_p9, %p16372_p1 }
  0x1b   : > { %p11268_p13 = pneg %p11559_p11 }
  0x1e   : > { %s11266_s21 = scalar_lea.hbm %s16763_s2, 512 }
  0x1f   : > { %p11267_p12 = scmp.ne.s32.totalorder %s16763_s2, %s11266_s21  ;;  %p11273_p5 = scmp.lt.u32.totalorder %s11266_s21, %s16763_s2 }
  0x21   : > { %p11269_p0 = pnand %p11268_p13, %p11267_p12 }
  0x23   : > { %p11270_p3 = pneg %p11269_p0 }
  0x25   : > { %p11275_p7 = pnand %p11273_p5, %p11270_p3 }
  0x27   : > { %11278 = shalt.err (!%p11275_p7)
}
  0x28   : > { %s11279_s26 = scalar_lea.vmem %s11552_s15, 512  ;;  %p11287_p2 = scmp.lt.s32.totalorder %s11552_s15, %s11552_s15 }
  0x29   : > { %p11280_p9 = scmp.ne.s32.totalorder %s11552_s15, %s11279_s26  ;;  %p11288_p12 = scmp.lt.s32.totalorder %s11279_s26, %s11279_s26 }
  0x2b   : > { %p11282_p10 = pnand %p11280_p9, %p11268_p13  ;;  %p11289_p0 = por %p11288_p12, %p11287_p2 }
  0x2d   : > { %p11283_p1 = pneg %p11282_p10 }
  0x2f   : > { %p11290_p6 = pnand %p11289_p0, %p11283_p1 }
  0x31   : > { %11293 = shalt.err (!%p11290_p6)
}
  0x32   : > { %s11430_s10 = smov 256   ;;  %s11431_s14 = smov 16  }
  0x33   : > { %9288 = dma.hbm_to_vmem [thread:$0]  (!%p11559_p11), %s16763_s2, 512, %s11552_s15, [#allocation9], %s11430_s10, %s11430_s10, %s11431_s14  }
  0x34   : > { %s16764_s0 = sld [smem:[#allocation96_spill]] }
  0x3a   : > { %s11294_s22 = scalar_lea.hbm %s16764_s0, 2560 }
  0x3b   : > { %p11295_p2 = scmp.ne.s32.totalorder %s16764_s0, %s11294_s22  ;;  %p11301_p10 = scmp.lt.u32.totalorder %s11294_s22, %s16764_s0 }
  0x3d   : > { %p11297_p1 = pnand %p11295_p2, %p11268_p13 }
  0x3f   : > { %p11298_p6 = pneg %p11297_p1 }
  0x41   : > { %p11303_p3 = pnand %p11301_p10, %p11298_p6 }
  0x43   : > { %11306 = shalt.err (!%p11303_p3)
}
  0x44   : > { %s11307_s15 = scalar_lea.vmem %s11563_s18, 2560  ;;  %p11315_p12 = scmp.lt.s32.totalorder %s11563_s18, %s11563_s18 }
  0x45   : > { %p11308_p5 = scmp.ne.s32.totalorder %s11563_s18, %s11307_s15  ;;  %p11316_p0 = scmp.lt.s32.totalorder %s11307_s15, %s11307_s15 }
  0x47   : > { %p11310_p7 = pnand %p11308_p5, %p11268_p13  ;;  %p11317_p2 = por %p11316_p0, %p11315_p12 }
  0x49   : > { %p11311_p9 = pneg %p11310_p7 }
  0x4b   : > { %p11318_p1 = pnand %p11317_p2, %p11311_p9 }
  0x4d   : > { %11321 = shalt.err (!%p11318_p1)
}
  0x4e   : > { %s11432_s10 = smov 1280   ;;  %s11433_s14 = smov 80  }
  0x4f   : > { %9285 = dma.hbm_to_vmem [thread:$0]  (!%p11559_p11), %s16764_s0, 2560, %s11563_s18, [#allocation6], %s11432_s10, %s11432_s10, %s11433_s14  }
  0x50   : > { %s11618_s20 = sadd.s32 1, %s11426_s30   ;;  %s53_s22 = sadd.s32 1, %s11422_s29 }
  0x51   : > { %16765 = sst [smem:[#allocation21_spill]] %s11618_s20  ;;  %s50_s21 = ssub.s32 %s11426_s30, %s11618_s20 }
  0x52   : > { %p51_p13 = scmp.eq.s32.totalorder %s50_s21, 0  ;;  %p60_p6 = scmp.ne.s32.totalorder %s11422_s29, %s11418_s28 }
  0x53   : > { %p61_p10 = scmp.eq.s32.totalorder %s11426_s30, 0  ;;  %p16767_p5 = scmp.eq.s32.totalorder %s11529_s9, 1 }
  0x54   : > { %s11627_s23 = scalar_select %p51_p13, %s11422_s29, %s53_s22  }
  0x55   : > { %p62_p3 = por %p61_p10, %p60_p6  ;;  %p11631_p7 = por %p16767_p5, %p60_p6 }
  0x56   : > { %16766 = sst [smem:[#allocation22_spill]] %s11627_s23  ;;  %p9299_p9 = scmp.lt.s32.totalorder %s11426_s30, 2 }
  0x57   : > { %s16768_s24 = scalar_select %p11631_p7, 1, 0 }
  0x58   : > { %s283_s16 = sand.u32 1, %s11426_s30   ;;  %s285_s25 = sand.u32 1, %s11422_s29  }
  0x59   : > { %16769 = sst [smem:[#allocation23_spill]] %s16768_s24  ;;  %s9265_s18 = smul.u32 96, %s285_s25 }
  0x5a   : > { %p11638_p11 = pnand %p9299_p9, %p62_p3  ;;  %s9266_s15 = smul.u32 1536, %s11426_s30 }
  0x5b   : > { %s16771_s1 = sld [smem:[#allocation97_spill]]  ;;  %s287_s19 = scalar_lea.vmem [#allocation8], %s9265_s18 }
  0x5c   : > { %s295_s21 = sshll.u32 %s287_s19, 4  ;;  %s284_s22 = scalar_lea.sflag [#allocation9], %s283_s16  ;;  %s11648_s21 = int_to_ptr.vmem [resolvable:$true] %s295_s21 }
  0x5d   : > { %p11324_p0 = pneg %p11638_p11 }
  0x61   : > { %s11646_s17 = scalar_lea.hbm %s16771_s1, %s9266_s15  ;;  %s11327_s14 = scalar_lea.hbm %s16771_s1, 3072 }
  0x62   : > { %s11322_s25 = scalar_lea.hbm %s11646_s17, 1536  ;;  %p11328_p13 = scmp.lt.u32.totalorder %s11646_s17, %s16771_s1 }
  0x63   : > { %p11323_p12 = scmp.ne.s32.totalorder %s11646_s17, %s11322_s25  ;;  %p11329_p6 = scmp.lt.u32.totalorder %s11327_s14, %s11322_s25 }
  0x64   : > { %p11331_p3 = scmp.lt.u32.totalorder %s11322_s25, %s11646_s17 }
  0x65   : > { %p11325_p2 = pnand %p11324_p0, %p11323_p12  ;;  %p11330_p10 = por %p11329_p6, %p11328_p13 }
  0x67   : > { %p11326_p1 = pneg %p11325_p2  ;;  %p11332_p5 = por %p11331_p3, %p11330_p10 }
  0x69   : > { %p11333_p9 = pnand %p11332_p5, %p11326_p1 }
  0x6b   : > { %11336 = shalt.err (!%p11333_p9)
}
  0x6c   : > { %s11337_s16 = scalar_lea.vmem %s11648_s21, 1536  ;;  %s11434_s18 = smov [#allocation8]  }
  0x6d   : > { %p11338_p12 = scmp.ne.s32.totalorder %s11648_s21, %s11337_s16  ;;  %s11342_s19 = sshll.u32 %s11434_s18, 4  ;;  %s11343_s19 = int_to_ptr.vmem [resolvable:$false] %s11342_s19 }
  0x6e   : > { %s11344_s0 = scalar_lea.vmem %s11343_s19, 3072  ;;  %p11345_p4 = scmp.lt.s32.totalorder %s11648_s21, %s11343_s19 }
  0x6f   : > { %p11340_p2 = pnand %p11338_p12, %p11324_p0  ;;  %p11346_p13 = scmp.lt.s32.totalorder %s11344_s0, %s11337_s16 }
  0x71   : > { %p11341_p7 = pneg %p11340_p2  ;;  %p11347_p6 = por %p11346_p13, %p11345_p4 }
  0x73   : > { %p11348_p10 = pnand %p11347_p6, %p11341_p7 }
  0x75   : > { %11351 = shalt.err (!%p11348_p10)
}
  0x76   : > { %9292 = dma.hbm_to_vmem [thread:$0]  (!%p11638_p11), %s11646_s17, 1536, %s11648_s21, %s284_s22  }
  0x77   : > { %304 = sbr.rel (%p11548_p8) target bundleno = 1907 (0x773), region = 52 }
  0x7e   : > { %p16772_p0 = scmp.eq.s32.totalorder %s11529_s9, 0 }
  0x80   : > { %11397 = dma.done.wait (%p16772_p0), [#allocation6], 2560   ;;  %p16773_p1 = pmov %p16772_p0 }
  0x81   : > { %s310_s2 = sand.u32 1, %s11529_s9   ;;  %s11683_s25 = sand.u32 1, %s11418_s28  }
  0x82   : > { %11399 = vsyncadd (%p16773_p1), [#allocation6], 4294964736  ;;  %s9267_s26 = smul.u32 96, %s11683_s25  ;;  %s311_s10 = scalar_lea.sflag [#allocation9], %s310_s2 }
  0x83   : > { %p16774_p4 = scmp.ne.s32.totalorder %s16758_s11, 0 }
  0x84   : > { %s11686_s15 = scalar_lea.vmem [#allocation8], %s9267_s26 }
  0x85   : > { %11401 = dma.done.wait (%p16774_p4), %s311_s10, 1536  }
  0x86   : > { %11403 = vsyncadd (%p16774_p4), %s311_s10, 4294965760  ;;  %p16775_p8 = pmov %p16772_p0 }
  0x87   : > { %p16776_p7 = pmov %p16772_p0 }
  0x88   : > { %11405 = dma.done.wait (%p16775_p8), [#allocation9], 512  }
  0x89   : > { %11407 = vsyncadd (%p16776_p7), [#allocation9], 4294966784  ;;  %v395_v0 = vld [vmem:[%s11686_s15 + $0x20] sm:$0xff]  ;;  %v396_v1 = vld [vmem:[%s11686_s15 + $0x28] sm:$0xff]  ;;  %s16392_s11 = smov 42   ;;  %s16390_s13 = smov 41  }
  0x8a   : > { %v391_v2 = vld [vmem:[%s11686_s15] sm:$0xff]  ;;  %v11699_v3 = vpack.i.bf16 %v396_v1, %v395_v0  ;;  %v392_v4 = vld [vmem:[%s11686_s15 + $0x8] sm:$0xff]  ;;  %v397_v5 = vld [vmem:[%s11686_s15 + $0x30] sm:$0xff]  ;;  %s16377_s17 = smov 40   ;;  %s16375_s21 = smov 39   ;;  %vm510_vm0 = vcmask 334848  }
  0x8b   : > { %v398_v6 = vld [vmem:[%s11686_s15 + $0x38] sm:$0xff]  ;;  %v11704_v7 = vpack.i.bf16 %v392_v4, %v391_v2  ;;  %v11707_v8 = vld [vmem:[%s11686_s15 + $0x10] sm:$0xff]  ;;  %v3541_v13 = vld [vmem:[#allocation2 + $0x60] sm:$0xff]  ;;  %v11756_v21 = vpack.i.bf16 %v397_v5, %v396_v1  ;;  %s16534_s22 = smov 38   ;;  %s16536_s14 = smov 22   ;;  %vm435_vm1 = vcmask 343040  }
  0x8c   : > { %v11710_v9 = vld [vmem:[%s11686_s15 + $0x18] sm:$0xff]  ;;  %9378 = vrot.lane.b32.xlu1 %v11699_v3, %s16392_s11  ;;  %v11714_v10 = vpack.i.bf16 %v398_v6, %v397_v5  ;;  %v11723_v12 = vld [vmem:[%s11686_s15 + $0x50] sm:$0xff]  ;;  %v399_v14 = vld [vmem:[%s11686_s15 + $0x40] sm:$0xff]  ;;  %v11748_v19 = vpack.i.bf16 %v11707_v8, %v392_v4  ;;  %s16530_s16 = smov 21   ;;  %s16551_s18 = smov 20   ;;  %vm585_vm2 = vcmask 326656  }
  0x8d   : > { %9368 = vrot.lane.b32.xlu0 %v11704_v7, %s16392_s11  ;;  %v11720_v11 = vpack.i.bf16 %v11710_v9, %v11707_v8  ;;  %v11727_v15 = vld [vmem:[%s11686_s15 + $0x48] sm:$0xff]  ;;  %v9392_v16 = vpack.i.bf16 %v3541_v13, %v11723_v12  ;;  %v11745_v18 = vpack.i.bf16 %v395_v0, %v11710_v9  ;;  %v11754_v20 = vpack.i.bf16 %v399_v14, %v398_v6  ;;  %v2929_v22 = vld [vmem:[#allocation2] sm:$0xff]  ;;  %s16528_s19 = smov 19   ;;  %s16542_s0 = smov 18  }
  0x8e   : > { %v11735_v17 = vpack.i.bf16 %v11727_v15, %v399_v14  ;;  %v11814_v23 = vpack.i.bf16 %v2929_v22, %v11723_v12  ;;  %s16408_s2 = smov 2   ;;  %s16532_s26 = smov 1   ;;  %vm660_vm3 = vcmask 318464   ;;  %vm735_vm4 = vcmask 310272  }
  0x8f   : > { %s16548_s10 = smov 127   ;;  %vm810_vm5 = vcmask 179200   ;;  %vm885_vm6 = vcmask 171008   ;;  %vm16490_vm7 = vcmask 162816   ;;  %vm16491_vm8 = vcmask 154624   ;;  %s16836_s3 = sld [smem:[#allocation99_spill]] }
  0x90   : > { %9383 = vrot.lane.b32.xlu1 %v11714_v10, %s16392_s11  ;;  %vm16517_vm9 = vcmask 146432   ;;  %vm16516_vm10 = vcmask 15360   ;;  %vm16492_vm11 = vcmask 7168   ;;  %vm16482_vm12 = vcmask 1039360   ;;  %s17073_s1 = smov 109   ;;  %s17085_s23 = smov 89  }
  0x91   : > { %9373 = vrot.lane.b32.xlu0 %v11720_v11, %s16392_s11  ;;  %vm2477_vm13 = vcmask 588800   ;;  %vm16435_vm14 = vcmask 1031168   ;;  %vm16436_vm15 = vcmask 900096   ;;  %s17090_s29 = smov 87   ;;  %s17092_s28 = smov 90  }
  0x92   : > { %s17096_s12 = smov 88   ;;  %s17099_s30 = smov 86  }
  0x93   : > { %s17102_s20 = smov 20  }
  0x94   : > { %9393 = vrot.lane.b32.xlu1 %v9392_v16, %s16392_s11 }
  0x95   : > { %9388 = vrot.lane.b32.xlu0 %v11735_v17, %s16392_s11  ;;  %s16406_s11 = smov 106  }
  0x98   : > { %9403 = vrot.lane.b32.xlu1 %v11720_v11, %s16390_s13 }
  0x99   : > { %9398 = vrot.lane.b32.xlu0 %v11704_v7, %s16390_s13 }
  0x9c   : > { %9413 = vrot.lane.b32.xlu1 %v11714_v10, %s16390_s13 }
  0x9d   : > { %9408 = vrot.lane.b32.xlu0 %v11699_v3, %s16390_s13 }
  0xa0   : > { %9423 = vrot.lane.b32.xlu1 %v9392_v16, %s16390_s13 }
  0xa1   : > { %9418 = vrot.lane.b32.xlu0 %v11735_v17, %s16390_s13  ;;  %s16538_s13 = smov 107  }
  0xa4   : > { %9433 = vrot.lane.b32.xlu1 %v11720_v11, %s16377_s17 }
  0xa5   : > { %9428 = vrot.lane.b32.xlu0 %v11704_v7, %s16377_s17 }
  0xa8   : > { %9443 = vrot.lane.b32.xlu1 %v11714_v10, %s16377_s17 }
  0xa9   : > { %9438 = vrot.lane.b32.xlu0 %v11699_v3, %s16377_s17 }
  0xac   : > { %9453 = vrot.lane.b32.xlu1 %v9392_v16, %s16377_s17 }
  0xad   : > { %9448 = vrot.lane.b32.xlu0 %v11735_v17, %s16377_s17  ;;  %s16379_s17 = smov 110  }
  0xb0   : > { %9463 = vrot.lane.b32.xlu1 %v11720_v11, %s16375_s21 }
  0xb1   : > { %9458 = vrot.lane.b32.xlu0 %v11704_v7, %s16375_s21 }
  0xb4   : > { %9473 = vrot.lane.b32.xlu1 %v11714_v10, %s16375_s21 }
  0xb5   : > { %9468 = vrot.lane.b32.xlu0 %v11699_v3, %s16375_s21 }
  0xb8   : > { %9483 = vrot.lane.b32.xlu1 %v9392_v16, %s16375_s21 }
  0xb9   : > { %9478 = vrot.lane.b32.xlu0 %v11735_v17, %s16375_s21  ;;  %s16381_s21 = smov 126  }
  0xbc   : > { %9493 = vrot.lane.b32.xlu1 %v11720_v11, %s16534_s22 }
  0xbd   : > { %9488 = vrot.lane.b32.xlu0 %v11704_v7, %s16534_s22 }
  0xc0   : > { %9503 = vrot.lane.b32.xlu1 %v11714_v10, %s16534_s22 }
  0xc1   : > { %9498 = vrot.lane.b32.xlu0 %v11699_v3, %s16534_s22 }
  0xc4   : > { %733 = vrot.lane.b32.xlu1 %v11723_v12, %s16534_s22 }
  0xc5   : > { %9508 = vrot.lane.b32.xlu0 %v11735_v17, %s16534_s22 }
  0xc8   : > { %9518 = vrot.lane.b32.xlu1 %v11720_v11, %s16536_s14 }
  0xc9   : > { %9513 = vrot.lane.b32.xlu0 %v11704_v7, %s16536_s14 }
  0xcc   : > { %9528 = vrot.lane.b32.xlu1 %v11714_v10, %s16536_s14 }
  0xcd   : > { %9523 = vrot.lane.b32.xlu0 %v11699_v3, %s16536_s14 }
  0xd0   : > { %808 = vrot.lane.b32.xlu1 %v11723_v12, %s16536_s14 }
  0xd1   : > { %9533 = vrot.lane.b32.xlu0 %v11735_v17, %s16536_s14 }
  0xd4   : > { %9543 = vrot.lane.b32.xlu1 %v11720_v11, %s16530_s16 }
  0xd5   : > { %9538 = vrot.lane.b32.xlu0 %v11704_v7, %s16530_s16 }
  0xd8   : > { %9553 = vrot.lane.b32.xlu1 %v11714_v10, %s16530_s16 }
  0xd9   : > { %9548 = vrot.lane.b32.xlu0 %v11699_v3, %s16530_s16 }
  0xdc   : > { %9563 = vrot.lane.b32.xlu1 %v11814_v23, %s16530_s16 }
  0xdd   : > { %9558 = vrot.lane.b32.xlu0 %v11735_v17, %s16530_s16 }
  0xe0   : > { %9573 = vrot.lane.b32.xlu1 %v11720_v11, %s16551_s18 }
  0xe1   : > { %9568 = vrot.lane.b32.xlu0 %v11704_v7, %s16551_s18 }
  0xe4   : > { %9583 = vrot.lane.b32.xlu1 %v11714_v10, %s16551_s18 }
  0xe5   : > { %9578 = vrot.lane.b32.xlu0 %v11699_v3, %s16551_s18 }
  0xe8   : > { %9593 = vrot.lane.b32.xlu1 %v11814_v23, %s16551_s18 }
  0xe9   : > { %9588 = vrot.lane.b32.xlu0 %v11735_v17, %s16551_s18 }
  0xec   : > { %9603 = vrot.lane.b32.xlu1 %v11720_v11, %s16528_s19 }
  0xed   : > { %9598 = vrot.lane.b32.xlu0 %v11704_v7, %s16528_s19 }
  0xf0   : > { %9613 = vrot.lane.b32.xlu1 %v11714_v10, %s16528_s19 }
  0xf1   : > { %9608 = vrot.lane.b32.xlu0 %v11699_v3, %s16528_s19 }
  0xf4   : > { %9623 = vrot.lane.b32.xlu1 %v11814_v23, %s16528_s19 }
  0xf5   : > { %9618 = vrot.lane.b32.xlu0 %v11735_v17, %s16528_s19 }
  0xf8   : > { %9633 = vrot.lane.b32.xlu1 %v11720_v11, %s16542_s0 }
  0xf9   : > { %9628 = vrot.lane.b32.xlu0 %v11704_v7, %s16542_s0 }
  0xfc   : > { %9643 = vrot.lane.b32.xlu1 %v11714_v10, %s16542_s0 }
  0xfd   : > { %9638 = vrot.lane.b32.xlu0 %v11699_v3, %s16542_s0 }
  0xfe   : > { %v11854_v24 = vpop.permute.xlu1 %9378 }
  0xff   : > { %v9369_v25 = vpop.permute.xlu0 %9368  ;;  %v16387_v48 = vunpack.i.h.bf16 %v11854_v24  ;;  %v9380_v49 = vunpack.i.l.bf16 %v11854_v24 }
 0x100   : > { %1108 = vrot.lane.b32.xlu1 %v11723_v12, %s16542_s0  ;;  %v9371_v30 = vunpack.i.h.bf16 %v9369_v25  ;;  %v9370_v31 = vunpack.i.l.bf16 %v9369_v25 }
 0x101   : > { %9648 = vrot.lane.b32.xlu0 %v11735_v17, %s16542_s0  ;;  %v11910_v60 = vsel %vm435_vm1, %v9380_v49, %v16387_v48 }
 0x102   : > { %v11860_v26 = vpop.permute.xlu1 %9383  ;;  %v436_v39 = vsel %vm435_vm1, %v9370_v31, %v9371_v30 }
 0x103   : > { %v9374_v27 = vpop.permute.xlu0 %9373 }
 0x104   : > { %9658 = vrot.lane.b32.xlu1 %v11720_v11, %s16408_s2  ;;  %v9375_v32 = vunpack.i.l.bf16 %v9374_v27  ;;  %v9376_v40 = vunpack.i.h.bf16 %v9374_v27 }
 0x105   : > { %9653 = vrot.lane.b32.xlu0 %v11704_v7, %s16408_s2 }
 0x106   : > { %v11866_v28 = vpop.permute.xlu1 %9393  ;;  %v437_v42 = vsel %vm435_vm1, %v9371_v30, %v9375_v32  ;;  %v439_v55 = vsel %vm435_vm1, %v9376_v40, %v9380_v49  ;;  %v438_v59 = vsel %vm435_vm1, %v9375_v32, %v9376_v40 }
 0x107   : > { %16777 = vst [vmem:[#allocation24_spill] sm:$0xff] %v11866_v28  ;;  %v11868_v29 = vpop.permute.xlu0 %9388 }
 0x108   : > { %9668 = vrot.lane.b32.xlu1 %v11714_v10, %s16408_s2 }
 0x109   : > { %9663 = vrot.lane.b32.xlu0 %v11699_v3, %s16408_s2 }
 0x10a   : > { %v9404_v33 = vpop.permute.xlu1 %9403 }
 0x10b   : > { %v9405_v34 = vunpack.i.l.bf16 %v9404_v33  ;;  %v9399_v35 = vpop.permute.xlu0 %9398  ;;  %v9406_v38 = vunpack.i.h.bf16 %v9404_v33 }
 0x10c   : > { %v9401_v36 = vunpack.i.h.bf16 %v9399_v35  ;;  %v9400_v37 = vunpack.i.l.bf16 %v9399_v35  ;;  %1183 = vrot.lane.b32.xlu1 %v11723_v12, %s16408_s2 }
 0x10d   : > { %9673 = vrot.lane.b32.xlu0 %v11735_v17, %s16408_s2  ;;  %v513_v52 = vsel %vm510_vm0, %v9405_v34, %v9406_v38  ;;  %s16424_s2 = smov 89  }
 0x10e   : > { %v11879_v41 = vpop.permute.xlu1 %9413  ;;  %v512_v43 = vsel %vm510_vm0, %v9401_v36, %v9405_v34  ;;  %v511_v44 = vsel %vm510_vm0, %v9400_v37, %v9401_v36  ;;  %v8515_v61 = vpack.c.bf16 %v513_v52, %v438_v59 }
 0x10f   : > { %v11884_v45 = vpop.permute.xlu0 %9408  ;;  %v8465_v46 = vpack.c.bf16 %v512_v43, %v437_v42  ;;  %v8467_v47 = vpack.c.bf16 %v511_v44, %v436_v39 }
 0x110   : > { %v16388_v50 = vunpack.i.h.bf16 %v11884_v45  ;;  %v9410_v51 = vunpack.i.l.bf16 %v11884_v45  ;;  %9683 = vrot.lane.b32.xlu1 %v11720_v11, %s16532_s26 }
 0x111   : > { %9678 = vrot.lane.b32.xlu0 %v11704_v7, %s16532_s26  ;;  %8466 = vmatprep.subr.bf16.mxu0 %v8465_v46  ;;  %v11939_v7 = vld [vmem:[%s11686_s15 + $0x58] sm:$0xff] }
 0x112   : > { %v11898_v53 = vsel %vm510_vm0, %v9410_v51, %v16388_v50  ;;  %8468 = vmatpush1.bf16.msra.mxu0 %v8467_v47  ;;  %v11900_v54 = vpop.permute.xlu1 %9423  ;;  %v514_v56 = vsel %vm510_vm0, %v9406_v38, %v9410_v51 }
 0x113   : > { %16778 = vst [vmem:[#allocation25_spill] sm:$0xff] %v11900_v54  ;;  %v11904_v57 = vpop.permute.xlu0 %9418  ;;  %v8513_v58 = vpack.c.bf16 %v514_v56, %v439_v55 }
 0x114   : > { %9693 = vrot.lane.b32.xlu1 %v11714_v10, %s16532_s26  ;;  %v11943_v10 = vpack.i.bf16 %v11723_v12, %v11727_v15 }
 0x115   : > { %9688 = vrot.lane.b32.xlu0 %v11699_v3, %s16532_s26  ;;  %8514 = vmatprep.subr.bf16.mxu1 %v8513_v58 }
 0x116   : > { %8516 = vmatpush1.bf16.msra.mxu1 %v8515_v61  ;;  %v9434_v63 = vpop.permute.xlu1 %9433 }
 0x117   : > { %v9429_v0 = vpop.permute.xlu0 %9428  ;;  %v9435_v5 = vunpack.i.l.bf16 %v9434_v63  ;;  %v9436_v32 = vunpack.i.h.bf16 %v9434_v63 }
 0x118   : > { %9703 = vrot.lane.b32.xlu1 %v11814_v23, %s16532_s26  ;;  %v9431_v6 = vunpack.i.h.bf16 %v9429_v0  ;;  %v9430_v11 = vunpack.i.l.bf16 %v9429_v0 }
 0x119   : > { %9698 = vrot.lane.b32.xlu0 %v11735_v17, %s16532_s26  ;;  %v588_v51 = vsel %vm585_vm2, %v9435_v5, %v9436_v32 }
 0x11a   : > { %v11922_v1 = vpop.permute.xlu1 %9443  ;;  %v587_v25 = vsel %vm585_vm2, %v9431_v6, %v9435_v5  ;;  %v586_v30 = vsel %vm585_vm2, %v9430_v11, %v9431_v6  ;;  %v12013_v11 = vld [vmem:[%s11686_s15 + $0x20] sm:$0xff] }
 0x11b   : > { %v11924_v2 = vpop.permute.xlu0 %9438 }
 0x11c   : > { %9713 = vrot.lane.b32.xlu1 %v11745_v18, %s16548_s10  ;;  %v9440_v12 = vunpack.i.l.bf16 %v11924_v2  ;;  %v16385_v38 = vunpack.i.h.bf16 %v11924_v2 }
 0x11d   : > { %9708 = vrot.lane.b32.xlu0 %v11748_v19, %s16548_s10 }
 0x11e   : > { %v11930_v3 = vpop.permute.xlu1 %9453  ;;  %v589_v43 = vsel %vm585_vm2, %v9436_v32, %v9440_v12  ;;  %v11978_v46 = vsel %vm585_vm2, %v9440_v12, %v16385_v38  ;;  %v1542_v12 = vld [vmem:[%s11686_s15 + $0x38] sm:$0xff] }
 0x11f   : > { %16779 = vst [vmem:[#allocation26_spill] sm:$0xff] %v11930_v3  ;;  %v11932_v4 = vpop.permute.xlu0 %9448 }
 0x120   : > { %9723 = vrot.lane.b32.xlu1 %v11754_v20, %s16548_s10 }
 0x121   : > { %9718 = vrot.lane.b32.xlu0 %v11756_v21, %s16548_s10 }
 0x122   : > { %v9464_v13 = vpop.permute.xlu1 %9463 }
 0x123   : > { %v9465_v14 = vunpack.i.l.bf16 %v9464_v13  ;;  %v9459_v16 = vpop.permute.xlu0 %9458  ;;  %v9466_v23 = vunpack.i.h.bf16 %v9464_v13  ;;  %v12016_v13 = vld [vmem:[%s11686_s15 + $0x8] sm:$0xff] }
 0x124   : > { %v9461_v17 = vunpack.i.h.bf16 %v9459_v16  ;;  %v9460_v22 = vunpack.i.l.bf16 %v9459_v16  ;;  %1353 = vrot.lane.b32.xlu1 %v11939_v7, %s16548_s10 }
 0x125   : > { %9728 = vrot.lane.b32.xlu0 %v11943_v10, %s16548_s10  ;;  %v663_v39 = vsel %vm660_vm3, %v9465_v14, %v9466_v23 }
 0x126   : > { %v11951_v15 = vpop.permute.xlu1 %9473  ;;  %v662_v27 = vsel %vm660_vm3, %v9461_v17, %v9465_v14  ;;  %v661_v31 = vsel %vm660_vm3, %v9460_v22, %v9461_v17  ;;  %v8519_v52 = vpack.c.bf16 %v663_v39, %v588_v51 }
 0x127   : > { %v11956_v33 = vpop.permute.xlu0 %9468  ;;  %v8469_v34 = vpack.c.bf16 %v662_v27, %v587_v25  ;;  %v8471_v35 = vpack.c.bf16 %v661_v31, %v586_v30  ;;  %v1543_v27 = vld [vmem:[%s11686_s15 + $0x40] sm:$0xff] }
 0x128   : > { %v16386_v36 = vunpack.i.h.bf16 %v11956_v33  ;;  %v9470_v37 = vunpack.i.l.bf16 %v11956_v33  ;;  %9738 = vrot.lane.b32.xlu1 %v11745_v18, %s16381_s21 }
 0x129   : > { %9733 = vrot.lane.b32.xlu0 %v11748_v19, %s16381_s21  ;;  %8470 = vmatprep.subr.bf16.mxu0 %v8469_v34 }
 0x12a   : > { %v11969_v40 = vsel %vm660_vm3, %v9470_v37, %v16386_v36  ;;  %8472 = vmatpush1.bf16.msra.mxu0 %v8471_v35  ;;  %v11971_v42 = vpop.permute.xlu1 %9483  ;;  %v664_v44 = vsel %vm660_vm3, %v9466_v23, %v9470_v37  ;;  %v9782_v23 = vpack.i.bf16 %v11707_v8, %v12016_v13  ;;  %v12036_v35 = vld [vmem:[%s11686_s15 + $0x28] sm:$0xff] }
 0x12b   : > { %16780 = vst [vmem:[#allocation27_spill] sm:$0xff] %v11971_v42  ;;  %v11980_v47 = vpop.permute.xlu0 %9478  ;;  %v8517_v49 = vpack.c.bf16 %v664_v44, %v589_v43 }
 0x12c   : > { %9748 = vrot.lane.b32.xlu1 %v11754_v20, %s16381_s21 }
 0x12d   : > { %9743 = vrot.lane.b32.xlu0 %v11756_v21, %s16381_s21  ;;  %8518 = vmatprep.subr.bf16.mxu1 %v8517_v49 }
 0x12e   : > { %8520 = vmatpush1.bf16.msra.mxu1 %v8519_v52  ;;  %v11989_v56 = vpop.permute.xlu1 %9493  ;;  %v12048_v52 = vpack.i.bf16 %v1543_v27, %v1542_v12 }
 0x12f   : > { %v9489_v58 = vpop.permute.xlu0 %9488  ;;  %v9495_v5 = vunpack.i.l.bf16 %v11989_v56  ;;  %v9496_v8 = vunpack.i.h.bf16 %v11989_v56 }
 0x130   : > { %1428 = vrot.lane.b32.xlu1 %v11939_v7, %s16381_s21  ;;  %v9491_v6 = vunpack.i.h.bf16 %v9489_v58 }
 0x131   : > { %9753 = vrot.lane.b32.xlu0 %v11943_v10, %s16381_s21  ;;  %s16546_s21 = smov 108  }
 0x132   : > { %v11995_v59 = vpop.permute.xlu1 %9503  ;;  %v737_v25 = vsel %vm735_vm4, %v9491_v6, %v9495_v5 }
 0x133   : > { %v11997_v61 = vpop.permute.xlu0 %9498 }
 0x134   : > { %9763 = vrot.lane.b32.xlu1 %v11745_v18, %s16379_s17  ;;  %v9490_v18 = vunpack.i.l.bf16 %v9489_v58  ;;  %v9500_v30 = vunpack.i.l.bf16 %v11997_v61  ;;  %v16383_v44 = vunpack.i.h.bf16 %v11997_v61 }
 0x135   : > { %9758 = vrot.lane.b32.xlu0 %v11748_v19, %s16379_s17 }
 0x136   : > { %v12003_v63 = vpop.permute.xlu1 %733  ;;  %v736_v34 = vsel %vm735_vm4, %v9490_v18, %v9491_v6  ;;  %v12059_v6 = vsel %vm735_vm4, %v9500_v30, %v16383_v44 }
 0x137   : > { %16781 = vst [vmem:[#allocation28_spill] sm:$0xff] %v12003_v63  ;;  %v12005_v0 = vpop.permute.xlu0 %9508  ;;  %16782 = vst [vmem:[#allocation29_spill] sm:$0xff] %v12059_v6 }
 0x138   : > { %9773 = vrot.lane.b32.xlu1 %v11754_v20, %s16379_s17 }
 0x139   : > { %9768 = vrot.lane.b32.xlu0 %v11756_v21, %s16379_s17  ;;  %v9787_v21 = vpack.i.bf16 %v12013_v11, %v11710_v9 }
 0x13a   : > { %v9519_v19 = vpop.permute.xlu1 %9518 }
 0x13b   : > { %v9520_v14 = vunpack.i.l.bf16 %v9519_v19  ;;  %v9514_v16 = vpop.permute.xlu0 %9513  ;;  %v9521_v22 = vunpack.i.h.bf16 %v9519_v19 }
 0x13c   : > { %v9516_v20 = vunpack.i.h.bf16 %v9514_v16  ;;  %v9515_v17 = vunpack.i.l.bf16 %v9514_v16  ;;  %1503 = vrot.lane.b32.xlu1 %v11939_v7, %s16379_s17  ;;  %v739_v16 = vsel %vm735_vm4, %v9496_v8, %v9500_v30 }
 0x13d   : > { %9778 = vrot.lane.b32.xlu0 %v11943_v10, %s16379_s17  ;;  %v12039_v10 = vld [vmem:[%s11686_s15 + $0x30] sm:$0xff]  ;;  %s16556_s17 = smov 109   ;;  %v813_v58 = vsel %vm810_vm5, %v9520_v14, %v9521_v22 }
 0x13e   : > { %v12030_v31 = vpop.permute.xlu1 %9528  ;;  %v812_v32 = vsel %vm810_vm5, %v9516_v20, %v9520_v14  ;;  %v811_v9 = vsel %vm810_vm5, %v9515_v17, %v9516_v20  ;;  %v12053_v56 = vpack.i.bf16 %v12039_v10, %v12036_v35  ;;  %v1544_v14 = vld [vmem:[%s11686_s15 + $0x48] sm:$0xff]  ;;  %v1545_v17 = vld [vmem:[%s11686_s15 + $0x50] sm:$0xff] }
 0x13f   : > { %v12042_v37 = vpop.permute.xlu0 %9523  ;;  %v8473_v39 = vpack.c.bf16 %v812_v32, %v737_v25  ;;  %v8475_v43 = vpack.c.bf16 %v811_v9, %v736_v34  ;;  %v738_v25 = vsel %vm735_vm4, %v9495_v5, %v9496_v8  ;;  %v12081_v30 = vpack.i.bf16 %v1545_v17, %v1544_v14  ;;  %v12087_v34 = vld [vmem:[%s11686_s15 + $0x10] sm:$0xff] }
 0x140   : > { %v16384_v49 = vunpack.i.h.bf16 %v12042_v37  ;;  %v9525_v51 = vunpack.i.l.bf16 %v12042_v37  ;;  %9788 = vrot.lane.b32.xlu1 %v9787_v21, %s16556_s17  ;;  %v8523_v27 = vpack.c.bf16 %v813_v58, %v738_v25  ;;  %v12099_v8 = vpack.i.bf16 %v12087_v34, %v12016_v13 }
 0x141   : > { %9783 = vrot.lane.b32.xlu0 %v9782_v23, %s16556_s17  ;;  %8474 = vmatprep.subr.bf16.mxu0 %v8473_v39 }
 0x142   : > { %v12064_v18 = vsel %vm810_vm5, %v9525_v51, %v16384_v49  ;;  %8476 = vmatpush1.bf16.msra.mxu0 %v8475_v43  ;;  %v12066_v19 = vpop.permute.xlu1 %808  ;;  %v814_v20 = vsel %vm810_vm5, %v9521_v22, %v9525_v51  ;;  %v12084_v22 = vld [vmem:[%s11686_s15 + $0x18] sm:$0xff] }
 0x143   : > { %16783 = vst [vmem:[#allocation30_spill] sm:$0xff] %v12066_v19  ;;  %v12072_v21 = vpop.permute.xlu0 %9533  ;;  %v8521_v23 = vpack.c.bf16 %v814_v20, %v739_v16  ;;  %v12093_v9 = vpack.i.bf16 %v12013_v11, %v12084_v22 }
 0x144   : > { %9798 = vrot.lane.b32.xlu1 %v12048_v52, %s16556_s17 }
 0x145   : > { %9793 = vrot.lane.b32.xlu0 %v12053_v56, %s16556_s17  ;;  %8522 = vmatprep.subr.bf16.mxu1 %v8521_v23 }
 0x146   : > { %8524 = vmatpush1.bf16.msra.mxu1 %v8523_v27  ;;  %v9544_v32 = vpop.permute.xlu1 %9543 }
 0x147   : > { %v9539_v5 = vpop.permute.xlu0 %9538  ;;  %v9545_v16 = vunpack.i.l.bf16 %v9544_v32 }
 0x148   : > { %1578 = vrot.lane.b32.xlu1 %v11939_v7, %s16556_s17  ;;  %v9541_v20 = vunpack.i.h.bf16 %v9539_v5  ;;  %v9540_v14 = vunpack.i.l.bf16 %v9539_v5 }
 0x149   : > { %9803 = vrot.lane.b32.xlu0 %v12081_v30, %s16556_s17 }
 0x14a   : > { %v12101_v39 = vpop.permute.xlu1 %9553  ;;  %v887_v44 = vsel %vm885_vm6, %v9541_v20, %v9545_v16  ;;  %v886_v38 = vsel %vm885_vm6, %v9540_v14, %v9541_v20 }
 0x14b   : > { %v12103_v43 = vpop.permute.xlu0 %9548 }
 0x14c   : > { %9813 = vrot.lane.b32.xlu1 %v12093_v9, %s16546_s21  ;;  %v9550_v49 = vunpack.i.l.bf16 %v12103_v43  ;;  %v16394_v19 = vunpack.i.h.bf16 %v12103_v43 }
 0x14d   : > { %9808 = vrot.lane.b32.xlu0 %v12099_v8, %s16546_s21 }
 0x14e   : > { %v12109_v51 = vpop.permute.xlu1 %9563  ;;  %v12150_v20 = vsel %vm885_vm6, %v9550_v49, %v16394_v19 }
 0x14f   : > { %16784 = vst [vmem:[#allocation31_spill] sm:$0xff] %v12109_v51  ;;  %v12111_v58 = vpop.permute.xlu0 %9558  ;;  %16788 = vst [vmem:[#allocation35_spill] sm:$0xff] %v12150_v20 }
 0x150   : > { %16785 = vst [vmem:[#allocation32_spill] sm:$0xff] %v12111_v58  ;;  %9823 = vrot.lane.b32.xlu1 %v12048_v52, %s16546_s21 }
 0x151   : > { %9818 = vrot.lane.b32.xlu0 %v12053_v56, %s16546_s21 }
 0x152   : > { %v9574_v17 = vpop.permute.xlu1 %9573 }
 0x153   : > { %v9575_v23 = vunpack.i.l.bf16 %v9574_v17  ;;  %v9569_v25 = vpop.permute.xlu0 %9568  ;;  %v9576_v55 = vunpack.i.h.bf16 %v9574_v17 }
 0x154   : > { %v9571_v27 = vunpack.i.h.bf16 %v9569_v25  ;;  %v9570_v12 = vunpack.i.l.bf16 %v9569_v25  ;;  %1653 = vrot.lane.b32.xlu1 %v11939_v7, %s16546_s21  ;;  %v9546_v25 = vunpack.i.h.bf16 %v9544_v32 }
 0x155   : > { %9828 = vrot.lane.b32.xlu0 %v12081_v30, %s16546_s21 }
 0x156   : > { %v12123_v62 = vpop.permute.xlu1 %9583  ;;  %v962_v5 = vsel %vm16490_vm7, %v9571_v27, %v9575_v23  ;;  %v961_v36 = vsel %vm16490_vm7, %v9570_v12, %v9571_v27  ;;  %v963_v12 = vsel %vm16490_vm7, %v9575_v23, %v9576_v55  ;;  %v888_v23 = vsel %vm885_vm6, %v9545_v16, %v9546_v25 }
 0x157   : > { %v12128_v48 = vpop.permute.xlu0 %9578  ;;  %v8477_v50 = vpack.c.bf16 %v962_v5, %v887_v44  ;;  %v8479_v17 = vpack.c.bf16 %v961_v36, %v886_v38  ;;  %v889_v44 = vsel %vm885_vm6, %v9546_v25, %v9550_v49  ;;  %v8527_v27 = vpack.c.bf16 %v963_v12, %v888_v23 }
 0x158   : > { %v16395_v63 = vunpack.i.h.bf16 %v12128_v48  ;;  %v9580_v51 = vunpack.i.l.bf16 %v12128_v48  ;;  %9838 = vrot.lane.b32.xlu1 %v12093_v9, %s16538_s13 }
 0x159   : > { %9833 = vrot.lane.b32.xlu0 %v12099_v8, %s16538_s13  ;;  %8478 = vmatprep.subr.bf16.mxu0 %v8477_v50 }
 0x15a   : > { %v12141_v36 = vsel %vm16490_vm7, %v9580_v51, %v16395_v63  ;;  %8480 = vmatpush1.bf16.msra.mxu0 %v8479_v17  ;;  %v12143_v38 = vpop.permute.xlu1 %9593  ;;  %v964_v32 = vsel %vm16490_vm7, %v9576_v55, %v9580_v51 }
 0x15b   : > { %16786 = vst [vmem:[#allocation33_spill] sm:$0xff] %v12141_v36  ;;  %16787 = vst [vmem:[#allocation34_spill] sm:$0xff] %v12143_v38  ;;  %v12152_v50 = vpop.permute.xlu0 %9588  ;;  %v8525_v14 = vpack.c.bf16 %v964_v32, %v889_v44 }
 0x15c   : > { %9848 = vrot.lane.b32.xlu1 %v12048_v52, %s16538_s13 }
 0x15d   : > { %9843 = vrot.lane.b32.xlu0 %v12053_v56, %s16538_s13  ;;  %8526 = vmatprep.subr.bf16.mxu1 %v8525_v14 }
 0x15e   : > { %8528 = vmatpush1.bf16.msra.mxu1 %v8527_v27  ;;  %v9604_v55 = vpop.permute.xlu1 %9603 }
 0x15f   : > { %v9599_v49 = vpop.permute.xlu0 %9598  ;;  %v9605_v12 = vunpack.i.l.bf16 %v9604_v55 }
 0x160   : > { %1728 = vrot.lane.b32.xlu1 %v11939_v7, %s16538_s13  ;;  %v9601_v44 = vunpack.i.h.bf16 %v9599_v49  ;;  %v9600_v32 = vunpack.i.l.bf16 %v9599_v49 }
 0x161   : > { %9853 = vrot.lane.b32.xlu0 %v12081_v30, %s16538_s13 }
 0x162   : > { %v12165_v51 = vpop.permute.xlu1 %9613  ;;  %v1036_v42 = vsel %vm16491_vm8, %v9600_v32, %v9601_v44 }
 0x163   : > { %v12167_v16 = vpop.permute.xlu0 %9608 }
 0x164   : > { %16789 = vst [vmem:[#allocation36_spill] sm:$0xff] %v12167_v16  ;;  %9863 = vrot.lane.b32.xlu1 %v12093_v9, %s16406_s11  ;;  %v9610_v38 = vunpack.i.l.bf16 %v12167_v16  ;;  %v16410_v20 = vunpack.i.h.bf16 %v12167_v16 }
 0x165   : > { %9858 = vrot.lane.b32.xlu0 %v12099_v8, %s16406_s11 }
 0x166   : > { %v12173_v25 = vpop.permute.xlu1 %9623 }
 0x167   : > { %16790 = vst [vmem:[#allocation37_spill] sm:$0xff] %v12173_v25  ;;  %v12175_v17 = vpop.permute.xlu0 %9618  ;;  %v1037_v25 = vsel %vm16491_vm8, %v9601_v44, %v9605_v12 }
 0x168   : > { %16791 = vst [vmem:[#allocation38_spill] sm:$0xff] %v12175_v17  ;;  %9873 = vrot.lane.b32.xlu1 %v12048_v52, %s16406_s11 }
 0x169   : > { %9868 = vrot.lane.b32.xlu0 %v12053_v56, %s16406_s11 }
 0x16a   : > { %v9634_v14 = vpop.permute.xlu1 %9633 }
 0x16b   : > { %v9635_v23 = vunpack.i.l.bf16 %v9634_v14  ;;  %v9629_v27 = vpop.permute.xlu0 %9628  ;;  %v9636_v63 = vunpack.i.h.bf16 %v9634_v14 }
 0x16c   : > { %v9631_v5 = vunpack.i.h.bf16 %v9629_v27  ;;  %v9630_v19 = vunpack.i.l.bf16 %v9629_v27  ;;  %1803 = vrot.lane.b32.xlu1 %v11939_v7, %s16406_s11  ;;  %v9606_v27 = vunpack.i.h.bf16 %v9604_v55 }
 0x16d   : > { %9878 = vrot.lane.b32.xlu0 %v12081_v30, %s16406_s11  ;;  %s16419_s11 = smov 90  }
 0x16e   : > { %v12187_v3 = vpop.permute.xlu1 %9643  ;;  %v1112_v49 = vsel %vm16517_vm9, %v9631_v5, %v9635_v23  ;;  %v1111_v54 = vsel %vm16517_vm9, %v9630_v19, %v9631_v5  ;;  %v1113_v19 = vsel %vm16517_vm9, %v9635_v23, %v9636_v63  ;;  %v1039_v55 = vsel %vm16491_vm8, %v9606_v27, %v9610_v38 }
 0x16f   : > { %v12192_v28 = vpop.permute.xlu0 %9638  ;;  %v8481_v17 = vpack.c.bf16 %v1112_v49, %v1037_v25  ;;  %v8483_v14 = vpack.c.bf16 %v1111_v54, %v1036_v42  ;;  %v12205_v54 = vsel %vm16491_vm8, %v9610_v38, %v16410_v20  ;;  %v1038_v32 = vsel %vm16491_vm8, %v9605_v12, %v9606_v27 }
 0x170   : > { %16792 = vst [vmem:[#allocation39_spill] sm:$0xff] %v12192_v28  ;;  %v16411_v36 = vunpack.i.h.bf16 %v12192_v28  ;;  %v9640_v58 = vunpack.i.l.bf16 %v12192_v28  ;;  %9888 = vrot.lane.b32.xlu1 %v12093_v9, %s16419_s11  ;;  %16793 = vst [vmem:[#allocation40_spill] sm:$0xff] %v12205_v54  ;;  %v8531_v49 = vpack.c.bf16 %v1113_v19, %v1038_v32 }
 0x171   : > { %9883 = vrot.lane.b32.xlu0 %v12099_v8, %s16419_s11  ;;  %8482 = vmatprep.subr.bf16.mxu0 %v8481_v17 }
 0x172   : > { %v12210_v42 = vsel %vm16517_vm9, %v9640_v58, %v16411_v36  ;;  %8484 = vmatpush1.bf16.msra.mxu0 %v8483_v14  ;;  %v12212_v5 = vpop.permute.xlu1 %1108  ;;  %v1114_v25 = vsel %vm16517_vm9, %v9636_v63, %v9640_v58 }
 0x173   : > { %16794 = vst [vmem:[#allocation41_spill] sm:$0xff] %v12210_v42  ;;  %16795 = vst [vmem:[#allocation42_spill] sm:$0xff] %v12212_v5  ;;  %v12216_v17 = vpop.permute.xlu0 %9648  ;;  %v8529_v44 = vpack.c.bf16 %v1114_v25, %v1039_v55 }
 0x174   : > { %16796 = vst [vmem:[#allocation43_spill] sm:$0xff] %v12216_v17  ;;  %9898 = vrot.lane.b32.xlu1 %v12048_v52, %s16419_s11 }
 0x175   : > { %9893 = vrot.lane.b32.xlu0 %v12053_v56, %s16419_s11  ;;  %8530 = vmatprep.subr.bf16.mxu1 %v8529_v44 }
 0x176   : > { %8532 = vmatpush1.bf16.msra.mxu1 %v8531_v49  ;;  %v9659_v38 = vpop.permute.xlu1 %9658 }
 0x177   : > { %v9654_v14 = vpop.permute.xlu0 %9653  ;;  %v9660_v19 = vunpack.i.l.bf16 %v9659_v38 }
 0x178   : > { %1878 = vrot.lane.b32.xlu1 %v11939_v7, %s16419_s11  ;;  %v9656_v55 = vunpack.i.h.bf16 %v9654_v14  ;;  %v9655_v25 = vunpack.i.l.bf16 %v9654_v14 }
 0x179   : > { %9903 = vrot.lane.b32.xlu0 %v12081_v30, %s16419_s11  ;;  %s16422_s11 = smov 88  }
 0x17a   : > { %v12229_v63 = vpop.permute.xlu1 %9668  ;;  %v1186_v54 = vsel %vm16516_vm10, %v9655_v25, %v9656_v55 }
 0x17b   : > { %16797 = vst [vmem:[#allocation44_spill] sm:$0xff] %v12229_v63  ;;  %v12231_v58 = vpop.permute.xlu0 %9663 }
 0x17c   : > { %9913 = vrot.lane.b32.xlu1 %v12093_v9, %s16424_s2  ;;  %v9665_v5 = vunpack.i.l.bf16 %v12231_v58  ;;  %v16427_v6 = vunpack.i.h.bf16 %v12231_v58 }
 0x17d   : > { %9908 = vrot.lane.b32.xlu0 %v12099_v8, %s16424_s2 }
 0x17e   : > { %v12237_v12 = vpop.permute.xlu1 %1183 }
 0x17f   : > { %16798 = vst [vmem:[#allocation45_spill] sm:$0xff] %v12237_v12  ;;  %v12239_v27 = vpop.permute.xlu0 %9673  ;;  %v1187_v12 = vsel %vm16516_vm10, %v9656_v55, %v9660_v19 }
 0x180   : > { %16799 = vst [vmem:[#allocation46_spill] sm:$0xff] %v12239_v27  ;;  %9923 = vrot.lane.b32.xlu1 %v12048_v52, %s16424_s2 }
 0x181   : > { %9918 = vrot.lane.b32.xlu0 %v12053_v56, %s16424_s2 }
 0x182   : > { %v9684_v44 = vpop.permute.xlu1 %9683 }
 0x183   : > { %v9685_v32 = vunpack.i.l.bf16 %v9684_v44  ;;  %v9679_v49 = vpop.permute.xlu0 %9678  ;;  %v9686_v36 = vunpack.i.h.bf16 %v9684_v44 }
 0x184   : > { %v9681_v23 = vunpack.i.h.bf16 %v9679_v49  ;;  %v9680_v20 = vunpack.i.l.bf16 %v9679_v49  ;;  %1953 = vrot.lane.b32.xlu1 %v11939_v7, %s16424_s2  ;;  %v9661_v49 = vunpack.i.h.bf16 %v9659_v38  ;;  %v12278_v38 = vsel %vm16516_vm10, %v9665_v5, %v16427_v6 }
 0x185   : > { %9928 = vrot.lane.b32.xlu0 %v12081_v30, %s16424_s2  ;;  %16802 = vst [vmem:[#allocation49_spill] sm:$0xff] %v12278_v38  ;;  %s16459_s2 = smov 86  }
 0x186   : > { %v12251_v27 = vpop.permute.xlu1 %9693  ;;  %v1262_v14 = vsel %vm16492_vm11, %v9681_v23, %v9685_v32  ;;  %v1261_v42 = vsel %vm16492_vm11, %v9680_v20, %v9681_v23  ;;  %v1263_v20 = vsel %vm16492_vm11, %v9685_v32, %v9686_v36  ;;  %v1189_v23 = vsel %vm16516_vm10, %v9661_v49, %v9665_v5 }
 0x187   : > { %v12256_v17 = vpop.permute.xlu0 %9688  ;;  %v8485_v16 = vpack.c.bf16 %v1262_v14, %v1187_v12  ;;  %v8487_v44 = vpack.c.bf16 %v1261_v42, %v1186_v54  ;;  %v1188_v12 = vsel %vm16516_vm10, %v9660_v19, %v9661_v49  ;;  %v9962_v19 = vpack.i.bf16 %v12013_v11, %v12016_v13 }
 0x188   : > { %v16428_v63 = vunpack.i.h.bf16 %v12256_v17  ;;  %v9690_v28 = vunpack.i.l.bf16 %v12256_v17  ;;  %9938 = vrot.lane.b32.xlu1 %v12093_v9, %s16422_s11  ;;  %v8535_v55 = vpack.c.bf16 %v1263_v20, %v1188_v12  ;;  %v12297_v20 = vld [vmem:[#allocation10 + $0x8] sm:$0xff] }
 0x189   : > { %9933 = vrot.lane.b32.xlu0 %v12099_v8, %s16422_s11  ;;  %8486 = vmatprep.subr.bf16.mxu0 %v8485_v16 }
 0x18a   : > { %v12269_v54 = vsel %vm16492_vm11, %v9690_v28, %v16428_v63  ;;  %8488 = vmatpush1.bf16.msra.mxu0 %v8487_v44  ;;  %v12271_v42 = vpop.permute.xlu1 %9703  ;;  %v1264_v9 = vsel %vm16492_vm11, %v9686_v36, %v9690_v28  ;;  %v9957_v44 = vpack.i.bf16 %v12084_v22, %v12087_v34  ;;  %8437 = vmatprep.mubr.msk.f32.mxu0 %vm2477_vm13, %v12297_v20 }
 0x18b   : > { %16800 = vst [vmem:[#allocation47_spill] sm:$0xff] %v12269_v54  ;;  %16801 = vst [vmem:[#allocation48_spill] sm:$0xff] %v12271_v42  ;;  %v12280_v8 = vpop.permute.xlu0 %9698  ;;  %v8533_v16 = vpack.c.bf16 %v1264_v9, %v1189_v23  ;;  %8439 = vmatprep.mubr.msk.f32.mxu1 %vm2477_vm13, %v12297_v20  ;;  %v12368_v54 = vld [vmem:[%s11686_s15 + $0x38] sm:$0xff] }
 0x18c   : > { %9948 = vrot.lane.b32.xlu1 %v12048_v52, %s16422_s11  ;;  %16809 = vst [vmem:[#allocation56_spill] sm:$0xff] %v12368_v54 }
 0x18d   : > { %9943 = vrot.lane.b32.xlu0 %v12053_v56, %s16422_s11  ;;  %8534 = vmatprep.subr.bf16.mxu1 %v8533_v16 }
 0x18e   : > { %8536 = vmatpush1.bf16.msra.mxu1 %v8535_v55  ;;  %v9714_v28 = vpop.permute.xlu1 %9713 }
 0x18f   : > { %v9715_v36 = vunpack.i.l.bf16 %v9714_v28  ;;  %v9709_v5 = vpop.permute.xlu0 %9708  ;;  %v9716_v49 = vunpack.i.h.bf16 %v9714_v28 }
 0x190   : > { %v9711_v32 = vunpack.i.h.bf16 %v9709_v5  ;;  %v9710_v14 = vunpack.i.l.bf16 %v9709_v5  ;;  %2028 = vrot.lane.b32.xlu1 %v11939_v7, %s16422_s11 }
 0x191   : > { %9953 = vrot.lane.b32.xlu0 %v12081_v30, %s16422_s11  ;;  %s16461_s11 = smov 87   ;;  %v1358_v5 = vsel %vm16482_vm12, %v9715_v36, %v9716_v49 }
 0x192   : > { %v12299_v23 = vpop.permute.xlu1 %9723  ;;  %v1357_v9 = vsel %vm16482_vm12, %v9711_v32, %v9715_v36  ;;  %v1356_v16 = vsel %vm16482_vm12, %v9710_v14, %v9711_v32 }
 0x193   : > { %v12307_v7 = vpop.permute.xlu0 %9718  ;;  %v8489_v12 = vpack.c.bf16 %v1357_v9, %v12087_v34  ;;  %v8491_v55 = vpack.c.bf16 %v1356_v16, %v12016_v13 }
 0x194   : > { %v16426_v28 = vunpack.i.l.bf16 %v12307_v7  ;;  %9963 = vrot.lane.b32.xlu1 %v9962_v19, %s16461_s11  ;;  %v8539_v19 = vpack.c.bf16 %v1358_v5, %v12084_v22 }
 0x195   : > { %9958 = vrot.lane.b32.xlu0 %v9957_v44, %s16461_s11  ;;  %8490 = vmatprep.subr.bf16.mxu0 %v8489_v12 }
 0x196   : > { %v12315_v32 = vpop.permute.xlu1 %1353  ;;  %8492 = vmatpush1.bf16.msra.mxu0 %v8491_v55  ;;  %v1359_v14 = vsel %vm16482_vm12, %v9716_v49, %v16426_v28  ;;  %vm16559_vm12 = vcmask 703488  }
 0x197   : > { %16803 = vst [vmem:[#allocation50_spill] sm:$0xff] %v12315_v32  ;;  %v12320_v9 = vpop.permute.xlu0 %9728  ;;  %v8537_v16 = vpack.c.bf16 %v1359_v14, %v12013_v11  ;;  %v2071_v14 = vld [vmem:[%s11686_s15 + $0x58] sm:$0xff]  ;;  %v12362_v32 = vld [vmem:[%s11686_s15 + $0x40] sm:$0xff] }
 0x198   : > { %2162 = vrot.lane.b32.xlu1 %v12084_v22, %s16459_s2  ;;  %16808 = vst [vmem:[#allocation55_spill] sm:$0xff] %v12362_v32 }
 0x199   : > { %2160 = vrot.lane.b32.xlu0 %v12087_v34, %s16459_s2  ;;  %8538 = vmatprep.subr.bf16.mxu1 %v8537_v16 }
 0x19a   : > { %8540 = vmatpush1.bf16.msra.mxu1 %v8539_v19  ;;  %v9739_v36 = vpop.permute.xlu1 %9738 }
 0x19b   : > { %v9734_v44 = vpop.permute.xlu0 %9733 }
 0x19c   : > { %9968 = vrot.lane.b32.xlu1 %v12053_v56, %s16461_s11  ;;  %v9740_v56 = vunpack.i.l.bf16 %v9739_v36  ;;  %v9736_v55 = vunpack.i.h.bf16 %v9734_v44 }
 0x19d   : > { %2158 = vrot.lane.b32.xlu0 %v12016_v13, %s16459_s2  ;;  %v9735_v13 = vunpack.i.l.bf16 %v9734_v44 }
 0x19e   : > { %v12332_v49 = vpop.permute.xlu1 %9748 }
 0x19f   : > { %v12334_v12 = vpop.permute.xlu0 %9743  ;;  %v1431_v6 = vsel %vm16435_vm14, %v9735_v13, %v9736_v55 }
 0x1a0   : > { %16804 = vst [vmem:[#allocation51_spill] sm:$0xff] %v12334_v12  ;;  %2166 = vrot.lane.b32.xlu1 %v12036_v35, %s16459_s2  ;;  %v16433_v42 = vunpack.i.h.bf16 %v12334_v12 }
 0x1a1   : > { %2164 = vrot.lane.b32.xlu0 %v12013_v11, %s16459_s2 }
 0x1a2   : > { %v12340_v22 = vpop.permute.xlu1 %1428 }
 0x1a3   : > { %16805 = vst [vmem:[#allocation52_spill] sm:$0xff] %v12340_v22  ;;  %v12342_v34 = vpop.permute.xlu0 %9753 }
 0x1a4   : > { %16806 = vst [vmem:[#allocation53_spill] sm:$0xff] %v12342_v34  ;;  %9978 = vrot.lane.b32.xlu1 %v12081_v30, %s16461_s11  ;;  %v1432_v30 = vsel %vm16435_vm14, %v9736_v55, %v9740_v56 }
 0x1a5   : > { %9973 = vrot.lane.b32.xlu0 %v12048_v52, %s16461_s11  ;;  %v9745_v52 = vunpack.i.l.bf16 %v12334_v12 }
 0x1a6   : > { %v9764_v5 = vpop.permute.xlu1 %9763 }
 0x1a7   : > { %v9765_v35 = vunpack.i.l.bf16 %v9764_v5  ;;  %v9759_v16 = vpop.permute.xlu0 %9758  ;;  %v9766_v25 = vunpack.i.h.bf16 %v9764_v5 }
 0x1a8   : > { %v9761_v11 = vunpack.i.h.bf16 %v9759_v16  ;;  %v9760_v19 = vunpack.i.l.bf16 %v9759_v16  ;;  %2168 = vrot.lane.b32.xlu1 %v12039_v10, %s16459_s2  ;;  %v9741_v16 = vunpack.i.h.bf16 %v9739_v36 }
 0x1a9   : > { %2103 = vrot.lane.b32.xlu0 %v2071_v14, %s16461_s11  ;;  %v1508_v36 = vsel %vm16436_vm15, %v9765_v35, %v9766_v25  ;;  %s17048_s11 = smov 2  }
 0x1aa   : > { %v12354_v44 = vpop.permute.xlu1 %9773  ;;  %v1507_v28 = vsel %vm16436_vm15, %v9761_v11, %v9765_v35  ;;  %v1506_v63 = vsel %vm16436_vm15, %v9760_v19, %v9761_v11  ;;  %v1434_v55 = vsel %vm16435_vm14, %v9741_v16, %v9745_v52  ;;  %v1433_v19 = vsel %vm16435_vm14, %v9740_v56, %v9741_v16 }
 0x1ab   : > { %v12359_v22 = vpop.permute.xlu0 %9768  ;;  %v8493_v10 = vpack.c.bf16 %v1507_v28, %v1432_v30  ;;  %v8495_v5 = vpack.c.bf16 %v1506_v63, %v1431_v6  ;;  %v12378_v6 = vsel %vm16435_vm14, %v9745_v52, %v16433_v42  ;;  %v2145_v30 = vld [vmem:[%s11686_s15 + $0x50] sm:$0xff]  ;;  %v8543_v42 = vpack.c.bf16 %v1508_v36, %v1433_v19 }
 0x1ac   : > { %16807 = vst [vmem:[#allocation54_spill] sm:$0xff] %v12359_v22  ;;  %v16437_v34 = vunpack.i.h.bf16 %v12359_v22  ;;  %v9770_v38 = vunpack.i.l.bf16 %v12359_v22  ;;  %2172 = vrot.lane.b32.xlu1 %v12362_v32, %s16459_s2  ;;  %16810 = vst [vmem:[#allocation57_spill] sm:$0xff] %v12378_v6  ;;  %vm16447_vm14 = vcmask 891904   ;;  %v12562_v22 = vld [vmem:[#allocation10] sm:$0xff] }
 0x1ad   : > { %8494 = vmatprep.subr.bf16.mxu0 %v8493_v10  ;;  %2170 = vrot.lane.b32.xlu0 %v12368_v54, %s16459_s2  ;;  %v2144_v54 = vld [vmem:[%s11686_s15 + $0x48] sm:$0xff] }
 0x1ae   : > { %v12383_v63 = vsel %vm16436_vm15, %v9770_v38, %v16437_v34  ;;  %8496 = vmatpush1.bf16.msra.mxu0 %v8495_v5  ;;  %v12385_v28 = vpop.permute.xlu1 %1503  ;;  %v1509_v13 = vsel %vm16436_vm15, %v9766_v25, %v9770_v38  ;;  %vm16448_vm15 = vcmask 883712  }
 0x1af   : > { %16811 = vst [vmem:[#allocation58_spill] sm:$0xff] %v12383_v63  ;;  %16812 = vst [vmem:[#allocation59_spill] sm:$0xff] %v12385_v28  ;;  %v12389_v35 = vpop.permute.xlu0 %9778  ;;  %v8541_v11 = vpack.c.bf16 %v1509_v13, %v1434_v55 }
 0x1b0   : > { %16813 = vst [vmem:[#allocation60_spill] sm:$0xff] %v12389_v35  ;;  %2176 = vrot.lane.b32.xlu1 %v2145_v30, %s16459_s2 }
 0x1b1   : > { %8542 = vmatprep.subr.bf16.mxu1 %v8541_v11  ;;  %2174 = vrot.lane.b32.xlu0 %v2144_v54, %s16459_s2 }
 0x1b2   : > { %8544 = vmatpush1.bf16.msra.mxu1 %v8543_v42  ;;  %v9789_v52 = vpop.permute.xlu1 %9788 }
 0x1b3   : > { %v9784_v5 = vpop.permute.xlu0 %9783  ;;  %v9790_v36 = vunpack.i.l.bf16 %v9789_v52  ;;  %v9791_v63 = vunpack.i.h.bf16 %v9789_v52 }
 0x1b4   : > { %v9786_v55 = vunpack.i.h.bf16 %v9784_v5  ;;  %v9785_v13 = vunpack.i.l.bf16 %v9784_v5 }
 0x1b5   : > { %2178 = vrot.lane.b32.xlu0 %v2071_v14, %s16459_s2  ;;  %s17050_s2 = smov 42  }
 0x1b6   : > { %v12399_v38 = vpop.permute.xlu1 %9798  ;;  %v1582_v14 = vsel %vm16447_vm14, %v9786_v55, %v9790_v36  ;;  %v1581_v6 = vsel %vm16447_vm14, %v9785_v13, %v9786_v55 }
 0x1b7   : > { %16814 = vst [vmem:[#allocation61_spill] sm:$0xff] %v12399_v38  ;;  %v12401_v25 = vpop.permute.xlu0 %9793 }
 0x1b8   : > { %16815 = vst [vmem:[#allocation62_spill] sm:$0xff] %v12401_v25  ;;  %v9795_v34 = vunpack.i.l.bf16 %v12401_v25 }
 0x1ba   : > { %v12403_v56 = vpop.permute.xlu1 %1578 }
 0x1bb   : > { %16816 = vst [vmem:[#allocation63_spill] sm:$0xff] %v12403_v56  ;;  %v12405_v16 = vpop.permute.xlu0 %9803 }
 0x1bc   : > { %16817 = vst [vmem:[#allocation64_spill] sm:$0xff] %v12405_v16 }
 0x1be   : > { %v9814_v11 = vpop.permute.xlu1 %9813 }
 0x1bf   : > { %v9815_v19 = vunpack.i.l.bf16 %v9814_v11  ;;  %v9809_v54 = vpop.permute.xlu0 %9808  ;;  %v9816_v10 = vunpack.i.h.bf16 %v9814_v11 }
 0x1c0   : > { %v9811_v42 = vunpack.i.h.bf16 %v9809_v54  ;;  %v9810_v30 = vunpack.i.l.bf16 %v9809_v54  ;;  %v16445_v54 = vunpack.i.h.bf16 %v12401_v25 }
 0x1c1   : > { %v1658_v38 = vsel %vm16448_vm15, %v9815_v19, %v9816_v10 }
 0x1c2   : > { %v12409_v28 = vpop.permute.xlu1 %9823  ;;  %v1657_v56 = vsel %vm16448_vm15, %v9811_v42, %v9815_v19  ;;  %v1656_v5 = vsel %vm16448_vm15, %v9810_v30, %v9811_v42  ;;  %v12423_v55 = vsel %vm16447_vm14, %v9795_v34, %v16445_v54  ;;  %v1583_v42 = vsel %vm16447_vm14, %v9790_v36, %v9791_v63 }
 0x1c3   : > { %16818 = vst [vmem:[#allocation65_spill] sm:$0xff] %v12409_v28  ;;  %v12414_v16 = vpop.permute.xlu0 %9818  ;;  %v8497_v32 = vpack.c.bf16 %v1657_v56, %v1582_v14  ;;  %v8499_v35 = vpack.c.bf16 %v1656_v5, %v1581_v6  ;;  %16820 = vst [vmem:[#allocation67_spill] sm:$0xff] %v12423_v55  ;;  %v1584_v56 = vsel %vm16447_vm14, %v9791_v63, %v9795_v34  ;;  %vm16463_vm14 = vcmask 875520  }
 0x1c4   : > { %16819 = vst [vmem:[#allocation66_spill] sm:$0xff] %v12414_v16  ;;  %v16446_v11 = vunpack.i.h.bf16 %v12414_v16  ;;  %v9820_v12 = vunpack.i.l.bf16 %v12414_v16  ;;  %v8547_v14 = vpack.c.bf16 %v1658_v38, %v1583_v42 }
 0x1c5   : > { %8498 = vmatprep.subr.bf16.mxu0 %v8497_v32 }
 0x1c6   : > { %v12428_v52 = vsel %vm16448_vm15, %v9820_v12, %v16446_v11  ;;  %8500 = vmatpush1.bf16.msra.mxu0 %v8499_v35  ;;  %v12430_v6 = vpop.permute.xlu1 %1653  ;;  %v1659_v13 = vsel %vm16448_vm15, %v9816_v10, %v9820_v12  ;;  %vm16464_vm15 = vcmask 867328  }
 0x1c7   : > { %16821 = vst [vmem:[#allocation68_spill] sm:$0xff] %v12428_v52  ;;  %16822 = vst [vmem:[#allocation69_spill] sm:$0xff] %v12430_v6  ;;  %v12434_v32 = vpop.permute.xlu0 %9828  ;;  %v8545_v19 = vpack.c.bf16 %v1659_v13, %v1584_v56 }
 0x1c8   : > { %16823 = vst [vmem:[#allocation70_spill] sm:$0xff] %v12434_v32 }
 0x1c9   : > { %8546 = vmatprep.subr.bf16.mxu1 %v8545_v19 }
 0x1ca   : > { %8548 = vmatpush1.bf16.msra.mxu1 %v8547_v14  ;;  %v9839_v5 = vpop.permute.xlu1 %9838 }
 0x1cb   : > { %v9834_v54 = vpop.permute.xlu0 %9833  ;;  %v9840_v10 = vunpack.i.l.bf16 %v9839_v5  ;;  %v9841_v52 = vunpack.i.h.bf16 %v9839_v5 }
 0x1cc   : > { %v9836_v56 = vunpack.i.h.bf16 %v9834_v54  ;;  %v9835_v13 = vunpack.i.l.bf16 %v9834_v54 }
 0x1ce   : > { %v12439_v35 = vpop.permute.xlu1 %9848  ;;  %v1732_v14 = vsel %vm16463_vm14, %v9836_v56, %v9840_v10 }
 0x1cf   : > { %16824 = vst [vmem:[#allocation71_spill] sm:$0xff] %v12439_v35  ;;  %v12441_v11 = vpop.permute.xlu0 %9843 }
 0x1d0   : > { %16825 = vst [vmem:[#allocation72_spill] sm:$0xff] %v12441_v11  ;;  %v9845_v6 = vunpack.i.l.bf16 %v12441_v11 }
 0x1d2   : > { %v12443_v34 = vpop.permute.xlu1 %1728 }
 0x1d3   : > { %16826 = vst [vmem:[#allocation73_spill] sm:$0xff] %v12443_v34  ;;  %v12445_v12 = vpop.permute.xlu0 %9853 }
 0x1d4   : > { %16827 = vst [vmem:[#allocation74_spill] sm:$0xff] %v12445_v12  ;;  %v1731_v12 = vsel %vm16463_vm14, %v9835_v13, %v9836_v56 }
 0x1d6   : > { %v9864_v63 = vpop.permute.xlu1 %9863 }
 0x1d7   : > { %v9865_v36 = vunpack.i.l.bf16 %v9864_v63  ;;  %v9859_v30 = vpop.permute.xlu0 %9858  ;;  %v9866_v42 = vunpack.i.h.bf16 %v9864_v63 }
 0x1d8   : > { %v9861_v38 = vunpack.i.h.bf16 %v9859_v30  ;;  %v9860_v19 = vunpack.i.l.bf16 %v9859_v30  ;;  %v16457_v30 = vunpack.i.h.bf16 %v12441_v11 }
 0x1da   : > { %v12449_v55 = vpop.permute.xlu1 %9873  ;;  %v1807_v34 = vsel %vm16464_vm15, %v9861_v38, %v9865_v36  ;;  %v1806_v54 = vsel %vm16464_vm15, %v9860_v19, %v9861_v38  ;;  %v12463_v56 = vsel %vm16463_vm14, %v9845_v6, %v16457_v30  ;;  %v1733_v38 = vsel %vm16463_vm14, %v9840_v10, %v9841_v52 }
 0x1db   : > { %16828 = vst [vmem:[#allocation75_spill] sm:$0xff] %v12449_v55  ;;  %v12454_v25 = vpop.permute.xlu0 %9868  ;;  %v8501_v35 = vpack.c.bf16 %v1807_v34, %v1732_v14  ;;  %v8503_v32 = vpack.c.bf16 %v1806_v54, %v1731_v12  ;;  %v1808_v55 = vsel %vm16464_vm15, %v9865_v36, %v9866_v42  ;;  %16830 = vst [vmem:[#allocation77_spill] sm:$0xff] %v12463_v56 }
 0x1dc   : > { %16829 = vst [vmem:[#allocation76_spill] sm:$0xff] %v12454_v25  ;;  %v16458_v63 = vunpack.i.h.bf16 %v12454_v25  ;;  %v9870_v16 = vunpack.i.l.bf16 %v12454_v25  ;;  %v1734_v12 = vsel %vm16463_vm14, %v9841_v52, %v9845_v6  ;;  %v8551_v14 = vpack.c.bf16 %v1808_v55, %v1733_v38 }
 0x1dd   : > { %8502 = vmatprep.subr.bf16.mxu0 %v8501_v35  ;;  %v11459_v6 = vmov 0   ;;  %vm16474_vm14 = vcmask 736256  }
 0x1de   : > { %v12468_v5 = vsel %vm16464_vm15, %v9870_v16, %v16458_v63  ;;  %8504 = vmatpush1.bf16.msra.mxu0 %v8503_v32  ;;  %v12470_v34 = vpop.permute.xlu1 %1803  ;;  %v1809_v13 = vsel %vm16464_vm15, %v9866_v42, %v9870_v16  ;;  %9982 = vset.pattern.permute.xlu1 %v11459_v6  ;;  %v2465_v16 = vld [vmem:[%s16836_s3] sm:$0xff]  ;;  %vm16475_vm15 = vcmask 728064  }
 0x1df   : > { %16831 = vst [vmem:[#allocation78_spill] sm:$0xff] %v12468_v5  ;;  %16832 = vst [vmem:[#allocation79_spill] sm:$0xff] %v12470_v34  ;;  %v12474_v35 = vpop.permute.xlu0 %9878  ;;  %v8549_v36 = vpack.c.bf16 %v1809_v13, %v1734_v12  ;;  %9983 = vset.pattern.permute.xlu0 %v11459_v6  ;;  %2469 = vperm.xlu1 %9982, %v2465_v16  }
 0x1e0   : > { %16833 = vst [vmem:[#allocation80_spill] sm:$0xff] %v12474_v35 }
 0x1e1   : > { %8550 = vmatprep.subr.bf16.mxu1 %v8549_v36 }
 0x1e2   : > { %8552 = vmatpush1.bf16.msra.mxu1 %v8551_v14  ;;  %v9889_v54 = vpop.permute.xlu1 %9888 }
 0x1e3   : > { %v9884_v30 = vpop.permute.xlu0 %9883  ;;  %v9890_v55 = vunpack.i.l.bf16 %v9889_v54  ;;  %v9891_v5 = vunpack.i.h.bf16 %v9889_v54 }
 0x1e4   : > { %v9886_v42 = vunpack.i.h.bf16 %v9884_v30  ;;  %v9885_v12 = vunpack.i.l.bf16 %v9884_v30 }
 0x1e6   : > { %v12479_v32 = vpop.permute.xlu1 %9898  ;;  %v1882_v56 = vsel %vm16474_vm14, %v9886_v42, %v9890_v55 }
 0x1e7   : > { %16834 = vst [vmem:[#allocation81_spill] sm:$0xff] %v12479_v32  ;;  %v12481_v63 = vpop.permute.xlu0 %9893 }
 0x1e8   : > { %16835 = vst [vmem:[#allocation82_spill] sm:$0xff] %v12481_v63  ;;  %v9895_v6 = vunpack.i.l.bf16 %v12481_v63 }
 0x1ea   : > { %v12486_v52 = vpop.permute.xlu1 %1878  ;;  %v1884_v54 = vsel %vm16474_vm14, %v9891_v5, %v9895_v6 }
 0x1eb   : > { %16837 = vst [vmem:[#allocation83_spill] sm:$0xff] %v12486_v52  ;;  %v12488_v10 = vpop.permute.xlu0 %9903 }
 0x1ec   : > { %16838 = vst [vmem:[#allocation84_spill] sm:$0xff] %v12488_v10  ;;  %v1881_v10 = vsel %vm16474_vm14, %v9885_v12, %v9886_v42  ;;  %v1883_v12 = vsel %vm16474_vm14, %v9890_v55, %v9891_v5 }
 0x1ee   : > { %v9914_v13 = vpop.permute.xlu1 %9913 }
 0x1ef   : > { %v9915_v36 = vunpack.i.l.bf16 %v9914_v13  ;;  %v9909_v38 = vpop.permute.xlu0 %9908  ;;  %v9916_v34 = vunpack.i.h.bf16 %v9914_v13 }
 0x1f0   : > { %v9911_v14 = vunpack.i.h.bf16 %v9909_v38  ;;  %v9910_v19 = vunpack.i.l.bf16 %v9909_v38  ;;  %v16473_v38 = vunpack.i.h.bf16 %v12481_v63 }
 0x1f2   : > { %v12492_v16 = vpop.permute.xlu1 %9923  ;;  %v1957_v52 = vsel %vm16475_vm15, %v9911_v14, %v9915_v36  ;;  %v1956_v30 = vsel %vm16475_vm15, %v9910_v19, %v9911_v14  ;;  %v12506_v42 = vsel %vm16474_vm14, %v9895_v6, %v16473_v38  ;;  %vm2030_vm14 = vcmask 719872  }
 0x1f3   : > { %16839 = vst [vmem:[#allocation85_spill] sm:$0xff] %v12492_v16  ;;  %v12497_v35 = vpop.permute.xlu0 %9918  ;;  %v8505_v11 = vpack.c.bf16 %v1957_v52, %v1882_v56  ;;  %v8507_v32 = vpack.c.bf16 %v1956_v30, %v1881_v10  ;;  %v1958_v16 = vsel %vm16475_vm15, %v9915_v36, %v9916_v34  ;;  %16841 = vst [vmem:[#allocation87_spill] sm:$0xff] %v12506_v42 }
 0x1f4   : > { %16840 = vst [vmem:[#allocation86_spill] sm:$0xff] %v12497_v35  ;;  %v16476_v13 = vunpack.i.h.bf16 %v12497_v35  ;;  %v9920_v25 = vunpack.i.l.bf16 %v12497_v35  ;;  %v8555_v14 = vpack.c.bf16 %v1958_v16, %v1883_v12 }
 0x1f5   : > { %8506 = vmatprep.subr.bf16.mxu0 %v8505_v11 }
 0x1f6   : > { %v12511_v19 = vsel %vm16475_vm15, %v9920_v25, %v16476_v13  ;;  %8508 = vmatpush1.bf16.msra.mxu0 %v8507_v32  ;;  %v12513_v56 = vpop.permute.xlu1 %1953  ;;  %v1959_v52 = vsel %vm16475_vm15, %v9916_v34, %v9920_v25  ;;  %v2466_v32 = vld [vmem:[%s16836_s3 + $0x8] sm:$0xff]  ;;  %vm16560_vm15 = vcmask 711680   ;;  %s17078_s3 = smov 106  }
 0x1f7   : > { %16842 = vst [vmem:[#allocation88_spill] sm:$0xff] %v12511_v19  ;;  %16843 = vst [vmem:[#allocation89_spill] sm:$0xff] %v12513_v56  ;;  %v12517_v11 = vpop.permute.xlu0 %9928  ;;  %v8553_v10 = vpack.c.bf16 %v1959_v52, %v1884_v54  ;;  %2474 = vperm.xlu0 %9983, %v2466_v32   ;;  %v9386_v32 = vunpack.i.h.bf16 %v11860_v26 }
 0x1f8   : > { %16844 = vst [vmem:[#allocation90_spill] sm:$0xff] %v12517_v11 }
 0x1f9   : > { %8554 = vmatprep.subr.bf16.mxu1 %v8553_v10 }
 0x1fa   : > { %8556 = vmatpush1.bf16.msra.mxu1 %v8555_v14  ;;  %v9939_v30 = vpop.permute.xlu1 %9938 }
 0x1fb   : > { %v9934_v38 = vpop.permute.xlu0 %9933  ;;  %v9940_v55 = vunpack.i.l.bf16 %v9939_v30  ;;  %v9941_v28 = vunpack.i.h.bf16 %v9939_v30 }
 0x1fc   : > { %v9936_v54 = vunpack.i.h.bf16 %v9934_v38  ;;  %v9935_v16 = vunpack.i.l.bf16 %v9934_v38  ;;  %v9385_v38 = vunpack.i.l.bf16 %v11860_v26 }
 0x1fe   : > { %v12525_v6 = vpop.permute.xlu1 %9948  ;;  %v2032_v56 = vsel %vm2030_vm14, %v9936_v54, %v9940_v55 }
 0x1ff   : > { %16845 = vst [vmem:[#allocation91_spill] sm:$0xff] %v12525_v6  ;;  %v12527_v25 = vpop.permute.xlu0 %9943 }
 0x200   : > { %v16488_v35 = vunpack.i.l.bf16 %v12527_v25 }
 0x202   : > { %v12529_v34 = vpop.permute.xlu1 %2028 }
 0x203   : > { %16846 = vst [vmem:[#allocation92_spill] sm:$0xff] %v12529_v34  ;;  %v12531_v5 = vpop.permute.xlu0 %9953 }
 0x204   : > { %16847 = vst [vmem:[#allocation93_spill] sm:$0xff] %v12531_v5  ;;  %v2031_v5 = vsel %vm2030_vm14, %v9935_v16, %v9936_v54 }
 0x206   : > { %v9964_v52 = vpop.permute.xlu1 %9963 }
 0x207   : > { %v9965_v10 = vunpack.i.l.bf16 %v9964_v52  ;;  %v9959_v12 = vpop.permute.xlu0 %9958  ;;  %v9966_v63 = vunpack.i.h.bf16 %v9964_v52  ;;  %v9530_v52 = vunpack.i.l.bf16 %v12030_v31 }
 0x208   : > { %v9961_v14 = vunpack.i.h.bf16 %v9959_v12  ;;  %v9960_v36 = vunpack.i.l.bf16 %v9959_v12  ;;  %v16487_v12 = vunpack.i.l.bf16 %v11951_v15 }
 0x20a   : > { %v12534_v13 = vpop.permute.xlu1 %2162  ;;  %v2107_v34 = vsel %vm16560_vm15, %v9960_v36, %v9961_v14  ;;  %v2106_v42 = vsel %vm16560_vm15, %v9965_v10, %v9960_v36 }
 0x20b   : > { %v2161_v19 = vpop.permute.xlu0 %2160  ;;  %v8509_v6 = vpack.c.bf16 %v2107_v34, %v2032_v56  ;;  %v8511_v11 = vpack.c.bf16 %v2106_v42, %v2031_v5  ;;  %v16848_v42 = vunpack.i.l.bf16 %v11879_v41  ;;  %v16849_v56 = vunpack.i.h.bf16 %v11884_v45 }
 0x20c   : > { %v2182_v36 = vsel %vm16559_vm12, %v2161_v19, %v12534_v13  ;;  %v9416_v5 = vunpack.i.h.bf16 %v11879_v41  ;;  %v16851_v45 = vunpack.i.h.bf16 %v11956_v33  ;;  %v16852_v33 = vunpack.i.l.bf16 %v11922_v1 }
 0x20d   : > { %8510 = vmatprep.subr.bf16.mxu0 %v8509_v6  ;;  %v516_v34 = vsel %vm510_vm0, %v16849_v56, %v16848_v42  ;;  %v2108_v56 = vsel %vm16560_vm15, %v9961_v14, %v9966_v63 }
 0x20e   : > { %8512 = vmatpush1.bf16.msra.mxu0 %v8511_v11  ;;  %v12545_v54 = vpop.permute.xlu1 %9968  ;;  %v16850_v11 = vunpack.i.h.bf16 %v11854_v24  ;;  %v666_v42 = vsel %vm660_vm3, %v16851_v45, %v16487_v12  ;;  %v2034_v24 = vsel %vm2030_vm14, %v9941_v28, %v16488_v35  ;;  %v16853_v45 = vunpack.i.h.bf16 %v11924_v2 }
 0x20f   : > { %v16489_v6 = vunpack.i.l.bf16 %v12545_v54  ;;  %v2159_v16 = vpop.permute.xlu0 %2158  ;;  %2532 = vmatprep.subr.mxu0 %v2182_v36  ;;  %v16509_v36 = vunpack.i.l.bf16 %v11904_v57  ;;  %v16854_v2 = vpack.c.bf16 %v11898_v53, %v11910_v60  ;;  %v16856_v60 = vunpack.i.l.bf16 %v11879_v41 }
 0x210   : > { %v441_v30 = vsel %vm435_vm1, %v16850_v11, %v9385_v38  ;;  %v2181_v10 = vsel %vm16559_vm12, %v2159_v16, %v2161_v19  ;;  %v9505_v16 = vunpack.i.l.bf16 %v11995_v59  ;;  %v591_v14 = vsel %vm585_vm2, %v16853_v45, %v16852_v33 }
 0x211   : > { %v8561_v26 = vpack.c.bf16 %v516_v34, %v441_v30  ;;  %v2109_v19 = vsel %vm16560_vm15, %v9966_v63, %v16489_v6  ;;  %v2033_v34 = vsel %vm2030_vm14, %v9940_v55, %v9941_v28  ;;  %v16507_v30 = vunpack.i.l.bf16 %v11980_v47 }
 0x212   : > { %2533 = vmatpush1.msra.mxu0 %v2181_v10  ;;  %v8557_v11 = vpack.c.bf16 %v2109_v19, %v2034_v24  ;;  %v12585_v12 = vpop.permute.xlu1 %2166  ;;  %v8565_v63 = vpack.c.bf16 %v666_v42, %v591_v14  ;;  %v8559_v6 = vpack.c.bf16 %v2108_v56, %v2033_v34  ;;  %v12588_v10 = vld [vmem:[#allocation10 + $0x18] sm:$0xff]  ;;  %v9585_v24 = vunpack.i.l.bf16 %v12123_v62  ;;  %v12601_v42 = vld [vmem:[#allocation10 + $0x10] sm:$0xff] }
 0x213   : > { %v2165_v35 = vpop.permute.xlu0 %2164  ;;  %2549 = vmatmul.mubr.f32.vlgmr.msra.gmra.mrb[0].mxu0 %v12562_v22  ;;  %8562 = vmatprep.subr.bf16.mxu0 %v8561_v26  ;;  %v16855_v55 = vunpack.i.h.bf16 %v12042_v37  ;;  %v442_v56 = vsel %vm435_vm1, %v9385_v38, %v9386_v32  ;;  %v16506_v19 = vunpack.i.l.bf16 %v11932_v4  ;;  %v9476_v33 = vunpack.i.h.bf16 %v11951_v15 }
 0x214   : > { %8564 = vmatpush1.bf16.msra.mxu0 %v16854_v2  ;;  %8558 = vmatprep.subr.bf16.mxu1 %v8557_v11  ;;  %v2184_v28 = vsel %vm16559_vm12, %v2165_v35, %v12585_v12  ;;  %v518_v53 = vsel %vm510_vm0, %v9416_v5, %v16509_v36  ;;  %v517_v37 = vsel %vm510_vm0, %v16856_v60, %v9416_v5  ;;  %v9555_v11 = vunpack.i.l.bf16 %v12101_v39 }
 0x215   : > { %v816_v26 = vsel %vm810_vm5, %v16855_v55, %v9530_v52  ;;  %8566 = vmatprep.subr.bf16.mxu0 %v8565_v63  ;;  %8560 = vmatpush1.bf16.msra.mxu1 %v8559_v6  ;;  %v16857_v38 = vunpack.i.h.bf16 %v11997_v61  ;;  %v16858_v14 = vunpack.i.l.bf16 %v11868_v29  ;;  %v9446_v41 = vunpack.i.h.bf16 %v11922_v1 }
 0x216   : > { %2609 = vmatprep.subr.mxu1 %v2184_v28  ;;  %8438 = vmatprep.mubr.msk.f32.mxu0 %vm2477_vm13, %v12588_v10  ;;  %v16505_v5 = vunpack.i.l.bf16 %v12072_v21  ;;  %v668_v63 = vsel %vm660_vm3, %v9476_v33, %v16507_v30  ;;  %v9645_v61 = vunpack.i.l.bf16 %v12187_v3  ;;  %v16859_v2 = vpack.c.bf16 %v11969_v40, %v11978_v46 }
 0x217   : > { %v741_v45 = vsel %vm735_vm4, %v16857_v38, %v9505_v16  ;;  %v443_v6 = vsel %vm435_vm1, %v9386_v32, %v16858_v14  ;;  %2555 = vmatmul.mubr.f32.gmra.mrb[2].mxu0 %v12601_v42  ;;  %v2183_v32 = vsel %vm16559_vm12, %v12534_v13, %v2165_v35  ;;  %v16860_v55 = vunpack.i.h.bf16 %v12128_v48 }
 0x218   : > { %v8569_v34 = vpack.c.bf16 %v816_v26, %v741_v45  ;;  %8568 = vmatpush1.bf16.msra.mxu0 %v16859_v2  ;;  %v8609_v28 = vpack.c.bf16 %v518_v53, %v443_v6  ;;  %8441 = vmatprep.mubr.msk.f32.mxu0 %vm2477_vm13, %v12297_v20  ;;  %v16502_v60 = vunpack.i.l.bf16 %v12005_v0  ;;  %v9531_v38 = vunpack.i.h.bf16 %v12030_v31 }
 0x219   : > { %v966_v26 = vsel %vm16490_vm7, %v16860_v55, %v9585_v24  ;;  %2610 = vmatpush1.msra.mxu1 %v2183_v32  ;;  %v8611_v40 = vpack.c.bf16 %v517_v37, %v442_v56  ;;  %v593_v46 = vsel %vm585_vm2, %v9446_v41, %v16506_v19  ;;  %v16861_v35 = vunpack.i.l.bf16 %v11951_v15  ;;  %v16866_v32 = vld [vmem:[#allocation39_spill] sm:$0xff] }
 0x21a   : > { %8570 = vmatprep.subr.bf16.mxu0 %v8569_v34  ;;  %v9615_v13 = vunpack.i.l.bf16 %v12165_v51  ;;  %2626 = vmatmul.mubr.f32.vlgmr.msra.gmra.mrb[0].mxu1 %v12562_v22  ;;  %v16862_v53 = vunpack.i.h.bf16 %v12103_v43  ;;  %v8613_v56 = vpack.c.bf16 %v668_v63, %v593_v46  ;;  %v9506_v37 = vunpack.i.h.bf16 %v11995_v59  ;;  %v16864_v63 = vld [vmem:[#allocation29_spill] sm:$0xff] }
 0x21b   : > { %v667_v48 = vsel %vm660_vm3, %v16861_v35, %v9476_v33  ;;  %8610 = vmatprep.subr.bf16.mxu1 %v8609_v28  ;;  %v16501_v14 = vunpack.i.l.bf16 %v12152_v50  ;;  %v818_v33 = vsel %vm810_vm5, %v9531_v38, %v16505_v5  ;;  %8440 = vmatprep.mubr.msk.f32.mxu1 %vm2477_vm13, %v12588_v10  ;;  %v16863_v6 = vunpack.i.l.bf16 %v11922_v1  ;;  %v16869_v35 = vld [vmem:[#allocation44_spill] sm:$0xff] }
 0x21c   : > { %v891_v45 = vsel %vm885_vm6, %v16862_v53, %v9555_v11  ;;  %8612 = vmatpush1.bf16.msra.mxu1 %v8611_v40  ;;  %v9695_v34 = vunpack.i.l.bf16 %v12251_v27  ;;  %v16865_v2 = vpack.c.bf16 %v12064_v18, %v16864_v63  ;;  %v16867_v28 = vunpack.i.h.bf16 %v16866_v32  ;;  %v16873_v32 = vld [vmem:[#allocation33_spill] sm:$0xff] }
 0x21d   : > { %v8573_v15 = vpack.c.bf16 %v966_v26, %v891_v45  ;;  %v592_v43 = vsel %vm585_vm2, %v16863_v6, %v9446_v41  ;;  %8614 = vmatprep.subr.bf16.mxu1 %v8613_v56  ;;  %v16868_v26 = vld [vmem:[#allocation32_spill] sm:$0xff]  ;;  %v9586_v46 = vunpack.i.h.bf16 %v12123_v62  ;;  %v743_v41 = vsel %vm735_vm4, %v9506_v37, %v16502_v60 }
 0x21e   : > { %8572 = vmatpush1.bf16.msra.mxu0 %v16865_v2  ;;  %v1116_v55 = vsel %vm16517_vm9, %v16867_v28, %v9645_v61  ;;  %v16500_v40 = vunpack.i.l.bf16 %v16868_v26  ;;  %v8615_v1 = vpack.c.bf16 %v667_v48, %v592_v43  ;;  %v817_v18 = vsel %vm810_vm5, %v9530_v52, %v9531_v38  ;;  %v16870_v45 = vld [vmem:[#allocation36_spill] sm:$0xff]  ;;  %2632 = vmatmul.mubr.f32.gmra.mrb[2].mxu1 %v12601_v42  ;;  %v16874_v28 = vld [vmem:[#allocation35_spill] sm:$0xff] }
 0x21f   : > { %8574 = vmatprep.subr.bf16.mxu0 %v8573_v15  ;;  %v9670_v53 = vunpack.i.l.bf16 %v16869_v35  ;;  %v16871_v56 = vunpack.i.h.bf16 %v16870_v45  ;;  %v8617_v63 = vpack.c.bf16 %v818_v33, %v743_v41  ;;  %v9556_v48 = vunpack.i.h.bf16 %v12101_v39  ;;  %v16872_v15 = vld [vmem:[#allocation43_spill] sm:$0xff]  ;;  %8443 = vmatprep.mubr.msk.f32.mxu1 %vm2477_vm13, %v12297_v20  ;;  %v16877_v20 = vld [vmem:[#allocation38_spill] sm:$0xff] }
 0x220   : > { %v16498_v43 = vunpack.i.l.bf16 %v16872_v15  ;;  %8616 = vmatpush1.bf16.msra.mxu1 %v8615_v1  ;;  %v968_v31 = vsel %vm16490_vm7, %v9586_v46, %v16501_v14  ;;  %v742_v52 = vsel %vm735_vm4, %v9505_v16, %v9506_v37  ;;  %v9725_v38 = vunpack.i.l.bf16 %v12299_v23  ;;  %v16931_v14 = vld [vmem:[#allocation68_spill] sm:$0xff] }
 0x221   : > { %v1041_v6 = vsel %vm16491_vm8, %v16871_v56, %v9615_v13  ;;  %v9721_v33 = vunpack.i.h.bf16 %v12307_v7  ;;  %v16875_v41 = vpack.c.bf16 %v16873_v32, %v16874_v28  ;;  %8618 = vmatprep.subr.bf16.mxu1 %v8617_v63  ;;  %v16496_v45 = vunpack.i.l.bf16 %v16877_v20 }
 0x222   : > { %v8577_v2 = vpack.c.bf16 %v1116_v55, %v1041_v6  ;;  %v16876_v55 = vunpack.i.h.bf16 %v12256_v17  ;;  %v9646_v59 = vunpack.i.h.bf16 %v12187_v3  ;;  %v8619_v16 = vpack.c.bf16 %v817_v18, %v742_v52 }
 0x223   : > { %8576 = vmatpush1.bf16.msra.mxu0 %v16875_v41  ;;  %v893_v37 = vsel %vm885_vm6, %v9556_v48, %v16500_v40  ;;  %v967_v56 = vsel %vm16490_vm7, %v9585_v24, %v9586_v46  ;;  %v16878_v17 = vunpack.i.h.bf16 %v12231_v58  ;;  %v9616_v32 = vunpack.i.h.bf16 %v12165_v51  ;;  %v16879_v58 = vld [vmem:[#allocation41_spill] sm:$0xff]  ;;  %v16880_v46 = vld [vmem:[#allocation40_spill] sm:$0xff] }
 0x224   : > { %v1266_v1 = vsel %vm16492_vm11, %v16876_v55, %v9695_v34  ;;  %8578 = vmatprep.subr.bf16.mxu0 %v8577_v2  ;;  %v8621_v63 = vpack.c.bf16 %v968_v31, %v893_v37  ;;  %v16495_v2 = vunpack.i.l.bf16 %v12280_v8  ;;  %8620 = vmatpush1.bf16.msra.mxu1 %v8619_v16  ;;  %v1118_v52 = vsel %vm16517_vm9, %v9646_v59, %v16498_v43  ;;  %v1296_v31 = vld [vmem:[%s11686_s15 + $0x30] sm:$0xff] }
 0x225   : > { %v1191_v6 = vsel %vm16516_vm10, %v16878_v17, %v9670_v53  ;;  %v892_v62 = vsel %vm885_vm6, %v9555_v11, %v9556_v48  ;;  %v9775_v24 = vunpack.i.l.bf16 %v12354_v44  ;;  %v16881_v28 = vpack.c.bf16 %v16879_v58, %v16880_v46  ;;  %v16883_v55 = vld [vmem:[#allocation46_spill] sm:$0xff] }
 0x226   : > { %v8581_v18 = vpack.c.bf16 %v1266_v1, %v1191_v6  ;;  %8622 = vmatprep.subr.bf16.mxu1 %v8621_v63  ;;  %vm16882_vm7 = vcmask 1039360   ;;  %v16494_v1 = vunpack.i.l.bf16 %v16883_v55  ;;  %v9696_v16 = vunpack.i.h.bf16 %v12251_v27 }
 0x227   : > { %8580 = vmatpush1.bf16.msra.mxu0 %v16881_v28  ;;  %v1361_v41 = vsel %vm16882_vm7, %v9721_v33, %v9725_v38  ;;  %v8623_v39 = vpack.c.bf16 %v967_v56, %v892_v62  ;;  %v1043_v11 = vsel %vm16491_vm8, %v9616_v32, %v16496_v45  ;;  %v1117_v48 = vsel %vm16517_vm9, %v9645_v61, %v9646_v59  ;;  %v1295_v62 = vld [vmem:[%s11686_s15 + $0x28] sm:$0xff] }
 0x228   : > { %8582 = vmatprep.subr.bf16.mxu0 %v8581_v18  ;;  %v9671_v37 = vunpack.i.h.bf16 %v16869_v35  ;;  %v9750_v17 = vunpack.i.l.bf16 %v12332_v49  ;;  %v8625_v6 = vpack.c.bf16 %v1118_v52, %v1043_v11  ;;  %v16884_v63 = vunpack.i.l.bf16 %v12307_v7  ;;  %v16885_v59 = vld [vmem:[#allocation65_spill] sm:$0xff]  ;;  %v16886_v52 = vld [vmem:[#allocation47_spill] sm:$0xff] }
 0x229   : > { %v16493_v18 = vunpack.i.l.bf16 %v12320_v9  ;;  %8624 = vmatpush1.bf16.msra.mxu1 %v8623_v39  ;;  %v8585_v56 = vpack.c.bf16 %v1361_v41, %v1296_v31  ;;  %v1268_v3 = vsel %vm16492_vm11, %v9696_v16, %v16495_v2  ;;  %v1042_v61 = vsel %vm16491_vm8, %v9615_v13, %v9616_v32  ;;  %v16887_v28 = vld [vmem:[#allocation49_spill] sm:$0xff]  ;;  %v16914_v2 = vld [vmem:[#allocation58_spill] sm:$0xff] }
 0x22a   : > { %v1360_v58 = vsel %vm16882_vm7, %v16884_v63, %v9721_v33  ;;  %v9825_v46 = vunpack.i.l.bf16 %v16885_v59  ;;  %v16888_v7 = vpack.c.bf16 %v16886_v52, %v16887_v28  ;;  %8626 = vmatprep.subr.bf16.mxu1 %v8625_v6  ;;  %v16889_v33 = vld [vmem:[#allocation54_spill] sm:$0xff]  ;;  %vm16891_vm7 = vcmask 900096   ;;  %v16892_v32 = vld [vmem:[#allocation61_spill] sm:$0xff]  ;;  %v16893_v6 = vld [vmem:[#allocation51_spill] sm:$0xff] }
 0x22b   : > { %v16890_v11 = vunpack.i.h.bf16 %v16889_v33  ;;  %v1267_v41 = vsel %vm16492_vm11, %v9695_v34, %v9696_v16  ;;  %v9726_v39 = vunpack.i.h.bf16 %v12299_v23  ;;  %v8627_v51 = vpack.c.bf16 %v1117_v48, %v1042_v61  ;;  %v16899_v61 = vld [vmem:[#allocation66_spill] sm:$0xff] }
 0x22c   : > { %8584 = vmatpush1.bf16.msra.mxu0 %v16888_v7  ;;  %v1193_v13 = vsel %vm16516_vm10, %v9671_v37, %v16494_v1  ;;  %v9800_v63 = vunpack.i.l.bf16 %v16892_v32  ;;  %v8587_v52 = vpack.c.bf16 %v1360_v58, %v1295_v62  ;;  %v16894_v28 = vunpack.i.h.bf16 %v16893_v6  ;;  %v16898_v58 = vld [vmem:[#allocation75_spill] sm:$0xff] }
 0x22d   : > { %v1511_v31 = vsel %vm16891_vm7, %v16890_v11, %v9775_v24  ;;  %8586 = vmatprep.subr.bf16.mxu0 %v8585_v56  ;;  %vm16895_vm8 = vcmask 1031168   ;;  %v8629_v33 = vpack.c.bf16 %v1268_v3, %v1193_v13  ;;  %v9776_v27 = vunpack.i.h.bf16 %v12354_v44  ;;  %v16896_v11 = vld [vmem:[#allocation60_spill] sm:$0xff]  ;;  %8628 = vmatpush1.bf16.msra.mxu1 %v8627_v51  ;;  %v16903_v13 = vld [vmem:[#allocation53_spill] sm:$0xff] }
 0x22e   : > { %v1436_v7 = vsel %vm16895_vm8, %v16894_v28, %v9750_v17  ;;  %v16497_v34 = vunpack.i.l.bf16 %v16896_v11  ;;  %vm16897_vm7 = vcmask 1039360   ;;  %v1192_v56 = vsel %vm16516_vm10, %v9670_v53, %v9671_v37  ;;  %v16904_v28 = vld [vmem:[#allocation70_spill] sm:$0xff]  ;;  %v16905_v37 = vld [vmem:[#allocation71_spill] sm:$0xff] }
 0x22f   : > { %v8589_v16 = vpack.c.bf16 %v1511_v31, %v1436_v7  ;;  %v1363_v48 = vsel %vm16897_vm7, %v9726_v39, %v16493_v18  ;;  %v9875_v62 = vunpack.i.l.bf16 %v16898_v58  ;;  %8630 = vmatprep.subr.bf16.mxu1 %v8629_v33  ;;  %v16900_v3 = vunpack.i.h.bf16 %v16899_v61  ;;  %vm16902_vm11 = vmmov %vm16897_vm7  ;;  %v16913_v18 = vld [vmem:[#allocation85_spill] sm:$0xff] }
 0x230   : > { %8588 = vmatpush1.bf16.msra.mxu0 %v8587_v52  ;;  %vm16901_vm8 = vcmask 883712   ;;  %v1362_v31 = vsel %vm16902_vm11, %v9725_v38, %v9726_v39  ;;  %v9751_v51 = vunpack.i.h.bf16 %v12332_v49  ;;  %v16499_v6 = vunpack.i.l.bf16 %v16903_v13  ;;  %v16906_v52 = vld [vmem:[#allocation62_spill] sm:$0xff]  ;;  %v16912_v39 = vld [vmem:[#allocation64_spill] sm:$0xff] }
 0x231   : > { %v1661_v44 = vsel %vm16901_vm8, %v16900_v3, %v9825_v46  ;;  %8590 = vmatprep.subr.bf16.mxu0 %v8589_v16  ;;  %v8631_v35 = vpack.c.bf16 %v1267_v41, %v1192_v56  ;;  %v16504_v53 = vunpack.i.l.bf16 %v16904_v28  ;;  %v9850_v7 = vunpack.i.l.bf16 %v16905_v37  ;;  %v16909_v3 = vld [vmem:[#allocation55_spill] sm:$0xff] }
 0x232   : > { %v16907_v33 = vunpack.i.h.bf16 %v16906_v52  ;;  %vm16908_vm7 = vcmask 891904   ;;  %v8633_v23 = vpack.c.bf16 %v1363_v48, %v16909_v3  ;;  %vm16910_vm8 = vcmask 900096   ;;  %v16915_v52 = vld [vmem:[#allocation57_spill] sm:$0xff] }
 0x233   : > { %v1512_v38 = vsel %vm16910_vm8, %v9775_v24, %v9776_v27  ;;  %8632 = vmatpush1.bf16.msra.mxu1 %v8631_v35  ;;  %vm16911_vm11 = vmmov %vm16910_vm8  ;;  %v16503_v16 = vunpack.i.l.bf16 %v16912_v39  ;;  %v9826_v56 = vunpack.i.h.bf16 %v16885_v59  ;;  %v16515_v1 = vunpack.i.l.bf16 %v16913_v18  ;;  %v16917_v24 = vld [vmem:[#allocation76_spill] sm:$0xff] }
 0x234   : > { %v1586_v61 = vsel %vm16908_vm7, %v16907_v33, %v9800_v63  ;;  %v1513_v41 = vsel %vm16911_vm11, %v9776_v27, %v16497_v34  ;;  %v16916_v45 = vpack.c.bf16 %v16914_v2, %v16915_v52  ;;  %8634 = vmatprep.subr.bf16.mxu1 %v8633_v23  ;;  %v16918_v48 = vunpack.i.h.bf16 %v16917_v24  ;;  %v16921_v27 = vld [vmem:[#allocation81_spill] sm:$0xff]  ;;  %v16922_v59 = vld [vmem:[#allocation56_spill] sm:$0xff]  ;;  %v16945_v34 = vld [vmem:[#allocation78_spill] sm:$0xff] }
 0x235   : > { %v8593_v49 = vpack.c.bf16 %v1661_v44, %v1586_v61  ;;  %vm16919_vm7 = vcmask 867328   ;;  %vm16920_vm8 = vcmask 1031168   ;;  %v16508_v33 = vunpack.i.l.bf16 %v16921_v27  ;;  %v12821_v61 = vpop.permute.xlu0 %9973  ;;  %v16924_v23 = vld [vmem:[#allocation72_spill] sm:$0xff] }
 0x236   : > { %8592 = vmatpush1.bf16.msra.mxu0 %v16916_v45  ;;  %v1811_v44 = vsel %vm16919_vm7, %v16918_v48, %v9875_v62  ;;  %v1437_v35 = vsel %vm16920_vm8, %v9750_v17, %v9751_v51  ;;  %v8635_v3 = vpack.c.bf16 %v1362_v31, %v16922_v59  ;;  %vm16923_vm11 = vmmov %vm16920_vm8  ;;  %v9801_v2 = vunpack.i.h.bf16 %v16892_v32  ;;  %v16929_v31 = vld [vmem:[#allocation80_spill] sm:$0xff] }
 0x237   : > { %8594 = vmatprep.subr.bf16.mxu0 %v8593_v49  ;;  %v1438_v45 = vsel %vm16923_vm11, %v9751_v51, %v16499_v6  ;;  %v16925_v52 = vunpack.i.h.bf16 %v16924_v23  ;;  %vm16926_vm7 = vcmask 875520   ;;  %vm16927_vm8 = vcmask 883712   ;;  %v16928_v49 = vld [vmem:[#allocation24_spill] sm:$0xff]  ;;  %v16932_v23 = vld [vmem:[#allocation67_spill] sm:$0xff] }
 0x238   : > { %v8637_v17 = vpack.c.bf16 %v1513_v41, %v1438_v45  ;;  %v1663_v48 = vsel %vm16927_vm8, %v9826_v56, %v16504_v53  ;;  %v16510_v59 = vunpack.i.l.bf16 %v16929_v31  ;;  %8636 = vmatpush1.bf16.msra.mxu1 %v8635_v3  ;;  %v8639_v51 = vpack.c.bf16 %v1512_v38, %v1437_v35  ;;  %vm16930_vm11 = vmmov %vm16927_vm8  ;;  %v16934_v41 = vld [vmem:[#allocation86_spill] sm:$0xff] }
 0x239   : > { %v1736_v24 = vsel %vm16926_vm7, %v16925_v52, %v9850_v7  ;;  %v1662_v6 = vsel %vm16930_vm11, %v9825_v46, %v9826_v56  ;;  %v16514_v40 = vunpack.i.l.bf16 %v12821_v61  ;;  %v16933_v60 = vpack.c.bf16 %v16931_v14, %v16932_v23  ;;  %v16938_v38 = vld [vmem:[#allocation74_spill] sm:$0xff]  ;;  %v16943_v23 = vld [vmem:[#allocation91_spill] sm:$0xff]  ;;  %v12866_v19 = vpop.permute.xlu0 %2103 }
 0x23a   : > { %v8597_v43 = vpack.c.bf16 %v1811_v44, %v1736_v24  ;;  %8638 = vmatprep.subr.bf16.mxu1 %v8637_v17  ;;  %v16935_v45 = vunpack.i.h.bf16 %v16934_v41  ;;  %vm16936_vm7 = vcmask 728064   ;;  %vm16937_vm8 = vcmask 891904   ;;  %v16939_v14 = vld [vmem:[#allocation82_spill] sm:$0xff] }
 0x23b   : > { %8596 = vmatpush1.bf16.msra.mxu0 %v16933_v60  ;;  %v1588_v44 = vsel %vm16937_vm8, %v9801_v2, %v16503_v16  ;;  %v16511_v35 = vunpack.i.l.bf16 %v16938_v38  ;;  %v9876_v46 = vunpack.i.h.bf16 %v16898_v58  ;;  %v16940_v60 = vunpack.i.h.bf16 %v16939_v14  ;;  %v16942_v24 = vld [vmem:[#allocation90_spill] sm:$0xff] }
 0x23c   : > { %v1961_v52 = vsel %vm16936_vm7, %v16935_v45, %v16515_v1  ;;  %8598 = vmatprep.subr.bf16.mxu0 %v8597_v43  ;;  %vm16941_vm11 = vcmask 736256   ;;  %v8641_v3 = vpack.c.bf16 %v1663_v48, %v1588_v44  ;;  %v16513_v17 = vunpack.i.l.bf16 %v16942_v24  ;;  %v12864_v43 = vpop.permute.xlu1 %9978  ;;  %8640 = vmatpush1.bf16.msra.mxu1 %v8639_v51 }
 0x23d   : > { %v1886_v56 = vsel %vm16941_vm11, %v16940_v60, %v16508_v33  ;;  %v16512_v41 = vunpack.i.l.bf16 %v16943_v23  ;;  %v9946_v45 = vunpack.i.h.bf16 %v12527_v25  ;;  %v9971_v16 = vunpack.i.h.bf16 %v12545_v54  ;;  %v16946_v33 = vld [vmem:[#allocation77_spill] sm:$0xff] }
 0x23e   : > { %v9391_v53 = vunpack.i.h.bf16 %v11868_v29  ;;  %v9851_v5 = vunpack.i.h.bf16 %v16905_v37  ;;  %v8601_v14 = vpack.c.bf16 %v1961_v52, %v1886_v56  ;;  %vm16944_vm7 = vcmask 867328   ;;  %8642 = vmatprep.subr.bf16.mxu1 %v8641_v3  ;;  %v16949_v56 = vld [vmem:[#allocation84_spill] sm:$0xff] }
 0x23f   : > { %v1813_v48 = vsel %vm16944_vm7, %v9876_v46, %v16510_v59  ;;  %v9421_v44 = vunpack.i.h.bf16 %v11904_v57  ;;  %v1587_v60 = vsel %vm16937_vm8, %v9800_v63, %v9801_v2  ;;  %v9926_v30 = vunpack.i.h.bf16 %v16913_v18  ;;  %vm16948_vm11 = vmmov %vm16944_vm7 }
 0x240   : > { %v16947_v36 = vpack.c.bf16 %v16945_v34, %v16946_v33  ;;  %v2111_v51 = vsel %vm16560_vm15, %v9971_v16, %v16514_v40  ;;  %v1812_v52 = vsel %vm16948_vm11, %v9875_v62, %v9876_v46  ;;  %v9905_v59 = vunpack.i.l.bf16 %v16949_v56 }
 0x241   : > { %v8643_v32 = vpack.c.bf16 %v1662_v6, %v1587_v60  ;;  %vm16950_vm7 = vcmask 875520   ;;  %v9901_v34 = vunpack.i.h.bf16 %v16921_v27  ;;  %vm16951_vm8 = vcmask 728064   ;;  %v16953_v60 = vld [vmem:[#allocation25_spill] sm:$0xff]  ;;  %v2169_v6 = vpop.permute.xlu1 %2168 }
 0x242   : > { %8600 = vmatpush1.bf16.msra.mxu0 %v16947_v36  ;;  %v1738_v63 = vsel %vm16950_vm7, %v9851_v5, %v16511_v35  ;;  %v2036_v36 = vsel %vm2030_vm14, %v9946_v45, %v16512_v41  ;;  %v1963_v58 = vsel %vm16951_vm8, %v9926_v30, %v16513_v17  ;;  %v16952_v62 = vunpack.i.l.bf16 %v12545_v54  ;;  %v16954_v41 = vld [vmem:[#allocation27_spill] sm:$0xff]  ;;  %vm16955_vm11 = vmmov %vm16950_vm7  ;;  %v16956_v17 = vld [vmem:[#allocation88_spill] sm:$0xff] }
 0x243   : > { %8602 = vmatprep.subr.bf16.mxu0 %v8601_v14  ;;  %v8645_v33 = vpack.c.bf16 %v1813_v48, %v1738_v63  ;;  %v9976_v46 = vunpack.i.h.bf16 %v12821_v61  ;;  %8644 = vmatpush1.bf16.msra.mxu1 %v8643_v32  ;;  %v8605_v3 = vpack.c.bf16 %v2111_v51, %v2036_v36  ;;  %v12901_v14 = vpop.permute.xlu0 %2170  ;;  %v9425_v35 = vunpack.i.l.bf16 %v16953_v60  ;;  %v16960_v36 = vld [vmem:[#allocation93_spill] sm:$0xff] }
 0x244   : > { %v2110_v2 = vsel %vm16560_vm15, %v16952_v62, %v9971_v16  ;;  %v9485_v48 = vunpack.i.l.bf16 %v16954_v41  ;;  %v9481_v63 = vunpack.i.h.bf16 %v11980_v47  ;;  %v1737_v54 = vsel %vm16955_vm11, %v9850_v7, %v9851_v5  ;;  %v16957_v16 = vld [vmem:[#allocation87_spill] sm:$0xff] }
 0x245   : > { %v16958_v62 = vpack.c.bf16 %v16956_v17, %v16957_v16  ;;  %8646 = vmatprep.subr.bf16.mxu1 %v8645_v33  ;;  %v16959_v32 = vunpack.i.l.bf16 %v12527_v25  ;;  %v9955_v40 = vunpack.i.l.bf16 %v16960_v36  ;;  %v8647_v1 = vpack.c.bf16 %v1812_v52, %v1737_v54 }
 0x246   : > { %vm16961_vm7 = vcmask 736256   ;;  %v16962_v5 = vunpack.i.l.bf16 %v16913_v18  ;;  %v2186_v25 = vsel %vm16559_vm12, %v2169_v6, %v12901_v14  ;;  %v16964_v52 = vunpack.i.l.bf16 %v12864_v43 }
 0x247   : > { %8604 = vmatpush1.bf16.msra.mxu0 %v16958_v62  ;;  %v2035_v51 = vsel %vm2030_vm14, %v16959_v32, %v9946_v45  ;;  %v1888_v37 = vsel %vm16961_vm7, %v9901_v34, %v9905_v59  ;;  %v16963_v45 = vunpack.i.l.bf16 %v11904_v57  ;;  %8648 = vmatpush1.bf16.msra.mxu1 %v8647_v1  ;;  %v16965_v62 = vld [vmem:[#allocation26_spill] sm:$0xff]  ;;  %vm16967_vm11 = vmmov %vm16961_vm7  ;;  %v520_v57 = vsel %vm510_vm0, %v9421_v44, %v9425_v35 }
 0x248   : > { %8606 = vmatprep.subr.bf16.mxu0 %v8605_v3  ;;  %v1962_v7 = vsel %vm16951_vm8, %v16962_v5, %v9926_v30  ;;  %v8607_v17 = vpack.c.bf16 %v2110_v2, %v2035_v51  ;;  %v8649_v16 = vpack.c.bf16 %v1963_v58, %v1888_v37  ;;  %v9951_v3 = vunpack.i.h.bf16 %v16943_v23 }
 0x249   : > { %v519_v33 = vsel %vm510_vm0, %v16963_v45, %v9421_v44  ;;  %v2113_v54 = vsel %vm16560_vm15, %v9976_v46, %v16964_v52  ;;  %v9455_v18 = vunpack.i.l.bf16 %v16965_v62  ;;  %v9451_v30 = vunpack.i.h.bf16 %v11932_v4 }
 0x24a   : > { %v16966_v58 = vunpack.i.l.bf16 %v16921_v27  ;;  %8650 = vmatprep.subr.bf16.mxu1 %v8649_v16  ;;  %v16968_v32 = vunpack.i.l.bf16 %v11868_v29  ;;  %v2038_v37 = vsel %vm2030_vm14, %v9951_v3, %v9955_v40  ;;  %v16969_v5 = vunpack.i.l.bf16 %v16928_v49  ;;  %v2173_v16 = vpop.permute.xlu1 %2172 }
 0x24b   : > { %8608 = vmatpush1.bf16.msra.mxu0 %v8607_v17  ;;  %v16970_v17 = vunpack.i.l.bf16 %v12821_v61  ;;  %v8653_v44 = vpack.c.bf16 %v2113_v54, %v2038_v37  ;;  %v670_v29 = vsel %vm660_vm3, %v9481_v63, %v9485_v48  ;;  %v9511_v61 = vunpack.i.h.bf16 %v12005_v0 }
 0x24c   : > { %v1887_v2 = vsel %vm16967_vm11, %v16966_v58, %v9901_v34  ;;  %v444_v1 = vsel %vm435_vm1, %v16968_v32, %v9391_v53  ;;  %2686 = vmatprep.subr.mxu0 %v2186_v25  ;;  %v445_v27 = vsel %vm435_vm1, %v9391_v53, %v16969_v5  ;;  %v9536_v34 = vunpack.i.h.bf16 %v12072_v21  ;;  %v12951_v25 = vpop.permute.xlu0 %2174 }
 0x24d   : > { %v8651_v51 = vpack.c.bf16 %v1962_v7, %v1887_v2  ;;  %v2112_v35 = vsel %vm16560_vm15, %v16970_v17, %v9976_v46  ;;  %v2185_v7 = vsel %vm16559_vm12, %v12585_v12, %v2169_v6  ;;  %v8657_v45 = vpack.c.bf16 %v520_v57, %v445_v27  ;;  %v16974_v2 = vld [vmem:[#allocation34_spill] sm:$0xff] }
 0x24e   : > { %v8659_v52 = vpack.c.bf16 %v519_v33, %v444_v1  ;;  %v16971_v53 = vunpack.i.l.bf16 %v11980_v47  ;;  %v16972_v46 = vunpack.i.l.bf16 %v16943_v23  ;;  %v595_v48 = vsel %vm585_vm2, %v9451_v30, %v9455_v18  ;;  %v16975_v18 = vld [vmem:[#allocation30_spill] sm:$0xff]  ;;  %v16976_v1 = vld [vmem:[#allocation31_spill] sm:$0xff] }
 0x24f   : > { %8652 = vmatpush1.bf16.msra.mxu1 %v8651_v51  ;;  %2687 = vmatpush1.msra.mxu0 %v2185_v7  ;;  %v8661_v12 = vpack.c.bf16 %v670_v29, %v595_v48  ;;  %v2188_v47 = vsel %vm16559_vm12, %v2173_v16, %v12951_v25  ;;  %v9595_v23 = vunpack.i.l.bf16 %v16974_v2  ;;  %v820_v57 = vsel %vm810_vm5, %v9536_v34, %v16975_v18  ;;  %v11244_v7 = vld [vmem:[#allocation10 + $0x8] sm:$0xff] }
 0x250   : > { %v669_v58 = vsel %vm660_vm3, %v16971_v53, %v9481_v63  ;;  %v2037_v54 = vsel %vm2030_vm14, %v16972_v46, %v9951_v3  ;;  %8654 = vmatprep.subr.bf16.mxu1 %v8653_v44  ;;  %2703 = vmatmul.mubr.f32.vlgmr.msra.gmra.mrb[4].mxu0 %v12562_v22  ;;  %v16973_v63 = vunpack.i.l.bf16 %v11932_v4  ;;  %v9591_v3 = vunpack.i.h.bf16 %v12152_v50 }
 0x251   : > { %8658 = vmatprep.subr.bf16.mxu0 %v8657_v45  ;;  %v8655_v6 = vpack.c.bf16 %v2112_v35, %v2037_v54  ;;  %8442 = vmatprep.mubr.msk.f32.mxu0 %vm2477_vm13, %v12588_v10  ;;  %v9565_v51 = vunpack.i.l.bf16 %v16976_v1  ;;  %v9561_v4 = vunpack.i.h.bf16 %v16868_v26  ;;  %v2187_v5 = vsel %vm16559_vm12, %v12901_v14, %v2173_v16 }
 0x252   : > { %v594_v33 = vsel %vm585_vm2, %v16973_v63, %v9451_v30  ;;  %8660 = vmatpush1.bf16.msra.mxu0 %v8659_v52  ;;  %v16977_v30 = vld [vmem:[#allocation28_spill] sm:$0xff]  ;;  %v16978_v27 = vunpack.i.l.bf16 %v12072_v21  ;;  %v9651_v44 = vunpack.i.h.bf16 %v16872_v15  ;;  %vm16979_vm7 = vcmask 162816   ;;  %v16981_v21 = vld [vmem:[#allocation37_spill] sm:$0xff] }
 0x253   : > { %8662 = vmatprep.subr.bf16.mxu0 %v8661_v12  ;;  %8656 = vmatpush1.bf16.msra.mxu1 %v8655_v6  ;;  %v8663_v32 = vpack.c.bf16 %v669_v58, %v594_v33  ;;  %v745_v37 = vsel %vm735_vm4, %v9511_v61, %v16977_v30  ;;  %v970_v29 = vsel %vm16979_vm7, %v9591_v3, %v9595_v23  ;;  %v16980_v45 = vunpack.i.l.bf16 %v12005_v0  ;;  %vm16983_vm8 = vmmov %vm16979_vm7  ;;  %v16984_v0 = vld [vmem:[#allocation48_spill] sm:$0xff]  ;;  %v16985_v12 = vld [vmem:[#allocation42_spill] sm:$0xff] }
 0x254   : > { %2763 = vmatprep.subr.mxu1 %v2188_v47  ;;  %v819_v17 = vsel %vm810_vm5, %v16978_v27, %v9536_v34  ;;  %2709 = vmatmul.mubr.f32.gmra.mrb[6].mxu0 %v12601_v42  ;;  %v8665_v35 = vpack.c.bf16 %v820_v57, %v745_v37  ;;  %v9625_v14 = vunpack.i.l.bf16 %v16981_v21  ;;  %v9621_v34 = vunpack.i.h.bf16 %v16877_v20  ;;  %v16992_v37 = vld [vmem:[#allocation45_spill] sm:$0xff] }
 0x255   : > { %8445 = vmatprep.mubr.msk.f32.mxu0 %vm2477_vm13, %v11244_v7  ;;  %v744_v52 = vsel %vm735_vm4, %v16980_v45, %v9511_v61  ;;  %v895_v53 = vsel %vm885_vm6, %v9561_v4, %v9565_v51  ;;  %v16982_v58 = vunpack.i.l.bf16 %v12152_v50  ;;  %v9705_v61 = vunpack.i.l.bf16 %v16984_v0 }
 0x256   : > { %8664 = vmatpush1.bf16.msra.mxu0 %v8663_v32  ;;  %v8667_v16 = vpack.c.bf16 %v819_v17, %v744_v52  ;;  %v8669_v54 = vpack.c.bf16 %v970_v29, %v895_v53  ;;  %v9701_v48 = vunpack.i.h.bf16 %v12280_v8  ;;  %v1120_v6 = vsel %vm16517_vm9, %v9651_v44, %v16985_v12 }
 0x257   : > { %8666 = vmatprep.subr.bf16.mxu0 %v8665_v35  ;;  %2764 = vmatpush1.msra.mxu1 %v2187_v5  ;;  %v969_v46 = vsel %vm16983_vm8, %v16982_v58, %v9591_v3  ;;  %v16986_v47 = vunpack.i.l.bf16 %v16868_v26  ;;  %v9676_v50 = vunpack.i.h.bf16 %v16883_v55  ;;  %vm16987_vm11 = vcmask 154624   ;;  %v17000_v58 = vld [vmem:[#allocation59_spill] sm:$0xff] }
 0x258   : > { %2780 = vmatmul.mubr.f32.vlgmr.msra.gmra.mrb[4].mxu1 %v12562_v22  ;;  %v1045_v23 = vsel %vm16987_vm11, %v9621_v34, %v9625_v14  ;;  %v16988_v3 = vunpack.i.l.bf16 %v16872_v15  ;;  %v9731_v32 = vunpack.i.h.bf16 %v12320_v9  ;;  %vm16989_vm7 = vcmask 7168   ;;  %vm16991_vm8 = vmmov %vm16987_vm11 }
 0x259   : > { %8444 = vmatprep.mubr.msk.f32.mxu1 %vm2477_vm13, %v12588_v10  ;;  %v894_v63 = vsel %vm885_vm6, %v16986_v47, %v9561_v4  ;;  %v8673_v57 = vpack.c.bf16 %v1120_v6, %v1045_v23  ;;  %v1270_v26 = vsel %vm16989_vm7, %v9701_v48, %v9705_v61  ;;  %v16990_v51 = vunpack.i.l.bf16 %v16877_v20  ;;  %vm16994_vm11 = vmmov %vm16989_vm7 }
 0x25a   : > { %8668 = vmatpush1.bf16.msra.mxu0 %v8667_v16  ;;  %v8671_v33 = vpack.c.bf16 %v969_v46, %v894_v63  ;;  %v1119_v18 = vsel %vm16517_vm9, %v16988_v3, %v9651_v44  ;;  %v1195_v5 = vsel %vm16516_vm10, %v9676_v50, %v16992_v37  ;;  %v16993_v15 = vunpack.i.l.bf16 %v12280_v8  ;;  %v16995_v44 = vld [vmem:[#allocation50_spill] sm:$0xff]  ;;  %v17014_v37 = vld [vmem:[#allocation79_spill] sm:$0xff] }
 0x25b   : > { %8670 = vmatprep.subr.bf16.mxu0 %v8669_v54  ;;  %v1044_v4 = vsel %vm16991_vm8, %v16990_v51, %v9621_v34  ;;  %v8677_v17 = vpack.c.bf16 %v1270_v26, %v1195_v5  ;;  %v9781_v35 = vunpack.i.h.bf16 %v16896_v11  ;;  %vm16996_vm7 = vcmask 1039360   ;;  %v11245_v34 = vld [vmem:[%s11686_s15 + $0x50] sm:$0xff]  ;;  %v11246_v54 = vld [vmem:[%s11686_s15 + $0x48] sm:$0xff] }
 0x25c   : > { %2786 = vmatmul.mubr.f32.gmra.mrb[6].mxu1 %v12601_v42  ;;  %v8675_v30 = vpack.c.bf16 %v1119_v18, %v1044_v4  ;;  %v1269_v27 = vsel %vm16994_vm11, %v16993_v15, %v9701_v48  ;;  %v1365_v29 = vsel %vm16996_vm7, %v9731_v32, %v16995_v44  ;;  %v16997_v20 = vunpack.i.l.bf16 %v16883_v55  ;;  %vm16999_vm8 = vmmov %vm16996_vm7  ;;  %v17002_v48 = vld [vmem:[#allocation52_spill] sm:$0xff] }
 0x25d   : > { %v9756_v45 = vunpack.i.h.bf16 %v16903_v13  ;;  %v16998_v8 = vunpack.i.l.bf16 %v12320_v9  ;;  %v8681_v16 = vpack.c.bf16 %v1365_v29, %v11245_v34  ;;  %v9831_v53 = vunpack.i.h.bf16 %v16904_v28 }
 0x25e   : > { %8672 = vmatpush1.bf16.msra.mxu0 %v8671_v33  ;;  %v1194_v7 = vsel %vm16516_vm10, %v16997_v20, %v9676_v50  ;;  %vm17001_vm11 = vcmask 900096   ;;  %v9806_v55 = vunpack.i.h.bf16 %v16912_v39  ;;  %vm17003_vm7 = vcmask 1031168   ;;  %v17006_v50 = vld [vmem:[#allocation69_spill] sm:$0xff] }
 0x25f   : > { %8674 = vmatprep.subr.bf16.mxu0 %v8673_v57  ;;  %v8679_v52 = vpack.c.bf16 %v1269_v27, %v1194_v7  ;;  %v1364_v14 = vsel %vm16999_vm8, %v16998_v8, %v9731_v32  ;;  %v1515_v46 = vsel %vm17001_vm11, %v9781_v35, %v17000_v58  ;;  %v1440_v12 = vsel %vm17003_vm7, %v9756_v45, %v17002_v48  ;;  %vm17005_vm10 = vmmov %vm17001_vm11  ;;  %v17010_v32 = vld [vmem:[#allocation63_spill] sm:$0xff]  ;;  %v17022_v7 = vld [vmem:[#allocation89_spill] sm:$0xff] }
 0x260   : > { %v8683_v61 = vpack.c.bf16 %v1364_v14, %v11246_v54  ;;  %v17004_v9 = vunpack.i.l.bf16 %v16896_v11  ;;  %v8685_v47 = vpack.c.bf16 %v1515_v46, %v1440_v12  ;;  %v9881_v63 = vunpack.i.h.bf16 %v16929_v31  ;;  %vm17009_vm11 = vmmov %vm17003_vm7  ;;  %v17031_v54 = vld [vmem:[#allocation92_spill] sm:$0xff] }
 0x261   : > { %vm17007_vm8 = vcmask 883712   ;;  %v17008_v23 = vunpack.i.l.bf16 %v16903_v13  ;;  %v9856_v18 = vunpack.i.h.bf16 %v16938_v38  ;;  %vm17011_vm7 = vcmask 891904  }
 0x262   : > { %8676 = vmatpush1.bf16.msra.mxu0 %v8675_v30  ;;  %v1514_v6 = vsel %vm17005_vm10, %v17004_v9, %v9781_v35  ;;  %v1665_v33 = vsel %vm17007_vm8, %v9831_v53, %v17006_v50  ;;  %v1590_v11 = vsel %vm17011_vm7, %v9806_v55, %v17010_v32  ;;  %v17012_v26 = vunpack.i.l.bf16 %v16904_v28  ;;  %vm17013_vm10 = vmmov %vm17007_vm8  ;;  %v17018_v35 = vld [vmem:[#allocation73_spill] sm:$0xff] }
 0x263   : > { %8678 = vmatprep.subr.bf16.mxu0 %v8677_v17  ;;  %v1439_v3 = vsel %vm17009_vm11, %v17008_v23, %v9756_v45  ;;  %v8689_v4 = vpack.c.bf16 %v1665_v33, %v1590_v11  ;;  %v9931_v30 = vunpack.i.h.bf16 %v16942_v24  ;;  %vm17015_vm8 = vcmask 867328   ;;  %vm17017_vm11 = vmmov %vm17011_vm7  ;;  %v13104_v50 = vld [vmem:[#allocation5 + $0x8] sm:$0xff] }
 0x264   : > { %v8687_v57 = vpack.c.bf16 %v1514_v6, %v1439_v3  ;;  %v1664_v51 = vsel %vm17013_vm10, %v17012_v26, %v9831_v53  ;;  %v1815_v13 = vsel %vm17015_vm8, %v9881_v63, %v17014_v37  ;;  %v17016_v5 = vunpack.i.l.bf16 %v16912_v39  ;;  %vm17021_vm10 = vmmov %vm17015_vm8  ;;  %v2177_v6 = vpop.permute.xlu1 %2176  ;;  %17034 = vst [vmem:[#allocation39_spill] sm:$0xff] %v13104_v50 }
 0x265   : > { %v9906_v27 = vunpack.i.h.bf16 %v16949_v56  ;;  %vm17019_vm7 = vcmask 875520   ;;  %v17020_v44 = vunpack.i.l.bf16 %v16929_v31  ;;  %vm17023_vm9 = vcmask 728064  }
 0x266   : > { %8680 = vmatpush1.bf16.msra.mxu0 %v8679_v52  ;;  %v1589_v15 = vsel %vm17017_vm11, %v17016_v5, %v9806_v55  ;;  %v1740_v28 = vsel %vm17019_vm7, %v9856_v18, %v17018_v35  ;;  %v1965_v45 = vsel %vm17023_vm9, %v9931_v30, %v17022_v7  ;;  %v17024_v39 = vunpack.i.l.bf16 %v16938_v38  ;;  %vm17025_vm8 = vmmov %vm17019_vm7 }
 0x267   : > { %8682 = vmatprep.subr.bf16.mxu0 %v8681_v16  ;;  %v8691_v17 = vpack.c.bf16 %v1664_v51, %v1589_v15  ;;  %v1814_v29 = vsel %vm17021_vm10, %v17020_v44, %v9881_v63  ;;  %v8693_v20 = vpack.c.bf16 %v1815_v13, %v1740_v28  ;;  %v9956_v8 = vunpack.i.h.bf16 %v16960_v36  ;;  %v17026_v16 = vld [vmem:[#allocation83_spill] sm:$0xff]  ;;  %vm17029_vm7 = vmmov %vm17023_vm9 }
 0x268   : > { %v1739_v52 = vsel %vm17025_vm8, %v17024_v39, %v9856_v18  ;;  %v9981_v14 = vunpack.i.h.bf16 %v12864_v43  ;;  %vm17027_vm11 = vcmask 736256   ;;  %v17028_v53 = vunpack.i.l.bf16 %v16942_v24  ;;  %v13135_v13 = vld [vmem:[#allocation5 + $0x18] sm:$0xff] }
 0x269   : > { %v8695_v34 = vpack.c.bf16 %v1814_v29, %v1739_v52  ;;  %v1890_v31 = vsel %vm17027_vm11, %v9906_v27, %v17026_v16  ;;  %vm17030_vm9 = vmmov %vm17027_vm11  ;;  %v17032_v12 = vunpack.i.l.bf16 %v12864_v43  ;;  %v2189_v63 = vsel %vm16559_vm12, %v12951_v25, %v2177_v6  ;;  %v13100_v43 = vpop.permute.xlu1 %2469  ;;  %17038 = vst [vmem:[#allocation43_spill] sm:$0xff] %v13135_v13  ;;  %v13155_v52 = vld [vmem:[#allocation5 + $0x68] sm:$0xff] }
 0x26a   : > { %8684 = vmatpush1.bf16.msra.mxu0 %v8683_v61  ;;  %v1964_v58 = vsel %vm17029_vm7, %v17028_v53, %v9931_v30  ;;  %v8697_v46 = vpack.c.bf16 %v1965_v45, %v1890_v31  ;;  %v2115_v55 = vsel %vm16560_vm15, %v9981_v14, %v12866_v19  ;;  %v1889_v38 = vsel %vm17030_vm9, %v9905_v59, %v9906_v27 }
 0x26b   : > { %8686 = vmatprep.subr.bf16.mxu0 %v8685_v47  ;;  %v2040_v61 = vsel %vm2030_vm14, %v9956_v8, %v17031_v54  ;;  %v8699_v48 = vpack.c.bf16 %v1964_v58, %v1889_v38  ;;  %v2114_v24 = vsel %vm16560_vm15, %v17032_v12, %v9981_v14  ;;  %v2179_v47 = vpop.permute.xlu0 %2178  ;;  %v2039_v19 = vsel %vm2030_vm14, %v9955_v40, %v9956_v8  ;;  %v13102_v40 = vld [vmem:[#allocation5] sm:$0xff] }
 0x26c   : > { %v8701_v9 = vpack.c.bf16 %v2115_v55, %v2040_v61  ;;  %v8703_v56 = vpack.c.bf16 %v2114_v24, %v2039_v19  ;;  %v2190_v59 = vsel %vm16559_vm12, %v2177_v6, %v2179_v47  ;;  %17033 = vst [vmem:[#allocation29_spill] sm:$0xff] %v13102_v40  ;;  %vm371_vm10 = vcmp.ne.f32.partialorder %v13102_v40, 0.0  ;;  %17040 = vst [vmem:[#allocation35_spill] sm:$0xff] %v13155_v52  ;;  %v13212_v47 = vld [vmem:[#allocation5 + $0x20] sm:$0xff] }
 0x26d   : > { %vm16522_vm9 = vcmp.ne.f32.partialorder %v13135_v13, 0.0  ;;  %17041 = vst [vmem:[#allocation38_spill] sm:$0xff] %v13212_v47 }
 0x26e   : > { %8688 = vmatpush1.bf16.msra.mxu0 %v8687_v57  ;;  %v13120_v57 = vld [vmem:[#allocation5 + $0x58] sm:$0xff] }
 0x26f   : > { %8690 = vmatprep.subr.bf16.mxu0 %v8689_v4  ;;  %17036 = vst [vmem:[#allocation44_spill] sm:$0xff] %v13120_v57  ;;  %v13131_v4 = vld [vmem:[#allocation5 + $0x10] sm:$0xff]  ;;  %vm16518_vm11 = vcmp.ne.f32.partialorder %v13120_v57, 0.0 }
 0x270   : > { %17037 = vst [vmem:[#allocation36_spill] sm:$0xff] %v13131_v4  ;;  %vm16525_vm7 = vcmp.ne.f32.partialorder %v13131_v4, 0.0 }
 0x272   : > { %8692 = vmatpush1.bf16.msra.mxu0 %v8691_v17 }
 0x273   : > { %8694 = vmatprep.subr.bf16.mxu0 %v8693_v20  ;;  %v13147_v20 = vld [vmem:[#allocation5 + $0x60] sm:$0xff] }
 0x274   : > { %17039 = vst [vmem:[#allocation33_spill] sm:$0xff] %v13147_v20 }
 0x276   : > { %8696 = vmatpush1.bf16.msra.mxu0 %v8695_v34  ;;  %v13113_v25 = vpop.permute.xlu0 %2474 }
 0x277   : > { %8698 = vmatprep.subr.bf16.mxu0 %v8697_v46 }
 0x27a   : > { %8700 = vmatpush1.bf16.msra.mxu0 %v8699_v48 }
 0x27b   : > { %8702 = vmatprep.subr.bf16.mxu0 %v8701_v9  ;;  %v3911_v9 = vld [vmem:[#allocation2 + $0x60] sm:$0xff] }
 0x27e   : > { %8704 = vmatpush1.bf16.msra.mxu0 %v8703_v56  ;;  %v13214_v56 = vld [vmem:[#allocation5 + $0x28] sm:$0xff] }
 0x27f   : > { %2840 = vmatprep.subr.mxu0 %v2190_v59  ;;  %17042 = vst [vmem:[#allocation41_spill] sm:$0xff] %v13214_v56 }
 0x282   : > { %2841 = vmatpush1.msra.mxu0 %v2189_v63 }
 0x283   : > { %2857 = vmatmul.mubr.f32.vlgmr.msra.gmra.mrb[8].mxu0 %v12562_v22 }
 0x284   : > { %8446 = vmatprep.mubr.msk.f32.mxu0 %vm2477_vm13, %v12588_v10  ;;  %vm372_vm13 = vcmp.ne.f32.partialorder %v13104_v50, 0.0 }
 0x287   : > { %2863 = vmatmul.mubr.f32.gmra.mrb[10].mxu0 %v12601_v42  ;;  %v13117_v42 = vld [vmem:[#allocation5 + $0x50] sm:$0xff] }
 0x288   : > { %17035 = vst [vmem:[#allocation32_spill] sm:$0xff] %v13117_v42  ;;  %vm16519_vm8 = vcmp.ne.f32.partialorder %v13117_v42, 0.0 }
 0x2e6   : > { %v2550_v36 = vpop.f32.mrb[0].mxu0 }
 0x2e7   : > { %v13107_v33 = vadd.f32 %v2550_v36, %v13100_v43  ;;  %v2552_v23 = vpop.f32.mrb[1].mxu0 }
 0x2e8   : > { %v13111_v22 = vadd.f32 %v2552_v23, %v13100_v43 }
 0x2e9   : > { %v2869_v10 = vmax.f32 %v13107_v33, 0.0 }
 0x2ea   : > { %v2870_v3 = vmax.f32 %v13111_v22, 0.0  ;;  %v2556_v18 = vpop.f32.mrb[2].mxu0 }
 0x2eb   : > { %v2889_v32 = vsel %vm371_vm10, %v2869_v10, 0.0  ;;  %v2557_v11 = vadd.f32 %v2556_v18, %v13113_v25  ;;  %v2558_v26 = vpop.f32.mrb[3].mxu0  ;;  %v13224_v18 = vld [vmem:[#allocation5 + $0x70] sm:$0xff] }
 0x2ec   : > { %v2890_v51 = vsel %vm372_vm13, %v2870_v3, 0.0  ;;  %v2559_v30 = vadd.f32 %v2558_v26, %v13113_v25  ;;  %17043 = vst [vmem:[#allocation40_spill] sm:$0xff] %v13224_v18  ;;  %v13226_v26 = vld [vmem:[#allocation5 + $0x78] sm:$0xff] }
 0x2ed   : > { %v2627_v37 = vpop.f32.mrb[0].mxu1  ;;  %v9984_v5 = vpack.i.bf16 %v2890_v51, %v2889_v32  ;;  %v2879_v15 = vmax.f32 %v2557_v11, 0.0  ;;  %17044 = vst [vmem:[#allocation46_spill] sm:$0xff] %v13226_v26 }
 0x2ee   : > { %v2628_v27 = vadd.f32 %v2627_v37, %v13100_v43  ;;  %v2629_v17 = vpop.f32.mrb[1].mxu1  ;;  %v2880_v35 = vmax.f32 %v2559_v30, 0.0 }
 0x2ef   : > { %v2630_v28 = vadd.f32 %v2629_v17, %v13100_v43  ;;  %9985 = vrot.lane.b32.xlu1 %v9984_v5, %s16530_s16  ;;  %v13144_v44 = vsel %vm16519_vm8, %v2879_v15, 0.0  ;;  %vm16520_vm8 = vcmp.ne.f32.partialorder %v13155_v52, 0.0 }
 0x2f0   : > { %v2871_v29 = vmax.f32 %v2628_v27, 0.0  ;;  %2919 = vst [vmem:[#allocation2 + $0x68] sm:$0xff] %v13144_v44  ;;  %v13152_v7 = vsel %vm16518_vm11, %v2880_v35, 0.0  ;;  %vm16521_vm11 = vcmp.ne.f32.partialorder %v13147_v20, 0.0  ;;  %v13235_v27 = vld [vmem:[#allocation5 + $0x30] sm:$0xff]  ;;  %v9486_v20 = vunpack.i.h.bf16 %v16954_v41 }
 0x2f1   : > { %v2872_v45 = vmax.f32 %v2630_v28, 0.0  ;;  %v2633_v39 = vpop.f32.mrb[2].mxu1  ;;  %2920 = vst [vmem:[#allocation2 + $0x70] sm:$0xff] %v13152_v7  ;;  %v13159_v8 = vpack.i.bf16 %v13152_v7, %v13144_v44  ;;  %17045 = vst [vmem:[#allocation65_spill] sm:$0xff] %v13235_v27  ;;  %v13242_v28 = vld [vmem:[#allocation5 + $0x38] sm:$0xff] }
 0x2f2   : > { %v2891_v14 = vsel %vm16525_vm7, %v2871_v29, 0.0  ;;  %v2634_v34 = vadd.f32 %v2633_v39, %v13113_v25  ;;  %v2635_v16 = vpop.f32.mrb[3].mxu1  ;;  %17046 = vst [vmem:[#allocation47_spill] sm:$0xff] %v13242_v28  ;;  %vm16544_vm7 = vcmp.ne.f32.partialorder %v13242_v28, 0.0 }
 0x2f3   : > { %2911 = vst [vmem:[#allocation2 + $0x18] sm:$0xff] %v2891_v14  ;;  %v2892_v31 = vsel %vm16522_vm9, %v2872_v45, 0.0  ;;  %v2636_v53 = vadd.f32 %v2635_v16, %v13113_v25  ;;  %vm16527_vm9 = vcmp.ne.f32.partialorder %v13224_v18, 0.0 }
 0x2f4   : > { %2912 = vst [vmem:[#allocation2 + $0x20] sm:$0xff] %v2892_v31  ;;  %v9999_v58 = vpack.i.bf16 %v2892_v31, %v2891_v14  ;;  %v2881_v46 = vmax.f32 %v2634_v34, 0.0 }
 0x2f5   : > { %v2882_v55 = vmax.f32 %v2636_v53, 0.0 }
 0x2f6   : > { %10000 = vrot.lane.b32.xlu0 %v9999_v58, %s16551_s18  ;;  %9990 = vrot.lane.b32.xlu1 %v9999_v58, %s16530_s16  ;;  %v2901_v38 = vsel %vm16521_vm11, %v2881_v46, 0.0  ;;  %vm16524_vm11 = vcmp.ne.f32.partialorder %v13214_v56, 0.0 }
 0x2f7   : > { %2921 = vst [vmem:[#allocation2 + $0x78] sm:$0xff] %v2901_v38  ;;  %v13175_v54 = vsel %vm16520_vm8, %v2882_v55, 0.0  ;;  %v13178_v61 = vpack.i.bf16 %v13144_v44, %v2901_v38  ;;  %v13181_v48 = vpack.i.bf16 %v2901_v38, %v13152_v7  ;;  %v13203_v6 = vpack.i.bf16 %v2901_v38, %v3911_v9 }
 0x2f8   : > { %2922 = vst [vmem:[#allocation2 + $0x80] sm:$0xff] %v13175_v54  ;;  %v13185_v12 = vpack.i.bf16 %v13175_v54, %v2901_v38  ;;  %v13189_v24 = vpack.i.bf16 %v13175_v54, %v13144_v44  ;;  %vm16523_vm8 = vcmp.ne.f32.partialorder %v13212_v47, 0.0  ;;  %v13260_v38 = vld [vmem:[#allocation5 + $0x88] sm:$0xff] }
 0x2f9   : > { %17049 = vst [vmem:[#allocation54_spill] sm:$0xff] %v13260_v38 }
 0x2fa   : > { %10005 = vrot.lane.b32.xlu0 %v9984_v5, %s16528_s19  ;;  %9995 = vrot.lane.b32.xlu1 %v9984_v5, %s16551_s18 }
 0x2fe   : > { %10020 = vrot.lane.b32.xlu0 %v9999_v58, %s16532_s26  ;;  %10010 = vrot.lane.b32.xlu1 %v9999_v58, %s16528_s19 }
 0x302   : > { %10025 = vrot.lane.b32.xlu0 %v9984_v5, %s16548_s10  ;;  %10015 = vrot.lane.b32.xlu1 %v9984_v5, %s16532_s26 }
 0x306   : > { %10035 = vrot.lane.b32.xlu0 %v9984_v5, %s16556_s17  ;;  %10030 = vrot.lane.b32.xlu1 %v9999_v58, %s16548_s10 }
 0x30a   : > { %10045 = vrot.lane.b32.xlu0 %v9984_v5, %s16546_s21  ;;  %10040 = vrot.lane.b32.xlu1 %v9999_v58, %s16556_s17 }
 0x30e   : > { %10055 = vrot.lane.b32.xlu0 %v9984_v5, %s16538_s13  ;;  %10050 = vrot.lane.b32.xlu1 %v9999_v58, %s16546_s21 }
 0x312   : > { %10070 = vrot.lane.b32.xlu0 %v13203_v6, %s16536_s14  ;;  %10060 = vrot.lane.b32.xlu1 %v9999_v58, %s16538_s13  ;;  %v13254_v58 = vld [vmem:[#allocation5 + $0x80] sm:$0xff] }
 0x313   : > { %17047 = vst [vmem:[#allocation49_spill] sm:$0xff] %v13254_v58 }
 0x316   : > { %10080 = vrot.lane.b32.xlu0 %v13203_v6, %s16551_s18  ;;  %10065 = vrot.lane.b32.xlu1 %v13203_v6, %s16534_s22 }
 0x31a   : > { %10090 = vrot.lane.b32.xlu0 %v13203_v6, %s16542_s0  ;;  %10075 = vrot.lane.b32.xlu1 %v13203_v6, %s16530_s16  ;;  %s17052_s16 = smov 40  }
 0x31e   : > { %10105 = vrot.lane.b32.xlu0 %v13178_v61, %s16548_s10  ;;  %10085 = vrot.lane.b32.xlu1 %v13203_v6, %s16528_s19  ;;  %s17051_s19 = smov 41  }
 0x322   : > { %10110 = vrot.lane.b32.xlu0 %v13178_v61, %s16556_s17  ;;  %10095 = vrot.lane.b32.xlu1 %v13203_v6, %s17048_s11 }
 0x323   : > { %v2704_v19 = vpop.f32.mrb[4].mxu0 }
 0x324   : > { %v2705_v59 = vadd.f32 %v2704_v19, %v13100_v43  ;;  %v2706_v63 = vpop.f32.mrb[5].mxu0 }
 0x325   : > { %v2707_v36 = vadd.f32 %v2706_v63, %v13100_v43 }
 0x326   : > { %v2873_v23 = vmax.f32 %v2705_v59, 0.0  ;;  %10135 = vrot.lane.b32.xlu0 %v13159_v8, %s17050_s2  ;;  %10100 = vrot.lane.b32.xlu1 %v13203_v6, %s16532_s26  ;;  %s17053_s26 = smov 39   ;;  %v13313_v6 = vld [vmem:[#allocation5 + $0x40] sm:$0xff] }
 0x327   : > { %v2874_v32 = vmax.f32 %v2707_v36, 0.0  ;;  %v2710_v11 = vpop.f32.mrb[6].mxu0  ;;  %17055 = vst [vmem:[#allocation61_spill] sm:$0xff] %v13313_v6 }
 0x328   : > { %v2893_v51 = vsel %vm16523_vm8, %v2873_v23, 0.0  ;;  %v2711_v30 = vadd.f32 %v2710_v11, %v13113_v25  ;;  %v2712_v37 = vpop.f32.mrb[7].mxu0  ;;  %vm16526_vm8 = vcmp.ne.f32.partialorder %v13226_v26, 0.0 }
 0x329   : > { %2913 = vst [vmem:[#allocation2 + $0x28] sm:$0xff] %v2893_v51  ;;  %v2894_v5 = vsel %vm16524_vm11, %v2874_v32, 0.0  ;;  %v2713_v15 = vadd.f32 %v2712_v37, %v13113_v25  ;;  %vm16545_vm11 = vcmp.ne.f32.partialorder %v13235_v27, 0.0  ;;  %v3255_v32 = vld [vmem:[#allocation2 + $0x58] sm:$0xff]  ;;  %v9426_v27 = vunpack.i.h.bf16 %v16953_v60 }
 0x32a   : > { %2914 = vst [vmem:[#allocation2 + $0x30] sm:$0xff] %v2894_v5  ;;  %v2883_v17 = vmax.f32 %v2711_v30, 0.0  ;;  %v13244_v29 = vpack.i.bf16 %v2894_v5, %v2893_v51  ;;  %v10114_v5 = vpack.i.bf16 %v13152_v7, %v3255_v32  ;;  %10150 = vrot.lane.b32.xlu0 %v13185_v12, %s17051_s19 }
 0x32b   : > { %v2781_v35 = vpop.f32.mrb[4].mxu1  ;;  %v2884_v45 = vmax.f32 %v2713_v15, 0.0 }
 0x32c   : > { %v2782_v39 = vadd.f32 %v2781_v35, %v13100_v43  ;;  %v2783_v14 = vpop.f32.mrb[5].mxu1  ;;  %v2903_v34 = vsel %vm16527_vm9, %v2883_v17, 0.0  ;;  %vm16540_vm9 = vcmp.ne.f32.partialorder %v13260_v38, 0.0  ;;  %10115 = vrot.lane.b32.xlu1 %v10114_v5, %s16548_s10 }
 0x32d   : > { %v2784_v16 = vadd.f32 %v2783_v14, %v13100_v43  ;;  %2923 = vst [vmem:[#allocation2 + $0x88] sm:$0xff] %v2903_v34  ;;  %v2904_v31 = vsel %vm16526_vm8, %v2884_v45, 0.0  ;;  %vm16541_vm8 = vcmp.ne.f32.partialorder %v13254_v58, 0.0  ;;  %v13315_v45 = vld [vmem:[#allocation5 + $0x48] sm:$0xff] }
 0x32e   : > { %v2875_v53 = vmax.f32 %v2782_v39, 0.0  ;;  %2924 = vst [vmem:[#allocation2 + $0x90] sm:$0xff] %v2904_v31  ;;  %v13262_v9 = vpack.i.bf16 %v2904_v31, %v2903_v34  ;;  %10155 = vrot.lane.b32.xlu0 %v13159_v8, %s17052_s16  ;;  %17056 = vst [vmem:[#allocation51_spill] sm:$0xff] %v13315_v45 }
 0x32f   : > { %v2876_v46 = vmax.f32 %v2784_v16, 0.0  ;;  %v2787_v55 = vpop.f32.mrb[6].mxu1  ;;  %v13325_v16 = vld [vmem:[#allocation5 + $0x90] sm:$0xff] }
 0x330   : > { %v2895_v19 = vsel %vm16545_vm11, %v2875_v53, 0.0  ;;  %v2788_v59 = vadd.f32 %v2787_v55, %v13113_v25  ;;  %v2789_v63 = vpop.f32.mrb[7].mxu1  ;;  %10120 = vrot.lane.b32.xlu1 %v10114_v5, %s16556_s17  ;;  %17059 = vst [vmem:[#allocation60_spill] sm:$0xff] %v13325_v16 }
 0x331   : > { %2915 = vst [vmem:[#allocation2 + $0x38] sm:$0xff] %v2895_v19  ;;  %v2896_v36 = vsel %vm16544_vm7, %v2876_v46, 0.0  ;;  %v2790_v23 = vadd.f32 %v2789_v63, %v13113_v25  ;;  %v13327_v46 = vld [vmem:[#allocation5 + $0x98] sm:$0xff]  ;;  %vm16553_vm7 = vcmp.ne.f32.partialorder %v13325_v16, 0.0 }
 0x332   : > { %2916 = vst [vmem:[#allocation2 + $0x40] sm:$0xff] %v2896_v36  ;;  %v2885_v11 = vmax.f32 %v2788_v59, 0.0  ;;  %v13276_v51 = vpack.i.bf16 %v2896_v36, %v2895_v19  ;;  %10170 = vrot.lane.b32.xlu0 %v13185_v12, %s17053_s26  ;;  %17060 = vst [vmem:[#allocation75_spill] sm:$0xff] %v13327_v46  ;;  %vm16550_vm11 = vcmp.ne.f32.partialorder %v13327_v46, 0.0 }
 0x333   : > { %v2886_v30 = vmax.f32 %v2790_v23, 0.0 }
 0x334   : > { %v2905_v37 = vsel %vm16541_vm8, %v2885_v11, 0.0  ;;  %10125 = vrot.lane.b32.xlu1 %v10114_v5, %s16546_s21  ;;  %vm16554_vm8 = vcmp.ne.f32.partialorder %v13315_v45, 0.0 }
 0x335   : > { %2925 = vst [vmem:[#allocation2 + $0x98] sm:$0xff] %v2905_v37  ;;  %v2906_v15 = vsel %vm16540_vm9, %v2886_v30, 0.0  ;;  %vm16558_vm9 = vcmp.ne.f32.partialorder %v13313_v6, 0.0 }
 0x336   : > { %2926 = vst [vmem:[#allocation2 + $0xa0] sm:$0xff] %v2906_v15  ;;  %v13286_v17 = vpack.i.bf16 %v2906_v15, %v2905_v37  ;;  %10175 = vrot.lane.b32.xlu0 %v13159_v8, %s16534_s22  ;;  %s17054_s22 = smov 1  }
 0x338   : > { %10130 = vrot.lane.b32.xlu1 %v10114_v5, %s16538_s13  ;;  %s17058_s13 = smov 21  }
 0x33a   : > { %10180 = vrot.lane.b32.xlu0 %v13159_v8, %s16536_s14  ;;  %s17057_s14 = smov 126  }
 0x33c   : > { %10140 = vrot.lane.b32.xlu1 %v13185_v12, %s17050_s2  ;;  %v13622_v56 = vld [vmem:[#allocation2 + $0x98] sm:$0xff] }
 0x33e   : > { %10190 = vrot.lane.b32.xlu0 %v13159_v8, %s16551_s18 }
 0x340   : > { %10145 = vrot.lane.b32.xlu1 %v13159_v8, %s17051_s19 }
 0x342   : > { %10200 = vrot.lane.b32.xlu0 %v13159_v8, %s16542_s0  ;;  %s17061_s0 = smov 19  }
 0x344   : > { %10160 = vrot.lane.b32.xlu1 %v13185_v12, %s17052_s16 }
 0x346   : > { %10210 = vrot.lane.b32.xlu0 %v13159_v8, %s17054_s22 }
 0x348   : > { %10165 = vrot.lane.b32.xlu1 %v13159_v8, %s17053_s26 }
 0x34a   : > { %10220 = vrot.lane.b32.xlu0 %v13189_v24, %s17057_s14 }
 0x34c   : > { %10185 = vrot.lane.b32.xlu1 %v13159_v8, %s17058_s13 }
 0x34e   : > { %10235 = vrot.lane.b32.xlu0 %v13178_v61, %s16546_s21  ;;  %s17062_s21 = smov 110  }
 0x350   : > { %10195 = vrot.lane.b32.xlu1 %v13159_v8, %s17061_s0 }
 0x352   : > { %10240 = vrot.lane.b32.xlu0 %v13244_v29, %s17058_s13 }
 0x354   : > { %10205 = vrot.lane.b32.xlu1 %v13159_v8, %s17048_s11 }
 0x356   : > { %v2858_v35 = vpop.f32.mrb[8].mxu0  ;;  %10255 = vrot.lane.b32.xlu0 %v13276_v51, %s16551_s18 }
 0x357   : > { %v2859_v39 = vadd.f32 %v2858_v35, %v13100_v43  ;;  %v2860_v12 = vpop.f32.mrb[9].mxu0 }
 0x358   : > { %v2861_v14 = vadd.f32 %v2860_v12, %v13100_v43  ;;  %10215 = vrot.lane.b32.xlu1 %v13181_v48, %s17057_s14 }
 0x359   : > { %v2877_v34 = vmax.f32 %v2859_v39, 0.0 }
 0x35a   : > { %v2878_v31 = vmax.f32 %v2861_v14, 0.0  ;;  %v2864_v53 = vpop.f32.mrb[10].mxu0  ;;  %10260 = vrot.lane.b32.xlu0 %v13244_v29, %s17061_s0 }
 0x35b   : > { %v2897_v55 = vsel %vm16558_vm9, %v2877_v34, 0.0  ;;  %v2865_v43 = vadd.f32 %v2864_v53, %v13113_v25  ;;  %v2866_v19 = vpop.f32.mrb[11].mxu0  ;;  %v9566_v53 = vunpack.i.h.bf16 %v16976_v1 }
 0x35c   : > { %2917 = vst [vmem:[#allocation2 + $0x48] sm:$0xff] %v2897_v55  ;;  %v2898_v59 = vsel %vm16554_vm8, %v2878_v31, 0.0  ;;  %v2867_v63 = vadd.f32 %v2866_v19, %v13113_v25  ;;  %10225 = vrot.lane.b32.xlu1 %v13181_v48, %s17062_s21 }
 0x35d   : > { %2918 = vst [vmem:[#allocation2 + $0x50] sm:$0xff] %v2898_v59  ;;  %v2887_v36 = vmax.f32 %v2865_v43, 0.0  ;;  %v13341_v61 = vpack.i.bf16 %v2898_v59, %v2897_v55  ;;  %v9596_v59 = vunpack.i.h.bf16 %v16974_v2 }
 0x35e   : > { %v2888_v23 = vmax.f32 %v2867_v63, 0.0  ;;  %10275 = vrot.lane.b32.xlu0 %v13276_v51, %s17054_s22 }
 0x35f   : > { %v2907_v32 = vsel %vm16553_vm7, %v2887_v36, 0.0 }
 0x360   : > { %2927 = vst [vmem:[#allocation2 + $0xa8] sm:$0xff] %v2907_v32  ;;  %v2908_v25 = vsel %vm16550_vm11, %v2888_v23, 0.0  ;;  %10230 = vrot.lane.b32.xlu1 %v13189_v24, %s17062_s21  ;;  %vm17064_vm11 = vcmask 162816  }
 0x361   : > { %2928 = vst [vmem:[#allocation2 + $0xb0] sm:$0xff] %v2908_v25  ;;  %v13351_v11 = vpack.i.bf16 %v2908_v25, %v2907_v32  ;;  %v9986_v8 = vpop.permute.xlu1 %9985  ;;  %vm17066_vm7 = vmmov %vm17064_vm11 }
 0x362   : > { %10280 = vrot.lane.b32.xlu0 %v13244_v29, %s16548_s10  ;;  %v9988_v12 = vunpack.i.h.bf16 %v9986_v8  ;;  %v9987_v14 = vunpack.i.l.bf16 %v9986_v8  ;;  %s17063_s10 = smov 108   ;;  %vm17067_vm8 = vmmov %vm17066_vm7 }
 0x364   : > { %10245 = vrot.lane.b32.xlu1 %v13276_v51, %s17058_s13  ;;  %v2973_v23 = vsel %vm885_vm6, %v9566_v53, %v9987_v14  ;;  %v2974_v32 = vsel %vm885_vm6, %v9987_v14, %v9988_v12 }
 0x366   : > { %10290 = vrot.lane.b32.xlu0 %v13244_v29, %s16556_s17  ;;  %s17068_s17 = smov 127  }
 0x368   : > { %10250 = vrot.lane.b32.xlu1 %v13244_v29, %s16551_s18  ;;  %v13373_v30 = vpop.permute.xlu0 %10000  ;;  %v13375_v37 = vpop.permute.xlu1 %9990  ;;  %s17065_s18 = smov 107  }
 0x369   : > { %v16563_v5 = vunpack.i.h.bf16 %v13373_v30  ;;  %v10002_v15 = vunpack.i.l.bf16 %v13373_v30  ;;  %v16555_v35 = vunpack.i.h.bf16 %v13375_v37  ;;  %v9992_v39 = vunpack.i.l.bf16 %v13375_v37 }
 0x36a   : > { %10300 = vrot.lane.b32.xlu0 %v13244_v29, %s17063_s10 }
 0x36b   : > { %v2976_v34 = vsel %vm885_vm6, %v9992_v39, %v16555_v35  ;;  %v3050_v31 = vsel %vm17064_vm11, %v10002_v15, %v16563_v5  ;;  %v2975_v25 = vsel %vm885_vm6, %v9988_v12, %v9992_v39 }
 0x36c   : > { %10265 = vrot.lane.b32.xlu1 %v13276_v51, %s17061_s0  ;;  %v10006_v55 = vpop.permute.xlu0 %10005  ;;  %v9996_v43 = vpop.permute.xlu1 %9995  ;;  %v8773_v19 = vpack.c.bf16 %v3050_v31, %v2976_v34 }
 0x36d   : > { %v9998_v63 = vunpack.i.h.bf16 %v9996_v43  ;;  %v9997_v36 = vunpack.i.l.bf16 %v9996_v43  ;;  %v10008_v12 = vunpack.i.h.bf16 %v10006_v55 }
 0x36e   : > { %10310 = vrot.lane.b32.xlu0 %v13244_v29, %s17065_s18  ;;  %8774 = vmatprep.subr.bf16.mxu0 %v8773_v19 }
 0x36f   : > { %v3049_v1 = vsel %vm17064_vm11, %v9998_v63, %v10002_v15  ;;  %v3047_v8 = vsel %vm17066_vm7, %v9596_v59, %v9997_v36  ;;  %v3048_v2 = vsel %vm17067_vm8, %v9997_v36, %v9998_v63  ;;  %v10007_v59 = vunpack.i.l.bf16 %v10006_v55 }
 0x370   : > { %10270 = vrot.lane.b32.xlu1 %v13244_v29, %s17054_s22  ;;  %v13403_v34 = vpop.permute.xlu0 %10020  ;;  %v13405_v31 = vpop.permute.xlu1 %10010  ;;  %v8705_v53 = vpack.c.bf16 %v3048_v2, %v2974_v32  ;;  %v8775_v43 = vpack.c.bf16 %v3049_v1, %v2975_v25  ;;  %v8707_v35 = vpack.c.bf16 %v3047_v8, %v2973_v23  ;;  %vm17069_vm8 = vcmask 154624  }
 0x371   : > { %v16562_v29 = vunpack.i.h.bf16 %v13403_v34  ;;  %v10022_v14 = vunpack.i.l.bf16 %v13403_v34  ;;  %v16561_v39 = vunpack.i.h.bf16 %v13405_v31  ;;  %v10012_v15 = vunpack.i.l.bf16 %v13405_v31  ;;  %vm17071_vm11 = vmmov %vm17069_vm8 }
 0x372   : > { %10320 = vrot.lane.b32.xlu0 %v13262_v9, %s17050_s2  ;;  %8706 = vmatprep.subr.bf16.mxu1 %v8705_v53  ;;  %vm17070_vm7 = vcmask 7168   ;;  %v9626_v36 = vunpack.i.h.bf16 %v16981_v21  ;;  %v9706_v25 = vunpack.i.h.bf16 %v16984_v0  ;;  %vm17072_vm9 = vmmov %vm17069_vm8  ;;  %v3122_v21 = vsel %vm17069_vm8, %v10007_v59, %v10008_v12 }
 0x373   : > { %8776 = vmatpush1.bf16.msra.mxu0 %v8775_v43  ;;  %v3124_v19 = vsel %vm17069_vm8, %v10012_v15, %v16561_v39  ;;  %v3198_v63 = vsel %vm17070_vm7, %v10022_v14, %v16562_v29  ;;  %8708 = vmatpush1.bf16.msra.mxu1 %v8707_v35  ;;  %v3123_v53 = vsel %vm17072_vm9, %v10008_v12, %v10012_v15  ;;  %vm17074_vm12 = vmmov %vm17070_vm7  ;;  %vm17076_vm9 = vcmask 1039360  }
 0x374   : > { %10285 = vrot.lane.b32.xlu1 %v13276_v51, %s17068_s17  ;;  %v10026_v55 = vpop.permute.xlu0 %10025  ;;  %v10016_v23 = vpop.permute.xlu1 %10015  ;;  %v8777_v32 = vpack.c.bf16 %v3198_v63, %v3124_v19  ;;  %v3121_v2 = vsel %vm17071_vm11, %v9626_v36, %v10007_v59  ;;  %vm17075_vm15 = vmmov %vm17070_vm7 }
 0x375   : > { %v10018_v1 = vunpack.i.h.bf16 %v10016_v23  ;;  %v10017_v8 = vunpack.i.l.bf16 %v10016_v23  ;;  %v10028_v43 = vunpack.i.h.bf16 %v10026_v55  ;;  %v10027_v35 = vunpack.i.l.bf16 %v10026_v55 }
 0x376   : > { %10335 = vrot.lane.b32.xlu0 %v13286_v17, %s17051_s19  ;;  %8778 = vmatprep.subr.bf16.mxu0 %v8777_v32 }
 0x377   : > { %v3197_v19 = vsel %vm17070_vm7, %v10018_v1, %v10022_v14  ;;  %v3195_v0 = vsel %vm17074_vm12, %v9706_v25, %v10017_v8  ;;  %v3196_v63 = vsel %vm17075_vm15, %v10017_v8, %v10018_v1  ;;  %v3289_v14 = vsel %vm17076_vm9, %v10027_v35, %v10028_v43  ;;  %vm17077_vm12 = vmmov %vm17076_vm9 }
 0x378   : > { %10295 = vrot.lane.b32.xlu1 %v13276_v51, %s17073_s1  ;;  %v10036_v36 = vpop.permute.xlu0 %10035  ;;  %v13433_v23 = vpop.permute.xlu1 %10030  ;;  %v8709_v15 = vpack.c.bf16 %v3196_v63, %v3122_v21  ;;  %v8779_v39 = vpack.c.bf16 %v3197_v19, %v3123_v53  ;;  %v8711_v29 = vpack.c.bf16 %v3195_v0, %v3121_v2  ;;  %vm11460_vm15 = vmmov 1  }
 0x379   : > { %v16571_v5 = vunpack.i.l.bf16 %v13433_v23  ;;  %vm11254_vm11 = vmpackc.low %vm11460_vm15, %vm372_vm13  ;;  %v11258_v8 = vpack.c.bf16 %v3289_v14, %v2869_v10  ;;  %v10038_v53 = vunpack.i.h.bf16 %v10036_v36  ;;  %vm17079_vm7 = vcmask 883712  }
 0x37a   : > { %10340 = vrot.lane.b32.xlu0 %v13262_v9, %s17052_s16  ;;  %8710 = vmatprep.subr.bf16.mxu1 %v8709_v15  ;;  %vm11257_vm8 = vmpackc.low %vm11460_vm15, %vm371_vm10  ;;  %vm17080_vm9 = vcmask 891904  }
 0x37b   : > { %8780 = vmatpush1.bf16.msra.mxu0 %v8779_v39  ;;  %v3290_v12 = vsel %vm17077_vm12, %v10028_v43, %v16571_v5  ;;  %8712 = vmatpush1.bf16.msra.mxu1 %v8711_v29  ;;  %v10037_v43 = vunpack.i.l.bf16 %v10036_v36  ;;  %vm17081_vm12 = vmmov %vm17079_vm7 }
 0x37c   : > { %10305 = vrot.lane.b32.xlu1 %v13276_v51, %s17063_s10  ;;  %v10046_v59 = vpop.permute.xlu0 %10045  ;;  %v13444_v55 = vpop.permute.xlu1 %10040  ;;  %v11255_v29 = vpack.c.bf16 %v3290_v12, %v2870_v3  ;;  %vm17082_vm15 = vmmov %vm17080_vm9 }
 0x37d   : > { %v10048_v32 = vunpack.i.h.bf16 %v10046_v59  ;;  %v10047_v25 = vunpack.i.l.bf16 %v10046_v59  ;;  %v16567_v1 = vunpack.i.h.bf16 %v13444_v55  ;;  %v10042_v39 = vunpack.i.l.bf16 %v13444_v55 }
 0x37e   : > { %10360 = vrot.lane.b32.xlu0 %v13181_v48, %s17078_s3  ;;  %11256 = vmatprep.subr.msk.bf16.mxu1 %vm11254_vm11, %v11255_v29  ;;  %vm17083_vm11 = vmmov %vm17079_vm7 }
 0x37f   : > { %11259 = vmatpush1.bf16.msk.msra.mxu1 %vm11257_vm8, %v11258_v8  ;;  %v3437_v22 = vsel %vm17079_vm7, %v10047_v25, %v10048_v32  ;;  %v13472_v33 = vsel %vm17080_vm9, %v10042_v39, %v16567_v1  ;;  %v3364_v3 = vsel %vm17082_vm15, %v10038_v53, %v10042_v39  ;;  %vm17084_vm8 = vmmov %vm17080_vm9  ;;  %vm17093_vm7 = vcmask 875520  }
 0x380   : > { %10315 = vrot.lane.b32.xlu1 %v13276_v51, %s17065_s18  ;;  %v10056_v51 = vpop.permute.xlu0 %10055  ;;  %v13460_v2 = vpop.permute.xlu1 %10050  ;;  %v3363_v14 = vsel %vm17084_vm8, %v10037_v43, %v10038_v53  ;;  %vm17094_vm9 = vmmov %vm17093_vm7  ;;  %vm17113_vm15 = vcmask 162816   ;;  %vm17116_vm8 = vcmask 154624  }
 0x381   : > { %v16566_v21 = vunpack.i.h.bf16 %v13460_v2  ;;  %v10052_v35 = vunpack.i.l.bf16 %v13460_v2  ;;  %v8719_v12 = vpack.c.bf16 %v3437_v22, %v3363_v14 }
 0x382   : > { %10370 = vrot.lane.b32.xlu0 %v13189_v24, %s17078_s3 }
 0x383   : > { %v13477_v10 = vsel %vm17081_vm12, %v10052_v35, %v16566_v21  ;;  %v3438_v19 = vsel %vm17083_vm11, %v10048_v32, %v10052_v35  ;;  %v13534_v21 = vld [vmem:[#allocation2 + $0x70] sm:$0xff]  ;;  %vm17101_vm12 = vmmov %vm17093_vm7 }
 0x384   : > { %10325 = vrot.lane.b32.xlu1 %v13286_v17, %s17050_s2  ;;  %v13481_v0 = vpop.permute.xlu0 %10070  ;;  %v13483_v63 = vpop.permute.xlu1 %10060  ;;  %v8717_v36 = vpack.c.bf16 %v3438_v19, %v3364_v3  ;;  %v13524_v3 = vld [vmem:[#allocation2 + $0x80] sm:$0xff]  ;;  %vm17115_vm11 = vmmov %vm17113_vm15 }
 0x385   : > { %v10062_v19 = vunpack.i.l.bf16 %v13483_v63  ;;  %v17107_v50 = vunpack.i.h.bf16 %v13481_v0 }
 0x386   : > { %10380 = vrot.lane.b32.xlu0 %v13181_v48, %s17085_s23  ;;  %8718 = vmatprep.subr.bf16.mxu1 %v8717_v36  ;;  %v5191_v48 = vld [vmem:[#allocation2 + $0x78] sm:$0xff] }
 0x387   : > { %8720 = vmatpush1.bf16.msra.mxu1 %v8719_v12  ;;  %v10404_v53 = vpack.i.bf16 %v5191_v48, %v13152_v7  ;;  %v10354_v43 = vpack.i.bf16 %v13144_v44, %v5191_v48  ;;  %v10058_v44 = vunpack.i.h.bf16 %v10056_v51  ;;  %v10057_v7 = vunpack.i.l.bf16 %v10056_v51 }
 0x388   : > { %10330 = vrot.lane.b32.xlu1 %v13262_v9, %s17051_s19  ;;  %v13492_v59 = vpop.permute.xlu0 %10080  ;;  %v13494_v32 = vpop.permute.xlu1 %10065 }
 0x389   : > { %17086 = vst [vmem:[#allocation66_spill] sm:$0xff] %v13494_v32  ;;  %v3511_v51 = vsel %vm17093_vm7, %v10057_v7, %v10058_v44  ;;  %v10067_v13 = vunpack.i.l.bf16 %v13494_v32  ;;  %vm17118_vm7 = vmmov %vm17116_vm8 }
 0x38a   : > { %10390 = vrot.lane.b32.xlu0 %v13286_v17, %s17053_s26 }
 0x38c   : > { %10345 = vrot.lane.b32.xlu1 %v13286_v17, %s17052_s16  ;;  %v13500_v25 = vpop.permute.xlu0 %10090  ;;  %v13502_v39 = vpop.permute.xlu1 %10075  ;;  %v13514_v17 = vld [vmem:[#allocation2 + $0x68] sm:$0xff] }
 0x38d   : > { %17087 = vst [vmem:[#allocation53_spill] sm:$0xff] %v13502_v39  ;;  %v10414_v22 = vpack.i.bf16 %v13175_v54, %v13514_v17  ;;  %v10374_v12 = vpack.i.bf16 %v13524_v3, %v13514_v17 }
 0x38e   : > { %10395 = vrot.lane.b32.xlu0 %v13189_v24, %s17085_s23 }
 0x390   : > { %10350 = vrot.lane.b32.xlu1 %v13262_v9, %s17053_s26  ;;  %v13508_v29 = vpop.permute.xlu0 %10105  ;;  %v13510_v8 = vpop.permute.xlu1 %10085 }
 0x391   : > { %17088 = vst [vmem:[#allocation70_spill] sm:$0xff] %v13508_v29  ;;  %17089 = vst [vmem:[#allocation71_spill] sm:$0xff] %v13510_v8 }
 0x392   : > { %10405 = vrot.lane.b32.xlu0 %v10404_v53, %s17090_s29 }
 0x394   : > { %10355 = vrot.lane.b32.xlu1 %v10354_v43, %s17065_s18  ;;  %v13518_v35 = vpop.permute.xlu0 %10110  ;;  %v13520_v24 = vpop.permute.xlu1 %10095  ;;  %v9396_v43 = vunpack.i.h.bf16 %v16928_v49  ;;  %v5338_v49 = vld [vmem:[%s16367_s4 + $0x8] sm:$0xff] }
 0x395   : > { %17091 = vst [vmem:[#allocation62_spill] sm:$0xff] %v13518_v35  ;;  %5766 = vmatprep.mubr.f32.mxu1 %v5338_v49  ;;  %5920 = vmatprep.mubr.f32.mxu0 %v5338_v49 }
 0x396   : > { %10415 = vrot.lane.b32.xlu0 %v10414_v22, %s17090_s29  ;;  %v3512_v22 = vsel %vm17094_vm9, %v10058_v44, %v10062_v19  ;;  %vm17119_vm9 = vmmov %vm17118_vm7 }
 0x398   : > { %10365 = vrot.lane.b32.xlu1 %v10404_v53, %s17092_s28  ;;  %v10136_v36 = vpop.permute.xlu0 %10135  ;;  %v13529_v14 = vpop.permute.xlu1 %10100 }
 0x399   : > { %v10138_v15 = vunpack.i.h.bf16 %v10136_v36  ;;  %v10137_v54 = vunpack.i.l.bf16 %v10136_v36 }
 0x39a   : > { %10425 = vrot.lane.b32.xlu0 %v13262_v9, %s17090_s29  ;;  %v10384_v9 = vpack.i.bf16 %v5191_v48, %v13534_v21 }
 0x39b   : > { %v3585_v53 = vsel %vm435_vm1, %v9396_v43, %v10137_v54  ;;  %v3586_v1 = vsel %vm435_vm1, %v10137_v54, %v10138_v15  ;;  %v5267_v43 = vld [vmem:[#allocation2 + $0x88] sm:$0xff]  ;;  %v5268_v54 = vld [vmem:[#allocation2 + $0x90] sm:$0xff] }
 0x39c   : > { %10375 = vrot.lane.b32.xlu1 %v10374_v12, %s17092_s28  ;;  %v13546_v36 = vpop.permute.xlu0 %10150  ;;  %v8721_v46 = vpack.c.bf16 %v3586_v1, %v3512_v22  ;;  %v8723_v16 = vpack.c.bf16 %v3585_v53, %v3511_v51  ;;  %v16582_v51 = vunpack.i.h.bf16 %v13483_v63  ;;  %v13580_v49 = vpack.i.bf16 %v5268_v54, %v5267_v43 }
 0x39e   : > { %v13548_v5 = vpop.permute.xlu1 %10115  ;;  %10435 = vrot.lane.b32.xlu0 %v13341_v61, %s17058_s13  ;;  %8722 = vmatprep.subr.bf16.mxu1 %v8721_v46 }
 0x39f   : > { %17095 = vst [vmem:[#allocation55_spill] sm:$0xff] %v13548_v5  ;;  %8724 = vmatpush1.bf16.msra.mxu1 %v8723_v16 }
 0x3a0   : > { %10385 = vrot.lane.b32.xlu1 %v10384_v9, %s17096_s12  ;;  %v13554_v44 = vpop.permute.xlu0 %10155 }
 0x3a1   : > { %v10157_v6 = vunpack.i.l.bf16 %v13554_v44 }
 0x3a2   : > { %v13556_v7 = vpop.permute.xlu1 %10120  ;;  %10445 = vrot.lane.b32.xlu0 %v13341_v61, %s17061_s0 }
 0x3a3   : > { %17097 = vst [vmem:[#allocation64_spill] sm:$0xff] %v13556_v7 }
 0x3a4   : > { %10400 = vrot.lane.b32.xlu1 %v10374_v12, %s17096_s12  ;;  %v13561_v1 = vpop.permute.xlu0 %10170 }
 0x3a6   : > { %v13563_v48 = vpop.permute.xlu1 %10125  ;;  %10455 = vrot.lane.b32.xlu0 %v13341_v61, %s17068_s17 }
 0x3a7   : > { %17098 = vst [vmem:[#allocation85_spill] sm:$0xff] %v13563_v48 }
 0x3a8   : > { %10410 = vrot.lane.b32.xlu1 %v10384_v9, %s17099_s30  ;;  %v13568_v46 = vpop.permute.xlu0 %10175 }
 0x3aa   : > { %v13570_v16 = vpop.permute.xlu1 %10130  ;;  %10460 = vrot.lane.b32.xlu0 %v13341_v61, %s17073_s1 }
 0x3ab   : > { %17100 = vst [vmem:[#allocation58_spill] sm:$0xff] %v13570_v16 }
 0x3ac   : > { %10420 = vrot.lane.b32.xlu1 %v10374_v12, %s17099_s30  ;;  %v13576_v53 = vpop.permute.xlu0 %10180  ;;  %v13590_v12 = vsel %vm17101_vm12, %v10062_v19, %v16582_v51  ;;  %vm17121_vm12 = vmmov %vm17115_vm11 }
 0x3ae   : > { %v13578_v22 = vpop.permute.xlu1 %10140  ;;  %10465 = vrot.lane.b32.xlu0 %v13341_v61, %s17063_s10 }
 0x3af   : > { %v16583_v9 = vunpack.i.l.bf16 %v13578_v22 }
 0x3b0   : > { %10430 = vrot.lane.b32.xlu1 %v13580_v49, %s17099_s30  ;;  %v13598_v38 = vpop.permute.xlu0 %10190 }
 0x3b1   : > { %v13595_v45 = vsel %vm435_vm1, %v10138_v15, %v16583_v9  ;;  %v9456_v15 = vunpack.i.h.bf16 %v16965_v62  ;;  %v17103_v62 = vunpack.i.h.bf16 %v13554_v44 }
 0x3b2   : > { %v13600_v58 = vpop.permute.xlu1 %10145  ;;  %10470 = vrot.lane.b32.xlu0 %v13341_v61, %s17065_s18 }
 0x3b3   : > { %v16589_v19 = vunpack.i.h.bf16 %v13600_v58  ;;  %v10147_v51 = vunpack.i.l.bf16 %v13600_v58  ;;  %v3733_v28 = vsel %vm585_vm2, %v9456_v15, %v10157_v6  ;;  %v3734_v47 = vsel %vm585_vm2, %v10157_v6, %v17103_v62 }
 0x3b4   : > { %10440 = vrot.lane.b32.xlu1 %v13341_v61, %s17102_s20  ;;  %v13615_v18 = vpop.permute.xlu0 %10200  ;;  %v13633_v15 = vpack.i.bf16 %v5267_v43, %v13524_v3  ;;  %v16598_v3 = vunpack.i.l.bf16 %v13561_v1  ;;  %v10183_v43 = vunpack.i.h.bf16 %v13576_v53  ;;  %v10077_v6 = vunpack.i.l.bf16 %v13502_v39 }
 0x3b5   : > { %v3659_v9 = vsel %vm510_vm0, %v9426_v27, %v10147_v51  ;;  %v3660_v26 = vsel %vm510_vm0, %v10147_v51, %v16589_v19  ;;  %v10072_v19 = vunpack.i.l.bf16 %v13481_v0  ;;  %v17105_v51 = vunpack.i.h.bf16 %v13494_v32 }
 0x3b6   : > { %v13617_v60 = vpop.permute.xlu1 %10160  ;;  %v8727_v52 = vpack.c.bf16 %v3733_v28, %v3659_v9  ;;  %10475 = vrot.lane.b32.xlu0 %v13351_v11, %s17050_s2  ;;  %v8725_v27 = vpack.c.bf16 %v3734_v47, %v3660_v26  ;;  %v13639_v28 = vpack.i.bf16 %v13622_v56, %v5268_v54  ;;  %v10178_v9 = vunpack.i.h.bf16 %v13568_v46 }
 0x3b7   : > { %v10177_v47 = vunpack.i.l.bf16 %v13568_v46  ;;  %v10193_v32 = vunpack.i.h.bf16 %v13598_v38 }
 0x3b8   : > { %10450 = vrot.lane.b32.xlu1 %v13341_v61, %s17054_s22  ;;  %8726 = vmatprep.subr.bf16.mxu1 %v8725_v27  ;;  %v13645_v26 = vpop.permute.xlu0 %10210  ;;  %v13669_v4 = vsel %vm735_vm4, %v10178_v9, %v17105_v51  ;;  %v10192_v51 = vunpack.i.l.bf16 %v13598_v38 }
 0x3b9   : > { %17104 = vst [vmem:[#allocation57_spill] sm:$0xff] %v13645_v26  ;;  %8728 = vmatpush1.bf16.msra.mxu1 %v8727_v52  ;;  %v10182_v52 = vunpack.i.l.bf16 %v13576_v53  ;;  %v3881_v41 = vsel %vm735_vm4, %v10067_v13, %v10177_v47  ;;  %v3882_v53 = vsel %vm735_vm4, %v10177_v47, %v10178_v9  ;;  %v17110_v47 = vunpack.i.h.bf16 %v13502_v39 }
 0x3ba   : > { %v10166_v61 = vpop.permute.xlu1 %10165  ;;  %10485 = vrot.lane.b32.xlu0 %v13351_v11, %s17052_s16  ;;  %s17109_s16 = smov 38  }
 0x3bb   : > { %v10168_v62 = vunpack.i.h.bf16 %v10166_v61  ;;  %v10167_v54 = vunpack.i.l.bf16 %v10166_v61 }
 0x3bc   : > { %10480 = vrot.lane.b32.xlu1 %v13351_v11, %s17051_s19  ;;  %v13671_v57 = vpop.permute.xlu0 %10220  ;;  %s17114_s19 = smov 22  }
 0x3bd   : > { %v13662_v27 = vsel %vm660_vm3, %v10168_v62, %v16598_v3  ;;  %v3807_v61 = vsel %vm660_vm3, %v9486_v20, %v10167_v54  ;;  %17106 = vst [vmem:[#allocation76_spill] sm:$0xff] %v13671_v57  ;;  %v3808_v46 = vsel %vm660_vm3, %v10167_v54, %v10168_v62  ;;  %v13678_v3 = vsel %vm810_vm5, %v10183_v43, %v17107_v50 }
 0x3be   : > { %v10186_v42 = vpop.permute.xlu1 %10185  ;;  %17108 = vst [vmem:[#allocation81_spill] sm:$0xff] %v13678_v3  ;;  %v8731_v13 = vpack.c.bf16 %v3881_v41, %v3807_v61  ;;  %10490 = vrot.lane.b32.xlu0 %v13633_v15, %s17109_s16  ;;  %v8729_v62 = vpack.c.bf16 %v3882_v53, %v3808_v46  ;;  %v3956_v41 = vsel %vm810_vm5, %v10182_v52, %v10183_v43  ;;  %v10087_v54 = vunpack.i.l.bf16 %v13510_v8 }
 0x3bf   : > { %v10188_v20 = vunpack.i.h.bf16 %v10186_v42  ;;  %v10187_v40 = vunpack.i.l.bf16 %v10186_v42  ;;  %v3955_v61 = vsel %vm810_vm5, %v10072_v19, %v10182_v52  ;;  %v10203_v52 = vunpack.i.h.bf16 %v13615_v18 }
 0x3c0   : > { %10495 = vrot.lane.b32.xlu1 %v13351_v11, %s17053_s26  ;;  %8730 = vmatprep.subr.bf16.mxu1 %v8729_v62  ;;  %v13698_v11 = vpop.permute.xlu0 %10235  ;;  %v10202_v62 = vunpack.i.l.bf16 %v13615_v18  ;;  %s17139_s26 = smov 18  }
 0x3c1   : > { %v4029_v50 = vsel %vm885_vm6, %v10077_v6, %v10187_v40  ;;  %v13692_v42 = vsel %vm885_vm6, %v10188_v20, %v17110_v47  ;;  %v4030_v38 = vsel %vm885_vm6, %v10187_v40, %v10188_v20  ;;  %17111 = vst [vmem:[#allocation56_spill] sm:$0xff] %v13698_v11  ;;  %8732 = vmatpush1.bf16.msra.mxu1 %v8731_v13  ;;  %v10097_v40 = vunpack.i.l.bf16 %v13520_v24 }
 0x3c2   : > { %v10196_v46 = vpop.permute.xlu1 %10195  ;;  %v8733_v53 = vpack.c.bf16 %v4030_v38, %v3956_v41  ;;  %v8735_v43 = vpack.c.bf16 %v4029_v50, %v3955_v61  ;;  %v17112_v20 = vunpack.i.h.bf16 %v13492_v59  ;;  %10505 = vrot.lane.b32.xlu0 %v13633_v15, %s17058_s13  ;;  %v4104_v13 = vsel %vm17115_vm11, %v10192_v51, %v10193_v32 }
 0x3c3   : > { %v10198_v47 = vunpack.i.h.bf16 %v10196_v46  ;;  %v10197_v39 = vunpack.i.l.bf16 %v10196_v46  ;;  %v17117_v41 = vunpack.i.h.bf16 %v13510_v8  ;;  %v17120_v46 = vunpack.i.l.bf16 %v13492_v59 }
 0x3c4   : > { %v13707_v19 = vsel %vm17113_vm15, %v10193_v32, %v17112_v20  ;;  %10500 = vrot.lane.b32.xlu1 %v13633_v15, %s17114_s19  ;;  %8734 = vmatprep.subr.bf16.mxu1 %v8733_v53  ;;  %v13727_v9 = vpop.permute.xlu0 %10240  ;;  %v10212_v8 = vunpack.i.l.bf16 %v13645_v26  ;;  %vm17123_vm15 = vcmask 146432   ;;  %vm17125_vm11 = vcmask 15360  }
 0x3c5   : > { %v4177_v50 = vsel %vm17116_vm8, %v10087_v54, %v10197_v39  ;;  %v13720_v38 = vsel %vm17118_vm7, %v10198_v47, %v17117_v41  ;;  %v4178_v61 = vsel %vm17119_vm9, %v10197_v39, %v10198_v47  ;;  %v4103_v20 = vsel %vm17121_vm12, %v17120_v46, %v10192_v51  ;;  %8736 = vmatpush1.bf16.msra.mxu1 %v8735_v43  ;;  %vm17127_vm8 = vmmov %vm17125_vm11 }
 0x3c6   : > { %v10206_v32 = vpop.permute.xlu1 %10205  ;;  %v8737_v18 = vpack.c.bf16 %v4178_v61, %v4104_v13  ;;  %v8739_v3 = vpack.c.bf16 %v4177_v50, %v4103_v20  ;;  %v10092_v39 = vunpack.i.l.bf16 %v13500_v25  ;;  %v17122_v47 = vunpack.i.h.bf16 %v13500_v25  ;;  %10515 = vrot.lane.b32.xlu0 %v13633_v15, %s17102_s20  ;;  %vm17129_vm7 = vmmov %vm17123_vm15 }
 0x3c7   : > { %v10208_v41 = vunpack.i.h.bf16 %v10206_v32  ;;  %v10207_v53 = vunpack.i.l.bf16 %v10206_v32  ;;  %v17126_v43 = vunpack.i.h.bf16 %v13520_v24  ;;  %v4252_v50 = vsel %vm17129_vm7, %v10202_v62, %v10203_v52  ;;  %vm17130_vm9 = vmmov %vm17127_vm8 }
 0x3c8   : > { %v13736_v51 = vsel %vm17123_vm15, %v10203_v52, %v17122_v47  ;;  %10510 = vrot.lane.b32.xlu1 %v13639_v28, %s17109_s16  ;;  %8738 = vmatprep.subr.bf16.mxu1 %v8737_v18  ;;  %vm17131_vm12 = vmmov %vm17129_vm7  ;;  %v13751_v32 = vpop.permute.xlu0 %10255  ;;  %v17134_v52 = vunpack.i.h.bf16 %v13645_v26  ;;  %vm17135_vm15 = vcmask 7168   ;;  %vm17140_vm7 = vcmask 1039360  }
 0x3c9   : > { %17124 = vst [vmem:[#allocation72_spill] sm:$0xff] %v13736_v51  ;;  %v4325_v13 = vsel %vm17125_vm11, %v10097_v40, %v10207_v53  ;;  %v13746_v61 = vsel %vm17127_vm8, %v10208_v41, %v17126_v43  ;;  %v4326_v46 = vsel %vm17130_vm9, %v10207_v53, %v10208_v41  ;;  %v4251_v20 = vsel %vm17131_vm12, %v10092_v39, %v10202_v62  ;;  %vm17136_vm11 = vmmov %vm17135_vm15 }
 0x3ca   : > { %17128 = vst [vmem:[#allocation24_spill] sm:$0xff] %v13746_v61  ;;  %17132 = vst [vmem:[#allocation80_spill] sm:$0xff] %v13751_v32  ;;  %v13753_v47 = vpop.permute.xlu1 %10215  ;;  %v8741_v54 = vpack.c.bf16 %v4326_v46, %v4252_v50  ;;  %8740 = vmatpush1.bf16.msra.mxu1 %v8739_v3  ;;  %v8743_v18 = vpack.c.bf16 %v4325_v13, %v4251_v20  ;;  %v4400_v41 = vsel %vm17135_vm15, %v10212_v8, %v17134_v52  ;;  %vm17138_vm8 = vcmask 1031168  }
 0x3cb   : > { %17133 = vst [vmem:[#allocation68_spill] sm:$0xff] %v13753_v47  ;;  %v16605_v6 = vunpack.i.h.bf16 %v13753_v47  ;;  %v10217_v43 = vunpack.i.l.bf16 %v13753_v47  ;;  %v10102_v62 = vunpack.i.l.bf16 %v13529_v14  ;;  %10525 = vrot.lane.b32.xlu0 %v13639_v28, %s17114_s19  ;;  %v10118_v53 = vunpack.i.h.bf16 %v13548_v5  ;;  %vm17141_vm9 = vmmov %vm17138_vm8 }
 0x3cc   : > { %10520 = vrot.lane.b32.xlu1 %v13633_v15, %s17061_s0  ;;  %8742 = vmatprep.subr.bf16.mxu1 %v8741_v54  ;;  %v13769_v39 = vpop.permute.xlu0 %10260  ;;  %v8745_v50 = vpack.c.bf16 %v13534_v21, %v4400_v41  ;;  %v16608_v46 = vunpack.i.l.bf16 %v13508_v29  ;;  %v10222_v54 = vunpack.i.l.bf16 %v13671_v57  ;;  %v10108_v41 = vunpack.i.h.bf16 %v13508_v29  ;;  %vm17146_vm15 = vmmov %vm17140_vm7 }
 0x3cd   : > { %v4399_v3 = vsel %vm17136_vm11, %v10102_v62, %v10212_v8  ;;  %v4568_v40 = vsel %vm17138_vm8, %v10217_v43, %v16605_v6  ;;  %v10123_v8 = vunpack.i.h.bf16 %v13556_v7  ;;  %v16611_v7 = vunpack.i.l.bf16 %v13518_v35 }
 0x3ce   : > { %v13771_v13 = vpop.permute.xlu1 %10225  ;;  %8744 = vmatpush1.bf16.msra.mxu1 %v8743_v18  ;;  %v8747_v21 = vpack.c.bf16 %v13514_v17, %v4399_v3  ;;  %v4494_v18 = vsel %vm17140_vm7, %v10118_v53, %v16608_v46  ;;  %v4567_v62 = vsel %vm17141_vm9, %v10222_v54, %v10217_v43  ;;  %vm17145_vm12 = vcmask 900096   ;;  %vm17152_vm9 = vmmov %vm17146_vm15 }
 0x3cf   : > { %17137 = vst [vmem:[#allocation67_spill] sm:$0xff] %v13771_v13  ;;  %v10227_v52 = vunpack.i.l.bf16 %v13771_v13  ;;  %8746 = vmatprep.subr.bf16.mxu1 %v8745_v50  ;;  %10535 = vrot.lane.b32.xlu0 %v13633_v15, %s17139_s26  ;;  %v8749_v20 = vpack.c.bf16 %v4568_v40, %v4494_v18  ;;  %v17144_v17 = vunpack.i.h.bf16 %v13771_v13  ;;  %v10033_v46 = vunpack.i.h.bf16 %v13433_v23  ;;  %vm17147_vm11 = vmmov %vm17145_vm12 }
 0x3d0   : > { %10530 = vrot.lane.b32.xlu1 %v13639_v28, %s17058_s13  ;;  %v13792_v6 = vpop.permute.xlu0 %10275  ;;  %v10113_v29 = vunpack.i.h.bf16 %v13518_v35  ;;  %v4493_v43 = vsel %vm17146_vm15, %v10108_v41, %v10118_v53  ;;  %vm17148_vm8 = vcmask 891904   ;;  %vm17155_vm15 = vcmask 162816  }
 0x3d1   : > { %17142 = vst [vmem:[#allocation86_spill] sm:$0xff] %v13792_v6  ;;  %v4642_v3 = vsel %vm17145_vm12, %v10227_v52, %v17144_v17  ;;  %v8751_v54 = vpack.c.bf16 %v4567_v62, %v4493_v43  ;;  %vm17149_vm7 = vmmov %vm17148_vm8  ;;  %v17191_v35 = vunpack.i.l.bf16 %v13698_v11 }
 0x3d2   : > { %v13794_v50 = vpop.permute.xlu1 %10230  ;;  %8748 = vmatpush1.bf16.msra.mxu1 %v8747_v21  ;;  %v4716_v21 = vsel %vm17148_vm8, %v10123_v8, %v16611_v7  ;;  %v4715_v18 = vsel %vm17149_vm7, %v10113_v29, %v10123_v8  ;;  %v3228_v29 = vld [vmem:[#allocation2 + $0x20] sm:$0xff]  ;;  %vm17153_vm12 = vmmov %vm17152_vm9  ;;  %vm17159_vm8 = vcmask 883712  }
 0x3d3   : > { %17143 = vst [vmem:[#allocation74_spill] sm:$0xff] %v13794_v50  ;;  %v10232_v5 = vunpack.i.l.bf16 %v13794_v50  ;;  %8750 = vmatprep.subr.bf16.mxu1 %v8749_v20  ;;  %10545 = vrot.lane.b32.xlu0 %v13639_v28, %s17102_s20  ;;  %v8753_v53 = vpack.c.bf16 %v4716_v21, %v4642_v3  ;;  %v16613_v21 = vunpack.i.l.bf16 %v13751_v32 }
 0x3d4   : > { %10540 = vrot.lane.b32.xlu1 %v13633_v15, %s17048_s11  ;;  %v13813_v17 = vpop.permute.xlu0 %10280 }
 0x3d5   : > { %v4641_v40 = vsel %vm17147_vm11, %v10232_v5, %v10227_v52  ;;  %v16614_v20 = vunpack.i.l.bf16 %v13813_v17  ;;  %v17151_v5 = vunpack.i.l.bf16 %v13433_v23  ;;  %vm17158_vm11 = vmmov %vm17149_vm7 }
 0x3d6   : > { %v13815_v13 = vpop.permute.xlu1 %10245  ;;  %8752 = vmatpush1.bf16.msra.mxu1 %v8751_v54  ;;  %v8755_v41 = vpack.c.bf16 %v4715_v18, %v4641_v40  ;;  %v3227_v40 = vld [vmem:[#allocation2 + $0x18] sm:$0xff]  ;;  %v16615_v54 = vunpack.i.h.bf16 %v13727_v9 }
 0x3d7   : > { %17150 = vst [vmem:[#allocation82_spill] sm:$0xff] %v13815_v13  ;;  %v3291_v52 = vsel %vm17152_vm9, %v17151_v5, %v10033_v46  ;;  %8754 = vmatprep.subr.bf16.mxu1 %v8753_v53  ;;  %10555 = vrot.lane.b32.xlu0 %v13633_v15, %s17054_s22  ;;  %v16612_v62 = vunpack.i.l.bf16 %v13815_v13  ;;  %v3292_v8 = vsel %vm17153_vm12, %v10033_v46, %v16614_v20  ;;  %v17160_v20 = vunpack.i.h.bf16 %v13444_v55  ;;  %vm17162_vm9 = vmmov %vm17159_vm8 }
 0x3d8   : > { %10550 = vrot.lane.b32.xlu1 %v13639_v28, %s17061_s0  ;;  %v13829_v3 = vpop.permute.xlu0 %10290  ;;  %v8781_v23 = vpack.c.bf16 %v3292_v8, %v3228_v29  ;;  %v8783_v53 = vpack.c.bf16 %v3291_v52, %v3227_v40  ;;  %v16625_v55 = vunpack.i.h.bf16 %v13769_v39  ;;  %vm17164_vm12 = vcmask 154624  }
 0x3d9   : > { %v16616_v5 = vunpack.i.h.bf16 %v13829_v3  ;;  %v10292_v7 = vunpack.i.l.bf16 %v13829_v3  ;;  %v13845_v46 = vsel %vm885_vm6, %v16615_v54, %v16612_v62  ;;  %v10143_v62 = vunpack.i.h.bf16 %v13578_v22 }
 0x3da   : > { %v13831_v43 = vpop.permute.xlu1 %10250  ;;  %8756 = vmatpush1.bf16.msra.mxu1 %v8755_v41  ;;  %8782 = vmatprep.subr.bf16.mxu0 %v8781_v23  ;;  %17154 = vst [vmem:[#allocation90_spill] sm:$0xff] %v13845_v46 }
 0x3db   : > { %v16617_v18 = vunpack.i.h.bf16 %v13831_v43  ;;  %10565 = vrot.lane.b32.xlu0 %v13639_v28, %s17048_s11  ;;  %8784 = vmatpush1.bf16.msra.mxu0 %v8783_v53  ;;  %v3366_v54 = vsel %vm17149_vm7, %v17160_v20, %v10292_v7 }
 0x3dc   : > { %10560 = vrot.lane.b32.xlu1 %v13639_v28, %s17139_s26  ;;  %v13856_v52 = vpop.permute.xlu0 %10300 }
 0x3dd   : > { %v13852_v41 = vsel %vm17155_vm15, %v16617_v18, %v16613_v21  ;;  %v16622_v23 = vunpack.i.h.bf16 %v13856_v52  ;;  %v10302_v40 = vunpack.i.l.bf16 %v13856_v52  ;;  %v13868_v21 = vsel %vm17158_vm11, %v10292_v7, %v16616_v5 }
 0x3de   : > { %17156 = vst [vmem:[#allocation91_spill] sm:$0xff] %v13852_v41  ;;  %v13858_v29 = vpop.permute.xlu1 %10265  ;;  %v17161_v5 = vunpack.i.h.bf16 %v13460_v2  ;;  %v10162_v41 = vunpack.i.l.bf16 %v13617_v60  ;;  %v16628_v7 = vunpack.i.l.bf16 %v13792_v6  ;;  %vm17166_vm15 = vcmask 7168  }
 0x3df   : > { %17157 = vst [vmem:[#allocation78_spill] sm:$0xff] %v13858_v29  ;;  %10575 = vrot.lane.b32.xlu0 %v13580_v49, %s17057_s14  ;;  %v13875_v53 = vsel %vm17159_vm8, %v10302_v40, %v16622_v23  ;;  %vm17170_vm11 = vcmask 875520  }
 0x3e0   : > { %10570 = vrot.lane.b32.xlu1 %v13633_v15, %s17068_s17  ;;  %v3440_v18 = vsel %vm17162_vm9, %v17161_v5, %v10302_v40  ;;  %v13888_v32 = vpop.permute.xlu0 %10310  ;;  %v10152_v40 = vunpack.i.l.bf16 %v13546_v36  ;;  %vm17174_vm8 = vmmov %vm17170_vm11 }
 0x3e1   : > { %v8785_v8 = vpack.c.bf16 %v3440_v18, %v3366_v54  ;;  %v10312_v2 = vunpack.i.l.bf16 %v13888_v32  ;;  %v17163_v54 = vunpack.i.l.bf16 %v13858_v29 }
 0x3e2   : > { %v13890_v23 = vpop.permute.xlu1 %10270 }
 0x3e3   : > { %v16629_v20 = vunpack.i.h.bf16 %v13890_v23  ;;  %10585 = vrot.lane.b32.xlu0 %v13580_v49, %s17062_s21  ;;  %8786 = vmatprep.subr.bf16.mxu0 %v8785_v8  ;;  %v13907_v18 = vsel %vm17164_vm12, %v16625_v55, %v17163_v54  ;;  %v17168_v8 = vpack.c.bf16 %v13477_v10, %v13472_v33  ;;  %v17169_v55 = vunpack.i.h.bf16 %v13483_v63  ;;  %v13940_v63 = vld [vmem:[#allocation2 + $0xa0] sm:$0xff]  ;;  %vm17183_vm12 = vmmov %vm17174_vm8 }
 0x3e4   : > { %17165 = vst [vmem:[#allocation77_spill] sm:$0xff] %v13907_v18  ;;  %10580 = vrot.lane.b32.xlu1 %v13639_v28, %s17054_s22  ;;  %v13922_v46 = vpop.permute.xlu0 %10320  ;;  %v17172_v33 = vunpack.i.h.bf16 %v13617_v60 }
 0x3e5   : > { %v13915_v5 = vsel %vm17166_vm15, %v16629_v20, %v16628_v7  ;;  %8788 = vmatpush1.bf16.msra.mxu0 %v17168_v8  ;;  %v3514_v13 = vsel %vm17170_vm11, %v17169_v55, %v10312_v2  ;;  %v16633_v7 = vunpack.i.l.bf16 %v13922_v46  ;;  %v17171_v20 = vunpack.i.l.bf16 %v13578_v22  ;;  %vm17190_vm15 = vmmov %vm17162_vm9 }
 0x3e6   : > { %17167 = vst [vmem:[#allocation84_spill] sm:$0xff] %v13915_v5  ;;  %v13924_v54 = vpop.permute.xlu1 %10285  ;;  %v3736_v10 = vsel %vm585_vm2, %v10162_v41, %v17172_v33  ;;  %v17173_v55 = vunpack.i.h.bf16 %v13888_v32  ;;  %vm17192_vm11 = vmmov %vm17162_vm9 }
 0x3e7   : > { %v3588_v29 = vsel %vm435_vm1, %v17171_v20, %v10143_v62  ;;  %10595 = vrot.lane.b32.xlu0 %v13639_v28, %s17068_s17  ;;  %v13950_v22 = vsel %vm435_vm1, %v10143_v62, %v16633_v7  ;;  %v17175_v20 = vunpack.i.h.bf16 %v13546_v36  ;;  %v17178_v7 = vpack.c.bf16 %v13595_v45, %v13590_v12 }
 0x3e8   : > { %v8789_v8 = vpack.c.bf16 %v3588_v29, %v3514_v13  ;;  %v13945_v6 = vsel %vm17174_vm8, %v10312_v2, %v17173_v55  ;;  %10590 = vrot.lane.b32.xlu1 %v13633_v15, %s17073_s1  ;;  %v17176_v13 = vunpack.i.h.bf16 %v13554_v44  ;;  %v13960_v18 = vpop.permute.xlu0 %10335  ;;  %v17179_v44 = vunpack.i.h.bf16 %v13600_v58 }
 0x3e9   : > { %v3662_v33 = vsel %vm510_vm0, %v10152_v40, %v17175_v20  ;;  %17177 = vst [vmem:[#allocation25_spill] sm:$0xff] %v13960_v18  ;;  %v13971_v20 = vpack.i.bf16 %v13940_v63, %v13622_v56 }
 0x3ea   : > { %v3735_v29 = vsel %vm585_vm2, %v17176_v13, %v10162_v41  ;;  %8790 = vmatprep.subr.bf16.mxu0 %v8789_v8  ;;  %v13962_v2 = vpop.permute.xlu1 %10295  ;;  %v8793_v55 = vpack.c.bf16 %v3736_v10, %v3662_v33  ;;  %v3661_v41 = vsel %vm510_vm0, %v17179_v44, %v10152_v40 }
 0x3eb   : > { %8792 = vmatpush1.bf16.msra.mxu0 %v17178_v7  ;;  %10605 = vrot.lane.b32.xlu0 %v13633_v15, %s17063_s10  ;;  %v16634_v10 = vunpack.i.h.bf16 %v13962_v2  ;;  %v16636_v8 = vunpack.i.l.bf16 %v13962_v2  ;;  %v8795_v45 = vpack.c.bf16 %v3735_v29, %v3661_v41 }
 0x3ec   : > { %8794 = vmatprep.subr.bf16.mxu0 %v8793_v55  ;;  %10600 = vrot.lane.b32.xlu1 %v13971_v20, %s17057_s14  ;;  %v13982_v12 = vpop.permute.xlu0 %10340 }
 0x3ed   : > { %v13995_v33 = vsel %vm17149_vm7, %v16636_v8, %v16634_v10  ;;  %vm17193_vm7 = vmmov %vm17174_vm8 }
 0x3ee   : > { %v13984_v7 = vpop.permute.xlu1 %10305  ;;  %17180 = vst [vmem:[#allocation27_spill] sm:$0xff] %v13995_v33 }
 0x3ef   : > { %8796 = vmatpush1.bf16.msra.mxu0 %v8795_v45  ;;  %v16635_v58 = vunpack.i.h.bf16 %v13984_v7  ;;  %v16637_v40 = vunpack.i.l.bf16 %v13984_v7  ;;  %10615 = vrot.lane.b32.xlu0 %v13971_v20, %s17062_s21 }
 0x3f0   : > { %10610 = vrot.lane.b32.xlu1 %v13633_v15, %s17065_s18  ;;  %v14006_v29 = vpop.permute.xlu0 %10360 }
 0x3f1   : > { %v14002_v13 = vsel %vm17162_vm9, %v16637_v40, %v16635_v58  ;;  %v16642_v58 = vunpack.i.h.bf16 %v13922_v46  ;;  %v10363_v50 = vunpack.i.h.bf16 %v14006_v29  ;;  %v10362_v47 = vunpack.i.l.bf16 %v14006_v29 }
 0x3f2   : > { %17181 = vst [vmem:[#allocation88_spill] sm:$0xff] %v14002_v13  ;;  %v14008_v55 = vpop.permute.xlu1 %10315  ;;  %vm17194_vm9 = vcmask 867328  }
 0x3f3   : > { %10625 = vrot.lane.b32.xlu0 %v13580_v49, %s17078_s3  ;;  %v16640_v41 = vunpack.i.h.bf16 %v14008_v55  ;;  %v16643_v45 = vunpack.i.l.bf16 %v14008_v55 }
 0x3f4   : > { %10620 = vrot.lane.b32.xlu1 %v13639_v28, %s17073_s1  ;;  %v14018_v10 = vpop.permute.xlu0 %10370 }
 0x3f5   : > { %v14031_v44 = vsel %vm17183_vm12, %v16643_v45, %v16640_v41  ;;  %v16651_v45 = vunpack.i.l.bf16 %v13960_v18  ;;  %v10372_v26 = vunpack.i.l.bf16 %v14018_v10  ;;  %vm17195_vm12 = vcmask 736256  }
 0x3f6   : > { %v14020_v15 = vpop.permute.xlu1 %10325  ;;  %17184 = vst [vmem:[#allocation93_spill] sm:$0xff] %v14031_v44 }
 0x3f7   : > { %17182 = vst [vmem:[#allocation87_spill] sm:$0xff] %v14020_v15  ;;  %v16641_v62 = vunpack.i.l.bf16 %v14020_v15  ;;  %10635 = vrot.lane.b32.xlu0 %v13639_v28, %s17063_s10  ;;  %v16654_v15 = vunpack.i.h.bf16 %v13982_v12 }
 0x3f8   : > { %10630 = vrot.lane.b32.xlu1 %v13580_v49, %s17092_s28  ;;  %v14042_v40 = vpop.permute.xlu0 %10380 }
 0x3f9   : > { %v14038_v8 = vsel %vm435_vm1, %v16642_v58, %v16641_v62 }
 0x3fa   : > { %17185 = vst [vmem:[#allocation26_spill] sm:$0xff] %v14038_v8  ;;  %v14044_v33 = vpop.permute.xlu1 %10330 }
 0x3fb   : > { %10645 = vrot.lane.b32.xlu0 %v13580_v49, %s17085_s23  ;;  %v16652_v41 = vunpack.i.h.bf16 %v14044_v33 }
 0x3fc   : > { %10640 = vrot.lane.b32.xlu1 %v13639_v28, %s17065_s18  ;;  %v14053_v62 = vpop.permute.xlu0 %10390 }
 0x3fd   : > { %v14067_v13 = vsel %vm510_vm0, %v16652_v41, %v16651_v45  ;;  %v10238_v45 = vunpack.i.h.bf16 %v13698_v11 }
 0x3fe   : > { %v14055_v58 = vpop.permute.xlu1 %10345  ;;  %17187 = vst [vmem:[#allocation30_spill] sm:$0xff] %v14067_v13 }
 0x3ff   : > { %17186 = vst [vmem:[#allocation34_spill] sm:$0xff] %v14055_v58  ;;  %v16653_v5 = vunpack.i.l.bf16 %v14055_v58  ;;  %10655 = vrot.lane.b32.xlu0 %v13971_v20, %s17078_s3  ;;  %v10133_v58 = vunpack.i.h.bf16 %v13570_v16 }
 0x400   : > { %10650 = vrot.lane.b32.xlu1 %v13580_v49, %s17096_s12  ;;  %v14078_v44 = vpop.permute.xlu0 %10395 }
 0x401   : > { %v14074_v28 = vsel %vm585_vm2, %v16654_v15, %v16653_v5  ;;  %17189 = vst [vmem:[#allocation28_spill] sm:$0xff] %v14078_v44  ;;  %v10128_v5 = vunpack.i.h.bf16 %v13563_v48 }
 0x402   : > { %17188 = vst [vmem:[#allocation31_spill] sm:$0xff] %v14074_v28  ;;  %v14080_v8 = vpop.permute.xlu1 %10350  ;;  %v14098_v28 = vld [vmem:[#allocation2 + $0xa8] sm:$0xff] }
 0x403   : > { %10665 = vrot.lane.b32.xlu0 %v13971_v20, %s17085_s23  ;;  %v4789_v41 = vsel %vm17190_vm15, %v10238_v45, %v10128_v5  ;;  %v4790_v48 = vsel %vm17192_vm11, %v10128_v5, %v17191_v35  ;;  %v14118_v11 = vpack.i.bf16 %v14098_v28, %v13940_v63  ;;  %vm17197_vm15 = vmmov %vm17194_vm9 }
 0x404   : > { %10660 = vrot.lane.b32.xlu1 %v13971_v20, %s17092_s28  ;;  %v14091_v49 = vpop.permute.xlu0 %10405  ;;  %vm17198_vm11 = vmmov %vm17194_vm9 }
 0x406   : > { %v14093_v15 = vpop.permute.xlu1 %10355 }
 0x407   : > { %v10358_v18 = vunpack.i.h.bf16 %v14093_v15  ;;  %v16670_v13 = vunpack.i.l.bf16 %v14093_v15  ;;  %5223 = vrot.lane.b32.xlu0 %v13622_v56, %s17090_s29 }
 0x408   : > { %10670 = vrot.lane.b32.xlu1 %v13971_v20, %s17096_s12  ;;  %v14114_v57 = vpop.permute.xlu0 %10415  ;;  %v4938_v20 = vsel %vm17194_vm9, %v10362_v47, %v10363_v50  ;;  %vm17204_vm9 = vcmask 728064  }
 0x409   : > { %v4863_v16 = vsel %vm17174_vm8, %v10358_v18, %v10133_v58  ;;  %v4864_v45 = vsel %vm17193_vm7, %v10133_v58, %v16670_v13  ;;  %v16669_v18 = vunpack.i.h.bf16 %v14018_v10  ;;  %vm17200_vm8 = vmmov %vm17195_vm12 }
 0x40a   : > { %v10366_v51 = vpop.permute.xlu1 %10365  ;;  %v8757_v35 = vpack.c.bf16 %v4864_v45, %v4790_v48  ;;  %v8759_v5 = vpack.c.bf16 %v4863_v16, %v4789_v41  ;;  %v4937_v45 = vsel %vm17197_vm15, %v10372_v26, %v10362_v47  ;;  %vm17201_vm7 = vmmov %vm17200_vm8 }
 0x40b   : > { %v10368_v61 = vunpack.i.h.bf16 %v10366_v51  ;;  %v10367_v29 = vunpack.i.l.bf16 %v10366_v51  ;;  %10675 = vrot.lane.b32.xlu0 %v14118_v11, %s17109_s16  ;;  %vm17209_vm15 = vmmov %vm17204_vm9 }
 0x40c   : > { %8758 = vmatprep.subr.bf16.mxu1 %v8757_v35  ;;  %5297 = vrot.lane.b32.xlu1 %v13622_v56, %s17099_s30  ;;  %v14128_v48 = vpop.permute.xlu0 %10425  ;;  %v14138_v56 = vsel %vm17198_vm11, %v10363_v50, %v16669_v18  ;;  %v10383_v35 = vunpack.i.h.bf16 %v14042_v40  ;;  %vm17214_vm11 = vcmask 711680  }
 0x40d   : > { %8760 = vmatpush1.bf16.msra.mxu1 %v8759_v5  ;;  %v5012_v63 = vsel %vm17195_vm12, %v10367_v29, %v10368_v61  ;;  %17196 = vst [vmem:[#allocation37_spill] sm:$0xff] %v14128_v48  ;;  %17199 = vst [vmem:[#allocation48_spill] sm:$0xff] %v14138_v56  ;;  %v10382_v5 = vunpack.i.l.bf16 %v14042_v40  ;;  %v10407_v56 = vunpack.i.l.bf16 %v14091_v49 }
 0x40e   : > { %v14130_v16 = vpop.permute.xlu1 %10375  ;;  %v8761_v51 = vpack.c.bf16 %v5012_v63, %v4938_v20  ;;  %vm17207_vm12 = vmmov %vm17204_vm9 }
 0x40f   : > { %v16671_v58 = vunpack.i.h.bf16 %v14130_v16  ;;  %v10377_v41 = vunpack.i.l.bf16 %v14130_v16  ;;  %10685 = vrot.lane.b32.xlu0 %v14118_v11, %s17058_s13 }
 0x410   : > { %8762 = vmatprep.subr.bf16.mxu1 %v8761_v51  ;;  %10680 = vrot.lane.b32.xlu1 %v14118_v11, %s17114_s19  ;;  %v14152_v26 = vpop.permute.xlu0 %10435 }
 0x411   : > { %v5011_v20 = vsel %vm17200_vm8, %v10377_v41, %v10367_v29  ;;  %v14148_v63 = vsel %vm17201_vm7, %v10368_v61, %v16671_v58  ;;  %17203 = vst [vmem:[#allocation45_spill] sm:$0xff] %v14152_v26  ;;  %v10397_v29 = vunpack.i.l.bf16 %v14078_v44  ;;  %v5086_v61 = vsel %vm17204_vm9, %v10382_v5, %v10383_v35  ;;  %vm17219_vm7 = vmmov %vm17214_vm11 }
 0x412   : > { %17202 = vst [vmem:[#allocation42_spill] sm:$0xff] %v14148_v63  ;;  %v10386_v47 = vpop.permute.xlu1 %10385  ;;  %v8763_v50 = vpack.c.bf16 %v5011_v20, %v4937_v45  ;;  %vm17215_vm8 = vcmask 703488  }
 0x413   : > { %v10388_v18 = vunpack.i.h.bf16 %v10386_v47  ;;  %v10387_v13 = vunpack.i.l.bf16 %v10386_v47  ;;  %10695 = vrot.lane.b32.xlu0 %v14118_v11, %s17061_s0  ;;  %v5085_v40 = vsel %vm17207_vm12, %v10397_v29, %v10382_v5  ;;  %vm17220_vm9 = vmmov %vm17215_vm8 }
 0x414   : > { %8764 = vmatpush1.bf16.msra.mxu1 %v8763_v50  ;;  %10690 = vrot.lane.b32.xlu1 %v14118_v11, %s17102_s20  ;;  %v14164_v45 = vpop.permute.xlu0 %10445  ;;  %v17208_v50 = vunpack.i.h.bf16 %v14078_v44  ;;  %vm17224_vm12 = vmmov %vm17219_vm7 }
 0x415   : > { %v5160_v41 = vsel %vm2030_vm14, %v10387_v13, %v10388_v18  ;;  %17205 = vst [vmem:[#allocation50_spill] sm:$0xff] %v14164_v45  ;;  %v10408_v45 = vunpack.i.h.bf16 %v14091_v49  ;;  %v14199_v49 = vld [vmem:[%s16367_s4] sm:$0xff] }
 0x416   : > { %v14166_v20 = vpop.permute.xlu1 %10400  ;;  %v8765_v47 = vpack.c.bf16 %v5160_v41, %v5086_v61  ;;  %v14174_v26 = vsel %vm17209_vm15, %v10383_v35, %v17208_v50  ;;  %17213 = vst [vmem:[#allocation79_spill] sm:$0xff] %v14199_v49  ;;  %vm17225_vm15 = vmmov %vm17215_vm8 }
 0x417   : > { %17206 = vst [vmem:[#allocation59_spill] sm:$0xff] %v14166_v20  ;;  %v16680_v51 = vunpack.i.h.bf16 %v14166_v20  ;;  %v10402_v58 = vunpack.i.l.bf16 %v14166_v20  ;;  %17210 = vst [vmem:[#allocation52_spill] sm:$0xff] %v14174_v26  ;;  %10705 = vrot.lane.b32.xlu0 %v14118_v11, %s17048_s11  ;;  %v10252_v26 = vunpack.i.l.bf16 %v13831_v43 }
 0x418   : > { %8766 = vmatprep.subr.bf16.mxu1 %v8765_v47  ;;  %10700 = vrot.lane.b32.xlu1 %v14118_v11, %s17139_s26  ;;  %v14188_v35 = vpop.permute.xlu0 %10455 }
 0x419   : > { %v5159_v61 = vsel %vm2030_vm14, %v10402_v58, %v10387_v13  ;;  %v14184_v41 = vsel %vm2030_vm14, %v10388_v18, %v16680_v51  ;;  %17212 = vst [vmem:[#allocation63_spill] sm:$0xff] %v14188_v35  ;;  %v14194_v13 = vld [vmem:[#allocation2 + $0xb0] sm:$0xff]  ;;  %v10417_v18 = vunpack.i.l.bf16 %v14114_v57  ;;  %v5234_v58 = vsel %vm17214_vm11, %v10407_v56, %v10408_v45 }
 0x41a   : > { %17211 = vst [vmem:[#allocation69_spill] sm:$0xff] %v14184_v41  ;;  %v10411_v5 = vpop.permute.xlu1 %10410  ;;  %v8767_v29 = vpack.c.bf16 %v5159_v61, %v5085_v40  ;;  %v10427_v35 = vunpack.i.l.bf16 %v14128_v48  ;;  %vm5695_vm11 = vcmask 130048  }
 0x41b   : > { %v10413_v50 = vunpack.i.h.bf16 %v10411_v5  ;;  %v10412_v44 = vunpack.i.l.bf16 %v10411_v5  ;;  %10710 = vrot.lane.b32.xlu0 %v14118_v11, %s17054_s22 }
 0x41c   : > { %8768 = vmatpush1.bf16.msra.mxu1 %v8767_v29  ;;  %3879 = vrot.lane.b32.xlu1 %v14194_v13, %s17109_s16  ;;  %v14206_v61 = vpop.permute.xlu0 %10460  ;;  %v14211_v29 = vld [vmem:[%s16367_s4 + $0x20] sm:$0xff] }
 0x41d   : > { %v5308_v40 = vsel %vm17215_vm8, %v10412_v44, %v10413_v50  ;;  %17216 = vst [vmem:[#allocation73_spill] sm:$0xff] %v14206_v61  ;;  %17217 = vst [vmem:[#allocation89_spill] sm:$0xff] %v14211_v29  ;;  %vm17227_vm8 = vcmask 162816  }
 0x41e   : > { %v10421_v5 = vpop.permute.xlu1 %10420  ;;  %v8769_v47 = vpack.c.bf16 %v5308_v40, %v5234_v58  ;;  %v14222_v58 = vld [vmem:[%s16367_s4 + $0x18] sm:$0xff]  ;;  %v5233_v40 = vsel %vm17219_vm7, %v10417_v18, %v10407_v56  ;;  %v10242_v56 = vunpack.i.l.bf16 %v13727_v9  ;;  %v17223_v18 = vunpack.i.h.bf16 %v14128_v48  ;;  %vm17228_vm7 = vmmov %vm17220_vm9 }
 0x41f   : > { %v10422_v51 = vunpack.i.l.bf16 %v10421_v5  ;;  %5767 = vmatmul.mubr.f32.vlgmr.msra.gmra.mrb[8].mxu1 %v14199_v49  ;;  %v10423_v20 = vunpack.i.h.bf16 %v10421_v5  ;;  %4027 = vrot.lane.b32.xlu0 %v14194_v13, %s17058_s13  ;;  %17218 = vst [vmem:[#allocation83_spill] sm:$0xff] %v14222_v58  ;;  %v10418_v5 = vunpack.i.h.bf16 %v14114_v57 }
 0x420   : > { %8770 = vmatprep.subr.bf16.mxu1 %v8769_v47  ;;  %3953 = vrot.lane.b32.xlu1 %v14194_v13, %s17114_s19  ;;  %v14230_v41 = vpop.permute.xlu0 %10465  ;;  %v14236_v47 = vpack.i.bf16 %v14194_v13, %v14098_v28  ;;  %v14245_v57 = vsel %vm17224_vm12, %v10427_v35, %v17223_v18  ;;  %v14253_v28 = vld [vmem:[%s16367_s4 + $0x10] sm:$0xff] }
 0x421   : > { %v5307_v61 = vsel %vm17220_vm9, %v10422_v51, %v10412_v44  ;;  %5772 = vmatprep.mubr.f32.mxu1 %v14211_v29  ;;  %17221 = vst [vmem:[#allocation92_spill] sm:$0xff] %v14230_v41  ;;  %v5309_v29 = vsel %vm17225_vm15, %v10413_v50, %v10423_v20  ;;  %v16697_v50 = vmov 0.0   ;;  %vm17229_vm9 = vmmov %vm17224_vm12 }
 0x422   : > { %v14232_v49 = vpop.permute.xlu1 %10430  ;;  %v8771_v63 = vpack.c.bf16 %v5307_v61, %v5233_v40  ;;  %v17226_v61 = vunpack.i.h.bf16 %v13831_v43  ;;  %vm17230_vm12 = vmmov %vm17228_vm7 }
 0x423   : > { %17222 = vst [vmem:[#allocation94_spill] sm:$0xff] %v14232_v49  ;;  %v16695_v44 = vunpack.i.h.bf16 %v14232_v49  ;;  %v10432_v51 = vunpack.i.l.bf16 %v14232_v49  ;;  %5773 = vmatmul.mubr.f32.gmra.mrb[10].mxu1 %v14222_v58  ;;  %10720 = vrot.lane.b32.xlu0 %v14236_v47, %s17057_s14  ;;  %vm17231_vm15 = vmmov %vm17229_vm9 }
 0x424   : > { %8772 = vmatpush1.bf16.msra.mxu1 %v8771_v63  ;;  %v3052_v40 = vsel %vm17227_vm8, %v10252_v26, %v17226_v61  ;;  %10715 = vrot.lane.b32.xlu1 %v14118_v11, %s17068_s17  ;;  %v5236_v63 = vsel %vm17229_vm9, %v10418_v5, %v10427_v35  ;;  %v5235_v48 = vsel %vm17231_vm15, %v10408_v45, %v10418_v5  ;;  %v14269_v43 = vpop.permute.xlu0 %10470  ;;  %v17233_v5 = vmov 0.0  }
 0x425   : > { %v14261_v18 = vsel %vm17228_vm7, %v10432_v51, %v16695_v44  ;;  %5843 = vmatprep.mubr.f32.mxu1 %v16697_v50  ;;  %v5310_v58 = vsel %vm17230_vm12, %v10423_v20, %v10432_v51  ;;  %v8839_v41 = vpack.c.bf16 %v5309_v29, %v5235_v48  ;;  %v17232_v50 = vunpack.i.h.bf16 %v13727_v9 }
 0x426   : > { %v14271_v61 = vpop.permute.xlu1 %10440  ;;  %v8837_v49 = vpack.c.bf16 %v5310_v58, %v5236_v63  ;;  %v10272_v20 = vunpack.i.l.bf16 %v13890_v23  ;;  %v14286_v58 = vld [vmem:[%s16367_s4 + $0x28] sm:$0xff]  ;;  %v10262_v9 = vunpack.i.l.bf16 %v13769_v39  ;;  %vm17236_vm7 = vcmask 7168  }
 0x427   : > { %8447 = vmatmul.mubr.msk.f32.vlgmr.msra.gmra.mrb[8].mxu1 %vm5695_vm11, %v14253_v28  ;;  %v2978_v35 = vsel %vm885_vm6, %v10242_v56, %v17232_v50  ;;  %4175 = vrot.lane.b32.xlu0 %v14194_v13, %s17061_s0  ;;  %v17237_v63 = vunpack.i.h.bf16 %v13375_v37  ;;  %v17238_v44 = vunpack.i.h.bf16 %v13769_v39  ;;  %vm17239_vm9 = vcmask 154624   ;;  %vm17241_vm12 = vmmov %vm17236_vm7 }
 0x428   : > { %8838 = vmatprep.subr.bf16.mxu1 %v8837_v49  ;;  %v8841_v45 = vpack.c.bf16 %v3052_v40, %v2978_v35  ;;  %4101 = vrot.lane.b32.xlu1 %v14194_v13, %s17102_s20  ;;  %v14291_v48 = vpop.permute.xlu0 %10475  ;;  %v17234_v49 = vunpack.i.h.bf16 %v13373_v30  ;;  %v16699_v40 = vunpack.i.l.bf16 %v13924_v54  ;;  %vm17242_vm15 = vcmask 1039360  }
 0x429   : > { %8840 = vmatpush1.bf16.msra.mxu1 %v8839_v41  ;;  %5849 = vmatprep.mubr.f32.mxu1 %v17233_v5  ;;  %v17235_v41 = vunpack.i.h.bf16 %v13890_v23  ;;  %v2977_v30 = vsel %vm885_vm6, %v17237_v63, %v10242_v56  ;;  %v3126_v23 = vsel %vm17239_vm9, %v10262_v9, %v17238_v44  ;;  %v16700_v39 = vunpack.i.h.bf16 %v13561_v1 }
 0x42a   : > { %v14293_v29 = vpop.permute.xlu1 %10450  ;;  %8842 = vmatprep.subr.bf16.mxu1 %v8841_v45  ;;  %v3051_v51 = vsel %vm17227_vm8, %v17234_v49, %v10252_v26  ;;  %v10283_v26 = vunpack.i.h.bf16 %v13813_v17  ;;  %v17243_v44 = vunpack.i.h.bf16 %v13405_v31  ;;  %vm17244_vm8 = vmmov %vm17239_vm9  ;;  %vm17253_vm9 = vcmask 883712  }
 0x42b   : > { %8448 = vmatmul.mubr.msk.f32.gmra.mrb[10].mxu1 %vm5695_vm11, %v14286_v58  ;;  %10730 = vrot.lane.b32.xlu0 %v14118_v11, %s17073_s1  ;;  %v3200_v50 = vsel %vm17236_vm7, %v10272_v20, %v17235_v41  ;;  %v8843_v49 = vpack.c.bf16 %v3051_v51, %v2977_v30  ;;  %v17240_v41 = vunpack.i.h.bf16 %v13403_v34  ;;  %v3230_v30 = vld [vmem:[#allocation2 + $0x30] sm:$0xff]  ;;  %vm17247_vm7 = vmmov %vm17242_vm15 }
 0x42c   : > { %5997 = vmatprep.mubr.f32.mxu1 %v17233_v5  ;;  %10725 = vrot.lane.b32.xlu1 %v14236_v47, %s17062_s21  ;;  %v14314_v35 = vpop.permute.xlu0 %10485  ;;  %v8845_v56 = vpack.c.bf16 %v3200_v50, %v3126_v23  ;;  %v3294_v51 = vsel %vm17242_vm15, %v10283_v26, %v16699_v40  ;;  %v3125_v34 = vsel %vm17244_vm8, %v17243_v44, %v10262_v9  ;;  %v3229_v9 = vld [vmem:[#allocation2 + $0x28] sm:$0xff]  ;;  %v17251_v44 = vunpack.i.l.bf16 %v13984_v7 }
 0x42d   : > { %v3199_v37 = vsel %vm17241_vm12, %v17240_v41, %v10272_v20  ;;  %v8849_v41 = vpack.c.bf16 %v3294_v51, %v3230_v30  ;;  %vm17256_vm12 = vcmask 891904   ;;  %vm17259_vm15 = vcmask 875520  }
 0x42e   : > { %v14316_v45 = vpop.permute.xlu1 %10480  ;;  %v8847_v63 = vpack.c.bf16 %v3199_v37, %v3125_v34  ;;  %v17249_v37 = vld [vmem:[#allocation66_spill] sm:$0xff]  ;;  %v17252_v34 = vunpack.i.h.bf16 %v13856_v52  ;;  %v17254_v52 = vunpack.i.l.bf16 %v13962_v2  ;;  %vm17276_vm8 = vcmask 162816  }
 0x42f   : > { %8449 = vmatmul.mubr.msk.f32.vlgmr.msra.gmra.mrb[12].mxu1 %vm5695_vm11, %v14253_v28  ;;  %4323 = vrot.lane.b32.xlu0 %v14194_v13, %s17048_s11 }
 0x430   : > { %8844 = vmatpush1.bf16.msra.mxu1 %v8843_v49  ;;  %4249 = vrot.lane.b32.xlu1 %v14194_v13, %s17139_s26  ;;  %v14337_v20 = vpop.permute.xlu0 %10490  ;;  %v17246_v49 = vunpack.i.l.bf16 %v13813_v17  ;;  %v17248_v17 = vunpack.i.l.bf16 %v13561_v1 }
 0x431   : > { %8846 = vmatprep.subr.bf16.mxu1 %v8845_v56  ;;  %6003 = vmatprep.mubr.f32.mxu1 %v17233_v5  ;;  %v16701_v31 = vunpack.i.l.bf16 %v14337_v20  ;;  %v17250_v56 = vunpack.i.h.bf16 %v17249_v37  ;;  %v10353_v37 = vunpack.i.h.bf16 %v14080_v8 }
 0x432   : > { %v14339_v50 = vpop.permute.xlu1 %10495  ;;  %v3293_v23 = vsel %vm17247_vm7, %v17246_v49, %v10283_v26  ;;  %v3810_v26 = vsel %vm660_vm3, %v17248_v17, %v16700_v39  ;;  %v14374_v17 = vld [vmem:[%s16367_s4 + $0x8] sm:$0xff]  ;;  %v14384_v39 = vld [vmem:[#allocation2 + $0xb8] sm:$0xff]  ;;  %vm17279_vm7 = vcmask 154624  }
 0x433   : > { %17245 = vst [vmem:[#allocation95_spill] sm:$0xff] %v14339_v50  ;;  %8450 = vmatmul.mubr.msk.f32.gmra.mrb[14].mxu1 %vm5695_vm11, %v14286_v58  ;;  %10740 = vrot.lane.b32.xlu0 %v14118_v11, %s17065_s18  ;;  %v3884_v51 = vsel %vm735_vm4, %v17250_v56, %v16701_v31 }
 0x434   : > { %8848 = vmatpush1.bf16.msra.mxu1 %v8847_v63  ;;  %10735 = vrot.lane.b32.xlu1 %v14118_v11, %s17063_s10  ;;  %v3442_v63 = vsel %vm17253_vm9, %v17252_v34, %v17251_v44  ;;  %v14367_v30 = vpop.permute.xlu0 %10505  ;;  %v8797_v40 = vpack.c.bf16 %v3884_v51, %v3810_v26  ;;  %v17255_v44 = vunpack.i.h.bf16 %v13829_v3  ;;  %v17257_v26 = vunpack.i.l.bf16 %v14008_v55 }
 0x435   : > { %8850 = vmatprep.subr.bf16.mxu1 %v8849_v41  ;;  %v8851_v41 = vpack.c.bf16 %v3293_v23, %v3229_v9  ;;  %6074 = vmatprep.mubr.f32.mxu1 %v14374_v17  ;;  %v10332_v23 = vunpack.i.l.bf16 %v14044_v33  ;;  %v17258_v51 = vunpack.i.h.bf16 %v13888_v32  ;;  %v17260_v3 = vunpack.i.h.bf16 %v13481_v0  ;;  %v17263_v0 = vld [vmem:[#allocation53_spill] sm:$0xff] }
 0x436   : > { %v14369_v49 = vpop.permute.xlu1 %10500  ;;  %v3368_v34 = vsel %vm17256_vm12, %v17255_v44, %v17254_v52  ;;  %8798 = vmatprep.subr.bf16.mxu0 %v8797_v40  ;;  %v17261_v32 = vpack.c.bf16 %v13669_v4, %v13662_v27  ;;  %v14412_v40 = vpack.i.bf16 %v14384_v39, %v14194_v13  ;;  %v16704_v27 = vunpack.i.l.bf16 %v14053_v62 }
 0x437   : > { %v16702_v56 = vunpack.i.l.bf16 %v14369_v49  ;;  %10745 = vrot.lane.b32.xlu0 %v14236_v47, %s17078_s3  ;;  %v8853_v9 = vpack.c.bf16 %v3442_v63, %v3368_v34  ;;  %v3516_v31 = vsel %vm17259_vm15, %v17258_v51, %v17257_v26  ;;  %v10342_v63 = vunpack.i.l.bf16 %v13982_v12 }
 0x438   : > { %8852 = vmatpush1.bf16.msra.mxu1 %v8851_v41  ;;  %4397 = vrot.lane.b32.xlu1 %v14194_v13, %s17054_s22  ;;  %v14406_v52 = vpop.permute.xlu0 %10515  ;;  %v17262_v34 = vunpack.i.l.bf16 %v14367_v30  ;;  %v17264_v26 = vunpack.i.h.bf16 %v17263_v0  ;;  %v17267_v0 = vpack.c.bf16 %v13875_v53, %v13868_v21  ;;  %v10493_v21 = vunpack.i.h.bf16 %v14337_v20 }
 0x439   : > { %v3958_v41 = vsel %vm810_vm5, %v17260_v3, %v16702_v56  ;;  %8854 = vmatprep.subr.bf16.mxu1 %v8853_v9  ;;  %8800 = vmatpush1.bf16.msra.mxu0 %v17261_v32  ;;  %v17265_v9 = vunpack.i.h.bf16 %v13922_v46  ;;  %v17266_v3 = vunpack.i.l.bf16 %v13922_v46  ;;  %v10517_v50 = vunpack.i.l.bf16 %v14406_v52 }
 0x43a   : > { %v14408_v44 = vpop.permute.xlu1 %10510  ;;  %v4032_v51 = vsel %vm885_vm6, %v17264_v26, %v17262_v34  ;;  %v17268_v46 = vunpack.i.h.bf16 %v14044_v33  ;;  %vm17286_vm9 = vcmask 146432   ;;  %vm17288_vm12 = vcmask 15360  }
 0x43b   : > { %v3590_v4 = vsel %vm435_vm1, %v17266_v3, %v17265_v9  ;;  %v16705_v32 = vunpack.i.h.bf16 %v14408_v44  ;;  %v10512_v56 = vunpack.i.l.bf16 %v14408_v44  ;;  %10755 = vrot.lane.b32.xlu0 %v14412_v40, %s17068_s17  ;;  %v8801_v34 = vpack.c.bf16 %v4032_v51, %v3958_v41 }
 0x43c   : > { %v8857_v13 = vpack.c.bf16 %v3590_v4, %v3516_v31  ;;  %8856 = vmatpush1.bf16.msra.mxu1 %v17267_v0  ;;  %v3664_v26 = vsel %vm510_vm0, %v10332_v23, %v17268_v46  ;;  %v14439_v9 = vsel %vm660_vm3, %v10353_v37, %v16704_v27  ;;  %10750 = vrot.lane.b32.xlu1 %v14236_v47, %s17092_s28  ;;  %v17269_v41 = vunpack.i.h.bf16 %v13982_v12  ;;  %v17271_v46 = vld [vmem:[#allocation81_spill] sm:$0xff] }
 0x43d   : > { %v14444_v31 = vsel %vm735_vm4, %v10512_v56, %v16705_v32  ;;  %8802 = vmatprep.subr.bf16.mxu0 %v8801_v34  ;;  %v14449_v53 = vpop.permute.xlu0 %10525  ;;  %v17270_v4 = vunpack.i.h.bf16 %v13546_v36  ;;  %v17272_v34 = vpack.c.bf16 %v13692_v42, %v17271_v46  ;;  %v17273_v12 = vunpack.i.h.bf16 %v13617_v60  ;;  %v17277_v60 = vld [vmem:[#allocation71_spill] sm:$0xff] }
 0x43e   : > { %8858 = vmatprep.subr.bf16.mxu1 %v8857_v13  ;;  %v14451_v33 = vpop.permute.xlu1 %10520  ;;  %v3738_v51 = vsel %vm585_vm2, %v10342_v63, %v17269_v41  ;;  %v10352_v13 = vunpack.i.l.bf16 %v14080_v8  ;;  %v17274_v3 = vpack.c.bf16 %v13950_v22, %v13945_v6  ;;  %v17275_v36 = vunpack.i.h.bf16 %v13492_v59 }
 0x43f   : > { %v3663_v0 = vsel %vm510_vm0, %v17270_v4, %v10332_v23  ;;  %8804 = vmatpush1.bf16.msra.mxu0 %v17272_v34  ;;  %v10522_v27 = vunpack.i.l.bf16 %v14451_v33  ;;  %v8861_v32 = vpack.c.bf16 %v3738_v51, %v3664_v26  ;;  %v3737_v41 = vsel %vm585_vm2, %v17273_v12, %v10342_v63  ;;  %10760 = vrot.lane.b32.xlu0 %v14236_v47, %s17085_s23 }
 0x440   : > { %8860 = vmatpush1.bf16.msra.mxu1 %v17274_v3  ;;  %v4106_v42 = vsel %vm17276_vm8, %v17275_v36, %v10517_v50  ;;  %v16716_v8 = vunpack.i.h.bf16 %v14449_v53  ;;  %v10527_v23 = vunpack.i.l.bf16 %v14449_v53  ;;  %4565 = vrot.lane.b32.xlu1 %v14384_v39, %s17057_s14  ;;  %v17278_v6 = vunpack.i.h.bf16 %v17277_v60 }
 0x441   : > { %8862 = vmatprep.subr.bf16.mxu1 %v8861_v32  ;;  %v3886_v63 = vsel %vm735_vm4, %v10493_v21, %v10512_v56  ;;  %v17280_v26 = vunpack.i.l.bf16 %v14337_v20  ;;  %v14490_v51 = vpop.permute.xlu0 %10535  ;;  %v8863_v3 = vpack.c.bf16 %v3737_v41, %v3663_v0  ;;  %v10508_v46 = vunpack.i.h.bf16 %v14367_v30 }
 0x442   : > { %v4180_v22 = vsel %vm17279_vm7, %v17278_v6, %v10522_v27  ;;  %v10503_v34 = vunpack.i.h.bf16 %v14369_v49  ;;  %v14494_v12 = vpop.permute.xlu1 %10530  ;;  %v3812_v32 = vsel %vm660_vm3, %v10352_v13, %v10353_v37  ;;  %v17281_v36 = vunpack.i.h.bf16 %v13561_v1 }
 0x443   : > { %v3885_v59 = vsel %vm735_vm4, %v17280_v26, %v10493_v21  ;;  %v8805_v4 = vpack.c.bf16 %v4180_v22, %v4106_v42  ;;  %v16708_v20 = vunpack.i.h.bf16 %v14494_v12  ;;  %v10532_v21 = vunpack.i.l.bf16 %v14494_v12  ;;  %4639 = vrot.lane.b32.xlu0 %v14384_v39, %s17062_s21  ;;  %s17752_s21 = sld [smem:[#allocation100_spill]] }
 0x444   : > { %v3811_v56 = vsel %vm660_vm3, %v17281_v36, %v10352_v13  ;;  %8864 = vmatpush1.bf16.msra.mxu1 %v8863_v3  ;;  %v8865_v0 = vpack.c.bf16 %v3886_v63, %v3812_v32  ;;  %v14507_v41 = vsel %vm810_vm5, %v10527_v23, %v16716_v8  ;;  %10765 = vrot.lane.b32.xlu1 %v14236_v47, %s17096_s12  ;;  %v10537_v37 = vunpack.i.l.bf16 %v14490_v51 }
 0x445   : > { %8806 = vmatprep.subr.bf16.mxu0 %v8805_v4  ;;  %v8867_v1 = vpack.c.bf16 %v3885_v59, %v3811_v56  ;;  %v14515_v13 = vsel %vm885_vm6, %v10532_v21, %v16708_v20  ;;  %v17282_v42 = vpack.c.bf16 %v13720_v38, %v13707_v19  ;;  %v14520_v60 = vpop.permute.xlu0 %10545  ;;  %v3960_v6 = vsel %vm810_vm5, %v10503_v34, %v10527_v23 }
 0x446   : > { %8866 = vmatprep.subr.bf16.mxu1 %v8865_v0  ;;  %v4034_v47 = vsel %vm885_vm6, %v10508_v46, %v10532_v21  ;;  %v17283_v22 = vunpack.i.l.bf16 %v14367_v30  ;;  %v17284_v26 = vunpack.i.l.bf16 %v14369_v49  ;;  %v10541_v3 = vpop.permute.xlu1 %10540  ;;  %v10518_v38 = vunpack.i.h.bf16 %v14406_v52  ;;  %v17289_v0 = vld [vmem:[#allocation57_spill] sm:$0xff] }
 0x447   : > { %8808 = vmatpush1.bf16.msra.mxu0 %v17282_v42  ;;  %v8869_v4 = vpack.c.bf16 %v4034_v47, %v3960_v6  ;;  %v10523_v32 = vunpack.i.h.bf16 %v14451_v33  ;;  %v10542_v23 = vunpack.i.l.bf16 %v10541_v3  ;;  %10775 = vrot.lane.b32.xlu0 %v14412_v40, %s17063_s10  ;;  %v10103_v30 = vunpack.i.h.bf16 %v13529_v14 }
 0x448   : > { %v4033_v63 = vsel %vm885_vm6, %v17283_v22, %v10508_v46  ;;  %v3959_v59 = vsel %vm810_vm5, %v17284_v26, %v10503_v34  ;;  %8868 = vmatpush1.bf16.msra.mxu1 %v8867_v1  ;;  %v16706_v49 = vunpack.i.h.bf16 %v14520_v60  ;;  %v10547_v46 = vunpack.i.l.bf16 %v14520_v60  ;;  %10770 = vrot.lane.b32.xlu1 %v14412_v40, %s17073_s1 }
 0x449   : > { %8870 = vmatprep.subr.bf16.mxu1 %v8869_v4  ;;  %v14541_v34 = vpop.permute.xlu0 %10555  ;;  %v8871_v36 = vpack.c.bf16 %v4033_v63, %v3959_v59  ;;  %v17285_v33 = vunpack.i.h.bf16 %v13500_v25  ;;  %v17287_v21 = vunpack.i.h.bf16 %v13520_v24  ;;  %v17290_v1 = vunpack.i.h.bf16 %v17289_v0 }
 0x44a   : > { %vm17291_vm15 = vcmask 7168   ;;  %v10557_v6 = vunpack.i.l.bf16 %v14541_v34  ;;  %v14555_v47 = vpop.permute.xlu1 %10550  ;;  %v4107_v63 = vsel %vm17276_vm8, %v10517_v50, %v10518_v38  ;;  %v4181_v25 = vsel %vm17279_vm7, %v10522_v27, %v10523_v32  ;;  %v4432_v27 = vld [vmem:[#allocation2 + $0x80] sm:$0xff] }
 0x44b   : > { %v4254_v56 = vsel %vm17286_vm9, %v17285_v33, %v10537_v37  ;;  %v4328_v14 = vsel %vm17288_vm12, %v17287_v21, %v10542_v23  ;;  %v4401_v42 = vsel %vm17291_vm15, %v17290_v1, %v10103_v30  ;;  %v16707_v26 = vunpack.i.h.bf16 %v14555_v47  ;;  %10785 = vrot.lane.b32.xlu0 %v14118_v11, %s17090_s29  ;;  %vm17292_vm9 = vmmov %vm17276_vm8  ;;  %v17297_v33 = vld [vmem:[#allocation24_spill] sm:$0xff] }
 0x44c   : > { %v8809_v22 = vpack.c.bf16 %v4328_v14, %v4254_v56  ;;  %v10552_v24 = vunpack.i.l.bf16 %v14555_v47  ;;  %8872 = vmatpush1.bf16.msra.mxu1 %v8871_v36  ;;  %v10538_v59 = vunpack.i.h.bf16 %v14490_v51  ;;  %v14569_v4 = vsel %vm17292_vm9, %v10547_v46, %v16706_v49  ;;  %10780 = vrot.lane.b32.xlu1 %v14412_v40, %s17065_s18  ;;  %vm17294_vm12 = vmmov %vm17291_vm15  ;;  %v17298_v56 = vld [vmem:[#allocation72_spill] sm:$0xff] }
 0x44d   : > { %17293 = vst [vmem:[#allocation66_spill] sm:$0xff] %v14569_v4  ;;  %v10543_v52 = vunpack.i.h.bf16 %v10541_v3  ;;  %v4402_v50 = vsel %vm17294_vm12, %v10103_v30, %v10557_v6  ;;  %vm17295_vm15 = vmmov %vm17279_vm7  ;;  %v17299_v21 = vpack.c.bf16 %v17297_v33, %v17298_v56  ;;  %v14584_v14 = vpop.permute.xlu0 %10565  ;;  %v4108_v0 = vsel %vm17276_vm8, %v10518_v38, %v10547_v46  ;;  %v6523_v4 = vld [vmem:[#allocation3 + $0x60] sm:$0xff] }
 0x44e   : > { %8810 = vmatprep.subr.bf16.mxu0 %v8809_v22  ;;  %v14579_v36 = vsel %vm17295_vm15, %v10552_v24, %v16707_v26  ;;  %v8813_v3 = vpack.c.bf16 %v4432_v27, %v4402_v50  ;;  %v4182_v1 = vsel %vm17279_vm7, %v10523_v32, %v10552_v24  ;;  %v16710_v22 = vunpack.i.h.bf16 %v14584_v14  ;;  %v14590_v19 = vpop.permute.xlu1 %10560  ;;  %v4431_v26 = vld [vmem:[#allocation2 + $0x78] sm:$0xff]  ;;  %v17304_v27 = vld [vmem:[#allocation76_spill] sm:$0xff] }
 0x44f   : > { %17296 = vst [vmem:[#allocation53_spill] sm:$0xff] %v14579_v36  ;;  %8812 = vmatpush1.bf16.msra.mxu0 %v17299_v21  ;;  %v10567_v30 = vunpack.i.l.bf16 %v14584_v14  ;;  %v8873_v49 = vpack.c.bf16 %v4182_v1, %v4108_v0  ;;  %v16711_v33 = vunpack.i.h.bf16 %v14590_v19  ;;  %v10562_v56 = vunpack.i.l.bf16 %v14590_v19  ;;  %4935 = vrot.lane.b32.xlu0 %v14384_v39, %s17078_s3 }
 0x450   : > { %8814 = vmatprep.subr.bf16.mxu0 %v8813_v3  ;;  %v8815_v38 = vpack.c.bf16 %v4431_v26, %v4401_v42  ;;  %v8875_v32 = vpack.c.bf16 %v4181_v25, %v4107_v63  ;;  %vm17300_vm9 = vcmask 15360   ;;  %10790 = vrot.lane.b32.xlu1 %v14118_v11, %s17099_s30  ;;  %v10223_v21 = vunpack.i.h.bf16 %v17304_v27 }
 0x451   : > { %v4329_v46 = vsel %vm17300_vm9, %v10542_v23, %v10543_v52  ;;  %vm17301_vm12 = vmmov %vm17300_vm9  ;;  %8874 = vmatprep.subr.bf16.mxu1 %v8873_v49  ;;  %vm17305_vm8 = vcmask 146432   ;;  %v14613_v23 = vpop.permute.xlu0 %10575 }
 0x452   : > { %v14602_v24 = vsel %vm17301_vm12, %v10567_v30, %v16710_v22  ;;  %vm17303_vm15 = vmmov %vm17300_vm9  ;;  %v14611_v42 = vsel %vm17305_vm8, %v10562_v56, %v16711_v33  ;;  %8876 = vmatpush1.bf16.msra.mxu1 %v8875_v32  ;;  %v10577_v49 = vunpack.i.l.bf16 %v14613_v23  ;;  %v10571_v25 = vpop.permute.xlu1 %10570  ;;  %vm17309_vm12 = vcmask 1031168  }
 0x453   : > { %17302 = vst [vmem:[#allocation81_spill] sm:$0xff] %v14602_v24  ;;  %v4330_v50 = vsel %vm17303_vm15, %v10543_v52, %v10567_v30  ;;  %17306 = vst [vmem:[#allocation71_spill] sm:$0xff] %v14611_v42  ;;  %8816 = vmatpush1.bf16.msra.mxu0 %v8815_v38  ;;  %v10573_v3 = vunpack.i.h.bf16 %v10571_v25  ;;  %v10572_v0 = vunpack.i.l.bf16 %v10571_v25  ;;  %5083 = vrot.lane.b32.xlu0 %v14384_v39, %s17085_s23  ;;  %v10558_v30 = vunpack.i.h.bf16 %v14541_v34  ;;  %v17313_v38 = vld [vmem:[#allocation70_spill] sm:$0xff] }
 0x454   : > { %vm17307_vm7 = vmmov %vm17305_vm8  ;;  %5009 = vrot.lane.b32.xlu1 %v14384_v39, %s17092_s28  ;;  %v4570_v51 = vsel %vm17309_vm12, %v10223_v21, %v10577_v49  ;;  %v17314_v32 = vunpack.i.l.bf16 %v17313_v38  ;;  %vm17315_vm8 = vcmask 1039360   ;;  %v4434_v34 = vld [vmem:[#allocation2 + $0x90] sm:$0xff]  ;;  %s9269_s28 = smul.u32 1280, %s11529_s9  ;;  %s11462_s9 = smov [#allocation11]  }
 0x455   : > { %v4256_v63 = vsel %vm17307_vm7, %v10538_v59, %v10562_v56  ;;  %vm17308_vm9 = vmmov %vm17307_vm7  ;;  %s11356_s27 = sshll.u32 %s11462_s9, 4  ;;  %s11357_s27 = int_to_ptr.vmem [resolvable:$false] %s11356_s27 }
 0x456   : > { %v4255_v11 = vsel %vm17308_vm9, %v10537_v37, %v10538_v59  ;;  %v8877_v26 = vpack.c.bf16 %v4330_v50, %v4256_v63  ;;  %v17310_v37 = vld [vmem:[#allocation68_spill] sm:$0xff]  ;;  %vm17312_vm15 = vmmov %vm17309_vm12  ;;  %v4495_v50 = vsel %vm17315_vm8, %v17314_v32, %v10572_v0  ;;  %v14639_v63 = vpop.permute.xlu1 %10580  ;;  %vm17319_vm9 = vcmask 7168   ;;  %v4433_v32 = vld [vmem:[#allocation2 + $0x88] sm:$0xff]  ;;  %s16317_s14 = scalar_lea.hbm %s17752_s21, %s9269_s28  ;;  %s11358_s16 = scalar_lea.vmem %s11357_s27, 2560 }
 0x457   : > { %v8879_v1 = vpack.c.bf16 %v4329_v46, %v4255_v11  ;;  %v17311_v59 = vunpack.i.h.bf16 %v17310_v37  ;;  %v14636_v46 = vpop.permute.xlu0 %10585  ;;  %vm17316_vm7 = vmmov %vm17315_vm8  ;;  %17317 = vst [vmem:[#allocation57_spill] sm:$0xff] %v14639_v63  ;;  %10795 = vrot.lane.b32.xlu0 %v14412_v40, %s17090_s29  ;;  %v17318_v37 = vld [vmem:[#allocation74_spill] sm:$0xff]  ;;  %vm17326_vm8 = vcmask 891904  }
 0x458   : > { %8878 = vmatprep.subr.bf16.mxu1 %v8877_v26  ;;  %v4496_v27 = vsel %vm17316_vm7, %v10572_v0, %v10573_v3  ;;  %v16709_v26 = vunpack.i.l.bf16 %v14639_v63  ;;  %5157 = vrot.lane.b32.xlu1 %v14384_v39, %s17096_s12  ;;  %v5683_v0 = vld [vmem:[%s16368_s5] sm:$0xff]  ;;  %vm17320_vm12 = vmmov %vm17319_vm9 }
 0x459   : > { %v4569_v56 = vsel %vm17312_vm15, %v17311_v59, %v10223_v21  ;;  %8880 = vmatpush1.bf16.msra.mxu1 %v8879_v1  ;;  %v8817_v11 = vpack.c.bf16 %v4570_v51, %v4496_v27  ;;  %v10233_v21 = vunpack.i.h.bf16 %v17318_v37  ;;  %v4403_v59 = vsel %vm17319_vm9, %v10557_v6, %v10558_v30  ;;  %vm17328_vm9 = vmmov %vm17326_vm8 }
 0x45a   : > { %v8819_v25 = vpack.c.bf16 %v4569_v56, %v4495_v50  ;;  %v10587_v1 = vunpack.i.l.bf16 %v14636_v46  ;;  %v4404_v56 = vsel %vm17320_vm12, %v10558_v30, %v16709_v26  ;;  %v10591_v38 = vpop.permute.xlu1 %10590  ;;  %v8883_v27 = vpack.c.bf16 %v4433_v32, %v4403_v59  ;;  %v17324_v26 = vld [vmem:[#allocation62_spill] sm:$0xff]  ;;  %v5684_v59 = vld [vmem:[%s16368_s5 + $0x8] sm:$0xff] }
 0x45b   : > { %8818 = vmatprep.subr.bf16.mxu0 %v8817_v11  ;;  %v14654_v51 = vpop.permute.xlu0 %10595  ;;  %v8881_v6 = vpack.c.bf16 %v4434_v34, %v4404_v56  ;;  %v10593_v50 = vunpack.i.h.bf16 %v10591_v38  ;;  %v10592_v39 = vunpack.i.l.bf16 %v10591_v38  ;;  %5687 = vperm.xlu0 %9983, %v5683_v0   ;;  %v17321_v11 = vld [vmem:[#allocation67_spill] sm:$0xff]  ;;  %vm17323_vm15 = vcmask 900096  }
 0x45c   : > { %8820 = vmatpush1.bf16.msra.mxu0 %v8819_v25  ;;  %v17322_v37 = vunpack.i.h.bf16 %v17321_v11  ;;  %v10597_v25 = vunpack.i.l.bf16 %v14654_v51  ;;  %10800 = vrot.lane.b32.xlu1 %v14412_v40, %s17099_s30  ;;  %v16712_v30 = vunpack.i.h.bf16 %v14654_v51  ;;  %v17325_v20 = vunpack.i.l.bf16 %v17324_v26  ;;  %vm17327_vm7 = vmmov %vm17323_vm15 }
 0x45d   : > { %8882 = vmatprep.subr.bf16.mxu1 %v8881_v6  ;;  %v4644_v0 = vsel %vm17327_vm7, %v10233_v21, %v10587_v1  ;;  %v4718_v38 = vsel %vm17328_vm9, %v10592_v39, %v10593_v50  ;;  %v10578_v40 = vunpack.i.h.bf16 %v14613_v23  ;;  %vm17329_vm12 = vcmask 1039360  }
 0x45e   : > { %v4643_v52 = vsel %vm17323_vm15, %v17322_v37, %v10233_v21  ;;  %v4717_v56 = vsel %vm17326_vm8, %v17325_v20, %v10592_v39  ;;  %8884 = vmatpush1.bf16.msra.mxu1 %v8883_v27  ;;  %v14677_v6 = vpop.permute.xlu1 %10600  ;;  %v8821_v32 = vpack.c.bf16 %v4718_v38, %v4644_v0  ;;  %v4497_v20 = vsel %vm17329_vm12, %v10573_v3, %v10597_v25  ;;  %vm17331_vm15 = vmmov %vm17329_vm12 }
 0x45f   : > { %v14669_v34 = vpop.permute.xlu0 %10605  ;;  %v8823_v11 = vpack.c.bf16 %v4717_v56, %v4643_v52  ;;  %v16715_v26 = vunpack.i.l.bf16 %v14677_v6  ;;  %v4498_v39 = vsel %vm17331_vm15, %v10597_v25, %v16712_v30  ;;  %vm17332_vm8 = vcmask 1031168  }
 0x460   : > { %v10607_v27 = vunpack.i.l.bf16 %v14669_v34  ;;  %5692 = vperm.xlu1 %9982, %v5684_v59   ;;  %8822 = vmatprep.subr.bf16.mxu0 %v8821_v32  ;;  %v10608_v37 = vunpack.i.h.bf16 %v14669_v34  ;;  %vm17333_vm7 = vmmov %vm17332_vm8  ;;  %v10588_v32 = vunpack.i.h.bf16 %v14636_v46  ;;  %vm17336_vm9 = vcmask 883712  }
 0x461   : > { %8824 = vmatpush1.bf16.msra.mxu0 %v8823_v11  ;;  %v4572_v52 = vsel %vm17332_vm8, %v10578_v40, %v16715_v26  ;;  %v4571_v3 = vsel %vm17333_vm7, %v10577_v49, %v10578_v40  ;;  %v17334_v11 = vld [vmem:[#allocation56_spill] sm:$0xff]  ;;  %v17337_v30 = vunpack.i.l.bf16 %v14093_v15  ;;  %vm17338_vm12 = vcmask 875520   ;;  %vm17339_vm15 = vmmov %vm17336_vm9 }
 0x462   : > { %v10611_v56 = vpop.permute.xlu1 %10610  ;;  %v8885_v59 = vpack.c.bf16 %v4572_v52, %v4498_v39  ;;  %v8887_v34 = vpack.c.bf16 %v4571_v3, %v4497_v20  ;;  %v17335_v22 = vunpack.i.l.bf16 %v17334_v11  ;;  %v4792_v40 = vsel %vm17339_vm15, %v10607_v27, %v10608_v37  ;;  %vm17340_vm8 = vmmov %vm17338_vm12 }
 0x463   : > { %v14683_v21 = vpop.permute.xlu0 %10615  ;;  %v10613_v0 = vunpack.i.h.bf16 %v10611_v56  ;;  %v10612_v38 = vunpack.i.l.bf16 %v10611_v56  ;;  %vm17342_vm7 = vcmask 900096  }
 0x464   : > { %17330 = vst [vmem:[#allocation24_spill] sm:$0xff] %v14683_v21  ;;  %v4791_v33 = vsel %vm17336_vm9, %v17335_v22, %v10607_v27  ;;  %8886 = vmatprep.subr.bf16.mxu1 %v8885_v59  ;;  %v16714_v25 = vunpack.i.l.bf16 %v14683_v21  ;;  %v4645_v56 = vsel %vm17342_vm7, %v10587_v1, %v10588_v32  ;;  %vm17343_vm9 = vcmask 891904  }
 0x465   : > { %v4865_v23 = vsel %vm17338_vm12, %v17337_v30, %v10612_v38  ;;  %8888 = vmatpush1.bf16.msra.mxu1 %v8887_v34  ;;  %v4866_v20 = vsel %vm17340_vm8, %v10612_v38, %v10613_v0  ;;  %vm17345_vm12 = vmmov %vm17342_vm7  ;;  %vm17348_vm8 = vcmask 867328   ;;  %vm17350_vm7 = vcmask 736256  }
 0x466   : > { %v14706_v39 = vpop.permute.xlu1 %10620  ;;  %v8825_v46 = vpack.c.bf16 %v4866_v20, %v4792_v40  ;;  %v8827_v52 = vpack.c.bf16 %v4865_v23, %v4791_v33  ;;  %v4646_v27 = vsel %vm17345_vm12, %v10588_v32, %v16714_v25  ;;  %vm17346_vm15 = vmmov %vm17343_vm9  ;;  %v17347_v32 = vunpack.i.h.bf16 %v14018_v10  ;;  %v17362_v10 = vld [vmem:[#allocation78_spill] sm:$0xff] }
 0x467   : > { %v14702_v49 = vpop.permute.xlu0 %10625  ;;  %17341 = vst [vmem:[#allocation72_spill] sm:$0xff] %v14706_v39  ;;  %v16713_v22 = vunpack.i.h.bf16 %v14706_v39  ;;  %v10622_v3 = vunpack.i.l.bf16 %v14706_v39  ;;  %vm17354_vm12 = vcmask 875520   ;;  %v17379_v24 = vunpack.i.h.bf16 %v17362_v10  ;;  %v6512_v39 = vld [vmem:[#allocation3] sm:$0xff] }
 0x468   : > { %8826 = vmatprep.subr.bf16.mxu0 %v8825_v46  ;;  %v16717_v15 = vunpack.i.l.bf16 %v14702_v49  ;;  %v17349_v46 = vunpack.i.h.bf16 %v14130_v16  ;;  %v17356_v16 = vld [vmem:[#allocation48_spill] sm:$0xff] }
 0x469   : > { %v4719_v30 = vsel %vm17343_vm9, %v10593_v50, %v10622_v3  ;;  %8828 = vmatpush1.bf16.msra.mxu0 %v8827_v52  ;;  %v4720_v33 = vsel %vm17346_vm15, %v10622_v3, %v16713_v22  ;;  %vm17353_vm9 = vcmask 883712   ;;  %v17355_v22 = vld [vmem:[#allocation42_spill] sm:$0xff] }
 0x46a   : > { %v10631_v38 = vpop.permute.xlu1 %10630  ;;  %v8889_v34 = vpack.c.bf16 %v4720_v33, %v4646_v27  ;;  %v8891_v11 = vpack.c.bf16 %v4719_v30, %v4645_v56  ;;  %v4940_v20 = vsel %vm17348_vm8, %v17347_v32, %v16717_v15  ;;  %v17352_v33 = vld [vmem:[#allocation82_spill] sm:$0xff]  ;;  %v17357_v25 = vpack.c.bf16 %v17355_v22, %v17356_v16  ;;  %vm17359_vm15 = vmmov %vm17353_vm9 }
 0x46b   : > { %v14713_v59 = vpop.permute.xlu0 %10635  ;;  %v10632_v1 = vunpack.i.l.bf16 %v10631_v38  ;;  %vm17360_vm8 = vmmov %vm17354_vm12  ;;  %v10633_v22 = vunpack.i.h.bf16 %v10631_v38  ;;  %v17364_v16 = vunpack.i.l.bf16 %v17352_v33 }
 0x46c   : > { %17344 = vst [vmem:[#allocation76_spill] sm:$0xff] %v14713_v59  ;;  %v10637_v23 = vunpack.i.l.bf16 %v14713_v59  ;;  %8890 = vmatprep.subr.bf16.mxu1 %v8889_v34  ;;  %v16718_v50 = vunpack.i.h.bf16 %v14713_v59  ;;  %v10628_v34 = vunpack.i.h.bf16 %v14702_v49  ;;  %v17376_v59 = vld [vmem:[#allocation86_spill] sm:$0xff] }
 0x46d   : > { %8892 = vmatpush1.bf16.msra.mxu1 %v8891_v11  ;;  %v5014_v52 = vsel %vm17350_vm7, %v17349_v46, %v10632_v1  ;;  %vm17369_vm7 = vcmask 728064  }
 0x46e   : > { %v14733_v3 = vpop.permute.xlu1 %10640  ;;  %v8829_v56 = vpack.c.bf16 %v5014_v52, %v4940_v20  ;;  %v4793_v11 = vsel %vm17353_vm9, %v10608_v37, %v10637_v23  ;;  %v4794_v20 = vsel %vm17359_vm15, %v10637_v23, %v16718_v50  ;;  %v17361_v37 = vld [vmem:[#allocation80_spill] sm:$0xff]  ;;  %vm17375_vm9 = vcmask 162816  }
 0x46f   : > { %v14723_v40 = vpop.permute.xlu0 %10645  ;;  %17351 = vst [vmem:[#allocation68_spill] sm:$0xff] %v14733_v3  ;;  %v16719_v30 = vunpack.i.h.bf16 %v14733_v3  ;;  %v10642_v27 = vunpack.i.l.bf16 %v14733_v3  ;;  %vm17381_vm15 = vcmask 154624   ;;  %v17383_v3 = vld [vmem:[#allocation52_spill] sm:$0xff] }
 0x470   : > { %8830 = vmatprep.subr.bf16.mxu0 %v8829_v56 }
 0x471   : > { %v4867_v32 = vsel %vm17354_vm12, %v10613_v0, %v10642_v27  ;;  %8832 = vmatpush1.bf16.msra.mxu0 %v17357_v25  ;;  %v4868_v52 = vsel %vm17360_vm8, %v10642_v27, %v16719_v30  ;;  %v17363_v25 = vunpack.i.h.bf16 %v17352_v33  ;;  %v17366_v30 = vunpack.i.l.bf16 %v14723_v40 }
 0x472   : > { %v10651_v26 = vpop.permute.xlu1 %10650  ;;  %v8893_v8 = vpack.c.bf16 %v4868_v52, %v4794_v20  ;;  %v8895_v15 = vpack.c.bf16 %v4867_v32, %v4793_v11  ;;  %v17367_v20 = vld [vmem:[#allocation28_spill] sm:$0xff]  ;;  %v17370_v52 = vld [vmem:[#allocation59_spill] sm:$0xff]  ;;  %vm17378_vm12 = vcmask 736256   ;;  %vm17386_vm8 = vcmask 867328  }
 0x473   : > { %v14744_v46 = vpop.permute.xlu0 %10655  ;;  %v10652_v0 = vunpack.i.l.bf16 %v10651_v26  ;;  %v2980_v23 = vsel %vm885_vm6, %v17364_v16, %v17363_v25  ;;  %v17368_v11 = vunpack.i.h.bf16 %v17367_v20  ;;  %v17371_v38 = vunpack.i.h.bf16 %v17370_v52 }
 0x474   : > { %17358 = vst [vmem:[#allocation70_spill] sm:$0xff] %v14744_v46  ;;  %8894 = vmatprep.subr.bf16.mxu1 %v8893_v8  ;;  %v17373_v16 = vunpack.i.h.bf16 %v17361_v37  ;;  %v10653_v42 = vunpack.i.h.bf16 %v10651_v26  ;;  %v10804_v52 = vpack.i.bf16 %v6523_v4, %v6512_v39 }
 0x475   : > { %8896 = vmatpush1.bf16.msra.mxu1 %v8895_v15  ;;  %v5088_v32 = vsel %vm17369_vm7, %v17368_v11, %v17366_v30  ;;  %v5162_v8 = vsel %vm2030_vm14, %v17371_v38, %v10652_v0  ;;  %v17374_v15 = vunpack.i.l.bf16 %v17361_v37  ;;  %v17377_v11 = vld [vmem:[#allocation63_spill] sm:$0xff]  ;;  %v5015_v38 = vsel %vm17378_vm12, %v10632_v1, %v10633_v22  ;;  %vm17388_vm7 = vmmov %vm17378_vm12 }
 0x476   : > { %v14771_v56 = vpop.permute.xlu1 %10660  ;;  %v8833_v25 = vpack.c.bf16 %v5162_v8, %v5088_v32  ;;  %v17380_v32 = vunpack.i.l.bf16 %v17362_v10  ;;  %v17385_v1 = vunpack.i.l.bf16 %v14744_v46  ;;  %vm17394_vm12 = vcmask 7168   ;;  %10805 = vrot.lane.b32.xlu0 %v10804_v52, %s17058_s13  ;;  %10810 = vrot.lane.b32.xlu1 %v10804_v52, %s17102_s20 }
 0x477   : > { %v14760_v27 = vpop.permute.xlu0 %10665  ;;  %17372 = vst [vmem:[#allocation67_spill] sm:$0xff] %v14771_v56  ;;  %v3054_v50 = vsel %vm17375_vm9, %v17374_v15, %v17373_v16  ;;  %v17382_v15 = vld [vmem:[#allocation69_spill] sm:$0xff]  ;;  %vm17390_vm9 = vmmov %vm17386_vm8 }
 0x478   : > { %17365 = vst [vmem:[#allocation74_spill] sm:$0xff] %v14760_v27  ;;  %v8909_v30 = vpack.c.bf16 %v3054_v50, %v2980_v23  ;;  %8834 = vmatprep.subr.bf16.mxu0 %v8833_v25  ;;  %v3128_v8 = vsel %vm17381_vm15, %v17380_v32, %v17379_v24  ;;  %v17384_v20 = vpack.c.bf16 %v17382_v15, %v17383_v3  ;;  %v17387_v23 = vunpack.i.l.bf16 %v14771_v56 }
 0x479   : > { %v4942_v26 = vsel %vm17386_vm8, %v10628_v34, %v17385_v1  ;;  %v10288_v24 = vunpack.i.h.bf16 %v13924_v54  ;;  %v17389_v32 = vunpack.i.l.bf16 %v14702_v49  ;;  %v10648_v3 = vunpack.i.h.bf16 %v14723_v40  ;;  %v17395_v49 = vld [vmem:[#allocation92_spill] sm:$0xff] }
 0x47a   : > { %8836 = vmatpush1.bf16.msra.mxu0 %v17384_v20  ;;  %v5016_v25 = vsel %vm17388_vm7, %v10633_v22, %v17387_v23  ;;  %v14804_v20 = vpop.permute.xlu1 %10670  ;;  %v17392_v56 = vunpack.i.h.bf16 %v17376_v59  ;;  %v17393_v22 = vunpack.i.l.bf16 %v17376_v59  ;;  %v17396_v23 = vld [vmem:[#allocation79_spill] sm:$0xff]  ;;  %vm17398_vm15 = vcmask 1039360   ;;  %10815 = vrot.lane.b32.xlu0 %v10804_v52, %s17061_s0 }
 0x47b   : > { %v14791_v50 = vpop.permute.xlu0 %5223  ;;  %v4941_v16 = vsel %vm17390_vm9, %v17389_v32, %v10628_v34  ;;  %17391 = vst [vmem:[#allocation62_spill] sm:$0xff] %v14804_v20  ;;  %8910 = vmatprep.subr.bf16.mxu0 %v8909_v30  ;;  %v8897_v15 = vpack.c.bf16 %v5016_v25, %v4942_v26  ;;  %v16737_v46 = vunpack.i.l.bf16 %v14804_v20  ;;  %v5163_v34 = vsel %vm2030_vm14, %v10652_v0, %v10653_v42  ;;  %v17399_v25 = vld [vmem:[#allocation91_spill] sm:$0xff]  ;;  %v17400_v32 = vld [vmem:[#allocation90_spill] sm:$0xff]  ;;  %v17409_v20 = vld [vmem:[#allocation37_spill] sm:$0xff] }
 0x47c   : > { %v8899_v1 = vpack.c.bf16 %v5015_v38, %v4941_v16  ;;  %v3202_v4 = vsel %vm17394_vm12, %v17393_v22, %v17392_v56  ;;  %v17397_v38 = vunpack.i.l.bf16 %v17377_v11  ;;  %v10443_v26 = vunpack.i.h.bf16 %v14271_v61  ;;  %10820 = vrot.lane.b32.xlu1 %v10804_v52, %s17054_s22 }
 0x47d   : > { %5921 = vmatmul.mubr.f32.vlgmr.msra.gmra.mrb[12].mxu0 %v17396_v23  ;;  %8898 = vmatprep.subr.bf16.mxu1 %v8897_v15  ;;  %v8913_v30 = vpack.c.bf16 %v3202_v4, %v3128_v8  ;;  %v10442_v56 = vunpack.i.l.bf16 %v14271_v61  ;;  %v17401_v22 = vpack.c.bf16 %v17399_v25, %v17400_v32  ;;  %v17402_v0 = vunpack.i.l.bf16 %v14760_v27  ;;  %v17404_v4 = vld [vmem:[#allocation45_spill] sm:$0xff] }
 0x47e   : > { %v3296_v16 = vsel %vm17398_vm15, %v10288_v24, %v17397_v38  ;;  %8900 = vmatpush1.bf16.msra.mxu1 %v8899_v1  ;;  %vm17403_vm8 = vcmask 728064   ;;  %v5164_v8 = vsel %vm2030_vm14, %v10653_v42, %v16737_v46  ;;  %v10438_v38 = vunpack.i.h.bf16 %v17404_v4  ;;  %v14838_v25 = vpop.permute.xlu1 %5297  ;;  %v17407_v32 = vld [vmem:[#allocation89_spill] sm:$0xff]  ;;  %v17412_v46 = vld [vmem:[#allocation94_spill] sm:$0xff] }
 0x47f   : > { %8912 = vmatpush1.bf16.msra.mxu0 %v17401_v22  ;;  %v14825_v39 = vpop.permute.xlu0 %10675  ;;  %v5090_v15 = vsel %vm17403_vm8, %v10648_v3, %v17402_v0  ;;  %v17405_v61 = vunpack.i.l.bf16 %v14723_v40  ;;  %vm17406_vm7 = vmmov %vm17403_vm8  ;;  %5926 = vmatprep.mubr.f32.mxu0 %v17407_v32  ;;  %v17408_v27 = vld [vmem:[#allocation73_spill] sm:$0xff]  ;;  %v17410_v21 = vunpack.i.h.bf16 %v17409_v20  ;;  %vm17411_vm9 = vcmask 711680  }
 0x480   : > { %8914 = vmatprep.subr.bf16.mxu0 %v8913_v30  ;;  %v8901_v22 = vpack.c.bf16 %v5164_v8, %v5090_v15  ;;  %v16744_v0 = vunpack.i.l.bf16 %v17408_v27  ;;  %v17413_v36 = vunpack.i.h.bf16 %v17412_v46  ;;  %vm17414_vm12 = vcmask 703488   ;;  %v17416_v8 = vld [vmem:[#allocation83_spill] sm:$0xff]  ;;  %v17417_v46 = vld [vmem:[#allocation84_spill] sm:$0xff] }
 0x481   : > { %v5089_v1 = vsel %vm17406_vm7, %v17405_v61, %v10648_v3  ;;  %v5238_v42 = vsel %vm17411_vm9, %v17410_v21, %v14791_v50  ;;  %v3232_v3 = vld [vmem:[#allocation2 + $0x40] sm:$0xff]  ;;  %v17415_v30 = vunpack.i.l.bf16 %v13924_v54  ;;  %5927 = vmatmul.mubr.f32.gmra.mrb[14].mxu0 %v17416_v8  ;;  %v16741_v61 = vunpack.i.l.bf16 %v14269_v43 }
 0x482   : > { %v5312_v40 = vsel %vm17414_vm12, %v17413_v36, %v14838_v25  ;;  %v8903_v63 = vpack.c.bf16 %v5163_v34, %v5089_v1  ;;  %8902 = vmatprep.subr.bf16.mxu1 %v8901_v22  ;;  %v8917_v21 = vpack.c.bf16 %v3296_v16, %v3232_v3  ;;  %v17418_v36 = vld [vmem:[#allocation77_spill] sm:$0xff]  ;;  %v17420_v52 = vunpack.i.l.bf16 %v17395_v49  ;;  %v17424_v22 = vld [vmem:[#allocation87_spill] sm:$0xff]  ;;  %v14869_v16 = vpop.permute.xlu1 %10680  ;;  %6228 = vmatprep.mubr.f32.mxu0 %v14374_v17 }
 0x483   : > { %v3295_v15 = vsel %vm17398_vm15, %v17415_v30, %v10288_v24  ;;  %v8905_v20 = vpack.c.bf16 %v5312_v40, %v5238_v42  ;;  %v17419_v34 = vpack.c.bf16 %v17417_v46, %v17418_v36  ;;  %v14860_v1 = vpop.permute.xlu0 %10685  ;;  %v17421_v54 = vunpack.i.h.bf16 %v13984_v7  ;;  %v17425_v40 = vld [vmem:[#allocation34_spill] sm:$0xff] }
 0x484   : > { %8904 = vmatpush1.bf16.msra.mxu1 %v8903_v63  ;;  %vm17422_vm8 = vcmask 883712   ;;  %vm17423_vm7 = vcmask 162816   ;;  %v16740_v42 = vunpack.i.h.bf16 %v17424_v22  ;;  %v3231_v63 = vld [vmem:[#allocation2 + $0x38] sm:$0xff]  ;;  %v16742_v3 = vunpack.i.h.bf16 %v17425_v40 }
 0x485   : > { %8916 = vmatpush1.bf16.msra.mxu0 %v17419_v34  ;;  %v3444_v24 = vsel %vm17422_vm8, %v17421_v54, %v17420_v52  ;;  %v3056_v30 = vsel %vm17423_vm7, %v10442_v56, %v10443_v26  ;;  %8906 = vmatprep.subr.bf16.mxu1 %v8905_v20  ;;  %v8919_v46 = vpack.c.bf16 %v3295_v15, %v3231_v63  ;;  %v17426_v36 = vunpack.i.h.bf16 %v13962_v2  ;;  %v17429_v52 = vld [vmem:[#allocation25_spill] sm:$0xff]  ;;  %vm17437_vm15 = vmmov %vm17423_vm7 }
 0x486   : > { %8918 = vmatprep.subr.bf16.mxu0 %v8917_v21  ;;  %vm17427_vm9 = vcmask 891904   ;;  %v17428_v34 = vunpack.i.l.bf16 %v17404_v4  ;;  %v16743_v54 = vunpack.i.h.bf16 %v17429_v52  ;;  %v10453_v15 = vunpack.i.h.bf16 %v14293_v29 }
 0x487   : > { %v3370_v7 = vsel %vm17427_vm9, %v17426_v36, %v16744_v0  ;;  %6075 = vmatmul.mubr.f32.vlgmr.msra.gmra.mrb[16].mxu1 %v17396_v23  ;;  %v10452_v63 = vunpack.i.l.bf16 %v14293_v29  ;;  %v17430_v2 = vpack.c.bf16 %v14261_v18, %v14245_v57  ;;  %v14888_v36 = vpop.permute.xlu0 %10695  ;;  %vm17432_vm12 = vcmask 875520   ;;  %v17434_v18 = vld [vmem:[#allocation50_spill] sm:$0xff] }
 0x488   : > { %v2982_v26 = vsel %vm885_vm6, %v17428_v34, %v10438_v38  ;;  %v8921_v20 = vpack.c.bf16 %v3444_v24, %v3370_v7  ;;  %v17431_v38 = vunpack.i.h.bf16 %v14008_v55  ;;  %v14895_v24 = vpop.permute.xlu1 %10690  ;;  %v17433_v29 = vunpack.i.l.bf16 %v17424_v22  ;;  %6080 = vmatprep.mubr.f32.mxu1 %v17407_v32 }
 0x489   : > { %v8977_v21 = vpack.c.bf16 %v3056_v30, %v2982_v26  ;;  %8908 = vmatpush1.bf16.msra.mxu1 %v17430_v2  ;;  %8920 = vmatpush1.bf16.msra.mxu0 %v8919_v46  ;;  %v10448_v30 = vunpack.i.h.bf16 %v17434_v18  ;;  %v10447_v46 = vunpack.i.l.bf16 %v17434_v18  ;;  %v10458_v7 = vunpack.i.h.bf16 %v17377_v11  ;;  %v17438_v2 = vld [vmem:[#allocation55_spill] sm:$0xff]  ;;  %v17439_v18 = vld [vmem:[#allocation88_spill] sm:$0xff] }
 0x48a   : > { %v3518_v23 = vsel %vm17432_vm12, %v17431_v38, %v16741_v61  ;;  %8922 = vmatprep.subr.bf16.mxu0 %v8921_v20  ;;  %v3592_v57 = vsel %vm435_vm1, %v17433_v29, %v16740_v42  ;;  %v17435_v55 = vunpack.i.l.bf16 %v17425_v40  ;;  %v17436_v26 = vunpack.i.h.bf16 %v17361_v37  ;;  %v17440_v42 = vld [vmem:[#allocation27_spill] sm:$0xff] }
 0x48b   : > { %8978 = vmatprep.subr.bf16.mxu1 %v8977_v21  ;;  %6081 = vmatmul.mubr.f32.gmra.mrb[18].mxu1 %v17416_v8  ;;  %v8925_v21 = vpack.c.bf16 %v3592_v57, %v3518_v23  ;;  %v10117_v38 = vunpack.i.l.bf16 %v17438_v2  ;;  %v10677_v29 = vunpack.i.l.bf16 %v14825_v39  ;;  %v17441_v32 = vpack.c.bf16 %v17439_v18, %v17440_v42  ;;  %v14920_v61 = vpop.permute.xlu0 %10705  ;;  %v17444_v8 = vld [vmem:[#allocation64_spill] sm:$0xff] }
 0x48c   : > { %v3740_v34 = vsel %vm585_vm2, %v17435_v55, %v16742_v3  ;;  %v3055_v20 = vsel %vm17437_vm15, %v17436_v26, %v10442_v56  ;;  %6151 = vmatprep.mubr.f32.mxu1 %v17233_v5  ;;  %vm17442_vm8 = vcmask 7168   ;;  %v17443_v37 = vunpack.i.l.bf16 %v17429_v52  ;;  %v14936_v18 = vpop.permute.xlu1 %10700 }
 0x48d   : > { %8924 = vmatpush1.bf16.msra.mxu0 %v17441_v32  ;;  %v3204_v55 = vsel %vm17442_vm8, %v10452_v63, %v10453_v15  ;;  %v10122_v23 = vunpack.i.l.bf16 %v17444_v8  ;;  %v10393_v57 = vunpack.i.h.bf16 %v14053_v62  ;;  %v17445_v26 = vunpack.i.l.bf16 %v17404_v4  ;;  %vm17451_vm12 = vmmov %vm17442_vm8 }
 0x48e   : > { %v3666_v56 = vsel %vm510_vm0, %v17443_v37, %v16743_v54  ;;  %v17446_v42 = vunpack.i.h.bf16 %v17352_v33  ;;  %8926 = vmatprep.subr.bf16.mxu0 %v8925_v21  ;;  %v17447_v32 = vunpack.i.l.bf16 %v17377_v11  ;;  %vm17448_vm7 = vcmask 1039360   ;;  %v17453_v11 = vld [vmem:[#allocation85_spill] sm:$0xff] }
 0x48f   : > { %v8929_v15 = vpack.c.bf16 %v3740_v34, %v3666_v56  ;;  %v10468_v37 = vunpack.i.h.bf16 %v17395_v49  ;;  %vm17449_vm9 = vcmask 154624   ;;  %v10463_v0 = vunpack.i.h.bf16 %v17408_v27  ;;  %8451 = vmatmul.mubr.msk.f32.vlgmr.msra.gmra.mrb[16].mxu1 %vm5695_vm11, %v14253_v28  ;;  %vm17452_vm15 = vmmov %vm17448_vm7 }
 0x490   : > { %v2981_v2 = vsel %vm885_vm6, %v17446_v42, %v17445_v26  ;;  %v3297_v3 = vsel %vm17448_vm7, %v17447_v32, %v10458_v7  ;;  %v3130_v8 = vsel %vm17449_vm9, %v10447_v46, %v10448_v30  ;;  %v17450_v4 = vunpack.i.h.bf16 %v17376_v59  ;;  %v17454_v30 = vld [vmem:[#allocation26_spill] sm:$0xff]  ;;  %v17455_v42 = vld [vmem:[#allocation93_spill] sm:$0xff]  ;;  %v14956_v59 = vpop.permute.xlu0 %10710  ;;  %vm17459_vm8 = vmmov %vm17449_vm9  ;;  %v14968_v32 = vpop.permute.xlu1 %3879  ;;  %6157 = vmatprep.mubr.f32.mxu1 %v17233_v5 }
 0x491   : > { %v8979_v54 = vpack.c.bf16 %v3055_v20, %v2981_v2  ;;  %v8981_v21 = vpack.c.bf16 %v3204_v55, %v3130_v8  ;;  %v3298_v34 = vsel %vm17452_vm15, %v10458_v7, %v10117_v38  ;;  %v10127_v56 = vunpack.i.l.bf16 %v17453_v11  ;;  %v3234_v8 = vld [vmem:[#allocation2 + $0x50] sm:$0xff]  ;;  %v3233_v11 = vld [vmem:[#allocation2 + $0x48] sm:$0xff] }
 0x492   : > { %v3203_v33 = vsel %vm17451_vm12, %v17450_v4, %v10452_v63  ;;  %v10687_v26 = vunpack.i.l.bf16 %v14860_v1  ;;  %v10682_v20 = vunpack.i.l.bf16 %v14869_v16  ;;  %v17456_v2 = vpack.c.bf16 %v17454_v30, %v17455_v42 }
 0x493   : > { %8980 = vmatpush1.bf16.msra.mxu1 %v8979_v54  ;;  %v17457_v28 = vunpack.i.h.bf16 %v14408_v44  ;;  %v17458_v7 = vunpack.i.h.bf16 %v17362_v10  ;;  %v10478_v55 = vunpack.i.h.bf16 %v14291_v48  ;;  %v10477_v54 = vunpack.i.l.bf16 %v14291_v48 }
 0x494   : > { %8928 = vmatpush1.bf16.msra.mxu0 %v17456_v2  ;;  %8982 = vmatprep.subr.bf16.mxu1 %v8981_v21  ;;  %v17460_v4 = vunpack.i.l.bf16 %v14053_v62  ;;  %v8987_v30 = vpack.c.bf16 %v3297_v3, %v3233_v11  ;;  %vm17461_vm7 = vcmask 883712   ;;  %v17462_v48 = vunpack.i.l.bf16 %v17395_v49  ;;  %v17465_v3 = vld [vmem:[#allocation31_spill] sm:$0xff]  ;;  %v14989_v49 = vpop.permute.xlu0 %4027  ;;  %v15005_v11 = vpop.permute.xlu1 %3953 }
 0x495   : > { %v3888_v63 = vsel %vm735_vm4, %v17457_v28, %v10677_v29  ;;  %v3129_v38 = vsel %vm17459_vm8, %v17458_v7, %v10447_v46  ;;  %8930 = vmatprep.subr.bf16.mxu0 %v8929_v15  ;;  %v8985_v46 = vpack.c.bf16 %v3298_v34, %v3234_v8  ;;  %v3446_v42 = vsel %vm17461_vm7, %v10468_v37, %v10127_v56  ;;  %vm17463_vm9 = vmmov %vm17461_vm7  ;;  %v17466_v34 = vld [vmem:[#allocation30_spill] sm:$0xff] }
 0x496   : > { %v3814_v44 = vsel %vm660_vm3, %v17460_v4, %v10393_v57  ;;  %v8983_v10 = vpack.c.bf16 %v3203_v33, %v3129_v38  ;;  %v3445_v21 = vsel %vm17463_vm9, %v17462_v48, %v10468_v37  ;;  %v10473_v15 = vunpack.i.h.bf16 %v14269_v43  ;;  %8452 = vmatmul.mubr.msk.f32.gmra.mrb[18].mxu1 %vm5695_vm11, %v14286_v58  ;;  %v17470_v38 = vld [vmem:[#allocation58_spill] sm:$0xff] }
 0x497   : > { %v8933_v2 = vpack.c.bf16 %v3888_v63, %v3814_v44  ;;  %vm17464_vm12 = vcmask 891904   ;;  %v10697_v7 = vunpack.i.l.bf16 %v14888_v36  ;;  %v10692_v33 = vunpack.i.l.bf16 %v14895_v24  ;;  %6382 = vmatprep.mubr.f32.mxu1 %v14374_v17 }
 0x498   : > { %v3372_v28 = vsel %vm17464_vm12, %v10463_v0, %v10122_v23  ;;  %8984 = vmatpush1.bf16.msra.mxu1 %v8983_v10  ;;  %v17467_v56 = vpack.c.bf16 %v17465_v3, %v17466_v34  ;;  %v17468_v37 = vunpack.i.h.bf16 %v14449_v53  ;;  %v17469_v23 = vunpack.i.h.bf16 %v14494_v12  ;;  %vm17472_vm15 = vmmov %vm17464_vm12 }
 0x499   : > { %v10132_v8 = vunpack.i.l.bf16 %v17470_v38  ;;  %v17471_v4 = vunpack.i.l.bf16 %v17408_v27  ;;  %8986 = vmatprep.subr.bf16.mxu1 %v8985_v46  ;;  %v8989_v10 = vpack.c.bf16 %v3446_v42, %v3372_v28  ;;  %v3594_v53 = vsel %vm435_vm1, %v10477_v54, %v10478_v55 }
 0x49a   : > { %8932 = vmatpush1.bf16.msra.mxu0 %v17467_v56  ;;  %v3962_v58 = vsel %vm810_vm5, %v17468_v37, %v10682_v20  ;;  %v4036_v63 = vsel %vm885_vm6, %v17469_v23, %v10687_v26  ;;  %v10488_v48 = vunpack.i.h.bf16 %v14314_v35  ;;  %v10487_v3 = vunpack.i.l.bf16 %v14314_v35 }
 0x49b   : > { %v3371_v44 = vsel %vm17472_vm15, %v17471_v4, %v10463_v0  ;;  %8934 = vmatprep.subr.bf16.mxu0 %v8933_v2  ;;  %v10483_v12 = vunpack.i.h.bf16 %v14316_v45  ;;  %v10482_v34 = vunpack.i.l.bf16 %v14316_v45  ;;  %v10603_v27 = vunpack.i.h.bf16 %v14677_v6  ;;  %v15020_v2 = vpop.permute.xlu0 %10720 }
 0x49c   : > { %v8937_v0 = vpack.c.bf16 %v4036_v63, %v3962_v58  ;;  %v8991_v46 = vpack.c.bf16 %v3445_v21, %v3371_v44  ;;  %vm17473_vm8 = vcmask 875520   ;;  %v10707_v42 = vunpack.i.l.bf16 %v14920_v61  ;;  %8988 = vmatpush1.bf16.msra.mxu1 %v8987_v30  ;;  %v15038_v58 = vpop.permute.xlu1 %10715 }
 0x49d   : > { %v3520_v56 = vsel %vm17473_vm8, %v10473_v15, %v10132_v8  ;;  %v10702_v55 = vunpack.i.l.bf16 %v14936_v18  ;;  %v17474_v35 = vpack.c.bf16 %v14444_v31, %v14439_v9  ;;  %v17475_v45 = vunpack.i.h.bf16 %v14520_v60  ;;  %vm17480_vm12 = vmmov %vm17473_vm8  ;;  %8990 = vmatprep.subr.bf16.mxu1 %v8989_v10 }
 0x49e   : > { %vm17476_vm7 = vcmask 162816   ;;  %v17477_v21 = vunpack.i.h.bf16 %v14555_v47  ;;  %vm17478_vm9 = vcmask 154624   ;;  %v17479_v30 = vunpack.i.l.bf16 %v14269_v43 }
 0x49f   : > { %8936 = vmatpush1.bf16.msra.mxu0 %v17474_v35  ;;  %v4110_v17 = vsel %vm17476_vm7, %v17475_v45, %v10692_v33  ;;  %v17481_v9 = vunpack.i.h.bf16 %v17424_v22  ;;  %v8993_v60 = vpack.c.bf16 %v3594_v53, %v3520_v56  ;;  %v17482_v23 = vunpack.i.h.bf16 %v17425_v40  ;;  %v17494_v45 = vld [vmem:[#allocation57_spill] sm:$0xff] }
 0x4a0   : > { %v4184_v28 = vsel %vm17478_vm9, %v17477_v21, %v10697_v7  ;;  %v3519_v37 = vsel %vm17480_vm12, %v17479_v30, %v10473_v15  ;;  %8938 = vmatprep.subr.bf16.mxu0 %v8937_v0  ;;  %v10717_v47 = vunpack.i.l.bf16 %v15038_v58  ;;  %v3668_v38 = vsel %vm510_vm0, %v10482_v34, %v10483_v12  ;;  %v17483_v15 = vld [vmem:[#allocation95_spill] sm:$0xff]  ;;  %8992 = vmatpush1.bf16.msra.mxu1 %v8991_v46  ;;  %v17495_v21 = vld [vmem:[#allocation24_spill] sm:$0xff] }
 0x4a1   : > { %v3593_v31 = vsel %vm435_vm1, %v17481_v9, %v10477_v54  ;;  %v3741_v63 = vsel %vm585_vm2, %v17482_v23, %v10487_v3  ;;  %v3742_v43 = vsel %vm585_vm2, %v10487_v3, %v10488_v48  ;;  %v10498_v8 = vunpack.i.h.bf16 %v17483_v15  ;;  %v4176_v3 = vpop.permute.xlu0 %4175  ;;  %8994 = vmatprep.subr.bf16.mxu1 %v8993_v60 }
 0x4a2   : > { %v17484_v22 = vunpack.i.l.bf16 %v14677_v6  ;;  %vm17485_vm1 = vcmask 1031168   ;;  %v10712_v4 = vunpack.i.l.bf16 %v14956_v59  ;;  %v8941_v40 = vpack.c.bf16 %v4184_v28, %v4110_v17  ;;  %v4102_v17 = vpop.permute.xlu1 %4101 }
 0x4a3   : > { %v10497_v44 = vunpack.i.l.bf16 %v17483_v15  ;;  %v17486_v10 = vunpack.i.h.bf16 %v14654_v51  ;;  %vm17487_vm15 = vcmask 1039360   ;;  %v17488_v48 = vpack.c.bf16 %v14515_v13, %v14507_v41 }
 0x4a4   : > { %v15052_v54 = vsel %vm17485_vm1, %v17484_v22, %v10603_v27  ;;  %v17489_v12 = vunpack.i.h.bf16 %v14590_v19  ;;  %vm17490_vm2 = vcmask 146432   ;;  %v17491_v56 = vunpack.i.h.bf16 %v14584_v14  ;;  %v17497_v22 = vld [vmem:[#allocation53_spill] sm:$0xff] }
 0x4a5   : > { %v15059_v53 = vsel %vm17487_vm15, %v17486_v10, %v10717_v47  ;;  %8940 = vmatpush1.bf16.msra.mxu0 %v17488_v48  ;;  %vm17492_vm8 = vcmask 15360   ;;  %v17493_v35 = vunpack.i.h.bf16 %v17429_v52  ;;  %v10583_v41 = vunpack.i.h.bf16 %v17494_v45 }
 0x4a6   : > { %v4258_v0 = vsel %vm17490_vm2, %v17489_v12, %v10702_v55  ;;  %v4332_v51 = vsel %vm17492_vm8, %v17491_v56, %v10707_v42  ;;  %v10678_v13 = vunpack.i.h.bf16 %v14825_v39  ;;  %8942 = vmatprep.subr.bf16.mxu0 %v8941_v40  ;;  %v8955_v19 = vpack.c.bf16 %v15052_v54, %v15059_v53  ;;  %v17498_v40 = vld [vmem:[#allocation66_spill] sm:$0xff]  ;;  %v15101_v12 = vpop.permute.xlu1 %10725 }
 0x4a7   : > { %v3667_v46 = vsel %vm510_vm0, %v17493_v35, %v10482_v34  ;;  %v10618_v28 = vunpack.i.h.bf16 %v17495_v21  ;;  %v8995_v30 = vpack.c.bf16 %v3593_v31, %v3519_v37  ;;  %v8997_v14 = vpack.c.bf16 %v3742_v43, %v3668_v38  ;;  %v15093_v37 = vpop.permute.xlu0 %10730 }
 0x4a8   : > { %v3890_v9 = vsel %vm735_vm4, %v10678_v13, %v14968_v32  ;;  %v10722_v52 = vunpack.i.l.bf16 %v15020_v2  ;;  %v8945_v34 = vpack.c.bf16 %v4332_v51, %v4258_v0  ;;  %vm17496_vm0 = vcmask 7168   ;;  %v4436_v0 = vld [vmem:[#allocation2 + $0xa0] sm:$0xff] }
 0x4a9   : > { %v4406_v23 = vsel %vm17496_vm0, %v10583_v41, %v10712_v4  ;;  %v3816_v60 = vsel %vm660_vm3, %v10497_v44, %v10498_v8  ;;  %v10718_v15 = vunpack.i.h.bf16 %v15038_v58  ;;  %8996 = vmatpush1.bf16.msra.mxu1 %v8995_v30  ;;  %v17499_v10 = vpack.c.bf16 %v17497_v22, %v17498_v40  ;;  %vm17501_vm7 = vmmov %vm17496_vm0  ;;  %v17504_v30 = vld [vmem:[#allocation72_spill] sm:$0xff] }
 0x4aa   : > { %v8999_v31 = vpack.c.bf16 %v3741_v63, %v3667_v46  ;;  %v17500_v32 = vunpack.i.l.bf16 %v17494_v45  ;;  %v10688_v43 = vunpack.i.h.bf16 %v14860_v1  ;;  %v10683_v48 = vunpack.i.h.bf16 %v14869_v16  ;;  %8998 = vmatprep.subr.bf16.mxu1 %v8997_v14  ;;  %v4250_v40 = vpop.permute.xlu1 %4249 }
 0x4ab   : > { %8944 = vmatpush1.bf16.msra.mxu0 %v17499_v10  ;;  %v10732_v8 = vunpack.i.l.bf16 %v15093_v37  ;;  %v17502_v56 = vunpack.i.l.bf16 %v17495_v21  ;;  %vm17503_vm9 = vcmask 900096   ;;  %v3889_v63 = vsel %vm735_vm4, %v10677_v29, %v10678_v13  ;;  %v17508_v21 = vld [vmem:[#allocation71_spill] sm:$0xff]  ;;  %vm17510_vm4 = vmmov %vm17487_vm15 }
 0x4ac   : > { %v4405_v38 = vsel %vm17501_vm7, %v17500_v32, %v10583_v41  ;;  %8946 = vmatprep.subr.bf16.mxu0 %v8945_v34  ;;  %v9001_v35 = vpack.c.bf16 %v3890_v9, %v3816_v60  ;;  %v8949_v46 = vpack.c.bf16 %v4436_v0, %v4406_v23  ;;  %v4038_v45 = vsel %vm885_vm6, %v10688_v43, %v14989_v49  ;;  %v17507_v49 = vld [vmem:[#allocation81_spill] sm:$0xff]  ;;  %v4435_v23 = vld [vmem:[#allocation2 + $0x98] sm:$0xff]  ;;  %vm17513_vm2 = vmmov %vm17503_vm9 }
 0x4ad   : > { %v15106_v51 = vsel %vm17503_vm9, %v17502_v56, %v10618_v28  ;;  %v3964_v41 = vsel %vm810_vm5, %v10683_v48, %v15005_v11  ;;  %v17505_v14 = vunpack.i.h.bf16 %v17504_v30  ;;  %vm17506_vm12 = vcmask 891904   ;;  %9000 = vmatpush1.bf16.msra.mxu1 %v8999_v31  ;;  %v4324_v11 = vpop.permute.xlu0 %4323 }
 0x4ae   : > { %v4574_v39 = vsel %vm17485_vm1, %v10603_v27, %v10722_v52  ;;  %v10733_v29 = vunpack.i.h.bf16 %v15093_v37  ;;  %v10727_v13 = vunpack.i.l.bf16 %v15101_v12  ;;  %v17509_v9 = vpack.c.bf16 %v17507_v49, %v17508_v21  ;;  %9002 = vmatprep.subr.bf16.mxu1 %v9001_v35  ;;  %v17524_v49 = vld [vmem:[#allocation68_spill] sm:$0xff] }
 0x4af   : > { %v15118_v34 = vsel %vm17506_vm12, %v17505_v14, %v10732_v8  ;;  %v4500_v60 = vsel %vm17510_vm4, %v10717_v47, %v10718_v15  ;;  %v3815_v27 = vsel %vm660_vm3, %v10393_v57, %v10497_v44  ;;  %v10698_v22 = vunpack.i.h.bf16 %v14888_v36  ;;  %v15265_v37 = vld [vmem:[%s16367_s4] sm:$0xff] }
 0x4b0   : > { %8948 = vmatpush1.bf16.msra.mxu0 %v17509_v9  ;;  %v8959_v6 = vpack.c.bf16 %v15118_v34, %v15106_v51  ;;  %v8951_v10 = vpack.c.bf16 %v4435_v23, %v4405_v38  ;;  %v4037_v31 = vsel %vm885_vm6, %v10687_v26, %v10688_v43  ;;  %v3963_v47 = vsel %vm810_vm5, %v10682_v20, %v10683_v48  ;;  %vm17514_vm5 = vmmov %vm17506_vm12 }
 0x4b1   : > { %8950 = vmatprep.subr.bf16.mxu0 %v8949_v46  ;;  %v10693_v32 = vunpack.i.h.bf16 %v14895_v24  ;;  %v9003_v0 = vpack.c.bf16 %v3889_v63, %v3815_v27  ;;  %v9005_v62 = vpack.c.bf16 %v4038_v45, %v3964_v41  ;;  %vm17511_vm15 = vcmask 154624   ;;  %v15148_v38 = vpop.permute.xlu0 %10740 }
 0x4b2   : > { %v4186_v57 = vsel %vm17511_vm15, %v10698_v22, %v4176_v3  ;;  %v8953_v44 = vpack.c.bf16 %v4574_v39, %v4500_v60  ;;  %vm17512_vm3 = vcmask 162816   ;;  %v4648_v1 = vsel %vm17513_vm2, %v10618_v28, %v10727_v13  ;;  %vm17515_vm8 = vmmov %vm17511_vm15 }
 0x4b3   : > { %v4112_v56 = vsel %vm17512_vm3, %v10693_v32, %v4102_v17  ;;  %9004 = vmatpush1.bf16.msra.mxu1 %v9003_v0  ;;  %v4722_v16 = vsel %vm17514_vm5, %v10732_v8, %v10733_v29  ;;  %v10708_v26 = vunpack.i.h.bf16 %v14920_v61  ;;  %v10743_v20 = vunpack.i.h.bf16 %v15148_v38  ;;  %v15159_v17 = vpop.permute.xlu1 %10735  ;;  %vm17516_vm0 = vmmov %vm17512_vm3 }
 0x4b4   : > { %8952 = vmatpush1.bf16.msra.mxu0 %v8951_v10  ;;  %9006 = vmatprep.subr.bf16.mxu1 %v9005_v62  ;;  %v10742_v3 = vunpack.i.l.bf16 %v15148_v38  ;;  %v9007_v43 = vpack.c.bf16 %v4037_v31, %v3963_v47  ;;  %v4185_v48 = vsel %vm17515_vm8, %v10697_v7, %v10698_v22  ;;  %v10703_v28 = vunpack.i.h.bf16 %v14936_v18  ;;  %v4438_v31 = vld [vmem:[#allocation2 + $0xb0] sm:$0xff] }
 0x4b5   : > { %8954 = vmatprep.subr.bf16.mxu0 %v8953_v44  ;;  %v10738_v51 = vunpack.i.h.bf16 %v15159_v17  ;;  %v10737_v8 = vunpack.i.l.bf16 %v15159_v17  ;;  %v4111_v63 = vsel %vm17516_vm0, %v10692_v33, %v10693_v32  ;;  %v9009_v35 = vpack.c.bf16 %v4186_v57, %v4112_v56  ;;  %v15175_v36 = vpop.permute.xlu0 %10745  ;;  %v17521_v33 = vld [vmem:[#allocation67_spill] sm:$0xff] }
 0x4b6   : > { %vm17517_vm7 = vcmask 15360   ;;  %v8957_v45 = vpack.c.bf16 %v4722_v16, %v4648_v1  ;;  %vm17518_vm9 = vcmask 146432   ;;  %vm17519_vm12 = vcmask 883712  }
 0x4b7   : > { %v4334_v46 = vsel %vm17517_vm7, %v10708_v26, %v4324_v11  ;;  %v4260_v41 = vsel %vm17518_vm9, %v10703_v28, %v4250_v40  ;;  %9008 = vmatpush1.bf16.msra.mxu1 %v9007_v43  ;;  %v4796_v7 = vsel %vm17519_vm12, %v10737_v8, %v10738_v51  ;;  %vm17520_vm1 = vcmask 875520   ;;  %v4398_v14 = vpop.permute.xlu1 %4397  ;;  %vm17522_vm4 = vmmov %vm17517_vm7  ;;  %v17527_v11 = vld [vmem:[#allocation76_spill] sm:$0xff] }
 0x4b8   : > { %8956 = vmatpush1.bf16.msra.mxu0 %v8955_v19  ;;  %v4870_v24 = vsel %vm17520_vm1, %v10742_v3, %v10743_v20  ;;  %v10663_v30 = vunpack.i.h.bf16 %v17521_v33  ;;  %9010 = vmatprep.subr.bf16.mxu1 %v9009_v35  ;;  %v4333_v54 = vsel %vm17522_vm4, %v10707_v42, %v10708_v26  ;;  %vm17523_vm15 = vmmov %vm17518_vm9  ;;  %v10713_v19 = vunpack.i.h.bf16 %v14956_v59 }
 0x4b9   : > { %8958 = vmatprep.subr.bf16.mxu0 %v8957_v45  ;;  %v4259_v53 = vsel %vm17523_vm15, %v10702_v55, %v10703_v28  ;;  %v9011_v34 = vpack.c.bf16 %v4185_v48, %v4111_v63  ;;  %v9013_v39 = vpack.c.bf16 %v4334_v46, %v4260_v41  ;;  %v17525_v21 = vunpack.i.h.bf16 %v17524_v49  ;;  %vm17526_vm3 = vmmov %vm17520_vm1  ;;  %v10756_v18 = vpop.permute.xlu0 %10755  ;;  %v17531_v55 = vld [vmem:[#allocation70_spill] sm:$0xff]  ;;  %v4437_v28 = vld [vmem:[#allocation2 + $0xa8] sm:$0xff] }
 0x4ba   : > { %v17528_v23 = vunpack.i.h.bf16 %v17527_v11  ;;  %vm17529_vm2 = vmmov %vm17519_vm12  ;;  %v8961_v27 = vpack.c.bf16 %v4870_v24, %v4796_v7  ;;  %v10747_v61 = vunpack.i.l.bf16 %v15175_v36  ;;  %vm17530_vm5 = vcmask 7168   ;;  %v17541_v45 = vld [vmem:[#allocation62_spill] sm:$0xff] }
 0x4bb   : > { %v4869_v9 = vsel %vm17526_vm3, %v17525_v21, %v10742_v3  ;;  %v4408_v42 = vsel %vm17530_vm5, %v10713_v19, %v4398_v14  ;;  %9012 = vmatpush1.bf16.msra.mxu1 %v9011_v34  ;;  %v10658_v22 = vunpack.i.h.bf16 %v17531_v55  ;;  %v15200_v40 = vpop.permute.xlu1 %10750  ;;  %v9015_v10 = vpack.c.bf16 %v4333_v54, %v4259_v53  ;;  %vm17534_vm0 = vmmov %vm17530_vm5  ;;  %v17543_v14 = vld [vmem:[#allocation74_spill] sm:$0xff] }
 0x4bc   : > { %v4795_v60 = vsel %vm17529_vm2, %v17528_v23, %v10737_v8  ;;  %8960 = vmatpush1.bf16.msra.mxu0 %v8959_v6  ;;  %9014 = vmatprep.subr.bf16.mxu1 %v9013_v39  ;;  %v10758_v47 = vunpack.i.h.bf16 %v10756_v18  ;;  %v10757_v32 = vunpack.i.l.bf16 %v10756_v18  ;;  %v10752_v0 = vunpack.i.l.bf16 %v15200_v40 }
 0x4bd   : > { %8962 = vmatprep.subr.bf16.mxu0 %v8961_v27  ;;  %v8963_v62 = vpack.c.bf16 %v4869_v9, %v4795_v60  ;;  %v17532_v57 = vunpack.i.l.bf16 %v17521_v33  ;;  %vm17533_vm8 = vcmask 736256   ;;  %v4407_v6 = vsel %vm17534_vm0, %v10712_v4, %v10713_v19  ;;  %v15210_v16 = vpop.permute.xlu0 %10760 }
 0x4be   : > { %v9017_v56 = vpack.c.bf16 %v4438_v31, %v4408_v42  ;;  %v10723_v1 = vunpack.i.h.bf16 %v15020_v2  ;;  %vm17535_vm7 = vcmask 867328   ;;  %vm17536_vm9 = vmmov %vm17533_vm8  ;;  %v17537_v43 = vunpack.i.l.bf16 %v17531_v55 }
 0x4bf   : > { %v5017_v44 = vsel %vm17533_vm8, %v17532_v57, %v10663_v30  ;;  %9016 = vmatpush1.bf16.msra.mxu1 %v9015_v10  ;;  %v4944_v26 = vsel %vm17535_vm7, %v10658_v22, %v10747_v61  ;;  %v5018_v3 = vsel %vm17536_vm9, %v10663_v30, %v10752_v0  ;;  %vm17538_vm12 = vmmov %vm17535_vm7  ;;  %v4566_v4 = vpop.permute.xlu1 %4565  ;;  %vm17539_vm1 = vcmask 1039360  }
 0x4c0   : > { %8964 = vmatpush1.bf16.msra.mxu0 %v8963_v62  ;;  %v4943_v59 = vsel %vm17538_vm12, %v17537_v43, %v10658_v22  ;;  %9018 = vmatprep.subr.bf16.mxu1 %v9017_v56  ;;  %v8965_v48 = vpack.c.bf16 %v5018_v3, %v4944_v26  ;;  %v4502_v8 = vsel %vm17539_vm1, %v10757_v32, %v10758_v47  ;;  %vm17540_vm4 = vcmask 1031168   ;;  %vm17542_vm15 = vmmov %vm17539_vm1  ;;  %v11249_v43 = vld [vmem:[%s16367_s4 + $0x20] sm:$0xff] }
 0x4c1   : > { %v4576_v63 = vsel %vm17540_vm4, %v10723_v1, %v4566_v4  ;;  %v9019_v35 = vpack.c.bf16 %v4437_v28, %v4407_v6  ;;  %v8967_v46 = vpack.c.bf16 %v5017_v44, %v4943_v59  ;;  %v10673_v41 = vunpack.i.h.bf16 %v17541_v45  ;;  %v4640_v30 = vpop.permute.xlu0 %4639  ;;  %vm17544_vm3 = vmmov %vm17540_vm4 }
 0x4c2   : > { %v4501_v7 = vsel %vm17542_vm15, %v10718_v15, %v10757_v32  ;;  %v9021_v24 = vpack.c.bf16 %v4576_v63, %v4502_v8  ;;  %8966 = vmatprep.subr.bf16.mxu0 %v8965_v48  ;;  %v10762_v33 = vunpack.i.l.bf16 %v15210_v16  ;;  %v10668_v54 = vunpack.i.h.bf16 %v17543_v14 }
 0x4c3   : > { %9020 = vmatpush1.bf16.msra.mxu1 %v9019_v35  ;;  %v4575_v53 = vsel %vm17544_vm3, %v10722_v52, %v10723_v1  ;;  %v15232_v19 = vpop.permute.xlu1 %10765  ;;  %v17545_v15 = vunpack.i.l.bf16 %v17541_v45  ;;  %v10728_v49 = vunpack.i.h.bf16 %v15101_v12  ;;  %vm17546_vm2 = vcmask 728064   ;;  %v11250_v35 = vld [vmem:[%s16367_s4 + $0x18] sm:$0xff] }
 0x4c4   : > { %8968 = vmatpush1.bf16.msra.mxu0 %v8967_v46  ;;  %9022 = vmatprep.subr.bf16.mxu1 %v9021_v24  ;;  %v10767_v58 = vunpack.i.l.bf16 %v15232_v19  ;;  %v9023_v34 = vpack.c.bf16 %v4575_v53, %v4501_v7  ;;  %v5092_v2 = vsel %vm17546_vm2, %v10668_v54, %v10762_v33  ;;  %v17547_v9 = vunpack.i.l.bf16 %v17543_v14  ;;  %vm17548_vm5 = vmmov %vm17546_vm2 }
 0x4c5   : > { %v5165_v39 = vsel %vm2030_vm14, %v17545_v15, %v10673_v41  ;;  %v10776_v21 = vpop.permute.xlu0 %10775  ;;  %vm17549_vm8 = vcmask 900096   ;;  %vm17551_vm7 = vcmask 891904   ;;  %vm17553_vm12 = vcmask 883712  }
 0x4c6   : > { %v5166_v52 = vsel %vm2030_vm14, %v10673_v41, %v10767_v58  ;;  %v5091_v11 = vsel %vm17548_vm5, %v17547_v9, %v10668_v54  ;;  %v4649_v55 = vsel %vm17549_vm8, %v10727_v13, %v10728_v49  ;;  %v10777_v22 = vunpack.i.l.bf16 %v10776_v21  ;;  %vm17550_vm0 = vmmov %vm17549_vm8  ;;  %v11251_v9 = vld [vmem:[%s16367_s4 + $0x10] sm:$0xff] }
 0x4c7   : > { %9024 = vmatpush1.bf16.msra.mxu1 %v9023_v34  ;;  %v10771_v23 = vpop.permute.xlu1 %10770  ;;  %v8969_v60 = vpack.c.bf16 %v5166_v52, %v5092_v2  ;;  %v8971_v18 = vpack.c.bf16 %v5165_v39, %v5091_v11  ;;  %v4650_v10 = vsel %vm17550_vm0, %v10728_v49, %v4640_v30  ;;  %v10778_v31 = vunpack.i.h.bf16 %v10776_v21  ;;  %vm17552_vm9 = vmmov %vm17551_vm7 }
 0x4c8   : > { %v10773_v27 = vunpack.i.h.bf16 %v10771_v23  ;;  %v10772_v42 = vunpack.i.l.bf16 %v10771_v23  ;;  %v4797_v13 = vsel %vm17553_vm12, %v10738_v51, %v10777_v22  ;;  %vm17554_vm1 = vcmask 875520   ;;  %vm17555_vm4 = vmmov %vm17553_vm12 }
 0x4c9   : > { %8970 = vmatprep.subr.bf16.mxu0 %v8969_v60  ;;  %v15255_v32 = vpop.permute.xlu0 %10785  ;;  %v4798_v51 = vsel %vm17555_vm4, %v10777_v22, %v10778_v31  ;;  %vm17556_vm15 = vmmov %vm17554_vm1  ;;  %v10753_v59 = vunpack.i.h.bf16 %v15200_v40  ;;  %vm17557_vm3 = vcmask 711680   ;;  %vm17558_vm2 = vcmask 703488  }
 0x4ca   : > { %v4723_v47 = vsel %vm17551_vm7, %v10733_v29, %v10772_v42  ;;  %8972 = vmatpush1.bf16.msra.mxu0 %v8971_v18  ;;  %v4724_v62 = vsel %vm17552_vm9, %v10772_v42, %v10773_v27  ;;  %v10787_v1 = vunpack.i.l.bf16 %v15255_v32  ;;  %v10788_v29 = vunpack.i.h.bf16 %v15255_v32  ;;  %vm17559_vm5 = vmmov %vm17557_vm3 }
 0x4cb   : > { %v10781_v57 = vpop.permute.xlu1 %10780  ;;  %v9025_v44 = vpack.c.bf16 %v4724_v62, %v4650_v10  ;;  %v9027_v6 = vpack.c.bf16 %v4723_v47, %v4649_v55  ;;  %vm17560_vm8 = vmmov %vm17558_vm2  ;;  %vm17561_vm0 = vcmask 736256   ;;  %v10768_v24 = vunpack.i.h.bf16 %v15232_v19 }
 0x4cc   : > { %v10783_v12 = vunpack.i.h.bf16 %v10781_v57  ;;  %v10782_v56 = vunpack.i.l.bf16 %v10781_v57  ;;  %v5239_v63 = vsel %vm17557_vm3, %v14791_v50, %v10787_v1  ;;  %v5240_v41 = vsel %vm17559_vm5, %v10787_v1, %v10788_v29  ;;  %vm17563_vm9 = vmmov %vm17561_vm0 }
 0x4cd   : > { %9026 = vmatprep.subr.bf16.mxu1 %v9025_v44  ;;  %6229 = vmatmul.mubr.f32.vlgmr.msra.gmra.mrb[16].mxu0 %v15265_v37  ;;  %v4936_v17 = vpop.permute.xlu0 %4935  ;;  %v5019_v50 = vsel %vm17561_vm0, %v10752_v0, %v10753_v59  ;;  %vm17562_vm7 = vcmask 867328   ;;  %v10763_v15 = vunpack.i.h.bf16 %v15210_v16  ;;  %v5167_v0 = vsel %vm2030_vm14, %v10767_v58, %v10768_v24  ;;  %v11252_v16 = vld [vmem:[%s16367_s4 + $0x28] sm:$0xff] }
 0x4ce   : > { %v4871_v26 = vsel %vm17554_vm1, %v10743_v20, %v10782_v56  ;;  %9028 = vmatpush1.bf16.msra.mxu1 %v9027_v6  ;;  %v4872_v3 = vsel %vm17556_vm15, %v10782_v56, %v10783_v12  ;;  %6234 = vmatprep.mubr.f32.mxu0 %v11249_v43  ;;  %v10748_v20 = vunpack.i.h.bf16 %v15175_v36  ;;  %vm17564_vm12 = vmmov %vm17562_vm7  ;;  %vm17565_vm1 = vcmask 728064   ;;  %v17605_v44 = vld [vmem:[#allocation65_spill] sm:$0xff] }
 0x4cf   : > { %v10791_v4 = vpop.permute.xlu1 %10790  ;;  %v9029_v48 = vpack.c.bf16 %v4872_v3, %v4798_v51  ;;  %v9031_v28 = vpack.c.bf16 %v4871_v26, %v4797_v13  ;;  %vm17566_vm4 = vmmov %vm17565_vm1  ;;  %v17573_v3 = vld [vmem:[#allocation44_spill] sm:$0xff] }
 0x4d0   : > { %v10793_v8 = vunpack.i.h.bf16 %v10791_v4  ;;  %v10792_v38 = vunpack.i.l.bf16 %v10791_v4  ;;  %v4946_v53 = vsel %vm17562_vm7, %v10748_v20, %v4936_v17  ;;  %v4945_v34 = vsel %vm17564_vm12, %v10747_v61, %v10748_v20  ;;  %vm17568_vm15 = vmmov %vm17558_vm2  ;;  %v17571_v17 = vld [vmem:[#allocation32_spill] sm:$0xff] }
 0x4d1   : > { %9030 = vmatprep.subr.bf16.mxu1 %v9029_v48  ;;  %6235 = vmatmul.mubr.f32.gmra.mrb[18].mxu0 %v11250_v35  ;;  %v5084_v45 = vpop.permute.xlu0 %5083  ;;  %v9035_v40 = vpack.c.bf16 %v5019_v50, %v4945_v34  ;;  %v5093_v36 = vsel %vm17566_vm4, %v10762_v33, %v10763_v15  ;;  %vm17572_vm5 = vcmp.ne.f32.partialorder %v17571_v17, 0.0  ;;  %v17575_v50 = vld [vmem:[#allocation36_spill] sm:$0xff] }
 0x4d2   : > { %v5313_v46 = vsel %vm17558_vm2, %v14838_v25, %v10792_v38  ;;  %9032 = vmatpush1.bf16.msra.mxu1 %v9031_v28  ;;  %v5314_v7 = vsel %vm17560_vm8, %v10792_v38, %v10793_v8  ;;  %6305 = vmatprep.mubr.f32.mxu0 %v17233_v5  ;;  %v5094_v2 = vsel %vm17565_vm1, %v10763_v15, %v5084_v45  ;;  %vm17574_vm8 = vcmp.ne.f32.partialorder %v17573_v3, 0.0 }
 0x4d3   : > { %v8975_v30 = vpack.c.bf16 %v5313_v46, %v5239_v63  ;;  %v5010_v14 = vpop.permute.xlu1 %5009  ;;  %v8973_v54 = vpack.c.bf16 %v5314_v7, %v5240_v41  ;;  %v9039_v11 = vpack.c.bf16 %v5167_v0, %v5093_v36  ;;  %vm17576_vm0 = vcmp.ne.f32.partialorder %v17575_v50, 0.0  ;;  %v17579_v0 = vld [vmem:[#allocation33_spill] sm:$0xff] }
 0x4d4   : > { %v5020_v25 = vsel %vm17563_vm9, %v10753_v59, %v5010_v14  ;;  %vm17580_vm9 = vcmp.ne.f32.partialorder %v17579_v0, 0.0 }
 0x4d5   : > { %v9033_v39 = vpack.c.bf16 %v5020_v25, %v4946_v53  ;;  %8974 = vmatprep.subr.bf16.mxu0 %v8973_v54  ;;  %v10796_v49 = vpop.permute.xlu0 %10795  ;;  %v17577_v54 = vld [vmem:[#allocation43_spill] sm:$0xff] }
 0x4d6   : > { %8976 = vmatpush1.bf16.msra.mxu0 %v8975_v30  ;;  %v10798_v19 = vunpack.i.h.bf16 %v10796_v49  ;;  %v10797_v58 = vunpack.i.l.bf16 %v10796_v49  ;;  %vm17578_vm7 = vcmp.ne.f32.partialorder %v17577_v54, 0.0 }
 0x4d7   : > { %v5158_v21 = vpop.permute.xlu1 %5157  ;;  %9034 = vmatprep.subr.bf16.mxu1 %v9033_v39 }
 0x4d8   : > { %v5168_v52 = vsel %vm2030_vm14, %v10768_v24, %v5158_v21  ;;  %9036 = vmatpush1.bf16.msra.mxu1 %v9035_v40  ;;  %vm17567_vm14 = vmmov %vm17557_vm3  ;;  %v5242_v18 = vsel %vm17557_vm3, %v10797_v58, %v10798_v19  ;;  %v17581_v21 = vld [vmem:[#allocation35_spill] sm:$0xff]  ;;  %vm17591_vm3 = vcmask 162816  }
 0x4d9   : > { %v9037_v61 = vpack.c.bf16 %v5168_v52, %v5094_v2  ;;  %8453 = vmatmul.mubr.msk.f32.vlgmr.msra.gmra.mrb[16].mxu0 %vm5695_vm11, %v11251_v9  ;;  %v5241_v33 = vsel %vm17567_vm14, %v10788_v29, %v10797_v58  ;;  %vm17582_vm12 = vcmp.ne.f32.partialorder %v17581_v21, 0.0 }
 0x4da   : > { %6311 = vmatprep.mubr.f32.mxu0 %v17233_v5  ;;  %v15325_v31 = vpop.permute.xlu0 %5687 }
 0x4db   : > { %v10801_v23 = vpop.permute.xlu1 %10800  ;;  %9038 = vmatprep.subr.bf16.mxu1 %v9037_v61 }
 0x4dc   : > { %v10803_v60 = vunpack.i.h.bf16 %v10801_v23  ;;  %v10802_v27 = vunpack.i.l.bf16 %v10801_v23  ;;  %9040 = vmatpush1.bf16.msra.mxu1 %v9039_v11  ;;  %v17583_v11 = vld [vmem:[#allocation38_spill] sm:$0xff] }
 0x4dd   : > { %8454 = vmatmul.mubr.msk.f32.gmra.mrb[18].mxu0 %vm5695_vm11, %v11252_v16  ;;  %vm17584_vm1 = vcmp.ne.f32.partialorder %v17583_v11, 0.0 }
 0x4de   : > { %v5315_v42 = vsel %vm17568_vm15, %v10793_v8, %v10802_v27  ;;  %v5316_v55 = vsel %vm17558_vm2, %v10802_v27, %v10803_v60  ;;  %v17585_v60 = vld [vmem:[#allocation41_spill] sm:$0xff]  ;;  %vm17592_vm2 = vmmov %vm17591_vm3 }
 0x4df   : > { %v9043_v22 = vpack.c.bf16 %v5315_v42, %v5241_v33  ;;  %6383 = vmatmul.mubr.f32.vlgmr.msra.gmra.mrb[20].mxu1 %v15265_v37  ;;  %v9041_v10 = vpack.c.bf16 %v5316_v55, %v5242_v18  ;;  %v15336_v12 = vpop.permute.xlu1 %5692  ;;  %vm17586_vm4 = vcmp.ne.f32.partialorder %v17585_v60, 0.0 }
 0x4e0   : > { %6388 = vmatprep.mubr.f32.mxu1 %v11249_v43 }
 0x4e1   : > { %9042 = vmatprep.subr.bf16.mxu1 %v9041_v10  ;;  %v17587_v10 = vld [vmem:[#allocation40_spill] sm:$0xff] }
 0x4e2   : > { %9044 = vmatpush1.bf16.msra.mxu1 %v9043_v22  ;;  %vm17588_vm14 = vcmp.ne.f32.partialorder %v17587_v10, 0.0 }
 0x4e3   : > { %6389 = vmatmul.mubr.f32.gmra.mrb[22].mxu1 %v11250_v35 }
 0x4e4   : > { %6459 = vmatprep.mubr.f32.mxu1 %v17233_v5 }
 0x4e7   : > { %8455 = vmatmul.mubr.msk.f32.vlgmr.msra.gmra.mrb[20].mxu1 %vm5695_vm11, %v11251_v9 }
 0x4e8   : > { %6465 = vmatprep.mubr.f32.mxu1 %v17233_v5 }
 0x4eb   : > { %8456 = vmatmul.mubr.msk.f32.gmra.mrb[22].mxu1 %vm5695_vm11, %v11252_v16 }
 0x4fa   : > { %v5845_v47 = vpop.f32.mrb[8].mxu1 }
 0x4fb   : > { %v15328_v32 = vadd.f32 %v5845_v47, %v15325_v31  ;;  %v5847_v62 = vpop.f32.mrb[9].mxu1 }
 0x4fc   : > { %v15331_v57 = vadd.f32 %v5847_v62, %v15325_v31  ;;  %v10806_v62 = vpop.permute.xlu0 %10805 }
 0x4fd   : > { %v6472_v6 = vsel %vm371_vm10, %v15328_v32, 0.0 }
 0x4fe   : > { %v6473_v56 = vsel %vm372_vm13, %v15331_v57, 0.0  ;;  %v5851_v13 = vpop.f32.mrb[10].mxu1 }
 0x4ff   : > { %v15342_v1 = vadd.f32 %v5851_v13, %v15336_v12  ;;  %v5853_v37 = vpop.f32.mrb[11].mxu1  ;;  %v10829_v29 = vpack.i.bf16 %v6473_v56, %v6472_v6 }
 0x500   : > { %v15345_v26 = vadd.f32 %v5853_v37, %v15336_v12 }
 0x501   : > { %v6482_v51 = vsel %vm17572_vm5, %v15342_v1, 0.0  ;;  %10830 = vrot.lane.b32.xlu1 %v10829_v29, %s17102_s20  ;;  %10825 = vrot.lane.b32.xlu0 %v10829_v29, %s17058_s13  ;;  %vm17593_vm5 = vmmov %vm17592_vm2 }
 0x502   : > { %v6483_v43 = vsel %vm17574_vm8, %v15345_v26, 0.0  ;;  %v10849_v59 = vpack.i.bf16 %v6482_v51, %v6472_v6  ;;  %v5999_v4 = vpop.f32.mrb[12].mxu1  ;;  %v15403_v6 = vpop.permute.xlu1 %10810  ;;  %vm17594_vm8 = vcmask 154624  }
 0x503   : > { %v6001_v48 = vpop.f32.mrb[13].mxu1  ;;  %v10864_v38 = vpack.i.bf16 %v6483_v43, %v6482_v51  ;;  %v15417_v51 = vpop.permute.xlu0 %10815 }
 0x505   : > { %10840 = vrot.lane.b32.xlu1 %v10829_v29, %s17054_s22  ;;  %10835 = vrot.lane.b32.xlu0 %v10829_v29, %s17061_s0 }
 0x506   : > { %v6005_v28 = vpop.f32.mrb[14].mxu1 }
 0x507   : > { %v6007_v8 = vpop.f32.mrb[15].mxu1 }
 0x509   : > { %10850 = vrot.lane.b32.xlu1 %v10849_v59, %s17073_s1  ;;  %10845 = vrot.lane.b32.xlu0 %v10849_v59, %s17068_s17 }
 0x50d   : > { %10860 = vrot.lane.b32.xlu1 %v10849_v59, %s17065_s18  ;;  %10855 = vrot.lane.b32.xlu0 %v10849_v59, %s17063_s10 }
 0x511   : > { %10865 = vrot.lane.b32.xlu1 %v10864_v38, %s17058_s13  ;;  %10870 = vrot.lane.b32.xlu0 %v10864_v38, %s17102_s20 }
 0x515   : > { %10875 = vrot.lane.b32.xlu1 %v10864_v38, %s17061_s0  ;;  %10880 = vrot.lane.b32.xlu0 %v10864_v38, %s17054_s22 }
 0x550   : > { %v5922_v20 = vpop.f32.mrb[12].mxu0 }
 0x551   : > { %v5923_v63 = vadd.f32 %v5922_v20, %v15325_v31  ;;  %v5924_v35 = vpop.f32.mrb[13].mxu0 }
 0x552   : > { %v5925_v46 = vadd.f32 %v5924_v35, %v15325_v31 }
 0x553   : > { %v6000_v45 = vadd.f32 %v5999_v4, %v5923_v63 }
 0x554   : > { %v6002_v41 = vadd.f32 %v6001_v48, %v5925_v46  ;;  %v5928_v7 = vpop.f32.mrb[14].mxu0  ;;  %v15432_v48 = vld [vmem:[%s16369_s6 + $0x8] sm:$0xff]  ;;  %v10807_v46 = vunpack.i.l.bf16 %v10806_v62 }
 0x555   : > { %v6474_v24 = vsel %vm17576_vm0, %v6000_v45, 0.0  ;;  %v5929_v30 = vadd.f32 %v5928_v7, %v15336_v12  ;;  %v5930_v14 = vpop.f32.mrb[15].mxu0  ;;  %8457 = vmatprep.mubr.msk.f32.mxu0 %vm5695_vm11, %v15432_v48  ;;  %8458 = vmatprep.mubr.msk.f32.mxu1 %vm5695_vm11, %v15432_v48  ;;  %vm17595_vm0 = vmmov %vm17592_vm2 }
 0x556   : > { %6494 = vst [vmem:[#allocation3 + $0x18] sm:$0xff] %v6474_v24  ;;  %v6475_v53 = vsel %vm17578_vm7, %v6002_v41, 0.0  ;;  %v5931_v25 = vadd.f32 %v5930_v14, %v15336_v12  ;;  %v10889_v34 = vpack.i.bf16 %v6474_v24, %v6473_v56  ;;  %v17589_v56 = vld [vmem:[#allocation46_spill] sm:$0xff]  ;;  %v10808_v41 = vunpack.i.h.bf16 %v10806_v62  ;;  %vm17596_vm7 = vmmov %vm17594_vm8 }
 0x557   : > { %6495 = vst [vmem:[#allocation3 + $0x20] sm:$0xff] %v6475_v53  ;;  %v6006_v15 = vadd.f32 %v6005_v28, %v5929_v30  ;;  %v10904_v39 = vpack.i.bf16 %v6475_v53, %v6474_v24  ;;  %vm17590_vm15 = vcmp.ne.f32.partialorder %v17589_v56, 0.0 }
 0x558   : > { %v6008_v40 = vadd.f32 %v6007_v8, %v5931_v25  ;;  %10890 = vrot.lane.b32.xlu1 %v10889_v34, %s17073_s1  ;;  %10885 = vrot.lane.b32.xlu0 %v10889_v34, %s17068_s17 }
 0x559   : > { %v6484_v49 = vsel %vm17580_vm9, %v6006_v15, 0.0  ;;  %v10813_v15 = vunpack.i.h.bf16 %v15403_v6  ;;  %vm17597_vm9 = vmmov %vm17596_vm7 }
 0x55a   : > { %6504 = vst [vmem:[#allocation3 + $0x78] sm:$0xff] %v6484_v49  ;;  %v6485_v2 = vsel %vm17582_vm12, %v6008_v40, 0.0  ;;  %v10924_v36 = vpack.i.bf16 %v6484_v49, %v6483_v43  ;;  %v15419_v43 = vpop.permute.xlu1 %10820  ;;  %vm17598_vm12 = vcmask 7168  }
 0x55b   : > { %6505 = vst [vmem:[#allocation3 + $0x80] sm:$0xff] %v6485_v2  ;;  %v15379_v52 = vpack.i.bf16 %v6485_v2, %v6484_v49 }
 0x55c   : > { %10900 = vrot.lane.b32.xlu1 %v10889_v34, %s17065_s18  ;;  %10895 = vrot.lane.b32.xlu0 %v10889_v34, %s17063_s10 }
 0x560   : > { %10925 = vrot.lane.b32.xlu1 %v10924_v36, %s17068_s17  ;;  %10905 = vrot.lane.b32.xlu0 %v10904_v39, %s17058_s13 }
 0x562   : > { %v6153_v61 = vpop.f32.mrb[16].mxu1 }
 0x563   : > { %v9237_v9 = vadd.f32 %v6153_v61, %v15325_v31  ;;  %v6155_v19 = vpop.f32.mrb[17].mxu1 }
 0x564   : > { %v9238_v58 = vadd.f32 %v6155_v19, %v15325_v31  ;;  %10935 = vrot.lane.b32.xlu1 %v10924_v36, %s17063_s10  ;;  %10910 = vrot.lane.b32.xlu0 %v10904_v39, %s17102_s20 }
 0x565   : > { %v6476_v23 = vsel %vm17584_vm1, %v9237_v9, 0.0  ;;  %vm17599_vm1 = vmmov %vm17596_vm7 }
 0x566   : > { %6496 = vst [vmem:[#allocation3 + $0x28] sm:$0xff] %v6476_v23  ;;  %v15391_v27 = vsel %vm17586_vm4, %v9238_v58, 0.0  ;;  %v15395_v33 = vpack.i.bf16 %v6476_v23, %v6475_v53  ;;  %vm17600_vm4 = vmmov %vm17598_vm12 }
 0x567   : > { %6497 = vst [vmem:[#allocation3 + $0x30] sm:$0xff] %v15391_v27  ;;  %v10984_v55 = vpack.i.bf16 %v15391_v27, %v6476_v23 }
 0x568   : > { %10915 = vrot.lane.b32.xlu0 %v10904_v39, %s17061_s0 }
 0x569   : > { %v6159_v16 = vpop.f32.mrb[18].mxu1  ;;  %10985 = vrot.lane.b32.xlu1 %v10984_v55, %s17058_s13 }
 0x56a   : > { %v9239_v42 = vadd.f32 %v6159_v16, %v15336_v12  ;;  %v6161_v18 = vpop.f32.mrb[19].mxu1  ;;  %v10818_v16 = vunpack.i.h.bf16 %v15417_v51 }
 0x56b   : > { %v9240_v22 = vadd.f32 %v6161_v18, %v15336_v12 }
 0x56c   : > { %v6486_v47 = vsel %vm17588_vm14, %v9239_v42, 0.0  ;;  %10920 = vrot.lane.b32.xlu0 %v10904_v39, %s17054_s22  ;;  %vm17601_vm14 = vmmov %vm17600_vm4 }
 0x56d   : > { %6506 = vst [vmem:[#allocation3 + $0x88] sm:$0xff] %v6486_v47  ;;  %v15407_v13 = vsel %vm17590_vm15, %v9240_v22, 0.0  ;;  %v15411_v37 = vpack.i.bf16 %v6486_v47, %v6485_v2  ;;  %10990 = vrot.lane.b32.xlu1 %v10984_v55, %s17102_s20  ;;  %v10812_v2 = vunpack.i.l.bf16 %v15403_v6  ;;  %vm17602_vm15 = vmmov %vm17600_vm4 }
 0x56e   : > { %6507 = vst [vmem:[#allocation3 + $0x90] sm:$0xff] %v15407_v13  ;;  %v11024_v29 = vpack.i.bf16 %v15407_v13, %v6486_v47  ;;  %v10817_v47 = vunpack.i.l.bf16 %v15417_v51 }
 0x570   : > { %10930 = vrot.lane.b32.xlu0 %v10924_v36, %s17073_s1 }
 0x571   : > { %10995 = vrot.lane.b32.xlu1 %v10984_v55, %s17061_s0 }
 0x573   : > { %v15423_v59 = vpop.permute.xlu1 %10830  ;;  %v15425_v4 = vpop.permute.xlu0 %10825 }
 0x574   : > { %10940 = vrot.lane.b32.xlu0 %v10924_v36, %s17065_s18  ;;  %v10827_v45 = vunpack.i.l.bf16 %v15425_v4  ;;  %v10828_v7 = vunpack.i.h.bf16 %v15425_v4  ;;  %v10833_v50 = vunpack.i.h.bf16 %v15423_v59  ;;  %v10832_v24 = vunpack.i.l.bf16 %v15423_v59 }
 0x575   : > { %11000 = vrot.lane.b32.xlu1 %v10984_v55, %s17054_s22 }
 0x576   : > { %v6600_v39 = vsel %vm885_vm6, %v10807_v46, %v10827_v45  ;;  %v6601_v0 = vsel %vm885_vm6, %v10827_v45, %v10828_v7  ;;  %v6749_v19 = vsel %vm17592_vm2, %v10832_v24, %v10833_v50  ;;  %v6748_v62 = vsel %vm17595_vm0, %v10812_v2, %v10832_v24  ;;  %v17607_v2 = vld [vmem:[#allocation47_spill] sm:$0xff] }
 0x577   : > { %v15438_v28 = vpop.permute.xlu1 %10840  ;;  %v15440_v8 = vpop.permute.xlu0 %10835  ;;  %v10823_v45 = vunpack.i.h.bf16 %v15419_v43 }
 0x578   : > { %10945 = vrot.lane.b32.xlu0 %v15379_v52, %s17058_s13  ;;  %v10838_v58 = vunpack.i.h.bf16 %v15440_v8  ;;  %v10837_v11 = vunpack.i.l.bf16 %v15440_v8  ;;  %v10843_v6 = vunpack.i.h.bf16 %v15438_v28  ;;  %v10842_v56 = vunpack.i.l.bf16 %v15438_v28 }
 0x579   : > { %11025 = vrot.lane.b32.xlu1 %v11024_v29, %s17058_s13 }
 0x57a   : > { %v6897_v46 = vsel %vm17596_vm7, %v10837_v11, %v10838_v58 }
 0x57b   : > { %v15445_v38 = vpop.permute.xlu1 %10850  ;;  %v15447_v20 = vpop.permute.xlu0 %10845 }
 0x57c   : > { %10950 = vrot.lane.b32.xlu0 %v15379_v52, %s17102_s20 }
 0x57d   : > { %11030 = vrot.lane.b32.xlu1 %v11024_v29, %s17102_s20 }
 0x57f   : > { %v15452_v63 = vpop.permute.xlu1 %10860  ;;  %v15454_v35 = vpop.permute.xlu0 %10855 }
 0x580   : > { %10955 = vrot.lane.b32.xlu0 %v15379_v52, %s17061_s0 }
 0x581   : > { %11035 = vrot.lane.b32.xlu1 %v11024_v29, %s17061_s0 }
 0x583   : > { %v15463_v30 = vpop.permute.xlu1 %10865  ;;  %v15465_v14 = vpop.permute.xlu0 %10870 }
 0x584   : > { %v10868_v54 = vunpack.i.h.bf16 %v15463_v30  ;;  %v10867_v53 = vunpack.i.l.bf16 %v15463_v30  ;;  %10960 = vrot.lane.b32.xlu0 %v15379_v52, %s17054_s22  ;;  %v10873_v25 = vunpack.i.h.bf16 %v15465_v14  ;;  %v10872_v34 = vunpack.i.l.bf16 %v15465_v14 }
 0x585   : > { %11040 = vrot.lane.b32.xlu1 %v11024_v29, %s17054_s22 }
 0x586   : > { %v6610_v40 = vsel %vm885_vm6, %v10808_v41, %v10867_v53  ;;  %v6611_v49 = vsel %vm885_vm6, %v10867_v53, %v10868_v54  ;;  %v6759_v21 = vsel %vm17591_vm3, %v10872_v34, %v10873_v25  ;;  %v6758_v42 = vsel %vm17593_vm5, %v10813_v15, %v10872_v34 }
 0x587   : > { %v9047_v52 = vpack.c.bf16 %v6610_v40, %v6600_v39  ;;  %v15487_v36 = vpop.permute.xlu1 %10875  ;;  %v15489_v61 = vpop.permute.xlu0 %10880  ;;  %v9045_v9 = vpack.c.bf16 %v6611_v49, %v6601_v0  ;;  %v9049_v18 = vpack.c.bf16 %v6759_v21, %v6749_v19  ;;  %v9051_v29 = vpack.c.bf16 %v6758_v42, %v6748_v62 }
 0x588   : > { %v10878_v23 = vunpack.i.h.bf16 %v15487_v36  ;;  %v10877_v60 = vunpack.i.l.bf16 %v15487_v36  ;;  %10965 = vrot.lane.b32.xlu0 %v15395_v33, %s17068_s17  ;;  %v10883_v55 = vunpack.i.h.bf16 %v15489_v61  ;;  %v10882_v22 = vunpack.i.l.bf16 %v15489_v61 }
 0x589   : > { %9046 = vmatprep.subr.bf16.mxu0 %v9045_v9  ;;  %v10822_v53 = vunpack.i.l.bf16 %v15419_v43  ;;  %v6896_v34 = vsel %vm17599_vm1, %v10817_v47, %v10837_v11  ;;  %v7045_v39 = vsel %vm17600_vm4, %v10842_v56, %v10843_v6  ;;  %vm17603_vm3 = vcmp.ne.f32.partialorder %v17573_v3, 0.0 }
 0x58a   : > { %9048 = vmatpush1.bf16.msra.mxu0 %v9047_v52  ;;  %v6907_v10 = vsel %vm17594_vm8, %v10877_v60, %v10878_v23  ;;  %v6906_v41 = vsel %vm17597_vm9, %v10818_v16, %v10877_v60  ;;  %v7055_v24 = vsel %vm17598_vm12, %v10882_v22, %v10883_v55  ;;  %v7054_v40 = vsel %vm17601_vm14, %v10823_v45, %v10882_v22  ;;  %vm11260_vm2 = vmpackc.low %vm17603_vm3, %vm372_vm13  ;;  %v17609_v16 = vld [vmem:[#allocation49_spill] sm:$0xff] }
 0x58b   : > { %9050 = vmatprep.subr.bf16.mxu0 %v9049_v18  ;;  %v9053_v51 = vpack.c.bf16 %v6907_v10, %v6897_v46  ;;  %v9055_v15 = vpack.c.bf16 %v6906_v41, %v6896_v34  ;;  %v9057_v0 = vpack.c.bf16 %v7055_v24, %v7045_v39  ;;  %v7044_v49 = vsel %vm17602_vm15, %v10822_v53, %v10842_v56  ;;  %v17611_v18 = vld [vmem:[#allocation54_spill] sm:$0xff] }
 0x58c   : > { %10970 = vrot.lane.b32.xlu0 %v15395_v33, %s17073_s1  ;;  %v9059_v21 = vpack.c.bf16 %v7054_v40, %v7044_v49  ;;  %v11261_v43 = vpack.c.bf16 %v15345_v26, %v15331_v57  ;;  %vm17604_vm5 = vcmp.ne.f32.partialorder %v17571_v17, 0.0  ;;  %vm17606_vm13 = vcmp.ne.f32.partialorder %v17605_v44, 0.0  ;;  %v17619_v40 = vld [vmem:[#allocation75_spill] sm:$0xff] }
 0x58d   : > { %vm11263_vm8 = vmpackc.low %vm17604_vm5, %vm371_vm10  ;;  %vm17608_vm10 = vcmp.ne.f32.partialorder %v17607_v2, 0.0  ;;  %vm17610_vm0 = vcmp.ne.f32.partialorder %v17609_v16, 0.0  ;;  %vm17612_vm7 = vcmp.ne.f32.partialorder %v17611_v18, 0.0  ;;  %vm17620_vm4 = vcmp.ne.f32.partialorder %v17619_v40, 0.0 }
 0x58e   : > { %9052 = vmatpush1.bf16.msra.mxu0 %v9051_v29  ;;  %v17613_v29 = vld [vmem:[#allocation61_spill] sm:$0xff]  ;;  %v10848_v2 = vunpack.i.h.bf16 %v15447_v20  ;;  %vm17621_vm14 = vcmask 1039360   ;;  %vm17625_vm5 = vcmask 891904  }
 0x58f   : > { %9054 = vmatprep.subr.bf16.mxu0 %v9053_v51  ;;  %vm17614_vm9 = vcmp.ne.f32.partialorder %v17613_v29, 0.0  ;;  %vm17622_vm15 = vmmov %vm17621_vm14 }
 0x590   : > { %10975 = vrot.lane.b32.xlu0 %v15395_v33, %s17063_s10  ;;  %vm17623_vm3 = vmmov %vm17621_vm14 }
 0x592   : > { %9056 = vmatpush1.bf16.msra.mxu0 %v9055_v15  ;;  %v17617_v15 = vld [vmem:[#allocation60_spill] sm:$0xff] }
 0x593   : > { %9058 = vmatprep.subr.bf16.mxu0 %v9057_v0  ;;  %vm17618_vm1 = vcmp.ne.f32.partialorder %v17617_v15, 0.0 }
 0x594   : > { %10980 = vrot.lane.b32.xlu0 %v15395_v33, %s17065_s18  ;;  %v11264_v33 = vpack.c.bf16 %v15342_v1, %v15328_v32 }
 0x596   : > { %9060 = vmatpush1.bf16.msra.mxu0 %v9059_v21 }
 0x597   : > { %11262 = vmatprep.subr.msk.bf16.mxu0 %vm11260_vm2, %v11261_v43  ;;  %vm17624_vm2 = vmmov %vm17623_vm3 }
 0x598   : > { %11005 = vrot.lane.b32.xlu0 %v15411_v37, %s17068_s17 }
 0x59a   : > { %11265 = vmatpush1.bf16.msk.msra.mxu0 %vm11263_vm8, %v11264_v33  ;;  %vm17626_vm8 = vmmov %vm17625_vm5 }
 0x59c   : > { %11010 = vrot.lane.b32.xlu0 %v15411_v37, %s17073_s1 }
 0x5a0   : > { %11015 = vrot.lane.b32.xlu0 %v15411_v37, %s17063_s10 }
 0x5a4   : > { %11020 = vrot.lane.b32.xlu0 %v15411_v37, %s17065_s18 }
 0x5ac   : > { %v6307_v5 = vpop.f32.mrb[16].mxu0 }
 0x5ad   : > { %v9241_v57 = vadd.f32 %v6307_v5, %v15325_v31  ;;  %v6309_v26 = vpop.f32.mrb[17].mxu0 }
 0x5ae   : > { %v9242_v3 = vadd.f32 %v6309_v26, %v15325_v31 }
 0x5af   : > { %v6478_v17 = vsel %vm17606_vm13, %v9241_v57, 0.0  ;;  %vm17627_vm13 = vcmask 875520  }
 0x5b0   : > { %6498 = vst [vmem:[#allocation3 + $0x38] sm:$0xff] %v6478_v17  ;;  %v6479_v32 = vsel %vm17608_vm10, %v9242_v3, 0.0  ;;  %v6313_v1 = vpop.f32.mrb[18].mxu0  ;;  %v11044_v52 = vpack.i.bf16 %v6478_v17, %v15391_v27  ;;  %v7154_v3 = vld [vmem:[#allocation3 + $0x58] sm:$0xff]  ;;  %vm17628_vm10 = vcmask 883712  }
 0x5b1   : > { %6499 = vst [vmem:[#allocation3 + $0x40] sm:$0xff] %v6479_v32  ;;  %v9243_v9 = vadd.f32 %v6313_v1, %v15336_v12  ;;  %v6315_v19 = vpop.f32.mrb[19].mxu0  ;;  %v11064_v11 = vpack.i.bf16 %v6479_v32, %v6478_v17 }
 0x5b2   : > { %v9244_v60 = vadd.f32 %v6315_v19, %v15336_v12  ;;  %11045 = vrot.lane.b32.xlu1 %v11044_v52, %s17068_s17 }
 0x5b3   : > { %v6488_v42 = vsel %vm17610_vm0, %v9243_v9, 0.0  ;;  %11065 = vrot.lane.b32.xlu0 %v11064_v11, %s17058_s13  ;;  %vm17629_vm0 = vmmov %vm17628_vm10 }
 0x5b4   : > { %6508 = vst [vmem:[#allocation3 + $0x98] sm:$0xff] %v6488_v42  ;;  %v6489_v22 = vsel %vm17612_vm7, %v9244_v60, 0.0  ;;  %v11084_v27 = vpack.i.bf16 %v6488_v42, %v15407_v13  ;;  %v17615_v13 = vld [vmem:[#allocation51_spill] sm:$0xff]  ;;  %vm17630_vm7 = vmmov %vm17625_vm5 }
 0x5b5   : > { %6509 = vst [vmem:[#allocation3 + $0xa0] sm:$0xff] %v6489_v22  ;;  %v11104_v37 = vpack.i.bf16 %v6489_v22, %v6488_v42  ;;  %vm17616_vm12 = vcmp.ne.f32.partialorder %v17615_v13, 0.0  ;;  %v7165_v13 = vld [vmem:[#allocation3 + $0xb8] sm:$0xff] }
 0x5b6   : > { %11050 = vrot.lane.b32.xlu1 %v11044_v52, %s17073_s1 }
 0x5b7   : > { %11070 = vrot.lane.b32.xlu0 %v11064_v11, %s17102_s20 }
 0x5ba   : > { %v6461_v10 = vpop.f32.mrb[20].mxu1  ;;  %11055 = vrot.lane.b32.xlu1 %v11044_v52, %s17063_s10 }
 0x5bb   : > { %v9245_v47 = vadd.f32 %v6461_v10, %v15325_v31  ;;  %v6463_v62 = vpop.f32.mrb[21].mxu1  ;;  %11075 = vrot.lane.b32.xlu0 %v11064_v11, %s17061_s0 }
 0x5bc   : > { %v9246_v56 = vadd.f32 %v6463_v62, %v15325_v31 }
 0x5bd   : > { %v6480_v46 = vsel %vm17614_vm9, %v9245_v47, 0.0  ;;  %vm17631_vm9 = vmmov %vm17625_vm5 }
 0x5be   : > { %6500 = vst [vmem:[#allocation3 + $0x48] sm:$0xff] %v6480_v46  ;;  %v6481_v45 = vsel %vm17616_vm12, %v9246_v56, 0.0  ;;  %v6467_v41 = vpop.f32.mrb[22].mxu1  ;;  %11060 = vrot.lane.b32.xlu1 %v11044_v52, %s17065_s18  ;;  %v11124_v51 = vpack.i.bf16 %v6480_v46, %v6479_v32  ;;  %v10847_v32 = vunpack.i.l.bf16 %v15447_v20  ;;  %vm17632_vm12 = vmmov %vm17629_vm0 }
 0x5bf   : > { %6501 = vst [vmem:[#allocation3 + $0x50] sm:$0xff] %v6481_v45  ;;  %v9247_v24 = vadd.f32 %v6467_v41, %v15336_v12  ;;  %v6469_v53 = vpop.f32.mrb[23].mxu1  ;;  %v11144_v34 = vpack.i.bf16 %v6481_v45, %v6480_v46  ;;  %11080 = vrot.lane.b32.xlu0 %v11064_v11, %s17054_s22  ;;  %v15628_v9 = vpack.i.bf16 %v7154_v3, %v6481_v45  ;;  %v10853_v45 = vunpack.i.h.bf16 %v15445_v38 }
 0x5c0   : > { %v9248_v31 = vadd.f32 %v6469_v53, %v15336_v12  ;;  %v10852_v41 = vunpack.i.l.bf16 %v15445_v38  ;;  %v10858_v53 = vunpack.i.h.bf16 %v15454_v35 }
 0x5c1   : > { %v6490_v39 = vsel %vm17618_vm1, %v9247_v24, 0.0  ;;  %vm17633_vm1 = vmmov %vm17629_vm0 }
 0x5c2   : > { %6510 = vst [vmem:[#allocation3 + $0xa8] sm:$0xff] %v6490_v39  ;;  %v15586_v0 = vsel %vm17620_vm4, %v9248_v31, 0.0  ;;  %11085 = vrot.lane.b32.xlu1 %v11084_v27, %s17068_s17  ;;  %v15589_v49 = vpack.i.bf16 %v6490_v39, %v6489_v22  ;;  %vm17634_vm4 = vmmov %vm17627_vm13 }
 0x5c3   : > { %6511 = vst [vmem:[#allocation3 + $0xb0] sm:$0xff] %v15586_v0  ;;  %v15593_v21 = vpack.i.bf16 %v15586_v0, %v6490_v39  ;;  %11105 = vrot.lane.b32.xlu0 %v11104_v37, %s17058_s13 }
 0x5c6   : > { %11090 = vrot.lane.b32.xlu1 %v11084_v27, %s17073_s1 }
 0x5c7   : > { %11110 = vrot.lane.b32.xlu0 %v11104_v37, %s17102_s20 }
 0x5ca   : > { %11095 = vrot.lane.b32.xlu1 %v11084_v27, %s17063_s10  ;;  %v15605_v12 = vpop.permute.xlu1 %10890  ;;  %v15607_v43 = vpop.permute.xlu0 %10885 }
 0x5cb   : > { %11115 = vrot.lane.b32.xlu0 %v11104_v37, %s17061_s0  ;;  %v10888_v57 = vunpack.i.h.bf16 %v15607_v43  ;;  %v10887_v26 = vunpack.i.l.bf16 %v15607_v43  ;;  %v16748_v10 = vunpack.i.h.bf16 %v15605_v12  ;;  %v10892_v47 = vunpack.i.l.bf16 %v15605_v12 }
 0x5cd   : > { %v7232_v19 = vsel %vm17621_vm14, %v10847_v32, %v10887_v26  ;;  %v7233_v60 = vsel %vm17623_vm3, %v10887_v26, %v10888_v57  ;;  %v7380_v39 = vsel %vm17625_vm5, %v10852_v41, %v10892_v47  ;;  %v7381_v3 = vsel %vm17626_vm8, %v10892_v47, %v16748_v10  ;;  %v7918_v47 = vld [vmem:[%s16370_s7] sm:$0xff]  ;;  %vm17639_vm5 = vmmov %vm17634_vm4 }
 0x5ce   : > { %11100 = vrot.lane.b32.xlu1 %v11084_v27, %s17065_s18  ;;  %v15611_v33 = vpop.permute.xlu1 %10900  ;;  %v15613_v5 = vpop.permute.xlu0 %10895  ;;  %vm17635_vm14 = vcmask 162816  }
 0x5cf   : > { %11120 = vrot.lane.b32.xlu0 %v11104_v37, %s17054_s22  ;;  %v10902_v29 = vunpack.i.l.bf16 %v15611_v33  ;;  %v10897_v46 = vunpack.i.l.bf16 %v15613_v5  ;;  %v16745_v24 = vunpack.i.h.bf16 %v15613_v5  ;;  %v10903_v40 = vunpack.i.h.bf16 %v15611_v33  ;;  %vm17637_vm3 = vmmov %vm17635_vm14 }
 0x5d2   : > { %11145 = vrot.lane.b32.xlu1 %v11144_v34, %s17058_s13  ;;  %v15619_v44 = vpop.permute.xlu1 %10925  ;;  %v15621_v17 = vpop.permute.xlu0 %10905 }
 0x5d3   : > { %11125 = vrot.lane.b32.xlu0 %v11124_v51, %s17068_s17  ;;  %v10928_v1 = vunpack.i.h.bf16 %v15619_v44  ;;  %v10927_v52 = vunpack.i.l.bf16 %v15619_v44  ;;  %v17665_v44 = vunpack.i.h.bf16 %v15605_v12 }
 0x5d5   : > { %v7242_v11 = vsel %vm17622_vm15, %v10848_v2, %v10927_v52  ;;  %v7243_v20 = vsel %vm17624_vm2, %v10927_v52, %v10928_v1  ;;  %vm17636_vm15 = vmmov %vm17634_vm4  ;;  %vm17638_vm2 = vcmask 154624  }
 0x5d6   : > { %11150 = vrot.lane.b32.xlu1 %v11144_v34, %s17102_s20  ;;  %v9067_v16 = vpack.c.bf16 %v7242_v11, %v7232_v19  ;;  %v15640_v42 = vpop.permute.xlu1 %10935  ;;  %v15642_v18 = vpop.permute.xlu0 %10910  ;;  %v9065_v22 = vpack.c.bf16 %v7243_v20, %v7233_v60  ;;  %v10908_v11 = vunpack.i.h.bf16 %v15621_v17  ;;  %v10907_v60 = vunpack.i.l.bf16 %v15621_v17  ;;  %vm17640_vm8 = vmmov %vm17638_vm2 }
 0x5d7   : > { %11130 = vrot.lane.b32.xlu0 %v11124_v51, %s17073_s1  ;;  %v16747_v31 = vunpack.i.h.bf16 %v15640_v42  ;;  %v10937_v15 = vunpack.i.l.bf16 %v15640_v42  ;;  %v10913_v20 = vunpack.i.h.bf16 %v15642_v18 }
 0x5d8   : > { %9066 = vmatprep.subr.bf16.mxu0 %v9065_v22 }
 0x5d9   : > { %9068 = vmatpush1.bf16.msra.mxu0 %v9067_v16  ;;  %v10912_v16 = vunpack.i.l.bf16 %v15642_v18  ;;  %v15796_v18 = vld [vmem:[%s16369_s6] sm:$0xff] }
 0x5da   : > { %11155 = vrot.lane.b32.xlu1 %v11144_v34, %s17061_s0  ;;  %v15650_v37 = vpop.permute.xlu0 %10915 }
 0x5db   : > { %11135 = vrot.lane.b32.xlu0 %v11124_v51, %s17063_s10  ;;  %v15648_v27 = vpop.permute.xlu1 %10985 }
 0x5de   : > { %11160 = vrot.lane.b32.xlu1 %v11144_v34, %s17054_s22  ;;  %v15660_v56 = vpop.permute.xlu0 %10920  ;;  %v10857_v34 = vunpack.i.l.bf16 %v15454_v35  ;;  %v15686_v35 = vpack.i.bf16 %v7165_v13, %v15586_v0  ;;  %v7529_v0 = vsel %vm17629_vm0, %v10897_v46, %v16745_v24  ;;  %v10987_v13 = vunpack.i.l.bf16 %v15648_v27  ;;  %vm17643_vm0 = vmmov %vm17637_vm3 }
 0x5df   : > { %11140 = vrot.lane.b32.xlu0 %v11124_v51, %s17065_s18  ;;  %v15658_v62 = vpop.permute.xlu1 %10990  ;;  %v10862_v51 = vunpack.i.l.bf16 %v15452_v63  ;;  %v7538_v24 = vsel %vm17633_vm1, %v10858_v53, %v10937_v15  ;;  %v15735_v53 = vsel %vm17635_vm14, %v10833_v50, %v10912_v16  ;;  %vm17647_vm1 = vmmov %vm17638_vm2 }
 0x5e0   : > { %v7528_v32 = vsel %vm17628_vm10, %v10857_v34, %v10897_v46  ;;  %v10917_v46 = vunpack.i.l.bf16 %v15650_v37  ;;  %vm17642_vm10 = vmmov %vm17637_vm3 }
 0x5e1   : > { %v15689_v2 = vsel %vm17627_vm13, %v10862_v51, %v10902_v29  ;;  %vm17641_vm13 = vmmov %vm17637_vm3 }
 0x5e2   : > { %11165 = vrot.lane.b32.xlu1 %v15628_v9, %s17068_s17  ;;  %v15680_v26 = vpop.permute.xlu0 %10930  ;;  %v15751_v59 = vsel %vm17638_vm2, %v10838_v58, %v10917_v46  ;;  %vm17649_vm14 = vmmov %vm17647_vm1  ;;  %vm17652_vm2 = vcmask 7168  }
 0x5e3   : > { %11180 = vrot.lane.b32.xlu0 %v15589_v49, %s17068_s17  ;;  %v15678_v38 = vpop.permute.xlu1 %10995  ;;  %v16746_v52 = vunpack.i.h.bf16 %v15680_v26  ;;  %v10932_v19 = vunpack.i.l.bf16 %v15680_v26 }
 0x5e5   : > { %v7390_v22 = vsel %vm17630_vm7, %v10853_v45, %v10932_v19  ;;  %v7391_v17 = vsel %vm17631_vm9, %v10932_v19, %v16746_v52  ;;  %vm17644_vm7 = vmmov %vm17643_vm0 }
 0x5e6   : > { %11170 = vrot.lane.b32.xlu1 %v15628_v9, %s17073_s1  ;;  %v9071_v41 = vpack.c.bf16 %v7390_v22, %v7380_v39  ;;  %v15719_v51 = vpop.permute.xlu0 %10940  ;;  %v9069_v34 = vpack.c.bf16 %v7391_v17, %v7381_v3  ;;  %v6602_v39 = vsel %vm885_vm6, %v10828_v7, %v10907_v60  ;;  %v10988_v22 = vunpack.i.h.bf16 %v15648_v27  ;;  %vm17645_vm9 = vmmov %vm17643_vm0 }
 0x5e7   : > { %11185 = vrot.lane.b32.xlu0 %v15589_v49, %s17073_s1  ;;  %v15717_v45 = vpop.permute.xlu1 %11000  ;;  %v10943_v19 = vunpack.i.h.bf16 %v15719_v51  ;;  %v10942_v52 = vunpack.i.l.bf16 %v15719_v51  ;;  %v6603_v3 = vsel %vm885_vm6, %v10907_v60, %v10908_v11  ;;  %v6751_v7 = vsel %vm17637_vm3, %v10912_v16, %v10913_v20  ;;  %vm17651_vm3 = vmmov %vm17647_vm1 }
 0x5e8   : > { %9070 = vmatprep.subr.bf16.mxu0 %v9069_v34  ;;  %v15746_v60 = vsel %vm885_vm6, %v10908_v11, %v10987_v13  ;;  %v10992_v11 = vunpack.i.l.bf16 %v15658_v62  ;;  %v6605_v58 = vsel %vm885_vm6, %v10987_v13, %v10988_v22 }
 0x5e9   : > { %9072 = vmatpush1.bf16.msra.mxu0 %v9071_v41  ;;  %v7687_v4 = vsel %vm17636_vm15, %v10942_v52, %v10943_v19  ;;  %vm17650_vm15 = vmmov %vm17647_vm1 }
 0x5ea   : > { %11175 = vrot.lane.b32.xlu1 %v15628_v9, %s17063_s10 }
 0x5eb   : > { %11190 = vrot.lane.b32.xlu0 %v15589_v49, %s17063_s10  ;;  %v15755_v50 = vpop.permute.xlu1 %11025 }
 0x5ec   : > { %v11028_v16 = vunpack.i.h.bf16 %v15755_v50 }
 0x5ee   : > { %11195 = vrot.lane.b32.xlu1 %v15593_v21, %s17058_s13 }
 0x5ef   : > { %11220 = vrot.lane.b32.xlu0 %v15589_v49, %s17065_s18  ;;  %v7539_v49 = vsel %vm17632_vm12, %v10937_v15, %v16747_v31  ;;  %v7677_v31 = vsel %vm17634_vm4, %v10902_v29, %v10903_v40  ;;  %v10918_v15 = vunpack.i.h.bf16 %v15650_v37  ;;  %v10863_v29 = vunpack.i.h.bf16 %v15452_v63  ;;  %v15779_v30 = vpop.permute.xlu1 %11030  ;;  %vm17646_vm12 = vmmov %vm17643_vm0 }
 0x5f0   : > { %v9073_v10 = vpack.c.bf16 %v7539_v49, %v7529_v0  ;;  %v9075_v0 = vpack.c.bf16 %v7538_v24, %v7528_v32  ;;  %v11027_v63 = vunpack.i.l.bf16 %v15755_v50  ;;  %v9077_v17 = vpack.c.bf16 %v7687_v4, %v7677_v31  ;;  %vm17648_vm4 = vmmov %vm17647_vm1 }
 0x5f1   : > { %v7686_v8 = vsel %vm17639_vm5, %v10863_v29, %v10942_v52  ;;  %v15774_v52 = vsel %vm17640_vm8, %v10917_v46, %v10918_v15  ;;  %v11032_v29 = vunpack.i.l.bf16 %v15779_v30  ;;  %v10993_v46 = vunpack.i.h.bf16 %v15658_v62  ;;  %vm17653_vm5 = vmmov %vm17652_vm2 }
 0x5f2   : > { %11200 = vrot.lane.b32.xlu1 %v15593_v21, %s17102_s20  ;;  %9074 = vmatprep.subr.bf16.mxu0 %v9073_v10  ;;  %v6615_v41 = vsel %vm885_vm6, %v11027_v63, %v11028_v16  ;;  %v9079_v4 = vpack.c.bf16 %v7686_v8, %v15689_v2  ;;  %vm17654_vm8 = vmmov %vm17652_vm2  ;;  %s17751_s20 = sld [smem:[#allocation23_spill]] }
 0x5f3   : > { %7921 = vperm.xlu0 %9983, %v7918_v47   ;;  %v10946_v47 = vpop.permute.xlu0 %10945  ;;  %9076 = vmatpush1.bf16.msra.mxu0 %v9075_v0  ;;  %v15804_v14 = vpop.permute.xlu1 %11035 }
 0x5f4   : > { %v10948_v24 = vunpack.i.h.bf16 %v10946_v47  ;;  %v10947_v32 = vunpack.i.l.bf16 %v10946_v47  ;;  %9078 = vmatprep.subr.bf16.mxu0 %v9077_v17 }
 0x5f6   : > { %11205 = vrot.lane.b32.xlu1 %v15593_v21, %s17061_s0  ;;  %v6612_v49 = vsel %vm885_vm6, %v10868_v54, %v10947_v32  ;;  %v6613_v10 = vsel %vm885_vm6, %v10947_v32, %v10948_v24  ;;  %v6614_v31 = vsel %vm885_vm6, %v10948_v24, %v11027_v63  ;;  %v11033_v63 = vunpack.i.h.bf16 %v15779_v30 }
 0x5f7   : > { %v9083_v34 = vpack.c.bf16 %v6612_v49, %v6602_v39  ;;  %v10951_v54 = vpop.permute.xlu0 %10950  ;;  %v9081_v13 = vpack.c.bf16 %v6613_v10, %v6603_v3  ;;  %v6752_v39 = vsel %vm17641_vm13, %v10913_v20, %v10992_v11  ;;  %v10923_v24 = vunpack.i.h.bf16 %v15660_v56  ;;  %9080 = vmatpush1.bf16.msra.mxu0 %v9079_v4  ;;  %vm17655_vm13 = vmmov %vm17652_vm2 }
 0x5f8   : > { %v10953_v0 = vunpack.i.h.bf16 %v10951_v54  ;;  %v10952_v47 = vunpack.i.l.bf16 %v10951_v54  ;;  %v9119_v3 = vpack.c.bf16 %v6614_v31, %v15746_v60  ;;  %v10922_v32 = vunpack.i.l.bf16 %v15660_v56  ;;  %p17753_p3 = scmp.ne.s32.totalorder %s17751_s20, 0 }
 0x5f9   : > { %9082 = vmatprep.subr.bf16.mxu1 %v9081_v13  ;;  %v11037_v49 = vunpack.i.l.bf16 %v15804_v14  ;;  %v10998_v31 = vunpack.i.h.bf16 %v15678_v38  ;;  %v11002_v54 = vunpack.i.l.bf16 %v15717_v45 }
 0x5fa   : > { %11210 = vrot.lane.b32.xlu1 %v15593_v21, %s17054_s22  ;;  %v9117_v21 = vpack.c.bf16 %v6615_v41, %v6605_v58  ;;  %v6760_v2 = vsel %vm17642_vm10, %v10873_v25, %v10952_v47  ;;  %9084 = vmatpush1.bf16.msra.mxu1 %v9083_v34  ;;  %v6761_v20 = vsel %vm17643_vm0, %v10952_v47, %v10953_v0  ;;  %v11038_v58 = vunpack.i.h.bf16 %v15804_v14  ;;  %vm17656_vm10 = vmmov %vm17652_vm2 }
 0x5fb   : > { %v6762_v8 = vsel %vm17644_vm7, %v10953_v0, %v11032_v29  ;;  %v9087_v17 = vpack.c.bf16 %v6760_v2, %v15735_v53  ;;  %v10956_v25 = vpop.permute.xlu0 %10955  ;;  %v9085_v60 = vpack.c.bf16 %v6761_v20, %v6751_v7  ;;  %v10997_v34 = vunpack.i.l.bf16 %v15678_v38  ;;  %7992 = vmatmul.mubr.f32.vlgmr.msra.gmra.mrb[20].mxu0 %v15796_v18  ;;  %vm17657_vm0 = vmmov %vm17647_vm1 }
 0x5fc   : > { %9118 = vmatprep.subr.bf16.mxu0 %v9117_v21  ;;  %v10958_v10 = vunpack.i.h.bf16 %v10956_v25  ;;  %v10957_v41 = vunpack.i.l.bf16 %v10956_v25  ;;  %v6763_v53 = vsel %vm17646_vm12, %v11032_v29, %v11033_v63  ;;  %v11003_v7 = vunpack.i.h.bf16 %v15717_v45  ;;  %8459 = vmatprep.mubr.msk.f32.mxu0 %vm5695_vm11, %v15432_v48  ;;  %vm17658_vm7 = vmmov %vm17652_vm2 }
 0x5fd   : > { %9086 = vmatprep.subr.bf16.mxu1 %v9085_v60  ;;  %9120 = vmatpush1.bf16.msra.mxu0 %v9119_v3  ;;  %v9123_v0 = vpack.c.bf16 %v6762_v8, %v6752_v39  ;;  %v6911_v36 = vsel %vm17649_vm14, %v11037_v49, %v11038_v58  ;;  %v6901_v8 = vsel %vm17651_vm3, %v10997_v34, %v10998_v31  ;;  %vm17660_vm12 = vmmov %vm17652_vm2  ;;  %vm17666_vm3 = vcmask 891904  }
 0x5fe   : > { %11215 = vrot.lane.b32.xlu1 %v15628_v9, %s17065_s18  ;;  %v6753_v9 = vsel %vm17645_vm9, %v10992_v11, %v10993_v46  ;;  %v6908_v13 = vsel %vm17647_vm1, %v10878_v23, %v10957_v41  ;;  %9088 = vmatpush1.bf16.msra.mxu1 %v9087_v17  ;;  %v15825_v11 = vpop.permute.xlu1 %11040  ;;  %v6909_v21 = vsel %vm17648_vm4, %v10957_v41, %v10958_v10  ;;  %vm17659_vm9 = vmmov %vm17652_vm2  ;;  %vm17661_vm1 = vcmask 1039360  }
 0x5ff   : > { %v9121_v4 = vpack.c.bf16 %v6763_v53, %v6753_v9  ;;  %v9091_v47 = vpack.c.bf16 %v6908_v13, %v15751_v59  ;;  %v10961_v29 = vpop.permute.xlu0 %10960  ;;  %v11043_v23 = vunpack.i.h.bf16 %v15825_v11  ;;  %v11042_v3 = vunpack.i.l.bf16 %v15825_v11  ;;  %v7117_v13 = vld [vmem:[#allocation3 + $0x80] sm:$0xff]  ;;  %vm17662_vm4 = vmmov %vm17661_vm1 }
 0x600   : > { %v10963_v2 = vunpack.i.h.bf16 %v10961_v29  ;;  %v10962_v39 = vunpack.i.l.bf16 %v10961_v29  ;;  %v6910_v59 = vsel %vm17650_vm15, %v10958_v10, %v11037_v49  ;;  %v9089_v20 = vpack.c.bf16 %v6909_v21, %v15774_v52  ;;  %v7109_v21 = vld [vmem:[#allocation3 + $0x30] sm:$0xff]  ;;  %vm17663_vm14 = vmmov %vm17661_vm1 }
 0x601   : > { %9122 = vmatprep.subr.bf16.mxu0 %v9121_v4  ;;  %v7047_v17 = vsel %vm17652_vm2, %v10922_v32, %v10923_v24  ;;  %v9125_v60 = vpack.c.bf16 %v6911_v36, %v6901_v8  ;;  %v7059_v52 = vsel %vm17655_vm13, %v11042_v3, %v11043_v23  ;;  %v7046_v49 = vsel %vm17656_vm10, %v10843_v6, %v10922_v32  ;;  %v7119_v32 = vld [vmem:[#allocation3 + $0x90] sm:$0xff]  ;;  %v7106_v36 = vld [vmem:[#allocation3 + $0x18] sm:$0xff]  ;;  %vm17664_vm15 = vmmov %vm17661_vm1 }
 0x602   : > { %11225 = vrot.lane.b32.xlu1 %v15686_v35, %s17068_s17  ;;  %v7056_v25 = vsel %vm17653_vm5, %v10883_v55, %v10962_v39  ;;  %9124 = vmatpush1.bf16.msra.mxu0 %v9123_v0  ;;  %v7057_v41 = vsel %vm17654_vm8, %v10962_v39, %v10963_v2  ;;  %v6900_v10 = vsel %vm17657_vm0, %v10918_v15, %v10997_v34  ;;  %v7107_v15 = vld [vmem:[#allocation3 + $0x20] sm:$0xff]  ;;  %vm17668_vm2 = vmmov %vm17666_vm3  ;;  %vm17672_vm13 = vcmask 883712  }
 0x603   : > { %9090 = vmatprep.subr.bf16.mxu1 %v9089_v20  ;;  %v15858_v61 = vpop.permute.xlu0 %10965  ;;  %v9093_v55 = vpack.c.bf16 %v7057_v41, %v7047_v17  ;;  %v9127_v9 = vpack.c.bf16 %v6910_v59, %v6900_v10  ;;  %v9095_v53 = vpack.c.bf16 %v7056_v25, %v7046_v49  ;;  %9126 = vmatprep.subr.bf16.mxu0 %v9125_v60  ;;  %vm17669_vm5 = vmmov %vm17668_vm2 }
 0x604   : > { %9092 = vmatpush1.bf16.msra.mxu1 %v9091_v47  ;;  %v7049_v28 = vsel %vm17658_vm7, %v11002_v54, %v11003_v7  ;;  %v7058_v6 = vsel %vm17659_vm9, %v10963_v2, %v11042_v3  ;;  %v7048_v34 = vsel %vm17660_vm12, %v10923_v24, %v11002_v54  ;;  %v9097_v0 = vpack.c.bf16 %v7117_v13, %v7107_v15  ;;  %v7116_v47 = vld [vmem:[#allocation3 + $0x78] sm:$0xff]  ;;  %v7118_v2 = vld [vmem:[#allocation3 + $0x88] sm:$0xff]  ;;  %vm17670_vm8 = vmmov %vm17668_vm2 }
 0x605   : > { %9094 = vmatprep.subr.bf16.mxu1 %v9093_v55  ;;  %v9129_v37 = vpack.c.bf16 %v7059_v52, %v7049_v28  ;;  %v9131_v29 = vpack.c.bf16 %v7058_v6, %v7048_v34  ;;  %v9133_v3 = vpack.c.bf16 %v7119_v32, %v7109_v21  ;;  %v9099_v39 = vpack.c.bf16 %v7116_v47, %v7106_v36  ;;  %v7108_v24 = vld [vmem:[#allocation3 + $0x28] sm:$0xff]  ;;  %vm17673_vm10 = vmmov %vm17672_vm13 }
 0x606   : > { %11230 = vrot.lane.b32.xlu1 %v15686_v35, %s17073_s1  ;;  %9128 = vmatpush1.bf16.msra.mxu0 %v9127_v9  ;;  %v9135_v54 = vpack.c.bf16 %v7118_v2, %v7108_v24  ;;  %v10968_v20 = vunpack.i.h.bf16 %v15858_v61  ;;  %v10967_v8 = vunpack.i.l.bf16 %v15858_v61  ;;  %v17674_v24 = vunpack.i.h.bf16 %v15640_v42  ;;  %vm17675_vm0 = vmmov %vm17673_vm10 }
 0x607   : > { %v15869_v4 = vpop.permute.xlu0 %10970  ;;  %9130 = vmatprep.subr.bf16.mxu0 %v9129_v37  ;;  %v17667_v37 = vunpack.i.h.bf16 %v15680_v26  ;;  %v17671_v26 = vunpack.i.h.bf16 %v15613_v5  ;;  %vm17676_vm7 = vmmov %vm17675_vm0  ;;  %vm17677_vm9 = vcmask 875520  }
 0x608   : > { %9096 = vmatpush1.bf16.msra.mxu1 %v9095_v53  ;;  %v7235_v41 = vsel %vm17662_vm4, %v10967_v8, %v10968_v20  ;;  %v10973_v52 = vunpack.i.h.bf16 %v15869_v4  ;;  %v10972_v49 = vunpack.i.l.bf16 %v15869_v4  ;;  %vm17678_vm12 = vmmov %vm17677_vm9 }
 0x609   : > { %9098 = vmatprep.subr.bf16.mxu1 %v9097_v0 }
 0x60a   : > { %11235 = vrot.lane.b32.xlu1 %v15686_v35, %s17063_s10  ;;  %9132 = vmatpush1.bf16.msra.mxu0 %v9131_v29  ;;  %v7383_v32 = vsel %vm17669_vm5, %v10972_v49, %v10973_v52 }
 0x60b   : > { %v15873_v56 = vpop.permute.xlu0 %10975  ;;  %9134 = vmatprep.subr.bf16.mxu0 %v9133_v3 }
 0x60c   : > { %9100 = vmatpush1.bf16.msra.mxu1 %v9099_v39  ;;  %v10978_v28 = vunpack.i.h.bf16 %v15873_v56  ;;  %v10977_v6 = vunpack.i.l.bf16 %v15873_v56 }
 0x60e   : > { %11240 = vrot.lane.b32.xlu1 %v15686_v35, %s17065_s18  ;;  %9136 = vmatpush1.bf16.msra.mxu0 %v9135_v54  ;;  %v7234_v35 = vsel %vm17661_vm1, %v10888_v57, %v10967_v8  ;;  %v7530_v36 = vsel %vm17672_vm13, %v17671_v26, %v10977_v6  ;;  %v7531_v3 = vsel %vm17673_vm10, %v10977_v6, %v10978_v28  ;;  %vm17679_vm1 = vmmov %vm17677_vm9  ;;  %s9268_s18 = smul.u32 80, %s11683_s25 }
 0x60f   : > { %v15875_v59 = vpop.permute.xlu0 %10980  ;;  %vm17680_vm4 = vmmov %vm17679_vm1 }
 0x610   : > { %v10983_v2 = vunpack.i.h.bf16 %v15875_v59  ;;  %v10982_v39 = vunpack.i.l.bf16 %v15875_v59  ;;  %vm17686_vm13 = vmmov %vm17663_vm14  ;;  %s16294_s10 = scalar_lea.vmem [#allocation11], %s9268_s18 }
 0x611   : > { %vm17687_vm10 = vmmov %vm17686_vm13  ;;  %s8337_s29 = sshll.u32 %s16294_s10, 4  ;;  %s16319_s29 = int_to_ptr.vmem [resolvable:$true] %s8337_s29 }
 0x612   : > { %v7678_v42 = vsel %vm17677_vm9, %v10903_v40, %v10982_v39  ;;  %s11352_s30 = scalar_lea.vmem %s16319_s29, 1280  ;;  %p11359_p12 = scmp.lt.s32.totalorder %s16319_s29, %s11357_s27 }
 0x613   : > { %v15879_v17 = vpop.permute.xlu0 %11005  ;;  %p11353_p11 = scmp.ne.s32.totalorder %s16319_s29, %s11352_s30  ;;  %p11360_p2 = scmp.lt.s32.totalorder %s11358_s16, %s11352_s30 }
 0x614   : > { %v11008_v25 = vunpack.i.h.bf16 %v15879_v17  ;;  %v11007_v60 = vunpack.i.l.bf16 %v15879_v17 }
 0x615   : > { %p11354_p5 = pnand %p11353_p11, %p17753_p3  ;;  %p11361_p13 = por %p11360_p2, %p11359_p12 }
 0x616   : > { %v7244_v10 = vsel %vm17663_vm14, %v10928_v1, %v11007_v60  ;;  %v7245_v55 = vsel %vm17664_vm15, %v11007_v60, %v11008_v25  ;;  %v7382_v1 = vsel %vm17666_vm3, %v17665_v44, %v10972_v49  ;;  %vm17681_vm15 = vmmov %vm17663_vm14 }
 0x617   : > { %v9103_v9 = vpack.c.bf16 %v7244_v10, %v7234_v35  ;;  %v15897_v43 = vpop.permute.xlu0 %11010  ;;  %v9101_v57 = vpack.c.bf16 %v7245_v55, %v7235_v41  ;;  %vm17682_vm3 = vmmov %vm17668_vm2  ;;  %p11355_p9 = pneg %p11354_p5 }
 0x618   : > { %v11013_v53 = vunpack.i.h.bf16 %v15897_v43  ;;  %v11012_v13 = vunpack.i.l.bf16 %v15897_v43  ;;  %vm17684_vm5 = vmmov %vm17682_vm3 }
 0x619   : > { %9102 = vmatprep.subr.bf16.mxu1 %v9101_v57  ;;  %vm17689_vm9 = vmmov %vm17682_vm3  ;;  %p11362_p6 = pnand %p11361_p13, %p11355_p9 }
 0x61a   : > { %v7392_v15 = vsel %vm17668_vm2, %v17667_v37, %v11012_v13  ;;  %9104 = vmatpush1.bf16.msra.mxu1 %v9103_v9  ;;  %v7393_v34 = vsel %vm17670_vm8, %v11012_v13, %v11013_v53  ;;  %v7679_v9 = vsel %vm17679_vm1, %v10982_v39, %v10983_v2  ;;  %vm17683_vm2 = vcmask 162816  }
 0x61b   : > { %v9107_v0 = vpack.c.bf16 %v7392_v15, %v7382_v1  ;;  %v15915_v47 = vpop.permute.xlu0 %11015  ;;  %v9105_v29 = vpack.c.bf16 %v7393_v34, %v7383_v32  ;;  %vm17685_vm8 = vmmov %vm17683_vm2  ;;  %vm17691_vm1 = vcmask 154624  }
 0x61c   : > { %v11018_v12 = vunpack.i.h.bf16 %v15915_v47  ;;  %v11017_v21 = vunpack.i.l.bf16 %v15915_v47 }
 0x61d   : > { %9106 = vmatprep.subr.bf16.mxu1 %v9105_v29 }
 0x61e   : > { %v7540_v54 = vsel %vm17675_vm0, %v17674_v24, %v11017_v21  ;;  %9108 = vmatpush1.bf16.msra.mxu1 %v9107_v0  ;;  %v7541_v5 = vsel %vm17676_vm7, %v11017_v21, %v11018_v12  ;;  %vm17688_vm7 = vmmov %vm17675_vm0 }
 0x61f   : > { %v9111_v8 = vpack.c.bf16 %v7540_v54, %v7530_v36  ;;  %v15933_v60 = vpop.permute.xlu0 %11020  ;;  %v9109_v35 = vpack.c.bf16 %v7541_v5, %v7531_v3 }
 0x620   : > { %v11023_v41 = vunpack.i.h.bf16 %v15933_v60  ;;  %v11022_v49 = vunpack.i.l.bf16 %v15933_v60 }
 0x621   : > { %9110 = vmatprep.subr.bf16.mxu1 %v9109_v35 }
 0x622   : > { %v7688_v55 = vsel %vm17678_vm12, %v10943_v19, %v11022_v49  ;;  %9112 = vmatpush1.bf16.msra.mxu1 %v9111_v8  ;;  %v7689_v57 = vsel %vm17680_vm4, %v11022_v49, %v11023_v41  ;;  %vm17690_vm12 = vmmov %vm17682_vm3 }
 0x623   : > { %v9115_v13 = vpack.c.bf16 %v7688_v55, %v7678_v42  ;;  %v9113_v44 = vpack.c.bf16 %v7689_v57, %v7679_v9  ;;  %vm17692_vm4 = vmmov %vm17683_vm2 }
 0x624   : > { %v15937_v10 = vpop.permute.xlu1 %11045 }
 0x625   : > { %v15951_v6 = vpop.permute.xlu0 %11065  ;;  %9114 = vmatprep.subr.bf16.mxu1 %v9113_v44  ;;  %v11048_v1 = vunpack.i.h.bf16 %v15937_v10  ;;  %v11047_v37 = vunpack.i.l.bf16 %v15937_v10 }
 0x626   : > { %9116 = vmatpush1.bf16.msra.mxu1 %v9115_v13  ;;  %v11067_v15 = vunpack.i.l.bf16 %v15951_v6  ;;  %v11068_v34 = vunpack.i.h.bf16 %v15951_v6 }
 0x627   : > { %v7236_v36 = vsel %vm17663_vm14, %v10968_v20, %v11047_v37  ;;  %v7237_v54 = vsel %vm17681_vm15, %v11047_v37, %v11048_v1  ;;  %vm17693_vm14 = vmmov %vm17683_vm2 }
 0x628   : > { %v15953_v33 = vpop.permute.xlu1 %11050  ;;  %v6606_v3 = vsel %vm885_vm6, %v10988_v22, %v11067_v15  ;;  %v6607_v27 = vsel %vm885_vm6, %v11067_v15, %v11068_v34  ;;  %vm17694_vm15 = vmmov %vm17691_vm1 }
 0x629   : > { %v15955_v40 = vpop.permute.xlu0 %11070  ;;  %8063 = vmatmul.mubr.f32.vlgmr.msra.gmra.mrb[24].mxu1 %v15796_v18  ;;  %v11052_v0 = vunpack.i.l.bf16 %v15953_v33  ;;  %v11053_v29 = vunpack.i.h.bf16 %v15953_v33 }
 0x62a   : > { %8460 = vmatprep.mubr.msk.f32.mxu1 %vm5695_vm11, %v15432_v48  ;;  %v11073_v21 = vunpack.i.h.bf16 %v15955_v40  ;;  %v11072_v48 = vunpack.i.l.bf16 %v15955_v40 }
 0x62b   : > { %v7384_v5 = vsel %vm17682_vm3, %v10973_v52, %v11052_v0  ;;  %v7385_v4 = vsel %vm17684_vm5, %v11052_v0, %v11053_v29  ;;  %vm17695_vm3 = vmmov %vm17675_vm0 }
 0x62c   : > { %v15957_v51 = vpop.permute.xlu1 %11055  ;;  %v6754_v22 = vsel %vm17683_vm2, %v10993_v46, %v11072_v48  ;;  %v6755_v52 = vsel %vm17685_vm8, %v11072_v48, %v11073_v21  ;;  %vm17696_vm2 = vmmov %vm17675_vm0 }
 0x62d   : > { %v15962_v19 = vpop.permute.xlu0 %11075  ;;  %v11057_v39 = vunpack.i.l.bf16 %v15957_v51  ;;  %v11058_v8 = vunpack.i.h.bf16 %v15957_v51  ;;  %vm17697_vm5 = vmmov %vm17691_vm1 }
 0x62e   : > { %v11077_v9 = vunpack.i.l.bf16 %v15962_v19  ;;  %vm17698_vm8 = vmmov %vm17691_vm1 }
 0x62f   : > { %v7532_v55 = vsel %vm17675_vm0, %v10978_v28, %v11057_v39  ;;  %v11078_v28 = vunpack.i.h.bf16 %v15962_v19  ;;  %v7533_v50 = vsel %vm17688_vm7, %v11057_v39, %v11058_v8 }
 0x630   : > { %v15967_v32 = vpop.permute.xlu1 %11060 }
 0x631   : > { %v15974_v26 = vpop.permute.xlu0 %11080  ;;  %v6903_v30 = vsel %vm17694_vm15, %v11077_v9, %v11078_v28 }
 0x634   : > { %v15983_v24 = vpop.permute.xlu1 %11085 }
 0x635   : > { %v11088_v61 = vunpack.i.h.bf16 %v15983_v24  ;;  %v11087_v20 = vunpack.i.l.bf16 %v15983_v24  ;;  %v16000_v35 = vpop.permute.xlu0 %11105 }
 0x636   : > { %v11108_v62 = vunpack.i.h.bf16 %v16000_v35  ;;  %v11107_v46 = vunpack.i.l.bf16 %v16000_v35 }
 0x637   : > { %v7246_v49 = vsel %vm17686_vm13, %v11008_v25, %v11087_v20  ;;  %v7247_v42 = vsel %vm17687_vm10, %v11087_v20, %v11088_v61  ;;  %v6902_v20 = vsel %vm17691_vm1, %v10998_v31, %v11077_v9  ;;  %v11062_v31 = vunpack.i.l.bf16 %v15967_v32 }
 0x638   : > { %v9139_v57 = vpack.c.bf16 %v7246_v49, %v7236_v36  ;;  %v16020_v13 = vpop.permute.xlu1 %11090  ;;  %v9137_v17 = vpack.c.bf16 %v7247_v42, %v7237_v54  ;;  %v6616_v25 = vsel %vm885_vm6, %v11028_v16, %v11107_v46  ;;  %v6617_v56 = vsel %vm885_vm6, %v11107_v46, %v11108_v62 }
 0x639   : > { %v11093_v44 = vunpack.i.h.bf16 %v16020_v13  ;;  %v11092_v37 = vunpack.i.l.bf16 %v16020_v13  ;;  %v9155_v15 = vpack.c.bf16 %v6616_v25, %v6606_v3  ;;  %v16031_v0 = vpop.permute.xlu0 %11110  ;;  %v9153_v48 = vpack.c.bf16 %v6617_v56, %v6607_v27 }
 0x63a   : > { %9138 = vmatprep.subr.bf16.mxu0 %v9137_v17  ;;  %v11113_v36 = vunpack.i.h.bf16 %v16031_v0  ;;  %v11112_v54 = vunpack.i.l.bf16 %v16031_v0  ;;  %v11063_v27 = vunpack.i.h.bf16 %v15967_v32  ;;  %vm17699_vm13 = vcmask 875520  }
 0x63b   : > { %v7394_v16 = vsel %vm17689_vm9, %v11013_v53, %v11092_v37  ;;  %9140 = vmatpush1.bf16.msra.mxu0 %v9139_v57  ;;  %v7395_v3 = vsel %vm17690_vm12, %v11092_v37, %v11093_v44  ;;  %9154 = vmatprep.subr.bf16.mxu1 %v9153_v48  ;;  %v11083_v37 = vunpack.i.h.bf16 %v15974_v26  ;;  %vm17700_vm10 = vmmov %vm17699_vm13  ;;  %vm17703_vm9 = vcmask 7168  }
 0x63c   : > { %v9143_v39 = vpack.c.bf16 %v7394_v16, %v7384_v5  ;;  %v16048_v49 = vpop.permute.xlu1 %11095  ;;  %v9141_v43 = vpack.c.bf16 %v7395_v3, %v7385_v4  ;;  %v6764_v53 = vsel %vm17692_vm4, %v11033_v63, %v11112_v54  ;;  %9156 = vmatpush1.bf16.msra.mxu1 %v9155_v15  ;;  %v6765_v38 = vsel %vm17693_vm14, %v11112_v54, %v11113_v36  ;;  %vm17701_vm0 = vmmov %vm17700_vm10 }
 0x63d   : > { %v11098_v46 = vunpack.i.h.bf16 %v16048_v49  ;;  %v11097_v42 = vunpack.i.l.bf16 %v16048_v49  ;;  %v9159_v5 = vpack.c.bf16 %v6764_v53, %v6754_v22  ;;  %v16059_v57 = vpop.permute.xlu0 %11115  ;;  %v9157_v4 = vpack.c.bf16 %v6765_v38, %v6755_v52  ;;  %vm17702_vm7 = vmmov %vm17701_vm0 }
 0x63e   : > { %9142 = vmatprep.subr.bf16.mxu0 %v9141_v43  ;;  %v11118_v17 = vunpack.i.h.bf16 %v16059_v57  ;;  %v11117_v25 = vunpack.i.l.bf16 %v16059_v57  ;;  %v11082_v52 = vunpack.i.l.bf16 %v15974_v26  ;;  %vm17704_vm12 = vmmov %vm17703_vm9 }
 0x63f   : > { %v7542_v63 = vsel %vm17695_vm3, %v11018_v12, %v11097_v42  ;;  %9144 = vmatpush1.bf16.msra.mxu0 %v9143_v39  ;;  %v7543_v22 = vsel %vm17696_vm2, %v11097_v42, %v11098_v46  ;;  %9158 = vmatprep.subr.bf16.mxu1 %v9157_v4  ;;  %vm17705_vm1 = vmmov %vm17703_vm9  ;;  %vm17711_vm2 = vcmask 891904  }
 0x640   : > { %v9147_v56 = vpack.c.bf16 %v7542_v63, %v7532_v55  ;;  %v16074_v15 = vpop.permute.xlu1 %11100  ;;  %v9145_v47 = vpack.c.bf16 %v7543_v22, %v7533_v50  ;;  %v6912_v12 = vsel %vm17697_vm5, %v11038_v58, %v11117_v25  ;;  %9160 = vmatpush1.bf16.msra.mxu1 %v9159_v5  ;;  %v6913_v16 = vsel %vm17698_vm8, %v11117_v25, %v11118_v17  ;;  %vm17706_vm4 = vmmov %vm17705_vm1  ;;  %v7110_v25 = vld [vmem:[#allocation3 + $0x38] sm:$0xff] }
 0x641   : > { %v11103_v9 = vunpack.i.h.bf16 %v16074_v15  ;;  %v11102_v48 = vunpack.i.l.bf16 %v16074_v15  ;;  %v7680_v55 = vsel %vm17699_vm13, %v10983_v2, %v11062_v31  ;;  %v9163_v54 = vpack.c.bf16 %v6912_v12, %v6902_v20  ;;  %v16087_v3 = vpop.permute.xlu0 %11120  ;;  %vm17712_vm5 = vmmov %vm17711_vm2 }
 0x642   : > { %9146 = vmatprep.subr.bf16.mxu0 %v9145_v47  ;;  %v9161_v14 = vpack.c.bf16 %v6913_v16, %v6903_v30  ;;  %v7681_v58 = vsel %vm17700_vm10, %v11062_v31, %v11063_v27  ;;  %v11123_v39 = vunpack.i.h.bf16 %v16087_v3  ;;  %v11122_v43 = vunpack.i.l.bf16 %v16087_v3  ;;  %v7121_v31 = vld [vmem:[#allocation3 + $0xa0] sm:$0xff]  ;;  %v7120_v30 = vld [vmem:[#allocation3 + $0x98] sm:$0xff]  ;;  %vm17713_vm8 = vmmov %vm17711_vm2 }
 0x643   : > { %v7690_v50 = vsel %vm17701_vm0, %v11023_v41, %v11102_v48  ;;  %9148 = vmatpush1.bf16.msra.mxu0 %v9147_v56  ;;  %v7691_v59 = vsel %vm17702_vm7, %v11102_v48, %v11103_v9  ;;  %v7050_v60 = vsel %vm17703_vm9, %v11003_v7, %v11082_v52  ;;  %v7051_v42 = vsel %vm17705_vm1, %v11082_v52, %v11083_v37  ;;  %v7111_v7 = vld [vmem:[#allocation3 + $0x40] sm:$0xff]  ;;  %v11253_v52 = vld [vmem:[%s16369_s6 + $0x8] sm:$0xff]  ;;  %vm17714_vm13 = vmmov %vm17711_vm2 }
 0x644   : > { %v9151_v2 = vpack.c.bf16 %v7690_v50, %v7680_v55  ;;  %v16100_v20 = vpop.permute.xlu1 %11145  ;;  %9162 = vmatprep.subr.bf16.mxu1 %v9161_v14  ;;  %v9149_v53 = vpack.c.bf16 %v7691_v59, %v7681_v58  ;;  %v7060_v41 = vsel %vm17704_vm12, %v11043_v23, %v11122_v43  ;;  %v7061_v38 = vsel %vm17706_vm4, %v11122_v43, %v11123_v39 }
 0x645   : > { %9164 = vmatpush1.bf16.msra.mxu1 %v9163_v54  ;;  %v9167_v5 = vpack.c.bf16 %v7060_v41, %v7050_v60  ;;  %v16114_v4 = vpop.permute.xlu0 %11125  ;;  %v9165_v45 = vpack.c.bf16 %v7061_v38, %v7051_v42  ;;  %v9169_v23 = vpack.c.bf16 %v7121_v31, %v7111_v7  ;;  %v9171_v22 = vpack.c.bf16 %v7120_v30, %v7110_v25 }
 0x646   : > { %9150 = vmatprep.subr.bf16.mxu0 %v9149_v53  ;;  %v11128_v16 = vunpack.i.h.bf16 %v16114_v4  ;;  %v11127_v55 = vunpack.i.l.bf16 %v16114_v4  ;;  %v11148_v31 = vunpack.i.h.bf16 %v16100_v20  ;;  %vm17715_vm10 = vcmask 883712  }
 0x647   : > { %9152 = vmatpush1.bf16.msra.mxu0 %v9151_v2  ;;  %9166 = vmatprep.subr.bf16.mxu1 %v9165_v45  ;;  %vm17716_vm0 = vmmov %vm17715_vm10  ;;  %vm17719_vm12 = vcmask 875520  }
 0x648   : > { %v16116_v11 = vpop.permute.xlu1 %11150  ;;  %vm17717_vm7 = vmmov %vm17716_vm0 }
 0x649   : > { %9168 = vmatpush1.bf16.msra.mxu1 %v9167_v5  ;;  %v16118_v63 = vpop.permute.xlu0 %11130  ;;  %v11147_v5 = vunpack.i.l.bf16 %v16100_v20  ;;  %vm17718_vm9 = vmmov %vm17716_vm0 }
 0x64a   : > { %8134 = vmatmul.mubr.f32.vlgmr.msra.gmra.mrb[22].mxu0 %v15796_v18  ;;  %9170 = vmatprep.subr.bf16.mxu1 %v9169_v23  ;;  %v11133_v53 = vunpack.i.h.bf16 %v16118_v63  ;;  %v11132_v60 = vunpack.i.l.bf16 %v16118_v63  ;;  %vm17720_vm1 = vmmov %vm17719_vm12 }
 0x64b   : > { %8461 = vmatprep.mubr.msk.f32.mxu0 %vm5695_vm11, %v11253_v52  ;;  %vm17707_vm11 = vcmask 1039360   ;;  %v6608_v33 = vsel %vm885_vm6, %v11068_v34, %v11147_v5  ;;  %vm17721_vm4 = vmmov %vm17720_vm1 }
 0x64c   : > { %v16125_v56 = vpop.permute.xlu1 %11155  ;;  %v7238_v43 = vsel %vm17707_vm11, %v11048_v1, %v11127_v55  ;;  %vm17708_vm14 = vmmov %vm17707_vm11  ;;  %v7386_v30 = vsel %vm17711_vm2, %v11053_v29, %v11132_v60  ;;  %v7387_v20 = vsel %vm17713_vm8, %v11132_v60, %v11133_v53  ;;  %vm17727_vm2 = vcmask 154624  }
 0x64d   : > { %9172 = vmatpush1.bf16.msra.mxu1 %v9171_v22  ;;  %v16127_v47 = vpop.permute.xlu0 %11135  ;;  %v7239_v2 = vsel %vm17708_vm14, %v11127_v55, %v11128_v16  ;;  %vm17709_vm15 = vmmov %vm17707_vm11 }
 0x64e   : > { %vm17710_vm3 = vmmov %vm17707_vm11  ;;  %v11138_v24 = vunpack.i.h.bf16 %v16127_v47  ;;  %vm17723_vm11 = vcmask 162816  }
 0x64f   : > { %vm17724_vm14 = vmmov %vm17723_vm11 }
 0x650   : > { %v16129_v12 = vpop.permute.xlu1 %11160  ;;  %vm17729_vm8 = vmmov %vm17727_vm2 }
 0x651   : > { %v16131_v48 = vpop.permute.xlu0 %11140  ;;  %v11163_v0 = vunpack.i.h.bf16 %v16129_v12 }
 0x652   : > { %v11142_v60 = vunpack.i.l.bf16 %v16131_v48 }
 0x654   : > { %v16135_v54 = vpop.permute.xlu1 %11165 }
 0x655   : > { %v16137_v14 = vpop.permute.xlu0 %11180  ;;  %v11167_v26 = vunpack.i.l.bf16 %v16135_v54 }
 0x656   : > { %v11183_v58 = vunpack.i.h.bf16 %v16137_v14  ;;  %v11182_v50 = vunpack.i.l.bf16 %v16137_v14 }
 0x658   : > { %v16144_v59 = vpop.permute.xlu1 %11170  ;;  %v7248_v41 = vsel %vm17709_vm15, %v11088_v61, %v11182_v50  ;;  %v7249_v10 = vsel %vm17710_vm3, %v11182_v50, %v11183_v58  ;;  %v11137_v61 = vunpack.i.l.bf16 %v16127_v47  ;;  %vm17725_vm15 = vmmov %vm17723_vm11 }
 0x659   : > { %v9175_v42 = vpack.c.bf16 %v7248_v41, %v7238_v43  ;;  %v16157_v1 = vpop.permute.xlu0 %11185  ;;  %v9173_v38 = vpack.c.bf16 %v7249_v10, %v7239_v2  ;;  %v11143_v2 = vunpack.i.h.bf16 %v16131_v48  ;;  %vm17726_vm3 = vmmov %vm17723_vm11 }
 0x65a   : > { %v11188_v45 = vunpack.i.h.bf16 %v16157_v1  ;;  %v11187_v7 = vunpack.i.l.bf16 %v16157_v1  ;;  %v7534_v43 = vsel %vm17715_vm10, %v11058_v8, %v11137_v61  ;;  %v7535_v6 = vsel %vm17716_vm0, %v11137_v61, %v11138_v24 }
 0x65b   : > { %9174 = vmatprep.subr.bf16.mxu1 %v9173_v38  ;;  %v11153_v8 = vunpack.i.h.bf16 %v16116_v11  ;;  %v11152_v38 = vunpack.i.l.bf16 %v16116_v11  ;;  %v7683_v35 = vsel %vm17720_vm1, %v11142_v60, %v11143_v2  ;;  %vm17731_vm10 = vcmask 7168  }
 0x65c   : > { %v16165_v23 = vpop.permute.xlu1 %11175  ;;  %v7396_v25 = vsel %vm17712_vm5, %v11093_v44, %v11187_v7  ;;  %9176 = vmatpush1.bf16.msra.mxu1 %v9175_v42  ;;  %v7397_v22 = vsel %vm17714_vm13, %v11187_v7, %v11188_v45  ;;  %v6609_v44 = vsel %vm885_vm6, %v11147_v5, %v11148_v31  ;;  %vm17728_vm5 = vmmov %vm17727_vm2 }
 0x65d   : > { %v9179_v52 = vpack.c.bf16 %v7396_v25, %v7386_v30  ;;  %v16179_v55 = vpop.permute.xlu0 %11190  ;;  %v9177_v50 = vpack.c.bf16 %v7397_v22, %v7387_v20  ;;  %v7682_v25 = vsel %vm17719_vm12, %v11063_v27, %v11142_v60  ;;  %v11158_v27 = vunpack.i.h.bf16 %v16125_v56  ;;  %vm17730_vm13 = vmmov %vm17727_vm2 }
 0x65e   : > { %v11193_v29 = vunpack.i.h.bf16 %v16179_v55  ;;  %v11192_v13 = vunpack.i.l.bf16 %v16179_v55  ;;  %v6756_v15 = vsel %vm17723_vm11, %v11073_v21, %v11152_v38  ;;  %vm17732_vm0 = vmmov %vm17731_vm10  ;;  %vm17735_vm12 = vcmask 1039360  }
 0x65f   : > { %9178 = vmatprep.subr.bf16.mxu1 %v9177_v50  ;;  %vm17739_vm11 = vcmask 891904  }
 0x660   : > { %v11196_v41 = vpop.permute.xlu1 %11195  ;;  %v7544_v34 = vsel %vm17717_vm7, %v11098_v46, %v11192_v13  ;;  %9180 = vmatpush1.bf16.msra.mxu1 %v9179_v52  ;;  %v7545_v51 = vsel %vm17718_vm9, %v11192_v13, %v11193_v29  ;;  %vm17733_vm7 = vmmov %vm17732_vm0 }
 0x661   : > { %v11198_v10 = vunpack.i.h.bf16 %v11196_v41  ;;  %v11197_v42 = vunpack.i.l.bf16 %v11196_v41  ;;  %v9183_v31 = vpack.c.bf16 %v7544_v34, %v7534_v43  ;;  %v16203_v5 = vpop.permute.xlu0 %11220  ;;  %v9181_v7 = vpack.c.bf16 %v7545_v51, %v7535_v6  ;;  %vm17734_vm9 = vmmov %vm17732_vm0 }
 0x662   : > { %v11223_v46 = vunpack.i.h.bf16 %v16203_v5  ;;  %v11222_v61 = vunpack.i.l.bf16 %v16203_v5  ;;  %v6757_v43 = vsel %vm17725_vm15, %v11152_v38, %v11153_v8  ;;  %vm17741_vm15 = vmmov %vm17739_vm11 }
 0x663   : > { %v6618_v49 = vsel %vm885_vm6, %v11108_v62, %v11197_v42  ;;  %v6619_v30 = vsel %vm885_vm6, %v11197_v42, %v11198_v10  ;;  %9182 = vmatprep.subr.bf16.mxu1 %v9181_v7  ;;  %vm17722_vm6 = vmmov %vm17720_vm1 }
 0x664   : > { %v9191_v20 = vpack.c.bf16 %v6618_v49, %v6608_v33  ;;  %v11201_v11 = vpop.permute.xlu1 %11200  ;;  %v9189_v22 = vpack.c.bf16 %v6619_v30, %v6609_v44  ;;  %v7692_v62 = vsel %vm17721_vm4, %v11103_v9, %v11222_v61  ;;  %9184 = vmatpush1.bf16.msra.mxu1 %v9183_v31  ;;  %v7693_v32 = vsel %vm17722_vm6, %v11222_v61, %v11223_v46  ;;  %v7123_v49 = vld [vmem:[#allocation3 + $0xb0] sm:$0xff]  ;;  %vm17736_vm1 = vmmov %vm17735_vm12 }
 0x665   : > { %v11203_v52 = vunpack.i.h.bf16 %v11201_v11  ;;  %v11202_v50 = vunpack.i.l.bf16 %v11201_v11  ;;  %v11157_v33 = vunpack.i.l.bf16 %v16125_v56  ;;  %v9187_v13 = vpack.c.bf16 %v7692_v62, %v7682_v25  ;;  %vm17737_vm4 = vmmov %vm17736_vm1 }
 0x666   : > { %9190 = vmatprep.subr.bf16.mxu0 %v9189_v22  ;;  %v9185_v44 = vpack.c.bf16 %v7693_v32, %v7683_v35  ;;  %v11168_v11 = vunpack.i.h.bf16 %v16135_v54  ;;  %v7122_v22 = vld [vmem:[#allocation3 + $0xa8] sm:$0xff]  ;;  %v11172_v54 = vunpack.i.l.bf16 %v16144_v59  ;;  %vm17738_vm6 = vmmov %vm17736_vm1 }
 0x667   : > { %v6766_v9 = vsel %vm17724_vm14, %v11113_v36, %v11202_v50  ;;  %9192 = vmatpush1.bf16.msra.mxu0 %v9191_v20  ;;  %v6767_v60 = vsel %vm17726_vm3, %v11202_v50, %v11203_v52  ;;  %v6904_v40 = vsel %vm17727_vm2, %v11078_v28, %v11157_v33  ;;  %v6905_v21 = vsel %vm17728_vm5, %v11157_v33, %v11158_v27  ;;  %v7113_v20 = vld [vmem:[#allocation3 + $0x50] sm:$0xff]  ;;  %vm17740_vm14 = vmmov %vm17739_vm11 }
 0x668   : > { %v9195_v41 = vpack.c.bf16 %v6766_v9, %v6756_v15  ;;  %v11206_v6 = vpop.permute.xlu1 %11205  ;;  %9186 = vmatprep.subr.bf16.mxu1 %v9185_v44  ;;  %v9193_v56 = vpack.c.bf16 %v6767_v60, %v6757_v43  ;;  %v11162_v36 = vunpack.i.l.bf16 %v16129_v12  ;;  %v7240_v50 = vsel %vm17735_vm12, %v11128_v16, %v11167_v26  ;;  %vm17742_vm3 = vmmov %vm17739_vm11 }
 0x669   : > { %v11208_v34 = vunpack.i.h.bf16 %v11206_v6  ;;  %v11207_v10 = vunpack.i.l.bf16 %v11206_v6  ;;  %9188 = vmatpush1.bf16.msra.mxu1 %v9187_v13  ;;  %v7241_v32 = vsel %vm17736_vm1, %v11167_v26, %v11168_v11  ;;  %v11173_v27 = vunpack.i.h.bf16 %v16144_v59 }
 0x66a   : > { %9194 = vmatprep.subr.bf16.mxu0 %v9193_v56  ;;  %v7052_v7 = vsel %vm17731_vm10, %v11083_v37, %v11162_v36  ;;  %v9205_v37 = vpack.c.bf16 %v7123_v49, %v7113_v20  ;;  %v11178_v16 = vunpack.i.h.bf16 %v16165_v23  ;;  %v11177_v60 = vunpack.i.l.bf16 %v16165_v23  ;;  %v8285_v20 = vld [vmem:[%s11686_s15 + $0x20] sm:$0xff] }
 0x66b   : > { %v6914_v42 = vsel %vm17729_vm8, %v11118_v17, %v11207_v10  ;;  %9196 = vmatpush1.bf16.msra.mxu0 %v9195_v41  ;;  %v6915_v51 = vsel %vm17730_vm13, %v11207_v10, %v11208_v34  ;;  %v7053_v17 = vsel %vm17733_vm7, %v11162_v36, %v11163_v0  ;;  %v7388_v59 = vsel %vm17739_vm11, %v11133_v53, %v11172_v54 }
 0x66c   : > { %v9199_v8 = vpack.c.bf16 %v6914_v42, %v6904_v40  ;;  %v11211_v38 = vpop.permute.xlu1 %11210  ;;  %8205 = vmatmul.mubr.f32.vlgmr.msra.gmra.mrb[26].mxu1 %v15796_v18  ;;  %v9197_v19 = vpack.c.bf16 %v6915_v51, %v6905_v21  ;;  %vm17743_vm2 = vcmask 883712   ;;  %vm17747_vm10 = vcmask 875520  }
 0x66d   : > { %v11213_v28 = vunpack.i.h.bf16 %v11211_v38  ;;  %v11212_v31 = vunpack.i.l.bf16 %v11211_v38  ;;  %v7536_v63 = vsel %vm17743_vm2, %v11138_v24, %v11177_v60  ;;  %vm17744_vm5 = vmmov %vm17743_vm2 }
 0x66e   : > { %9198 = vmatprep.subr.bf16.mxu0 %v9197_v19  ;;  %v7537_v53 = vsel %vm17744_vm5, %v11177_v60, %v11178_v16  ;;  %vm17745_vm8 = vmmov %vm17743_vm2 }
 0x66f   : > { %v7062_v57 = vsel %vm17732_vm0, %v11123_v39, %v11212_v31  ;;  %9200 = vmatpush1.bf16.msra.mxu0 %v9199_v8  ;;  %v7063_v12 = vsel %vm17734_vm9, %v11212_v31, %v11213_v28  ;;  %v7112_v39 = vld [vmem:[#allocation3 + $0x48] sm:$0xff]  ;;  %vm17746_vm13 = vmmov %vm17743_vm2 }
 0x670   : > { %v9203_v61 = vpack.c.bf16 %v7062_v57, %v7052_v7  ;;  %v11216_v30 = vpop.permute.xlu1 %11215  ;;  %v9201_v25 = vpack.c.bf16 %v7063_v12, %v7053_v17  ;;  %v9207_v52 = vpack.c.bf16 %v7122_v22, %v7112_v39  ;;  %vm17748_vm0 = vmmov %vm17747_vm10 }
 0x671   : > { %v11218_v1 = vunpack.i.h.bf16 %v11216_v30  ;;  %v11217_v23 = vunpack.i.l.bf16 %v11216_v30  ;;  %vm17749_vm7 = vmmov %vm17748_vm0 }
 0x672   : > { %9202 = vmatprep.subr.bf16.mxu0 %v9201_v25  ;;  %vm17750_vm9 = vmmov %vm17748_vm0  ;;  %v7922_v28 = vpop.permute.xlu0 %7921 }
 0x673   : > { %9204 = vmatpush1.bf16.msra.mxu0 %v9203_v61  ;;  %v7684_v24 = vsel %vm17747_vm10, %v11143_v2, %v11217_v23  ;;  %v8282_v2 = vld [vmem:[%s11686_s15 + $0x8] sm:$0xff]  ;;  %v8284_v61 = vld [vmem:[%s11686_s15 + $0x18] sm:$0xff] }
 0x674   : > { %v11226_v3 = vpop.permute.xlu1 %11225  ;;  %9206 = vmatprep.subr.bf16.mxu0 %v9205_v37 }
 0x675   : > { %v11228_v35 = vunpack.i.h.bf16 %v11226_v3  ;;  %v11227_v62 = vunpack.i.l.bf16 %v11226_v3 }
 0x677   : > { %v7250_v33 = vsel %vm17737_vm4, %v11183_v58, %v11227_v62  ;;  %9208 = vmatpush1.bf16.msra.mxu0 %v9207_v52  ;;  %v7251_v13 = vsel %vm17738_vm6, %v11227_v62, %v11228_v35  ;;  %v7389_v58 = vsel %vm17741_vm15, %v11172_v54, %v11173_v27  ;;  %v8286_v35 = vld [vmem:[%s11686_s15 + $0x28] sm:$0xff] }
 0x678   : > { %v9211_v44 = vpack.c.bf16 %v7250_v33, %v7240_v50  ;;  %v11231_v15 = vpop.permute.xlu1 %11230  ;;  %v9209_v9 = vpack.c.bf16 %v7251_v13, %v7241_v32  ;;  %v8287_v50 = vld [vmem:[%s11686_s15 + $0x30] sm:$0xff] }
 0x679   : > { %v11233_v43 = vunpack.i.h.bf16 %v11231_v15  ;;  %v11232_v4 = vunpack.i.l.bf16 %v11231_v15  ;;  %v8288_v15 = vld [vmem:[%s11686_s15 + $0x38] sm:$0xff] }
 0x67a   : > { %9210 = vmatprep.subr.bf16.mxu0 %v9209_v9 }
 0x67b   : > { %v7398_v14 = vsel %vm17740_vm14, %v11188_v45, %v11232_v4  ;;  %9212 = vmatpush1.bf16.msra.mxu0 %v9211_v44  ;;  %v7399_v41 = vsel %vm17742_vm3, %v11232_v4, %v11233_v43  ;;  %v8289_v4 = vld [vmem:[%s11686_s15 + $0x40] sm:$0xff] }
 0x67c   : > { %v9215_v6 = vpack.c.bf16 %v7398_v14, %v7388_v59  ;;  %v11236_v56 = vpop.permute.xlu1 %11235  ;;  %v9213_v34 = vpack.c.bf16 %v7399_v41, %v7389_v58 }
 0x67d   : > { %v11238_v10 = vunpack.i.h.bf16 %v11236_v56  ;;  %v11237_v40 = vunpack.i.l.bf16 %v11236_v56 }
 0x67e   : > { %9214 = vmatprep.subr.bf16.mxu0 %v9213_v34 }
 0x67f   : > { %v7546_v45 = vsel %vm17745_vm8, %v11193_v29, %v11237_v40  ;;  %9216 = vmatpush1.bf16.msra.mxu0 %v9215_v6  ;;  %v7547_v21 = vsel %vm17746_vm13, %v11237_v40, %v11238_v10  ;;  %v7685_v29 = vsel %vm17749_vm7, %v11217_v23, %v11218_v1  ;;  %v8290_v6 = vld [vmem:[%s11686_s15 + $0x48] sm:$0xff]  ;;  %v8291_v10 = vld [vmem:[%s11686_s15 + $0x50] sm:$0xff] }
 0x680   : > { %v9219_v0 = vpack.c.bf16 %v7546_v45, %v7536_v63  ;;  %v11241_v36 = vpop.permute.xlu1 %11240  ;;  %v9217_v42 = vpack.c.bf16 %v7547_v21, %v7537_v53 }
 0x681   : > { %v11243_v51 = vunpack.i.h.bf16 %v11241_v36  ;;  %v11242_v47 = vunpack.i.l.bf16 %v11241_v36 }
 0x682   : > { %9218 = vmatprep.subr.bf16.mxu0 %v9217_v42 }
 0x683   : > { %v7694_v55 = vsel %vm17748_vm0, %v11223_v46, %v11242_v47  ;;  %9220 = vmatpush1.bf16.msra.mxu0 %v9219_v0  ;;  %v7695_v8 = vsel %vm17750_vm9, %v11242_v47, %v11243_v51  ;;  %v8283_v46 = vld [vmem:[%s11686_s15 + $0x10] sm:$0xff]  ;;  %s8323_s15 = scalar_lea.sflag [#allocation7], %s11683_s25 }
 0x684   : > { %v9223_v38 = vpack.c.bf16 %v7694_v55, %v7684_v24  ;;  %v9221_v19 = vpack.c.bf16 %v7695_v8, %v7685_v29 }
 0x686   : > { %9222 = vmatprep.subr.bf16.mxu0 %v9221_v19 }
 0x687   : > { %9224 = vmatpush1.bf16.msra.mxu0 %v9223_v38 }
 0x68a   : > { %8276 = vmatmul.mubr.f32.vlgmr.msra.gmra.mrb[24].mxu0 %v15796_v18 }
 0x6ce   : > { %v7993_v48 = vpop.f32.mrb[20].mxu0 }
 0x6cf   : > { %v7994_v5 = vadd.f32 %v7993_v48, %v7922_v28  ;;  %v7995_v31 = vpop.f32.mrb[21].mxu0 }
 0x6d0   : > { %v7996_v7 = vadd.f32 %v7995_v31, %v7922_v28 }
 0x6d1   : > { %v8292_v57 = vadd.f32 %v8282_v2, %v7994_v5 }
 0x6d2   : > { %v8293_v17 = vadd.f32 %v8283_v46, %v7996_v7 }
 0x6d3   : > { %v8302_v12 = vmax.f32 %v8292_v57, 0.0 }
 0x6d4   : > { %v8303_v49 = vmax.f32 %v8293_v17, 0.0 }
 0x6d5   : > { %8312 = vst [vmem:[%s16294_s10] sm:$0xff] %v8302_v12 }
 0x6d6   : > { %8313 = vst [vmem:[%s16294_s10 + $0x8] sm:$0xff] %v8303_v49 }
 0x6fc   : > { %v8064_v18 = vpop.f32.mrb[24].mxu1 }
 0x6fd   : > { %v8065_v30 = vadd.f32 %v8064_v18, %v7922_v28  ;;  %v8066_v25 = vpop.f32.mrb[25].mxu1 }
 0x6fe   : > { %v8067_v11 = vadd.f32 %v8066_v25, %v7922_v28 }
 0x6ff   : > { %v8294_v26 = vadd.f32 %v8284_v61, %v8065_v30 }
 0x700   : > { %v8295_v37 = vadd.f32 %v8285_v20, %v8067_v11 }
 0x701   : > { %v8304_v22 = vmax.f32 %v8294_v26, 0.0 }
 0x702   : > { %v8305_v3 = vmax.f32 %v8295_v37, 0.0 }
 0x703   : > { %8314 = vst [vmem:[%s16294_s10 + $0x10] sm:$0xff] %v8304_v22 }
 0x704   : > { %8315 = vst [vmem:[%s16294_s10 + $0x18] sm:$0xff] %v8305_v3 }
 0x71d   : > { %v8135_v39 = vpop.f32.mrb[22].mxu0 }
 0x71e   : > { %v8136_v62 = vadd.f32 %v8135_v39, %v7922_v28  ;;  %v8137_v52 = vpop.f32.mrb[23].mxu0 }
 0x71f   : > { %v8138_v32 = vadd.f32 %v8137_v52, %v7922_v28 }
 0x720   : > { %v8296_v27 = vadd.f32 %v8286_v35, %v8136_v62 }
 0x721   : > { %v8297_v54 = vadd.f32 %v8287_v50, %v8138_v32 }
 0x722   : > { %v8306_v33 = vmax.f32 %v8296_v27, 0.0 }
 0x723   : > { %v8307_v13 = vmax.f32 %v8297_v54, 0.0 }
 0x724   : > { %8316 = vst [vmem:[%s16294_s10 + $0x20] sm:$0xff] %v8306_v33 }
 0x725   : > { %8317 = vst [vmem:[%s16294_s10 + $0x28] sm:$0xff] %v8307_v13 }
 0x73f   : > { %v8206_v44 = vpop.f32.mrb[26].mxu1 }
 0x740   : > { %v8207_v9 = vadd.f32 %v8206_v44, %v7922_v28  ;;  %v8208_v43 = vpop.f32.mrb[27].mxu1 }
 0x741   : > { %v8209_v16 = vadd.f32 %v8208_v43, %v7922_v28 }
 0x742   : > { %v8298_v60 = vadd.f32 %v8288_v15, %v8207_v9 }
 0x743   : > { %v8299_v59 = vadd.f32 %v8289_v4, %v8209_v16 }
 0x744   : > { %v8308_v14 = vmax.f32 %v8298_v60, 0.0 }
 0x745   : > { %v8309_v58 = vmax.f32 %v8299_v59, 0.0 }
 0x746   : > { %8318 = vst [vmem:[%s16294_s10 + $0x30] sm:$0xff] %v8308_v14 }
 0x747   : > { %8319 = vst [vmem:[%s16294_s10 + $0x38] sm:$0xff] %v8309_v58 }
 0x75d   : > { %v8277_v41 = vpop.f32.mrb[24].mxu0 }
 0x75e   : > { %v8278_v56 = vadd.f32 %v8277_v41, %v7922_v28  ;;  %v8279_v34 = vpop.f32.mrb[25].mxu0 }
 0x75f   : > { %v8280_v40 = vadd.f32 %v8279_v34, %v7922_v28 }
 0x760   : > { %v8300_v63 = vadd.f32 %v8290_v6, %v8278_v56 }
 0x761   : > { %v8301_v53 = vadd.f32 %v8291_v10, %v8280_v40 }
 0x762   : > { %v8310_v1 = vmax.f32 %v8300_v63, 0.0 }
 0x763   : > { %v8311_v23 = vmax.f32 %v8301_v53, 0.0 }
 0x764   : > { %8320 = vst [vmem:[%s16294_s10 + $0x40] sm:$0xff] %v8310_v1 }
 0x765   : > { %8321 = vst [vmem:[%s16294_s10 + $0x48] sm:$0xff] %v8311_v23 }
 0x766   : > { %11365 = shalt.err (!%p11362_p6)
}
 0x767   : > { %s11366_s25 = scalar_lea.hbm %s16317_s14, 1280  ;;  %s11370_s19 = scalar_lea.hbm %s17752_s21, 2560 }
 0x768   : > { %p11367_p10 = scmp.ne.s32.totalorder %s16317_s14, %s11366_s25  ;;  %p11371_p4 = scmp.lt.u32.totalorder %s16317_s14, %s17752_s21 }
 0x769   : > { %p11372_p8 = scmp.lt.u32.totalorder %s11370_s19, %s11366_s25  ;;  %p11374_p11 = scmp.lt.u32.totalorder %s11366_s25, %s16317_s14 }
 0x76a   : > { %p11368_p0 = pnand %p11367_p10, %p17753_p3 }
 0x76b   : > { %p11373_p7 = por %p11372_p8, %p11371_p4 }
 0x76c   : > { %p11369_p1 = pneg %p11368_p0 }
 0x76d   : > { %p11375_p5 = por %p11374_p11, %p11373_p7 }
 0x76f   : > { %p11376_p9 = pnand %p11375_p5, %p11369_p1 }
 0x771   : > { %11379 = shalt.err (!%p11376_p9)
}
 0x772   : > { %9280 = dma.vmem_to_hbm [thread:$0]  (%p17753_p3), %s16319_s29, 1280, %s16317_s14, %s8323_s15  }
 0x773 PF: > { %s17754_s26 = sld [smem:[#allocation16_spill]]  ;;  %s17755_s13 = sld [smem:[#allocation20_spill]] }
 0x774   : > { %s17756_s3 = sld [smem:[#allocation19_spill]] }
 0x779   : > { %s8349_s22 = sand.u32 1, %s17754_s26   ;;  %p17757_p12 = scmp.ne.s32.totalorder %s17755_s13, 0 }
 0x77a   : > { %p17758_p2 = scmp.ge.s32.totalorder %s17756_s3, 2  ;;  %s8350_s0 = scalar_lea.sflag [#allocation7], %s8349_s22 }
 0x77c   : > { %p9294_p13 = pnand %p17758_p2, %p17757_p12 }
 0x77e   : > { %11409 = dma.done.wait (!%p9294_p13), %s8350_s0, 1280  }
 0x77f   : > { %11411 = vsyncadd (!%p9294_p13), %s8350_s0, 4294966016  ;;  %s17759_s30 = sld [smem:[#allocation21_spill]]  ;;  %s17760_s27 = sld [smem:[#allocation17_spill]] }
 0x780   : > { %s17761_s28 = sld [smem:[#allocation18_spill]]  ;;  %s17762_s29 = sld [smem:[#allocation22_spill]] }
 0x785   : > { %p22_p6 = scmp.ge.s32.totalorder %s17759_s30, 4  }
 0x787   :  { %24 = sbr.rel (!%p22_p6) target bundleno = 12 (0xc), region = 106 }
 0x78e   :  { %8355 = vsyncpa [#allocation6], 1 }
 0x78f   :  { %8357 = vsyncpa [#allocation6 + $0x1], 1 }
 0x790   :  { %8358 = vsyncpa [#allocation9], 1 }
 0x791   :  { %8360 = vsyncpa [#allocation9 + $0x1], 1 }
 0x792   :  { %8361 = vsyncpa [#allocation7], 1 }
 0x793   :  { %8363 = vsyncpa [#allocation7 + $0x1], 1 }

</bundles_post_ra>
